<compile_context>
chip_gen: v7x
topology: tpu7x:2x2x1
jax: 0.10.0
libtpu: 0.0.40
codegen_flags: <defaults>
</compile_context>

<pallas_src>
import jax
import jax.numpy as jnp
from jax.experimental import pallas as pl
from jax.experimental.pallas import tpu as pltpu

EPS = 1e-3


def _fused_add_conv_bn_kernel(x1_ref, x2_ref, w_ref, gb_ref, o_ref):
    # x1_ref, x2_ref : (Cin, M)   full flattened inputs (channel-major), f32
    # w_ref          : (TC, Cin)  tile of the 1x1-conv weight, bf16
    # gb_ref         : (TC, 2)    [gamma | beta] columns, f32
    # o_ref          : (TC, M)    tile of the channel-major output, f32

    # elementwise add (operator.add) in f32 -- tiny (Cin x M), recompute per tile
    x = x1_ref[...] + x2_ref[...]

    # 1x1 conv == MXU matmul: bf16 x bf16 -> f32 accumulate.  (TC, Cin)@(Cin, M)
    y = jnp.dot(w_ref[...], x.astype(jnp.bfloat16),
                preferred_element_type=jnp.float32)           # (TC, M) f32

    # BatchNorm2d (training mode): exact per-channel stats over all M samples.
    # Two-pass variance (numerically safe vs E[y^2]-E[y]^2).
    mean = jnp.mean(y, axis=1, keepdims=True)                 # (TC, 1)
    d = y - mean
    var = jnp.mean(d * d, axis=1, keepdims=True)              # (TC, 1)

    gamma = gb_ref[:, 0:1]                                    # (TC, 1)
    beta = gb_ref[:, 1:2]                                     # (TC, 1)
    scale = jax.lax.rsqrt(var + EPS) * gamma                  # (TC, 1)
    o_ref[...] = d * scale + beta


def _pick_cout_tile(cout: int) -> int:
    # Even number of tiles only (2 preferred, then 4) so v7x's two TensorCores
    # get a balanced split; tile count kept tiny for single-TC v5e/v6e.
    # TC is only ever a sublane dim -> multiple of 16 (bf16 weight packing).
    for ntiles in (2, 4):
        tc = cout // ntiles
        if cout % ntiles == 0 and tc % 16 == 0:
            return tc
    return cout  # fallback: single block (always correct)


def prepare_params(weight, gamma, beta):
    """One-time parameter setup (do NOT call per forward):
       - conv weight -> (Cout, Cin) bf16
       - gamma/beta  -> packed (Cout, 2) f32."""
    w2 = weight.reshape(weight.shape[0], -1).astype(jnp.bfloat16)   # (Cout, Cin)
    gb = jnp.stack([gamma.astype(jnp.float32),
                    beta.astype(jnp.float32)], axis=1)              # (Cout, 2)
    return w2, gb


def fused_add_conv_bn(x445, x430, w_bf16, gb):
    """x445, x430: (N, Cin, H, W) float32 (NCHW).
    w_bf16: (Cout, Cin) bf16 1x1-conv weight (from prepare_params).
    gb: (Cout, 2) packed [gamma, beta] (from prepare_params).
    Returns (N, Cout, H, W) float32."""
    N, Cin, H, W = x445.shape
    Cout = w_bf16.shape[0]
    M = N * H * W

    # NCHW -> (Cin, M).  For N == 1 this is a pure reshape (no data movement).
    if N == 1:
        a = x445.reshape(Cin, M)
        b = x430.reshape(Cin, M)
    else:
        a = jnp.transpose(x445, (1, 0, 2, 3)).reshape(Cin, M)
        b = jnp.transpose(x430, (1, 0, 2, 3)).reshape(Cin, M)

    tc = _pick_cout_tile(Cout)
    grid = (Cout // tc,)

    cost = pl.CostEstimate(
        flops=2 * Cout * Cin * M + 6 * Cout * M + Cin * M,
        transcendentals=Cout,                      # rsqrt per channel
        bytes_accessed=(Cout * Cin * 2             # bf16 weight
                        + 2 * Cin * M * 4          # two f32 inputs
                        + Cout * 2 * 4             # packed gamma/beta
                        + Cout * M * 4),           # f32 output
    )

    out_cm = pl.pallas_call(
        _fused_add_conv_bn_kernel,
        out_shape=jax.ShapeDtypeStruct((Cout, M), jnp.float32),
        grid=grid,
        in_specs=[
            pl.BlockSpec((Cin, M), lambda j: (0, 0)),     # x1: fetched once
            pl.BlockSpec((Cin, M), lambda j: (0, 0)),     # x2: fetched once
            pl.BlockSpec((tc, Cin), lambda j: (j, 0)),    # bf16 weight tile
            pl.BlockSpec((tc, 2), lambda j: (j, 0)),      # packed gamma/beta
        ],
        out_specs=pl.BlockSpec((tc, M), lambda j: (j, 0)),
        compiler_params=pltpu.CompilerParams(
            # Cout tiles are fully independent (per-channel BN stats), so the
            # axis is parallel -> v7x megacore splits the channels across TCs.
            dimension_semantics=("parallel",)),
        cost_estimate=cost,
    )(a, b, w_bf16, gb)

    # (Cout, M) -> NCHW.  For N == 1 this is again a pure reshape.
    if N == 1:
        return out_cm.reshape(1, Cout, H, W)
    return jnp.transpose(out_cm.reshape(Cout, N, H, W), (1, 0, 2, 3))


def _reference(x445, x430, weight, gamma, beta, quantize=False):
    """Pure-JAX reference.  With quantize=True it applies the same bf16
    rounding of weight/activation as the kernel (isolates implementation
    correctness from intentional quantization error)."""
    x = x445 + x430                                          # (N,Cin,H,W) f32
    N, Cin, H, W = x.shape
    Cout = weight.shape[0]
    if quantize:
        x = x.astype(jnp.bfloat16).astype(jnp.float32)
        weight = weight.astype(jnp.bfloat16).astype(jnp.float32)
    xm = jnp.transpose(x, (0, 2, 3, 1)).reshape(-1, Cin)     # (M, Cin)
    y = jnp.dot(xm, weight.T, precision=jax.lax.Precision.HIGHEST)  # (M, Cout)
    mean = jnp.mean(y, axis=0, keepdims=True)
    var = jnp.mean((y - mean) ** 2, axis=0, keepdims=True)
    yn = (y - mean) / jnp.sqrt(var + EPS) * gamma[None, :] + beta[None, :]
    return jnp.transpose(yn.reshape(N, H, W, Cout), (0, 3, 1, 2))


if __name__ == "__main__":
    # Shapes from the module: inputs (1, 304, 7, 7), conv 304 -> 1824.
    N, Cin, H, W, Cout = 1, 304, 7, 7, 1824

    key = jax.random.PRNGKey(0)
    k1, k2, k3, k4, k5 = jax.random.split(key, 5)

    x445 = jax.random.normal(k1, (N, Cin, H, W), dtype=jnp.float32)
    x430 = jax.random.normal(k2, (N, Cin, H, W), dtype=jnp.float32)

    # Conv2d weight in native PyTorch layout (Cout, Cin, 1, 1); BN affine params.
    weight = jax.random.normal(k3, (Cout, Cin, 1, 1), dtype=jnp.float32) * 0.05
    gamma = 1.0 + 0.1 * jax.random.normal(k4, (Cout,), dtype=jnp.float32)
    beta = 0.1 * jax.random.normal(k5, (Cout,), dtype=jnp.float32)

    # One-time parameter preparation (bf16 weight, packed gamma/beta).
    w_bf16, gb = prepare_params(weight, gamma, beta)

    out = fused_add_conv_bn(x445, x430, w_bf16, gb)
    out = jax.block_until_ready(out)
    assert out.shape == (N, Cout, H, W), out.shape

    w_f32 = weight.reshape(Cout, Cin)

    # 1) Implementation correctness: compare against a reference that applies
    #    the same bf16 rounding to weight/activation (tight tolerance).
    ref_q = _reference(x445, x430, w_f32, gamma, beta, quantize=True)
    err_q = float(jnp.max(jnp.abs(out - ref_q)))
    assert jnp.allclose(out, ref_q, atol=2e-3, rtol=2e-3), err_q

    # 2) End-to-end accuracy vs the exact f32 module math (bf16-weight
    #    quantization is an intentional, bounded approximation).
    ref_exact = _reference(x445, x430, w_f32, gamma, beta, quantize=False)
    err_exact = float(jnp.max(jnp.abs(out - ref_exact)))
    assert jnp.allclose(out, ref_exact, atol=2e-2, rtol=2e-2), err_exact

    print("KERNEL_OK")
</pallas_src>

<mosaic_0001>
module attributes {stable_mosaic.version = 11 : i64} {
  func.func @_fused_add_conv_bn_kernel(%arg0: i32, %arg1: memref<304x49xf32, #tpu.memory_space<vmem>>, %arg2: memref<304x49xf32, #tpu.memory_space<vmem>>, %arg3: memref<912x304xbf16, #tpu.memory_space<vmem>>, %arg4: memref<912x2xf32, #tpu.memory_space<vmem>>, %arg5: memref<912x49xf32, #tpu.memory_space<vmem>>) attributes {dimension_semantics = [#tpu.dimension_semantics<parallel>], iteration_bounds = array<i64: 2>, scalar_prefetch = 0 : i64, scratch_operands = 0 : i64, tpu.core_type = #tpu.core_type<tc>, window_params = [{pipeline_mode = #tpu.pipeline_mode<synchronous>, transform_indices = @transform_0, window_bounds = array<i64: 304, 49>}, {pipeline_mode = #tpu.pipeline_mode<synchronous>, transform_indices = @transform_1, window_bounds = array<i64: 304, 49>}, {transform_indices = @transform_2, window_bounds = array<i64: 912, 304>}, {transform_indices = @transform_3, window_bounds = array<i64: 912, 2>}, {transform_indices = @transform_4, window_bounds = array<i64: 912, 49>}]} {
    %c0 = arith.constant 0 : index
    %c0_0 = arith.constant 0 : index
    %0 = vector.load %arg1[%c0, %c0_0] : memref<304x49xf32, #tpu.memory_space<vmem>>, vector<304x49xf32>
    %c0_1 = arith.constant 0 : index
    %c0_2 = arith.constant 0 : index
    %1 = vector.load %arg2[%c0_1, %c0_2] : memref<304x49xf32, #tpu.memory_space<vmem>>, vector<304x49xf32>
    %2 = arith.addf %0, %1 : vector<304x49xf32>
    %c0_3 = arith.constant 0 : index
    %c0_4 = arith.constant 0 : index
    %3 = vector.load %arg3[%c0_3, %c0_4] : memref<912x304xbf16, #tpu.memory_space<vmem>>, vector<912x304xbf16>
    %4 = arith.truncf %2 : vector<304x49xf32> to vector<304x49xbf16>
    %cst = arith.constant dense<0.000000e+00> : vector<912x49xf32>
    %5 = tpu.matmul %3, %4, %cst {dimension_numbers = #tpu.dot_dimension_numbers<[1], [0], [0], [1], [0, 0, 1, 1], [], []>} : vector<912x304xbf16>, vector<304x49xbf16>, vector<912x49xf32> -> vector<912x49xf32>
    %cst_5 = arith.constant dense<0.000000e+00> : vector<912xf32>
    %6 = vector.multi_reduction <add>, %5, %cst_5 [1] : vector<912x49xf32> to vector<912xf32>
    %7 = vector.shape_cast %6 : vector<912xf32> to vector<912x1xf32>
    %cst_6 = arith.constant 4.900000e+01 : f32
    %8 = vector.broadcast %cst_6 : f32 to vector<912x1xf32>
    %9 = arith.divf %7, %8 : vector<912x1xf32>
    %10 = vector.broadcast %9 : vector<912x1xf32> to vector<912x49xf32>
    %11 = arith.subf %5, %10 : vector<912x49xf32>
    %12 = arith.mulf %11, %11 : vector<912x49xf32>
    %cst_7 = arith.constant dense<0.000000e+00> : vector<912xf32>
    %13 = vector.multi_reduction <add>, %12, %cst_7 [1] : vector<912x49xf32> to vector<912xf32>
    %14 = vector.shape_cast %13 : vector<912xf32> to vector<912x1xf32>
    %cst_8 = arith.constant 4.900000e+01 : f32
    %15 = vector.broadcast %cst_8 : f32 to vector<912x1xf32>
    %16 = arith.divf %14, %15 : vector<912x1xf32>
    %c0_9 = arith.constant 0 : index
    %c0_10 = arith.constant 0 : index
    %17 = vector.load %arg4[%c0_9, %c0_10] : memref<912x2xf32, #tpu.memory_space<vmem>>, vector<912x1xf32>
    %c0_11 = arith.constant 0 : index
    %c1 = arith.constant 1 : index
    %18 = vector.load %arg4[%c0_11, %c1] : memref<912x2xf32, #tpu.memory_space<vmem>>, vector<912x1xf32>
    %cst_12 = arith.constant 1.000000e-03 : f32
    %19 = vector.broadcast %cst_12 : f32 to vector<912x1xf32>
    %20 = arith.addf %16, %19 : vector<912x1xf32>
    %21 = math.rsqrt %20 : vector<912x1xf32>
    %22 = arith.mulf %21, %17 : vector<912x1xf32>
    %23 = vector.broadcast %22 : vector<912x1xf32> to vector<912x49xf32>
    %24 = arith.mulf %11, %23 : vector<912x49xf32>
    %25 = vector.broadcast %18 : vector<912x1xf32> to vector<912x49xf32>
    %26 = arith.addf %24, %25 : vector<912x49xf32>
    %c0_13 = arith.constant 0 : index
    %c0_14 = arith.constant 0 : index
    %27 = vector.load %arg5[%c0_13, %c0_14] : memref<912x49xf32, #tpu.memory_space<vmem>>, vector<912x49xf32>
    tpu.vector_store %arg5[%c0_13, %c0_14], %26 {strides = array<i32>} : memref<912x49xf32, #tpu.memory_space<vmem>>, vector<912x49xf32>,
    return
  }
  func.func @transform_0(%arg0: i32) -> (i32, i32) {
    %c0_i32 = arith.constant 0 : i32
    %c0_i32_0 = arith.constant 0 : i32
    %c0_i32_1 = arith.constant 0 : i32
    return %c0_i32, %c0_i32_0 : i32, i32
  }
  func.func @transform_1(%arg0: i32) -> (i32, i32) {
    %c0_i32 = arith.constant 0 : i32
    %c0_i32_0 = arith.constant 0 : i32
    %c0_i32_1 = arith.constant 0 : i32
    return %c0_i32, %c0_i32_0 : i32, i32
  }
  func.func @transform_2(%arg0: i32) -> (i32, i32) {
    %c0_i32 = arith.constant 0 : i32
    %c0_i32_0 = arith.constant 0 : i32
    return %arg0, %c0_i32 : i32, i32
  }
  func.func @transform_3(%arg0: i32) -> (i32, i32) {
    %c0_i32 = arith.constant 0 : i32
    %c0_i32_0 = arith.constant 0 : i32
    return %arg0, %c0_i32 : i32, i32
  }
  func.func @transform_4(%arg0: i32) -> (i32, i32) {
    %c0_i32 = arith.constant 0 : i32
    %c0_i32_0 = arith.constant 0 : i32
    return %arg0, %c0_i32 : i32, i32
  }
}

</mosaic_0001>

<bundles_post_ra>
// kernel: tpu_custom_call.1
= control target key start
LH: loop header
LB: loop body
LE: loop exit
PB: predicated region body
PF: predicated region fallthrough
CT: control target
= control target key end

     0   :  { %s7011_s15 = smov 0   ;;  %s10461_s0 = inlined_call_operand.vmem [shape: f32[304,49], index: 0, kind: input, shape index: {}]   ;;  %s10462_s1 = inlined_call_operand.vmem [shape: f32[304,49], index: 1, kind: input, shape index: {}]   ;;  %s10463_s2 = inlined_call_operand.vmem [shape: bf16[1824,304], index: 2, kind: input, shape index: {}]   ;;  %s10464_s3 = inlined_call_operand.vmem [shape: f32[1824,2], index: 3, kind: input, shape index: {}]   ;;  %s10465_s4 = inlined_call_operand.vmem [shape: f32[1824,49], index: 4, kind: output, shape index: {}]  }
   0x1 LB: > { %s5741_s16 = sadd.s32 4294967295, %s6980_s15   ;;  %p5745_p0 = scmp.ge.s32.totalorder %s6980_s15, 1  ;;  %s6980_s15 = sphi %s7011_s15, %s14_s15  }
   0x2   : > { %p175_p1 = scmp.lt.s32.totalorder %s6980_s15, 3 }
   0x4   : > { %p176_p2 = pnand %p5745_p0, %p175_p1 }
   0x6   : > { %179 = sbr.rel (%p176_p2) target bundleno = 2947 (0xb83), region = 36 }
   0xd   : > { %v227_v0 = vld [vmem:[%s10461_s0] sm:$0xff]  ;;  %v228_v1 = vld [vmem:[%s10461_s0 + $0x8] sm:$0xff]  ;;  %s207_s23 = smul.u32 114, %s5741_s16  ;;  %v6982_v3 = vmov 0   ;;  %v10466_v6 = vmov 1   ;;  %v229_v7 = vld [vmem:[%s10461_s0 + $0x10] sm:$0xff] }
   0xe   : > { %v265_v2 = vld [vmem:[%s10462_s1] sm:$0xff]  ;;  %1615 = vmatprep.subr.bf16.mxu1 %v6982_v3  ;;  %v266_v4 = vld [vmem:[%s10462_s1 + $0x8] sm:$0xff]  ;;  %6401 = vset.pattern.permute.xlu0 %v10466_v6  ;;  %v230_v8 = vld [vmem:[%s10461_s0 + $0x18] sm:$0xff]  ;;  %v10468_v13 = vmov 0.0   ;;  %vm6985_vm0 = vmmov 0   ;;  %vm1443_vm1 = vcmask 392192  }
   0xf   : > { %v303_v5 = vadd.f32 %v265_v2, %v227_v0  ;;  %v304_v9 = vadd.f32 %v266_v4, %v228_v1  ;;  %6400 = vset.pattern.permute.xlu1 %v10466_v6  ;;  %v267_v10 = vld [vmem:[%s10462_s1 + $0x10] sm:$0xff]  ;;  %v268_v11 = vld [vmem:[%s10462_s1 + $0x18] sm:$0xff]  ;;  %p208_p3 = scmp.lt.s32.totalorder %s207_s23, 227  ;;  %v231_v12 = vld [vmem:[%s10461_s0 + $0x20] sm:$0xff]  ;;  %6039 = vmatprep.subr.bf16.mxu0 %v10468_v13  ;;  %vm2593_vm2 = vcmask 400384  }
  0x10   : > { %v305_v14 = vadd.f32 %v267_v10, %v229_v7  ;;  %v306_v15 = vadd.f32 %v268_v11, %v230_v8  ;;  %v232_v16 = vld [vmem:[%s10461_s0 + $0x28] sm:$0xff]  ;;  %v269_v17 = vld [vmem:[%s10462_s1 + $0x20] sm:$0xff]  ;;  %6045 = vmatprep.mubr.msk.bf16.mxu0 %vm6985_vm0, %v10468_v13  ;;  %v233_v23 = vld [vmem:[%s10461_s0 + $0x30] sm:$0xff] }
  0x11   : > { %v270_v18 = vld [vmem:[%s10462_s1 + $0x28] sm:$0xff]  ;;  %v569_v19 = vpack.c.bf16 %v304_v9, %v303_v5  ;;  %s11228_s23 = smov (!%p208_p3, %s207_s23), 227  ;;  %v307_v21 = vadd.f32 %v269_v17, %v231_v12  ;;  %v234_v24 = vld [vmem:[%s10461_s0 + $0x38] sm:$0xff]  ;;  %v271_v25 = vld [vmem:[%s10462_s1 + $0x30] sm:$0xff] }
  0x12   : > { %v570_v20 = vpack.c.bf16 %v306_v15, %v305_v14  ;;  %s5747_s17 = sshll.u32 %s11228_s23, 3  ;;  %v308_v22 = vadd.f32 %v270_v18, %v232_v16  ;;  %v272_v26 = vld [vmem:[%s10462_s1 + $0x38] sm:$0xff]  ;;  %v309_v32 = vadd.f32 %v271_v25, %v233_v23  ;;  %v235_v34 = vld [vmem:[%s10461_s0 + $0x40] sm:$0xff]  ;;  %v236_v35 = vld [vmem:[%s10461_s0 + $0x48] sm:$0xff]  ;;  %s6387_s18 = smul.u32 12, %s11228_s23 }
  0x13   : > { %1616 = vmatpush1.bf16.msra.mxu1 %v569_v19  ;;  %s7073_s22 = scalar_lea.vmem %s10464_s3, %s5747_s17  ;;  %v310_v33 = vadd.f32 %v272_v26, %v234_v24  ;;  %v273_v36 = vld [vmem:[%s10462_s1 + $0x40] sm:$0xff]  ;;  %v274_v37 = vld [vmem:[%s10462_s1 + $0x48] sm:$0xff]  ;;  %v237_v43 = vld [vmem:[%s10461_s0 + $0x50] sm:$0xff]  ;;  %s8984_s26 = scalar_lea.vmem %s10465_s4, %s5747_s17 }
  0x14   : > { %1617 = vmatprep.subr.bf16.mxu1 %v6982_v3  ;;  %v3736_v27 = vld [vmem:[%s7073_s22 + $0x8] sm:$0xff]  ;;  %v3735_v28 = vld [vmem:[%s7073_s22] sm:$0xff]  ;;  %v571_v29 = vpack.c.bf16 %v308_v22, %v307_v21  ;;  %v3737_v31 = vld [vmem:[%s7073_s22 + $0x10] sm:$0xff]  ;;  %v311_v41 = vadd.f32 %v273_v36, %v235_v34  ;;  %v312_v42 = vadd.f32 %v274_v37, %v236_v35  ;;  %s7219_s13 = scalar_lea.vmem %s10463_s2, %s6387_s18 }
  0x15   : > { %4882 = vperm.xlu0 %6401, %v3736_v27   ;;  %4877 = vperm.xlu1 %6400, %v3735_v28   ;;  %v3739_v30 = vld [vmem:[%s7073_s22 + $0x20] sm:$0xff]  ;;  %v572_v38 = vpack.c.bf16 %v310_v33, %v309_v32  ;;  %v3741_v39 = vld [vmem:[%s7073_s22 + $0x30] sm:$0xff]  ;;  %v3738_v40 = vld [vmem:[%s7073_s22 + $0x18] sm:$0xff] }
  0x16   : > { %v238_v44 = vld [vmem:[%s10461_s0 + $0x58] sm:$0xff]  ;;  %v275_v45 = vld [vmem:[%s10462_s1 + $0x50] sm:$0xff]  ;;  %v573_v47 = vpack.c.bf16 %v312_v42, %v311_v41  ;;  %v3743_v48 = vld [vmem:[%s7073_s22 + $0x40] sm:$0xff] }
  0x17   : > { %1618 = vmatpush1.bf16.msra.mxu1 %v570_v20  ;;  %v276_v46 = vld [vmem:[%s10462_s1 + $0x58] sm:$0xff]  ;;  %v3740_v49 = vld [vmem:[%s7073_s22 + $0x28] sm:$0xff]  ;;  %v313_v50 = vadd.f32 %v275_v45, %v237_v43  ;;  %v239_v52 = vld [vmem:[%s10461_s0 + $0x60] sm:$0xff] }
  0x18   : > { %1619 = vmatprep.subr.bf16.mxu1 %v6982_v3  ;;  %v314_v51 = vadd.f32 %v276_v46, %v238_v44  ;;  %v240_v53 = vld [vmem:[%s10461_s0 + $0x68] sm:$0xff]  ;;  %v277_v54 = vld [vmem:[%s10462_s1 + $0x60] sm:$0xff]  ;;  %v3745_v56 = vld [vmem:[%s7073_s22 + $0x50] sm:$0xff] }
  0x19   : > { %4897 = vperm.xlu0 %6401, %v3739_v30   ;;  %4887 = vperm.xlu1 %6400, %v3737_v31   ;;  %v278_v55 = vld [vmem:[%s10462_s1 + $0x68] sm:$0xff]  ;;  %v3742_v57 = vld [vmem:[%s7073_s22 + $0x38] sm:$0xff]  ;;  %v241_v58 = vld [vmem:[%s10461_s0 + $0x70] sm:$0xff]  ;;  %v315_v60 = vadd.f32 %v277_v54, %v239_v52 }
  0x1a   : > { %v574_v59 = vpack.c.bf16 %v314_v51, %v313_v50  ;;  %v316_v61 = vadd.f32 %v278_v55, %v240_v53  ;;  %v242_v62 = vld [vmem:[%s10461_s0 + $0x78] sm:$0xff]  ;;  %v279_v63 = vld [vmem:[%s10462_s1 + $0x70] sm:$0xff]  ;;  %v3747_v1 = vld [vmem:[%s7073_s22 + $0x60] sm:$0xff] }
  0x1b   : > { %1620 = vmatpush1.bf16.msra.mxu1 %v571_v29  ;;  %v280_v0 = vld [vmem:[%s10462_s1 + $0x78] sm:$0xff]  ;;  %v3744_v2 = vld [vmem:[%s7073_s22 + $0x48] sm:$0xff]  ;;  %v317_v4 = vadd.f32 %v279_v63, %v241_v58  ;;  %v259_v7 = vld [vmem:[%s10461_s0 + $0x100] sm:$0xff] }
  0x1c   : > { %1621 = vmatprep.subr.bf16.mxu1 %v6982_v3  ;;  %v318_v5 = vadd.f32 %v280_v0, %v242_v62  ;;  %v260_v8 = vld [vmem:[%s10461_s0 + $0x108] sm:$0xff]  ;;  %v575_v9 = vpack.c.bf16 %v316_v61, %v315_v60  ;;  %v243_v10 = vld [vmem:[%s10461_s0 + $0x80] sm:$0xff]  ;;  %v261_v19 = vld [vmem:[%s10461_s0 + $0x110] sm:$0xff] }
  0x1d   : > { %4907 = vperm.xlu0 %6401, %v3741_v39   ;;  %4892 = vperm.xlu1 %6400, %v3738_v40   ;;  %v297_v11 = vld [vmem:[%s10462_s1 + $0x100] sm:$0xff]  ;;  %v298_v12 = vld [vmem:[%s10462_s1 + $0x108] sm:$0xff]  ;;  %v262_v22 = vld [vmem:[%s10461_s0 + $0x118] sm:$0xff] }
  0x1e   : > { %v244_v14 = vld [vmem:[%s10461_s0 + $0x88] sm:$0xff]  ;;  %v281_v15 = vld [vmem:[%s10462_s1 + $0x80] sm:$0xff]  ;;  %v335_v17 = vadd.f32 %v297_v11, %v259_v7  ;;  %v336_v18 = vadd.f32 %v298_v12, %v260_v8  ;;  %v576_v20 = vpack.c.bf16 %v318_v5, %v317_v4  ;;  %v299_v23 = vld [vmem:[%s10462_s1 + $0x110] sm:$0xff] }
  0x1f   : > { %1622 = vmatpush1.bf16.msra.mxu1 %v572_v38  ;;  %v282_v16 = vld [vmem:[%s10462_s1 + $0x88] sm:$0xff]  ;;  %v300_v24 = vld [vmem:[%s10462_s1 + $0x118] sm:$0xff]  ;;  %v3749_v25 = vld [vmem:[%s7073_s22 + $0x70] sm:$0xff]  ;;  %v319_v27 = vadd.f32 %v281_v15, %v243_v10  ;;  %v337_v30 = vadd.f32 %v299_v23, %v261_v19 }
  0x20   : > { %1623 = vmatprep.subr.bf16.mxu1 %v6982_v3  ;;  %v585_v21 = vpack.c.bf16 %v336_v18, %v335_v17  ;;  %v3746_v26 = vld [vmem:[%s7073_s22 + $0x58] sm:$0xff]  ;;  %v320_v28 = vadd.f32 %v282_v16, %v244_v14  ;;  %v245_v29 = vld [vmem:[%s10461_s0 + $0x90] sm:$0xff]  ;;  %v338_v31 = vadd.f32 %v300_v24, %v262_v22  ;;  %v263_v36 = vld [vmem:[%s10461_s0 + $0x120] sm:$0xff] }
  0x21   : > { %4917 = vperm.xlu0 %6401, %v3743_v48   ;;  %4902 = vperm.xlu1 %6400, %v3740_v49   ;;  %v246_v32 = vld [vmem:[%s10461_s0 + $0x98] sm:$0xff]  ;;  %v283_v33 = vld [vmem:[%s10462_s1 + $0x90] sm:$0xff]  ;;  %v264_v37 = vld [vmem:[%s10461_s0 + $0x128] sm:$0xff] }
  0x22   : > { %v284_v34 = vld [vmem:[%s10462_s1 + $0x98] sm:$0xff]  ;;  %6040 = vmatpush3.bf16.msra.mxu0 %v585_v21  ;;  %v586_v35 = vpack.c.bf16 %v338_v31, %v337_v30  ;;  %v301_v38 = vld [vmem:[%s10462_s1 + $0x120] sm:$0xff]  ;;  %v3748_v40 = vld [vmem:[%s7073_s22 + $0x68] sm:$0xff]  ;;  %v577_v43 = vpack.c.bf16 %v320_v28, %v319_v27  ;;  %v321_v44 = vadd.f32 %v283_v33, %v245_v29 }
  0x23   : > { %1624 = vmatpush1.bf16.msra.mxu1 %v573_v47  ;;  %6041 = vmatprep.subr.bf16.mxu0 %v10468_v13  ;;  %v3751_v39 = vld [vmem:[%s7073_s22 + $0x80] sm:$0xff]  ;;  %v302_v41 = vld [vmem:[%s10462_s1 + $0x128] sm:$0xff]  ;;  %v339_v42 = vadd.f32 %v301_v38, %v263_v36  ;;  %v322_v45 = vadd.f32 %v284_v34, %v246_v32  ;;  %v3753_v51 = vld [vmem:[%s7073_s22 + $0x90] sm:$0xff] }
  0x24   : > { %1625 = vmatprep.subr.bf16.mxu1 %v6982_v3  ;;  %v247_v46 = vld [vmem:[%s10461_s0 + $0xa0] sm:$0xff]  ;;  %v248_v47 = vld [vmem:[%s10461_s0 + $0xa8] sm:$0xff]  ;;  %v340_v49 = vadd.f32 %v302_v41, %v264_v37  ;;  %v3750_v53 = vld [vmem:[%s7073_s22 + $0x78] sm:$0xff] }
  0x25   : > { %4927 = vperm.xlu0 %6401, %v3745_v56   ;;  %4912 = vperm.xlu1 %6400, %v3742_v57   ;;  %v285_v48 = vld [vmem:[%s10462_s1 + $0xa0] sm:$0xff]  ;;  %v286_v50 = vld [vmem:[%s10462_s1 + $0xa8] sm:$0xff]  ;;  %v249_v54 = vld [vmem:[%s10461_s0 + $0xb0] sm:$0xff]  ;;  %v578_v56 = vpack.c.bf16 %v322_v45, %v321_v44 }
  0x26   : > { %6042 = vmatpush3.bf16.msra.mxu0 %v586_v35  ;;  %v587_v52 = vpack.c.bf16 %v340_v49, %v339_v42  ;;  %v6409_v55 = vld [vmem:[%s7219_s13 + $0x4] ss:$12 sps:$4 sm:$0xff]   ;;  %v323_v57 = vadd.f32 %v285_v48, %v247_v46  ;;  %v324_v58 = vadd.f32 %v286_v50, %v248_v47  ;;  %v6406_v61 = vld [vmem:[%s7219_s13 + $0x8] ss:$12 sps:$4 sm:$0xff]   ;;  %v288_v62 = vld [vmem:[%s10462_s1 + $0xb8] sm:$0xff] }
  0x27   : > { %1626 = vmatpush1.bf16.msra.mxu1 %v574_v59  ;;  %6043 = vmatprep.subr.bf16.mxu0 %v10468_v13  ;;  %v250_v59 = vld [vmem:[%s10461_s0 + $0xb8] sm:$0xff]  ;;  %v287_v60 = vld [vmem:[%s10462_s1 + $0xb0] sm:$0xff]  ;;  %v3755_v63 = vld [vmem:[%s7073_s22 + $0xa0] sm:$0xff] }
  0x28   : > { %1627 = vmatprep.subr.bf16.mxu1 %v6982_v3  ;;  %1647 = vmatprep.mubr.bf16.mxu1 %v6409_v55  ;;  %v3752_v0 = vld [vmem:[%s7073_s22 + $0x88] sm:$0xff]  ;;  %v326_v4 = vadd.f32 %v288_v62, %v250_v59  ;;  %v251_v5 = vld [vmem:[%s10461_s0 + $0xc0] sm:$0xff]  ;;  %v3757_v10 = vld [vmem:[%s7073_s22 + $0xb0] sm:$0xff] }
  0x29   : > { %4937 = vperm.xlu0 %6401, %v3747_v1   ;;  %4922 = vperm.xlu1 %6400, %v3744_v2   ;;  %v579_v1 = vpack.c.bf16 %v324_v58, %v323_v57  ;;  %v325_v2 = vadd.f32 %v287_v60, %v249_v54  ;;  %v252_v7 = vld [vmem:[%s10461_s0 + $0xc8] sm:$0xff]  ;;  %v289_v8 = vld [vmem:[%s10462_s1 + $0xc0] sm:$0xff]  ;;  %v3754_v11 = vld [vmem:[%s7073_s22 + $0x98] sm:$0xff] }
  0x2a   : > { %6044 = vmatpush3.bf16.msra.mxu0 %v587_v52  ;;  %v253_v12 = vld [vmem:[%s10461_s0 + $0xd0] sm:$0xff]  ;;  %v254_v14 = vld [vmem:[%s10461_s0 + $0xd8] sm:$0xff]  ;;  %v327_v16 = vadd.f32 %v289_v8, %v251_v5  ;;  %v6410_v18 = vld [vmem:[%s7219_s13 + $0x20] ss:$12 sps:$4 sm:$0xff]  }
  0x2b   : > { %1628 = vmatpush1.bf16.msra.mxu1 %v575_v9  ;;  %v290_v9 = vld [vmem:[%s10462_s1 + $0xc8] sm:$0xff]  ;;  %v580_v15 = vpack.c.bf16 %v326_v4, %v325_v2  ;;  %v291_v19 = vld [vmem:[%s10462_s1 + $0xd0] sm:$0xff]  ;;  %v3759_v21 = vld [vmem:[%s7073_s22 + $0xc0] sm:$0xff] }
  0x2c   : > { %1629 = vmatprep.subr.bf16.mxu1 %v6982_v3  ;;  %v328_v17 = vadd.f32 %v290_v9, %v252_v7  ;;  %v3756_v22 = vld [vmem:[%s7073_s22 + $0xa8] sm:$0xff]  ;;  %v255_v23 = vld [vmem:[%s10461_s0 + $0xe0] sm:$0xff]  ;;  %v3761_v30 = vld [vmem:[%s7073_s22 + $0xd0] sm:$0xff] }
  0x2d   : > { %4947 = vperm.xlu0 %6401, %v3749_v25   ;;  %4932 = vperm.xlu1 %6400, %v3746_v26   ;;  %v256_v24 = vld [vmem:[%s10461_s0 + $0xe8] sm:$0xff]  ;;  %v329_v26 = vadd.f32 %v291_v19, %v253_v12  ;;  %v293_v28 = vld [vmem:[%s10462_s1 + $0xe0] sm:$0xff]  ;;  %v3758_v31 = vld [vmem:[%s7073_s22 + $0xb8] sm:$0xff] }
  0x2e   : > { %6046 = vmatmul.mubr.msk.bf16.vlgmr.msra.gmra.mrb[0].mxu0 %vm1443_vm1, %v6406_v61  ;;  %v581_v25 = vpack.c.bf16 %v328_v17, %v327_v16  ;;  %v294_v29 = vld [vmem:[%s10462_s1 + $0xe8] sm:$0xff]  ;;  %v257_v32 = vld [vmem:[%s10461_s0 + $0xf0] sm:$0xff]  ;;  %v258_v33 = vld [vmem:[%s10461_s0 + $0xf8] sm:$0xff]  ;;  %v331_v35 = vadd.f32 %v293_v28, %v255_v23 }
  0x2f   : > { %1630 = vmatpush1.bf16.msra.mxu1 %v576_v20  ;;  %6049 = vmatprep.mubr.msk.bf16.mxu0 %vm6985_vm0, %v10468_v13  ;;  %v292_v20 = vld [vmem:[%s10462_s1 + $0xd8] sm:$0xff]  ;;  %v332_v36 = vadd.f32 %v294_v29, %v256_v24  ;;  %v295_v37 = vld [vmem:[%s10462_s1 + $0xf0] sm:$0xff]  ;;  %v3763_v41 = vld [vmem:[%s7073_s22 + $0xe0] sm:$0xff] }
  0x30   : > { %1631 = vmatprep.subr.bf16.mxu1 %v6982_v3  ;;  %v330_v27 = vadd.f32 %v292_v20, %v254_v14  ;;  %v6417_v38 = vld [vmem:[%s7219_s13 + $0x38] ss:$12 sps:$4 sm:$0xff]   ;;  %v3760_v42 = vld [vmem:[%s7073_s22 + $0xc8] sm:$0xff]  ;;  %v3765_v45 = vld [vmem:[%s7073_s22 + $0xf0] sm:$0xff] }
  0x31   : > { %4957 = vperm.xlu0 %6401, %v3751_v39   ;;  %4942 = vperm.xlu1 %6400, %v3748_v40   ;;  %v296_v39 = vld [vmem:[%s10462_s1 + $0xf8] sm:$0xff]  ;;  %v583_v40 = vpack.c.bf16 %v332_v36, %v331_v35  ;;  %v6407_v49 = vld [vmem:[%s7219_s13] ss:$12 sps:$4 sm:$0xff]   ;;  %v6425_v54 = vld [vmem:[%s7219_s13 + $0x68] ss:$12 sps:$4 sm:$0xff]  }
  0x32   : > { %v582_v34 = vpack.c.bf16 %v330_v27, %v329_v26  ;;  %v334_v44 = vadd.f32 %v296_v39, %v258_v33  ;;  %v3762_v46 = vld [vmem:[%s7073_s22 + $0xd8] sm:$0xff]  ;;  %v3767_v50 = vld [vmem:[%s7073_s22 + $0x100] sm:$0xff]  ;;  %v3764_v52 = vld [vmem:[%s7073_s22 + $0xe8] sm:$0xff] }
  0x33   : > { %1632 = vmatpush1.bf16.msra.mxu1 %v577_v43  ;;  %v333_v43 = vadd.f32 %v295_v37, %v257_v32  ;;  %v6421_v48 = vld [vmem:[%s7219_s13 + $0x50] ss:$12 sps:$4 sm:$0xff]   ;;  %v3771_v57 = vld [vmem:[%s7073_s22 + $0x120] sm:$0xff]  ;;  %v3768_v59 = vld [vmem:[%s7073_s22 + $0x108] sm:$0xff] }
  0x34   : > { %1633 = vmatprep.subr.bf16.mxu1 %v6982_v3  ;;  %v3766_v55 = vld [vmem:[%s7073_s22 + $0xf8] sm:$0xff]  ;;  %v6414_v58 = vld [vmem:[%s7219_s13 + $0x34] ss:$12 sps:$4 sm:$0xff]   ;;  %v3772_v2 = vld [vmem:[%s7073_s22 + $0x128] sm:$0xff] }
  0x35   : > { %4967 = vperm.xlu0 %6401, %v3753_v51   ;;  %4952 = vperm.xlu1 %6400, %v3750_v53   ;;  %v584_v47 = vpack.c.bf16 %v334_v44, %v333_v43  ;;  %v6411_v51 = vld [vmem:[%s7219_s13 + $0x1c] ss:$12 sps:$4 sm:$0xff]   ;;  %v3769_v53 = vld [vmem:[%s7073_s22 + $0x110] sm:$0xff]  ;;  %v6429_v61 = vld [vmem:[%s7219_s13 + $0x80] ss:$12 sps:$4 sm:$0xff]  }
  0x36   : > { %6050 = vmatmul.mubr.msk.bf16.gmra.mrb[4].mxu0 %vm1443_vm1, %v6410_v18  ;;  %v3773_v60 = vld [vmem:[%s7073_s22 + $0x130] sm:$0xff]  ;;  %v3770_v62 = vld [vmem:[%s7073_s22 + $0x118] sm:$0xff]  ;;  %v3779_v9 = vld [vmem:[%s7073_s22 + $0x160] sm:$0xff] }
  0x37   : > { %1634 = vmatpush1.bf16.msra.mxu1 %v578_v56  ;;  %6053 = vmatprep.mubr.msk.bf16.mxu0 %vm6985_vm0, %v10468_v13  ;;  %v6413_v56 = vld [vmem:[%s7219_s13 + $0x18] ss:$12 sps:$4 sm:$0xff]   ;;  %v3777_v4 = vld [vmem:[%s7073_s22 + $0x150] sm:$0xff]  ;;  %v6424_v16 = vld [vmem:[%s7219_s13 + $0x60] ss:$12 sps:$4 sm:$0xff]  }
  0x38   : > { %1635 = vmatprep.subr.bf16.mxu1 %v6982_v3  ;;  %v6433_v5 = vld [vmem:[%s7219_s13 + $0x98] ss:$12 sps:$4 sm:$0xff]   ;;  %v6420_v8 = vld [vmem:[%s7219_s13 + $0x48] ss:$12 sps:$4 sm:$0xff]   ;;  %v6437_v14 = vld [vmem:[%s7219_s13 + $0xb0] ss:$12 sps:$4 sm:$0xff]  }
  0x39   : > { %4977 = vperm.xlu0 %6401, %v3755_v63   ;;  %4962 = vperm.xlu1 %6400, %v3752_v0   ;;  %v6416_v63 = vld [vmem:[%s7219_s13 + $0x30] ss:$12 sps:$4 sm:$0xff]   ;;  %v3775_v0 = vld [vmem:[%s7073_s22 + $0x140] sm:$0xff]  ;;  %v3780_v19 = vld [vmem:[%s7073_s22 + $0x168] sm:$0xff] }
  0x3a   : > { %v3774_v7 = vld [vmem:[%s7073_s22 + $0x138] sm:$0xff]  ;;  %v3781_v12 = vld [vmem:[%s7073_s22 + $0x170] sm:$0xff]  ;;  %v3783_v17 = vld [vmem:[%s7073_s22 + $0x180] sm:$0xff] }
  0x3b   : > { %1636 = vmatpush1.bf16.msra.mxu1 %v579_v1  ;;  %v6418_v1 = vld [vmem:[%s7219_s13 + $0x4c] ss:$12 sps:$4 sm:$0xff]   ;;  %v6426_v18 = vld [vmem:[%s7219_s13 + $0x7c] ss:$12 sps:$4 sm:$0xff]   ;;  %v3785_v20 = vld [vmem:[%s7073_s22 + $0x190] sm:$0xff] }
  0x3c   : > { %1637 = vmatprep.subr.bf16.mxu1 %v6982_v3  ;;  %v6428_v23 = vld [vmem:[%s7219_s13 + $0x78] ss:$12 sps:$4 sm:$0xff]   ;;  %v3784_v26 = vld [vmem:[%s7073_s22 + $0x188] sm:$0xff]  ;;  %v3789_v27 = vld [vmem:[%s7073_s22 + $0x1b0] sm:$0xff] }
  0x3d   : > { %4987 = vperm.xlu0 %6401, %v3757_v10   ;;  %4972 = vperm.xlu1 %6400, %v3754_v11   ;;  %v6422_v10 = vld [vmem:[%s7219_s13 + $0x64] ss:$12 sps:$4 sm:$0xff]   ;;  %v3776_v11 = vld [vmem:[%s7073_s22 + $0x148] sm:$0xff]  ;;  %v3786_v29 = vld [vmem:[%s7073_s22 + $0x198] sm:$0xff] }
  0x3e   : > { %6054 = vmatmul.mubr.msk.bf16.gmra.mrb[8].mxu0 %vm1443_vm1, %v6417_v38  ;;  %v3787_v24 = vld [vmem:[%s7073_s22 + $0x1a0] sm:$0xff]  ;;  %v6434_v32 = vld [vmem:[%s7219_s13 + $0xac] ss:$12 sps:$4 sm:$0xff]   ;;  %v6436_v37 = vld [vmem:[%s7219_s13 + $0xa8] ss:$12 sps:$4 sm:$0xff]  }
  0x3f   : > { %1638 = vmatpush1.bf16.msra.mxu1 %v580_v15  ;;  %6057 = vmatprep.mubr.msk.bf16.mxu0 %vm6985_vm0, %v10468_v13  ;;  %v3778_v15 = vld [vmem:[%s7073_s22 + $0x158] sm:$0xff]  ;;  %v6445_v28 = vld [vmem:[%s7219_s13 + $0xe0] ss:$12 sps:$4 sm:$0xff]   ;;  %v6438_v39 = vld [vmem:[%s7219_s13 + $0xc4] ss:$12 sps:$4 sm:$0xff]  }
  0x40   : > { %1639 = vmatprep.subr.bf16.mxu1 %v6982_v3  ;;  %v3788_v33 = vld [vmem:[%s7073_s22 + $0x1a8] sm:$0xff]  ;;  %v6449_v35 = vld [vmem:[%s7219_s13 + $0xf8] ss:$12 sps:$4 sm:$0xff]  }
  0x41   : > { %4997 = vperm.xlu0 %6401, %v3759_v21   ;;  %4982 = vperm.xlu1 %6400, %v3756_v22   ;;  %v6441_v21 = vld [vmem:[%s7219_s13 + $0xc8] ss:$12 sps:$4 sm:$0xff]   ;;  %v3782_v22 = vld [vmem:[%s7073_s22 + $0x178] sm:$0xff]  ;;  %v3795_v38 = vld [vmem:[%s7073_s22 + $0x1e0] sm:$0xff] }
  0x42   : > { %v3790_v36 = vld [vmem:[%s7073_s22 + $0x1b8] sm:$0xff]  ;;  %v6440_v44 = vld [vmem:[%s7219_s13 + $0xc0] ss:$12 sps:$4 sm:$0xff]  }
  0x43   : > { %1640 = vmatpush1.bf16.msra.mxu1 %v581_v25  ;;  %v6430_v25 = vld [vmem:[%s7219_s13 + $0x94] ss:$12 sps:$4 sm:$0xff]   ;;  %v3794_v43 = vld [vmem:[%s7073_s22 + $0x1d8] sm:$0xff] }
  0x44   : > { %1641 = vmatprep.subr.bf16.mxu1 %v6982_v3 }
  0x45   : > { %5007 = vperm.xlu0 %6401, %v3761_v30   ;;  %4992 = vperm.xlu1 %6400, %v3758_v31   ;;  %v6432_v30 = vld [vmem:[%s7219_s13 + $0x90] ss:$12 sps:$4 sm:$0xff]   ;;  %v3791_v31 = vld [vmem:[%s7073_s22 + $0x1c0] sm:$0xff] }
  0x46   : > { %6058 = vmatmul.mubr.msk.bf16.gmra.mrb[12].mxu0 %vm1443_vm1, %v6421_v48  ;;  %v3801_v48 = vld [vmem:[%s7073_s22 + $0x210] sm:$0xff] }
  0x47   : > { %1642 = vmatpush1.bf16.msra.mxu1 %v582_v34  ;;  %6061 = vmatprep.mubr.msk.bf16.mxu0 %vm6985_vm0, %v10468_v13  ;;  %v3793_v34 = vld [vmem:[%s7073_s22 + $0x1d0] sm:$0xff] }
  0x48   : > { %1643 = vmatprep.subr.bf16.mxu1 %v6982_v3 }
  0x49   : > { %5017 = vperm.xlu0 %6401, %v3763_v41   ;;  %5002 = vperm.xlu1 %6400, %v3760_v42   ;;  %v3797_v41 = vld [vmem:[%s7073_s22 + $0x1f0] sm:$0xff] }
  0x4a   : > { %v6453_v42 = vld [vmem:[%s7219_s13 + $0x110] ss:$12 sps:$4 sm:$0xff]  }
  0x4b   : > { %1644 = vmatpush1.bf16.msra.mxu1 %v583_v40  ;;  %v3792_v40 = vld [vmem:[%s7073_s22 + $0x1c8] sm:$0xff] }
  0x4c   : > { %1645 = vmatprep.subr.bf16.mxu1 %v6982_v3 }
  0x4d   : > { %5027 = vperm.xlu0 %6401, %v3765_v45   ;;  %5012 = vperm.xlu1 %6400, %v3762_v46   ;;  %v3799_v45 = vld [vmem:[%s7073_s22 + $0x200] sm:$0xff]  ;;  %v6442_v46 = vld [vmem:[%s7219_s13 + $0xdc] ss:$12 sps:$4 sm:$0xff]  }
  0x4e   : > { %6062 = vmatmul.mubr.msk.bf16.gmra.mrb[16].mxu0 %vm1443_vm1, %v6425_v54  ;;  %v3803_v54 = vld [vmem:[%s7073_s22 + $0x220] sm:$0xff] }
  0x4f   : > { %1646 = vmatpush1.bf16.msra.mxu1 %v584_v47  ;;  %6065 = vmatprep.mubr.msk.bf16.mxu0 %vm6985_vm0, %v10468_v13  ;;  %v3796_v47 = vld [vmem:[%s7073_s22 + $0x1e8] sm:$0xff] }
  0x51   : > { %5037 = vperm.xlu0 %6401, %v3767_v50   ;;  %5022 = vperm.xlu1 %6400, %v3764_v52   ;;  %v3798_v50 = vld [vmem:[%s7073_s22 + $0x1f8] sm:$0xff] }
  0x52   : > { %1648 = vmatmul.mubr.bf16.vlgmr.msra.gmra.mrb[0].mxu1 %v6407_v49  ;;  %v6457_v49 = vld [vmem:[%s7219_s13 + $0x128] ss:$12 sps:$4 sm:$0xff]  }
  0x53   : > { %1655 = vmatprep.mubr.bf16.mxu1 %v6411_v51  ;;  %v6444_v51 = vld [vmem:[%s7219_s13 + $0xd8] ss:$12 sps:$4 sm:$0xff]  }
  0x55   : > { %5047 = vperm.xlu0 %6401, %v3769_v53   ;;  %5032 = vperm.xlu1 %6400, %v3766_v55   ;;  %v6446_v55 = vld [vmem:[%s7219_s13 + $0xf4] ss:$12 sps:$4 sm:$0xff]  }
  0x56   : > { %6066 = vmatmul.mubr.msk.bf16.gmra.mrb[20].mxu0 %vm1443_vm1, %v6429_v61  ;;  %v3802_v61 = vld [vmem:[%s7073_s22 + $0x218] sm:$0xff] }
  0x57   : > { %6069 = vmatprep.mubr.msk.bf16.mxu0 %vm6985_vm0, %v10468_v13 }
  0x59   : > { %5057 = vperm.xlu0 %6401, %v3771_v57   ;;  %5042 = vperm.xlu1 %6400, %v3768_v59   ;;  %v3805_v59 = vld [vmem:[%s7073_s22 + $0x230] sm:$0xff] }
  0x5a   : > { %1656 = vmatmul.mubr.bf16.gmra.mrb[4].mxu1 %v6413_v56  ;;  %v3800_v56 = vld [vmem:[%s7073_s22 + $0x208] sm:$0xff] }
  0x5b   : > { %1663 = vmatprep.mubr.bf16.mxu1 %v6414_v58 }
  0x5d   : > { %5067 = vperm.xlu0 %6401, %v3773_v60   ;;  %5052 = vperm.xlu1 %6400, %v3770_v62   ;;  %v6461_v60 = vld [vmem:[%s7219_s13 + $0x140] ss:$12 sps:$4 sm:$0xff]   ;;  %v6448_v62 = vld [vmem:[%s7219_s13 + $0xf0] ss:$12 sps:$4 sm:$0xff]  }
  0x5e   : > { %6070 = vmatmul.mubr.msk.bf16.gmra.mrb[24].mxu0 %vm1443_vm1, %v6433_v5 }
  0x5f   : > { %6073 = vmatprep.mubr.msk.bf16.mxu0 %vm6985_vm0, %v10468_v13 }
  0x61   : > { %5077 = vperm.xlu0 %6401, %v3775_v0   ;;  %5062 = vperm.xlu1 %6400, %v3772_v2   ;;  %v6450_v2 = vld [vmem:[%s7219_s13 + $0x10c] ss:$12 sps:$4 sm:$0xff]  }
  0x62   : > { %1664 = vmatmul.mubr.bf16.gmra.mrb[8].mxu1 %v6416_v63 }
  0x63   : > { %1671 = vmatprep.mubr.bf16.mxu1 %v6418_v1  ;;  %v3807_v1 = vld [vmem:[%s7073_s22 + $0x240] sm:$0xff] }
  0x65   : > { %5087 = vperm.xlu0 %6401, %v3777_v4   ;;  %5072 = vperm.xlu1 %6400, %v3774_v7   ;;  %v3804_v4 = vld [vmem:[%s7073_s22 + $0x228] sm:$0xff] }
  0x66   : > { %6074 = vmatmul.mubr.msk.bf16.gmra.mrb[28].mxu0 %vm1443_vm1, %v6437_v14 }
  0x67   : > { %6077 = vmatprep.mubr.msk.bf16.mxu0 %vm6985_vm0, %v10468_v13 }
  0x69   : > { %5097 = vperm.xlu0 %6401, %v3779_v9   ;;  %5082 = vperm.xlu1 %6400, %v3776_v11   ;;  %v6465_v9 = vld [vmem:[%s7219_s13 + $0x158] ss:$12 sps:$4 sm:$0xff]   ;;  %v6452_v11 = vld [vmem:[%s7219_s13 + $0x108] ss:$12 sps:$4 sm:$0xff]  }
  0x6a   : > { %1672 = vmatmul.mubr.bf16.gmra.mrb[12].mxu1 %v6420_v8  ;;  %v3809_v8 = vld [vmem:[%s7073_s22 + $0x250] sm:$0xff] }
  0x6b   : > { %1679 = vmatprep.mubr.bf16.mxu1 %v6422_v10  ;;  %v3806_v10 = vld [vmem:[%s7073_s22 + $0x238] sm:$0xff] }
  0x6d   : > { %5107 = vperm.xlu0 %6401, %v3781_v12   ;;  %5092 = vperm.xlu1 %6400, %v3778_v15   ;;  %v3811_v15 = vld [vmem:[%s7073_s22 + $0x260] sm:$0xff] }
  0x6e   : > { %6078 = vmatmul.mubr.msk.bf16.gmra.mrb[32].mxu0 %vm1443_vm1, %v6441_v21  ;;  %v6469_v21 = vld [vmem:[%s7219_s13 + $0x170] ss:$12 sps:$4 sm:$0xff]  }
  0x6f   : > { %6081 = vmatprep.mubr.msk.bf16.mxu0 %vm6985_vm0, %v10468_v13 }
  0x71   : > { %5117 = vperm.xlu0 %6401, %v3783_v17   ;;  %5102 = vperm.xlu1 %6400, %v3780_v19   ;;  %v3808_v17 = vld [vmem:[%s7073_s22 + $0x248] sm:$0xff] }
  0x72   : > { %1680 = vmatmul.mubr.bf16.gmra.mrb[16].mxu1 %v6424_v16  ;;  %v6454_v16 = vld [vmem:[%s7219_s13 + $0x124] ss:$12 sps:$4 sm:$0xff]  }
  0x73   : > { %1687 = vmatprep.mubr.bf16.mxu1 %v6426_v18 }
  0x75   : > { %5127 = vperm.xlu0 %6401, %v3785_v20   ;;  %5112 = vperm.xlu1 %6400, %v3782_v22   ;;  %v3813_v20 = vld [vmem:[%s7073_s22 + $0x270] sm:$0xff]  ;;  %v3810_v22 = vld [vmem:[%s7073_s22 + $0x258] sm:$0xff] }
  0x76   : > { %6082 = vmatmul.mubr.msk.bf16.gmra.mrb[36].mxu0 %vm1443_vm1, %v6445_v28  ;;  %v3812_v28 = vld [vmem:[%s7073_s22 + $0x268] sm:$0xff] }
  0x77   : > { %6085 = vmatprep.mubr.msk.bf16.mxu0 %vm6985_vm0, %v10468_v13 }
  0x79   : > { %5137 = vperm.xlu0 %6401, %v3787_v24   ;;  %5122 = vperm.xlu1 %6400, %v3784_v26   ;;  %v3815_v26 = vld [vmem:[%s7073_s22 + $0x280] sm:$0xff] }
  0x7a   : > { %1688 = vmatmul.mubr.bf16.gmra.mrb[20].mxu1 %v6428_v23  ;;  %v6456_v23 = vld [vmem:[%s7219_s13 + $0x120] ss:$12 sps:$4 sm:$0xff]  }
  0x7b   : > { %1695 = vmatprep.mubr.bf16.mxu1 %v6430_v25 }
  0x7d   : > { %5147 = vperm.xlu0 %6401, %v3789_v27   ;;  %5132 = vperm.xlu1 %6400, %v3786_v29   ;;  %v6458_v27 = vld [vmem:[%s7219_s13 + $0x13c] ss:$12 sps:$4 sm:$0xff]  }
  0x7e   : > { %6086 = vmatmul.mubr.msk.bf16.gmra.mrb[40].mxu0 %vm1443_vm1, %v6449_v35 }
  0x7f   : > { %6089 = vmatprep.mubr.msk.bf16.mxu0 %vm6985_vm0, %v10468_v13 }
  0x81   : > { %5157 = vperm.xlu0 %6401, %v3791_v31   ;;  %5142 = vperm.xlu1 %6400, %v3788_v33   ;;  %v3817_v31 = vld [vmem:[%s7073_s22 + $0x290] sm:$0xff]  ;;  %v3814_v33 = vld [vmem:[%s7073_s22 + $0x278] sm:$0xff] }
  0x82   : > { %1696 = vmatmul.mubr.bf16.gmra.mrb[24].mxu1 %v6432_v30 }
  0x83   : > { %1703 = vmatprep.mubr.bf16.mxu1 %v6434_v32  ;;  %v6473_v32 = vld [vmem:[%s7219_s13 + $0x188] ss:$12 sps:$4 sm:$0xff]  }
  0x85   : > { %5167 = vperm.xlu0 %6401, %v3793_v34   ;;  %5152 = vperm.xlu1 %6400, %v3790_v36   ;;  %v6460_v36 = vld [vmem:[%s7219_s13 + $0x138] ss:$12 sps:$4 sm:$0xff]  }
  0x86   : > { %6090 = vmatmul.mubr.msk.bf16.gmra.mrb[44].mxu0 %vm1443_vm1, %v6453_v42  ;;  %v3821_v42 = vld [vmem:[%s7073_s22 + $0x2b0] sm:$0xff] }
  0x87   : > { %6093 = vmatprep.mubr.msk.bf16.mxu0 %vm6985_vm0, %v10468_v13 }
  0x89   : > { %5177 = vperm.xlu0 %6401, %v3795_v38   ;;  %5162 = vperm.xlu1 %6400, %v3792_v40   ;;  %v6462_v38 = vld [vmem:[%s7219_s13 + $0x154] ss:$12 sps:$4 sm:$0xff]  }
  0x8a   : > { %1704 = vmatmul.mubr.bf16.gmra.mrb[28].mxu1 %v6436_v37  ;;  %v3819_v37 = vld [vmem:[%s7073_s22 + $0x2a0] sm:$0xff] }
  0x8b   : > { %1711 = vmatprep.mubr.bf16.mxu1 %v6438_v39  ;;  %v3816_v39 = vld [vmem:[%s7073_s22 + $0x288] sm:$0xff] }
  0x8d   : > { %5187 = vperm.xlu0 %6401, %v3797_v41   ;;  %5172 = vperm.xlu1 %6400, %v3794_v43   ;;  %v6477_v43 = vld [vmem:[%s7219_s13 + $0x1a0] ss:$12 sps:$4 sm:$0xff]  }
  0x8e   : > { %6094 = vmatmul.mubr.msk.bf16.gmra.mrb[48].mxu0 %vm1443_vm1, %v6457_v49  ;;  %v6466_v49 = vld [vmem:[%s7219_s13 + $0x16c] ss:$12 sps:$4 sm:$0xff]  }
  0x8f   : > { %6097 = vmatprep.mubr.msk.bf16.mxu0 %vm6985_vm0, %v10468_v13 }
  0x91   : > { %5197 = vperm.xlu0 %6401, %v3799_v45   ;;  %5182 = vperm.xlu1 %6400, %v3796_v47   ;;  %v6464_v47 = vld [vmem:[%s7219_s13 + $0x150] ss:$12 sps:$4 sm:$0xff]  }
  0x92   : > { %1712 = vmatmul.mubr.bf16.gmra.mrb[32].mxu1 %v6440_v44  ;;  %v3818_v44 = vld [vmem:[%s7073_s22 + $0x298] sm:$0xff] }
  0x93   : > { %1719 = vmatprep.mubr.bf16.mxu1 %v6442_v46 }
  0x94   : > { %v7421_v52 = vpop.permute.xlu0 %4882  ;;  %v7423_v53 = vpop.permute.xlu1 %4877 }
  0x95   : > { %10609 = vst [vmem:[#allocation2_spill] sm:$0xff] %v7421_v52  ;;  %5207 = vperm.xlu0 %6401, %v3801_v48   ;;  %5192 = vperm.xlu1 %6400, %v3798_v50   ;;  %v3823_v48 = vld [vmem:[%s7073_s22 + $0x2c0] sm:$0xff]  ;;  %v3820_v50 = vld [vmem:[%s7073_s22 + $0x2a8] sm:$0xff] }
  0x96   : > { %6098 = vmatmul.mubr.msk.bf16.gmra.mrb[52].mxu0 %vm1443_vm1, %v6461_v60 }
  0x97   : > { %6101 = vmatprep.mubr.msk.bf16.mxu0 %vm6985_vm0, %v10468_v13 }
  0x98   : > { %v7431_v57 = vpop.permute.xlu0 %4897  ;;  %v7433_v58 = vpop.permute.xlu1 %4887 }
  0x99   : > { %10610 = vst [vmem:[#allocation3_spill] sm:$0xff] %v7431_v57  ;;  %10611 = vst [vmem:[#allocation4_spill] sm:$0xff] %v7433_v58  ;;  %5217 = vperm.xlu0 %6401, %v3803_v54   ;;  %5202 = vperm.xlu1 %6400, %v3800_v56   ;;  %v6481_v56 = vld [vmem:[%s7219_s13 + $0x1b8] ss:$12 sps:$4 sm:$0xff]   ;;  %v6585_v58 = vld [vmem:[%s7219_s13 + $0x428] ss:$12 sps:$4 sm:$0xff]  }
  0x9a   : > { %1720 = vmatmul.mubr.bf16.gmra.mrb[36].mxu1 %v6444_v51 }
  0x9b   : > { %1727 = vmatprep.mubr.bf16.mxu1 %v6446_v55  ;;  %v3825_v55 = vld [vmem:[%s7073_s22 + $0x2d0] sm:$0xff] }
  0x9c   : > { %v7439_v63 = vpop.permute.xlu0 %4907  ;;  %v7441_v0 = vpop.permute.xlu1 %4892 }
  0x9d   : > { %10612 = vst [vmem:[#allocation5_spill] sm:$0xff] %v7439_v63  ;;  %10613 = vst [vmem:[#allocation6_spill] sm:$0xff] %v7441_v0  ;;  %5227 = vperm.xlu0 %6401, %v3805_v59   ;;  %5212 = vperm.xlu1 %6400, %v3802_v61   ;;  %v3822_v59 = vld [vmem:[%s7073_s22 + $0x2b8] sm:$0xff] }
  0x9e   : > { %6102 = vmatmul.mubr.msk.bf16.gmra.mrb[56].mxu0 %vm1443_vm1, %v6465_v9 }
  0x9f   : > { %6105 = vmatprep.mubr.msk.bf16.mxu0 %vm6985_vm0, %v10468_v13 }
  0xa0   : > { %v7449_v5 = vpop.permute.xlu0 %4917  ;;  %v7451_v7 = vpop.permute.xlu1 %4902 }
  0xa1   : > { %10614 = vst [vmem:[#allocation7_spill] sm:$0xff] %v7449_v5  ;;  %10615 = vst [vmem:[#allocation8_spill] sm:$0xff] %v7451_v7  ;;  %5237 = vperm.xlu0 %6401, %v3807_v1   ;;  %5222 = vperm.xlu1 %6400, %v3804_v4   ;;  %v3827_v1 = vld [vmem:[%s7073_s22 + $0x2e0] sm:$0xff]  ;;  %v3824_v4 = vld [vmem:[%s7073_s22 + $0x2c8] sm:$0xff] }
  0xa2   : > { %1728 = vmatmul.mubr.bf16.gmra.mrb[40].mxu1 %v6448_v62  ;;  %v6468_v62 = vld [vmem:[%s7219_s13 + $0x168] ss:$12 sps:$4 sm:$0xff]  }
  0xa3   : > { %1735 = vmatprep.mubr.bf16.mxu1 %v6450_v2  ;;  %v6470_v2 = vld [vmem:[%s7219_s13 + $0x184] ss:$12 sps:$4 sm:$0xff]  }
  0xa4   : > { %v7457_v12 = vpop.permute.xlu0 %4927  ;;  %v7459_v14 = vpop.permute.xlu1 %4912 }
  0xa5   : > { %10616 = vst [vmem:[#allocation9_spill] sm:$0xff] %v7457_v12  ;;  %10617 = vst [vmem:[#allocation10_spill] sm:$0xff] %v7459_v14  ;;  %5247 = vperm.xlu0 %6401, %v3809_v8   ;;  %5232 = vperm.xlu1 %6400, %v3806_v10   ;;  %v3829_v10 = vld [vmem:[%s7073_s22 + $0x2f0] sm:$0xff]  ;;  %v6578_v12 = vld [vmem:[%s7219_s13 + $0x40c] ss:$12 sps:$4 sm:$0xff]  }
  0xa6   : > { %6106 = vmatmul.mubr.msk.bf16.gmra.mrb[60].mxu0 %vm1443_vm1, %v6469_v21  ;;  %v3831_v21 = vld [vmem:[%s7073_s22 + $0x300] sm:$0xff] }
  0xa7   : > { %6109 = vmatprep.mubr.msk.bf16.mxu0 %vm6985_vm0, %v10468_v13 }
  0xa8   : > { %v7467_v18 = vpop.permute.xlu0 %4937  ;;  %v7469_v19 = vpop.permute.xlu1 %4922 }
  0xa9   : > { %10618 = vst [vmem:[#allocation11_spill] sm:$0xff] %v7467_v18  ;;  %10619 = vst [vmem:[#allocation12_spill] sm:$0xff] %v7469_v19  ;;  %5257 = vperm.xlu0 %6401, %v3811_v15   ;;  %5242 = vperm.xlu1 %6400, %v3808_v17   ;;  %v3826_v15 = vld [vmem:[%s7073_s22 + $0x2d8] sm:$0xff] }
  0xaa   : > { %1736 = vmatmul.mubr.bf16.gmra.mrb[44].mxu1 %v6452_v11  ;;  %v6485_v11 = vld [vmem:[%s7219_s13 + $0x1d0] ss:$12 sps:$4 sm:$0xff]  }
  0xab   : > { %1743 = vmatprep.mubr.bf16.mxu1 %v6454_v16  ;;  %v6570_v18 = vld [vmem:[%s7219_s13 + $0x3dc] ss:$12 sps:$4 sm:$0xff]  }
  0xac   : > { %v7475_v24 = vpop.permute.xlu0 %4947  ;;  %v7477_v25 = vpop.permute.xlu1 %4932 }
  0xad   : > { %10620 = vst [vmem:[#allocation13_spill] sm:$0xff] %v7475_v24  ;;  %10621 = vst [vmem:[#allocation14_spill] sm:$0xff] %v7477_v25  ;;  %5267 = vperm.xlu0 %6401, %v3813_v20   ;;  %5252 = vperm.xlu1 %6400, %v3810_v22   ;;  %v6472_v20 = vld [vmem:[%s7219_s13 + $0x180] ss:$12 sps:$4 sm:$0xff]   ;;  %v6474_v22 = vld [vmem:[%s7219_s13 + $0x19c] ss:$12 sps:$4 sm:$0xff]  }
  0xae   : > { %6110 = vmatmul.mubr.msk.bf16.gmra.mrb[64].mxu0 %vm1443_vm1, %v6473_v32  ;;  %v3830_v32 = vld [vmem:[%s7073_s22 + $0x2f8] sm:$0xff]  ;;  %v6568_v24 = vld [vmem:[%s7219_s13 + $0x3c0] ss:$12 sps:$4 sm:$0xff]  }
  0xaf   : > { %6113 = vmatprep.mubr.msk.bf16.mxu0 %vm6985_vm0, %v10468_v13 }
  0xb0   : > { %v7485_v29 = vpop.permute.xlu0 %4957  ;;  %v7487_v30 = vpop.permute.xlu1 %4942 }
  0xb1   : > { %10622 = vst [vmem:[#allocation15_spill] sm:$0xff] %v7485_v29  ;;  %10623 = vst [vmem:[#allocation16_spill] sm:$0xff] %v7487_v30  ;;  %5277 = vperm.xlu0 %6401, %v3815_v26   ;;  %5262 = vperm.xlu1 %6400, %v3812_v28   ;;  %v3833_v28 = vld [vmem:[%s7073_s22 + $0x310] sm:$0xff] }
  0xb2   : > { %1744 = vmatmul.mubr.bf16.gmra.mrb[48].mxu1 %v6456_v23  ;;  %v3828_v23 = vld [vmem:[%s7073_s22 + $0x2e8] sm:$0xff]  ;;  %v6566_v29 = vld [vmem:[%s7219_s13 + $0x3c4] ss:$12 sps:$4 sm:$0xff]  }
  0xb3   : > { %1751 = vmatprep.mubr.bf16.mxu1 %v6458_v27 }
  0xb4   : > { %v7492_v34 = vpop.permute.xlu0 %4967  ;;  %v7494_v35 = vpop.permute.xlu1 %4952 }
  0xb5   : > { %10624 = vst [vmem:[#allocation17_spill] sm:$0xff] %v7492_v34  ;;  %10625 = vst [vmem:[#allocation18_spill] sm:$0xff] %v7494_v35  ;;  %5287 = vperm.xlu0 %6401, %v3817_v31   ;;  %5272 = vperm.xlu1 %6400, %v3814_v33   ;;  %v6489_v31 = vld [vmem:[%s7219_s13 + $0x1e8] ss:$12 sps:$4 sm:$0xff]   ;;  %v6562_v34 = vld [vmem:[%s7219_s13 + $0x3ac] ss:$12 sps:$4 sm:$0xff]  }
  0xb6   : > { %6114 = vmatmul.mubr.msk.bf16.gmra.mrb[68].mxu0 %vm1443_vm1, %v6477_v43 }
  0xb7   : > { %6117 = vmatprep.mubr.msk.bf16.mxu0 %vm6985_vm0, %v10468_v13 }
  0xb8   : > { %v7503_v40 = vpop.permute.xlu0 %4977  ;;  %v7505_v41 = vpop.permute.xlu1 %4962 }
  0xb9   : > { %10626 = vst [vmem:[#allocation19_spill] sm:$0xff] %v7503_v40  ;;  %10627 = vst [vmem:[#allocation20_spill] sm:$0xff] %v7505_v41  ;;  %5297 = vperm.xlu0 %6401, %v3819_v37   ;;  %5282 = vperm.xlu1 %6400, %v3816_v39   ;;  %v6476_v37 = vld [vmem:[%s7219_s13 + $0x198] ss:$12 sps:$4 sm:$0xff]   ;;  %v6478_v39 = vld [vmem:[%s7219_s13 + $0x1b4] ss:$12 sps:$4 sm:$0xff]  }
  0xba   : > { %1752 = vmatmul.mubr.bf16.gmra.mrb[52].mxu1 %v6460_v36 }
  0xbb   : > { %1759 = vmatprep.mubr.bf16.mxu1 %v6462_v38  ;;  %v3835_v38 = vld [vmem:[%s7073_s22 + $0x320] sm:$0xff] }
  0xbc   : > { %v7510_v45 = vpop.permute.xlu0 %4987  ;;  %v7512_v46 = vpop.permute.xlu1 %4972 }
  0xbd   : > { %10628 = vst [vmem:[#allocation21_spill] sm:$0xff] %v7510_v45  ;;  %10629 = vst [vmem:[#allocation22_spill] sm:$0xff] %v7512_v46  ;;  %5307 = vperm.xlu0 %6401, %v3821_v42   ;;  %5292 = vperm.xlu1 %6400, %v3818_v44   ;;  %v3832_v42 = vld [vmem:[%s7073_s22 + $0x308] sm:$0xff] }
  0xbe   : > { %6118 = vmatmul.mubr.msk.bf16.gmra.mrb[72].mxu0 %vm1443_vm1, %v6481_v56  ;;  %v6480_v56 = vld [vmem:[%s7219_s13 + $0x1b0] ss:$12 sps:$4 sm:$0xff]  }
  0xbf   : > { %6121 = vmatprep.mubr.msk.bf16.mxu0 %vm6985_vm0, %v10468_v13 }
  0xc0   : > { %v7521_v51 = vpop.permute.xlu0 %4997  ;;  %v7523_v54 = vpop.permute.xlu1 %4982 }
  0xc1   : > { %10630 = vst [vmem:[#allocation23_spill] sm:$0xff] %v7521_v51  ;;  %10631 = vst [vmem:[#allocation24_spill] sm:$0xff] %v7523_v54  ;;  %5317 = vperm.xlu0 %6401, %v3823_v48   ;;  %5302 = vperm.xlu1 %6400, %v3820_v50   ;;  %v6493_v48 = vld [vmem:[%s7219_s13 + $0x200] ss:$12 sps:$4 sm:$0xff]  }
  0xc2   : > { %1760 = vmatmul.mubr.bf16.gmra.mrb[56].mxu1 %v6464_v47  ;;  %v3837_v47 = vld [vmem:[%s7073_s22 + $0x330] sm:$0xff] }
  0xc3   : > { %1767 = vmatprep.mubr.bf16.mxu1 %v6466_v49  ;;  %v3834_v49 = vld [vmem:[%s7073_s22 + $0x318] sm:$0xff] }
  0xc4   : > { %v7528_v60 = vpop.permute.xlu0 %5007  ;;  %v7530_v61 = vpop.permute.xlu1 %4992 }
  0xc5   : > { %10632 = vst [vmem:[#allocation25_spill] sm:$0xff] %v7528_v60  ;;  %10633 = vst [vmem:[#allocation26_spill] sm:$0xff] %v7530_v61  ;;  %5327 = vperm.xlu0 %6401, %v3825_v55   ;;  %5312 = vperm.xlu1 %6400, %v3822_v59   ;;  %v3839_v59 = vld [vmem:[%s7073_s22 + $0x340] sm:$0xff]  ;;  %v6546_v60 = vld [vmem:[%s7219_s13 + $0x34c] ss:$12 sps:$4 sm:$0xff]  }
  0xc6   : > { %6122 = vmatmul.mubr.msk.bf16.gmra.mrb[76].mxu0 %vm1443_vm1, %v6485_v11  ;;  %v6497_v11 = vld [vmem:[%s7219_s13 + $0x218] ss:$12 sps:$4 sm:$0xff]  }
  0xc7   : > { %6125 = vmatprep.mubr.msk.bf16.mxu0 %vm6985_vm0, %v10468_v13 }
  0xc8   : > { %v7539_v8 = vpop.permute.xlu0 %5017  ;;  %v7541_v9 = vpop.permute.xlu1 %5002 }
  0xc9   : > { %10634 = vst [vmem:[#allocation27_spill] sm:$0xff] %v7539_v8  ;;  %10635 = vst [vmem:[#allocation28_spill] sm:$0xff] %v7541_v9  ;;  %5337 = vperm.xlu0 %6401, %v3827_v1   ;;  %5322 = vperm.xlu1 %6400, %v3824_v4   ;;  %v3836_v1 = vld [vmem:[%s7073_s22 + $0x328] sm:$0xff]  ;;  %v6558_v9 = vld [vmem:[%s7219_s13 + $0x394] ss:$12 sps:$4 sm:$0xff]  }
  0xca   : > { %1768 = vmatmul.mubr.bf16.gmra.mrb[60].mxu1 %v6468_v62  ;;  %v6482_v62 = vld [vmem:[%s7219_s13 + $0x1cc] ss:$12 sps:$4 sm:$0xff]  }
  0xcb   : > { %1775 = vmatprep.mubr.bf16.mxu1 %v6470_v2 }
  0xcc   : > { %v7546_v16 = vpop.permute.xlu0 %5027  ;;  %v7548_v17 = vpop.permute.xlu1 %5012 }
  0xcd   : > { %10636 = vst [vmem:[#allocation29_spill] sm:$0xff] %v7546_v16  ;;  %10637 = vst [vmem:[#allocation30_spill] sm:$0xff] %v7548_v17  ;;  %5347 = vperm.xlu0 %6401, %v3829_v10   ;;  %5332 = vperm.xlu1 %6400, %v3826_v15   ;;  %v3841_v10 = vld [vmem:[%s7073_s22 + $0x350] sm:$0xff]  ;;  %v3838_v15 = vld [vmem:[%s7073_s22 + $0x338] sm:$0xff] }
  0xce   : > { %6126 = vmatmul.mubr.msk.bf16.gmra.mrb[80].mxu0 %vm1443_vm1, %v6489_v31  ;;  %v3840_v31 = vld [vmem:[%s7073_s22 + $0x348] sm:$0xff]  ;;  %v6556_v17 = vld [vmem:[%s7219_s13 + $0x378] ss:$12 sps:$4 sm:$0xff]  }
  0xcf   : > { %6129 = vmatprep.mubr.msk.bf16.mxu0 %vm6985_vm0, %v10468_v13 }
  0xd0   : > { %v7557_v26 = vpop.permute.xlu0 %5037  ;;  %v7559_v27 = vpop.permute.xlu1 %5022 }
  0xd1   : > { %10638 = vst [vmem:[#allocation31_spill] sm:$0xff] %v7557_v26  ;;  %10639 = vst [vmem:[#allocation32_spill] sm:$0xff] %v7559_v27  ;;  %5357 = vperm.xlu0 %6401, %v3831_v21   ;;  %5342 = vperm.xlu1 %6400, %v3828_v23   ;;  %v3843_v23 = vld [vmem:[%s7073_s22 + $0x360] sm:$0xff]  ;;  %v6554_v27 = vld [vmem:[%s7219_s13 + $0x37c] ss:$12 sps:$4 sm:$0xff]  }
  0xd2   : > { %1776 = vmatmul.mubr.bf16.gmra.mrb[64].mxu1 %v6472_v20  ;;  %v6534_v26 = vld [vmem:[%s7219_s13 + $0x304] ss:$12 sps:$4 sm:$0xff]  }
  0xd3   : > { %1783 = vmatprep.mubr.bf16.mxu1 %v6474_v22  ;;  %v6484_v22 = vld [vmem:[%s7219_s13 + $0x1c8] ss:$12 sps:$4 sm:$0xff]  }
  0xd4   : > { %v7564_v33 = vpop.permute.xlu0 %5047  ;;  %v7566_v36 = vpop.permute.xlu1 %5032 }
  0xd5   : > { %10640 = vst [vmem:[#allocation33_spill] sm:$0xff] %v7564_v33  ;;  %10641 = vst [vmem:[#allocation34_spill] sm:$0xff] %v7566_v36  ;;  %5367 = vperm.xlu0 %6401, %v3833_v28   ;;  %5352 = vperm.xlu1 %6400, %v3830_v32   ;;  %v6486_v28 = vld [vmem:[%s7219_s13 + $0x1e4] ss:$12 sps:$4 sm:$0xff]  }
  0xd6   : > { %6130 = vmatmul.mubr.msk.bf16.gmra.mrb[84].mxu0 %vm1443_vm1, %v6493_v48  ;;  %v6488_v48 = vld [vmem:[%s7219_s13 + $0x1e0] ss:$12 sps:$4 sm:$0xff]  }
  0xd7   : > { %6133 = vmatprep.mubr.msk.bf16.mxu0 %vm6985_vm0, %v10468_v13 }
  0xd8   : > { %v7575_v43 = vpop.permute.xlu0 %5057  ;;  %v7577_v44 = vpop.permute.xlu1 %5042 }
  0xd9   : > { %10642 = vst [vmem:[#allocation35_spill] sm:$0xff] %v7575_v43  ;;  %10643 = vst [vmem:[#allocation36_spill] sm:$0xff] %v7577_v44  ;;  %5377 = vperm.xlu0 %6401, %v3835_v38   ;;  %5362 = vperm.xlu1 %6400, %v3832_v42   ;;  %v3845_v38 = vld [vmem:[%s7073_s22 + $0x370] sm:$0xff]  ;;  %v3842_v42 = vld [vmem:[%s7073_s22 + $0x358] sm:$0xff] }
  0xda   : > { %1784 = vmatmul.mubr.bf16.gmra.mrb[68].mxu1 %v6476_v37 }
  0xdb   : > { %1791 = vmatprep.mubr.bf16.mxu1 %v6478_v39  ;;  %v6501_v39 = vld [vmem:[%s7219_s13 + $0x230] ss:$12 sps:$4 sm:$0xff]  }
  0xdc   : > { %v7582_v50 = vpop.permute.xlu0 %5067  ;;  %v7584_v55 = vpop.permute.xlu1 %5052 }
  0xdd   : > { %10644 = vst [vmem:[#allocation37_spill] sm:$0xff] %v7582_v50  ;;  %10645 = vst [vmem:[#allocation38_spill] sm:$0xff] %v7584_v55  ;;  %5387 = vperm.xlu0 %6401, %v3837_v47   ;;  %5372 = vperm.xlu1 %6400, %v3834_v49   ;;  %v6490_v49 = vld [vmem:[%s7219_s13 + $0x1fc] ss:$12 sps:$4 sm:$0xff]   ;;  %v6542_v55 = vld [vmem:[%s7219_s13 + $0x334] ss:$12 sps:$4 sm:$0xff]  }
  0xde   : > { %6134 = vmatmul.mubr.msk.bf16.gmra.mrb[88].mxu0 %vm1443_vm1, %v6497_v11 }
  0xdf   : > { %6137 = vmatprep.mubr.msk.bf16.mxu0 %vm6985_vm0, %v10468_v13 }
  0xe0   : > { %v7593_v2 = vpop.permute.xlu0 %5077  ;;  %v7595_v4 = vpop.permute.xlu1 %5062 }
  0xe1   : > { %10646 = vst [vmem:[#allocation39_spill] sm:$0xff] %v7593_v2  ;;  %10647 = vst [vmem:[#allocation40_spill] sm:$0xff] %v7595_v4  ;;  %5397 = vperm.xlu0 %6401, %v3839_v59   ;;  %5382 = vperm.xlu1 %6400, %v3836_v1   ;;  %v3844_v59 = vld [vmem:[%s7073_s22 + $0x368] sm:$0xff] }
  0xe2   : > { %1792 = vmatmul.mubr.bf16.gmra.mrb[72].mxu1 %v6480_v56  ;;  %v6505_v1 = vld [vmem:[%s7219_s13 + $0x248] ss:$12 sps:$4 sm:$0xff]  }
  0xe3   : > { %1799 = vmatprep.mubr.bf16.mxu1 %v6482_v62 }
  0xe4   : > { %v7600_v20 = vpop.permute.xlu0 %5087  ;;  %v7602_v21 = vpop.permute.xlu1 %5072 }
  0xe5   : > { %10648 = vst [vmem:[#allocation41_spill] sm:$0xff] %v7600_v20  ;;  %10649 = vst [vmem:[#allocation42_spill] sm:$0xff] %v7602_v21  ;;  %5407 = vperm.xlu0 %6401, %v3841_v10   ;;  %5392 = vperm.xlu1 %6400, %v3838_v15   ;;  %v3846_v10 = vld [vmem:[%s7073_s22 + $0x378] sm:$0xff]  ;;  %v6516_v20 = vld [vmem:[%s7219_s13 + $0x288] ss:$12 sps:$4 sm:$0xff]  }
  0xe6   : > { %6138 = vmatmul.mubr.msk.bf16.gmra.mrb[92].mxu0 %vm1443_vm1, %v6501_v39  ;;  %v6492_v15 = vld [vmem:[%s7219_s13 + $0x1f8] ss:$12 sps:$4 sm:$0xff]   ;;  %v6496_v39 = vld [vmem:[%s7219_s13 + $0x210] ss:$12 sps:$4 sm:$0xff]  }
  0xe7   : > { %6141 = vmatprep.mubr.msk.bf16.mxu0 %vm6985_vm0, %v10468_v13 }
  0xe8   : > { %v7611_v32 = vpop.permute.xlu0 %5097  ;;  %v7613_v37 = vpop.permute.xlu1 %5082 }
  0xe9   : > { %10650 = vst [vmem:[#allocation43_spill] sm:$0xff] %v7611_v32  ;;  %10651 = vst [vmem:[#allocation44_spill] sm:$0xff] %v7613_v37  ;;  %5417 = vperm.xlu0 %6401, %v3843_v23   ;;  %5402 = vperm.xlu1 %6400, %v3840_v31   ;;  %v6514_v32 = vld [vmem:[%s7219_s13 + $0x28c] ss:$12 sps:$4 sm:$0xff]  }
  0xea   : > { %1800 = vmatmul.mubr.bf16.gmra.mrb[76].mxu1 %v6484_v22  ;;  %v6494_v22 = vld [vmem:[%s7219_s13 + $0x214] ss:$12 sps:$4 sm:$0xff]   ;;  %v6530_v37 = vld [vmem:[%s7219_s13 + $0x2ec] ss:$12 sps:$4 sm:$0xff]  }
  0xeb   : > { %1807 = vmatprep.mubr.bf16.mxu1 %v6486_v28  ;;  %v6509_v28 = vld [vmem:[%s7219_s13 + $0x260] ss:$12 sps:$4 sm:$0xff]  }
  0xec   : > { %v7618_v47 = vpop.permute.xlu1 %5092  ;;  %v7623_v56 = vpop.permute.xlu0 %5107 }
  0xed   : > { %10652 = vst [vmem:[#allocation45_spill] sm:$0xff] %v7618_v47  ;;  %5427 = vperm.xlu0 %6401, %v3845_v38   ;;  %5412 = vperm.xlu1 %6400, %v3842_v42   ;;  %10653 = vst [vmem:[#allocation46_spill] sm:$0xff] %v7623_v56  ;;  %v6498_v42 = vld [vmem:[%s7219_s13 + $0x22c] ss:$12 sps:$4 sm:$0xff]   ;;  %v6510_v56 = vld [vmem:[%s7219_s13 + $0x274] ss:$12 sps:$4 sm:$0xff]  }
  0xee   : > { %6142 = vmatmul.mubr.msk.bf16.gmra.mrb[96].mxu0 %vm1443_vm1, %v6505_v1  ;;  %v6502_v1 = vld [vmem:[%s7219_s13 + $0x244] ss:$12 sps:$4 sm:$0xff]  }
  0xef   : > { %6145 = vmatprep.mubr.msk.bf16.mxu0 %vm6985_vm0, %v10468_v13 }
  0xf0   : > { %v7628_v62 = vpop.permute.xlu1 %5102  ;;  %v7633_v11 = vpop.permute.xlu0 %5117 }
  0xf1   : > { %10654 = vst [vmem:[#allocation47_spill] sm:$0xff] %v7628_v62  ;;  %6402 = vset.pattern.permute.xlu0 %v6982_v3  ;;  %5422 = vperm.xlu1 %6400, %v3844_v59   ;;  %10655 = vst [vmem:[#allocation48_spill] sm:$0xff] %v7633_v11  ;;  %v10673_v62 = vmov 0.0  }
  0xf2   : > { %1808 = vmatmul.mubr.bf16.gmra.mrb[80].mxu1 %v6488_v48 }
  0xf3   : > { %1815 = vmatprep.mubr.bf16.mxu1 %v6490_v49  ;;  %v6513_v49 = vld [vmem:[%s7219_s13 + $0x278] ss:$12 sps:$4 sm:$0xff]  }
  0xf4   : > { %v7638_v23 = vpop.permute.xlu1 %5112  ;;  %v7644_v31 = vpop.permute.xlu0 %5127 }
  0xf5   : > { %5432 = vperm.xlu1 %6400, %v3846_v10   ;;  %10656 = vst [vmem:[#allocation49_spill] sm:$0xff] %v7638_v23  ;;  %10657 = vst [vmem:[#allocation50_spill] sm:$0xff] %v7644_v31  ;;  %v6506_v31 = vld [vmem:[%s7219_s13 + $0x25c] ss:$12 sps:$4 sm:$0xff]   ;;  %v6518_v23 = vld [vmem:[%s7219_s13 + $0x2a4] ss:$12 sps:$4 sm:$0xff]  }
  0xf6   : > { %6146 = vmatmul.mubr.msk.bf16.gmra.mrb[100].mxu0 %vm1443_vm1, %v6509_v28 }
  0xf7   : > { %6149 = vmatprep.mubr.msk.bf16.mxu0 %vm6985_vm0, %v10468_v13 }
  0xf8   : > { %v7646_v38 = vpop.permute.xlu1 %5122  ;;  %v7653_v48 = vpop.permute.xlu0 %5137 }
  0xf9   : > { %6403 = vset.pattern.permute.xlu1 %v6982_v3  ;;  %10658 = vst [vmem:[#allocation51_spill] sm:$0xff] %v7646_v38  ;;  %10659 = vst [vmem:[#allocation52_spill] sm:$0xff] %v7653_v48  ;;  %v6500_v3 = vld [vmem:[%s7219_s13 + $0x228] ss:$12 sps:$4 sm:$0xff]  }
  0xfa   : > { %1816 = vmatmul.mubr.bf16.gmra.mrb[84].mxu1 %v6492_v15 }
  0xfb   : > { %1823 = vmatprep.mubr.bf16.mxu1 %v6494_v22 }
  0xfc   : > { %v7656_v59 = vpop.permute.xlu1 %5132  ;;  %v7661_v10 = vpop.permute.xlu0 %5147 }
  0xfd   : > { %10660 = vst [vmem:[#allocation53_spill] sm:$0xff] %v7656_v59  ;;  %10661 = vst [vmem:[#allocation54_spill] sm:$0xff] %v7661_v10  ;;  %v6512_v59 = vld [vmem:[%s7219_s13 + $0x270] ss:$12 sps:$4 sm:$0xff]  }
  0xfe   : > { %6150 = vmatmul.mubr.msk.bf16.gmra.mrb[104].mxu0 %vm1443_vm1, %v6513_v49  ;;  %v6504_v49 = vld [vmem:[%s7219_s13 + $0x240] ss:$12 sps:$4 sm:$0xff]  }
  0xff   : > { %6153 = vmatprep.mubr.msk.bf16.mxu0 %vm6985_vm0, %v10468_v13 }
 0x100   : > { %v7665_v15 = vpop.permute.xlu1 %5142  ;;  %v7668_v48 = vpop.permute.xlu0 %5157 }
 0x101   : > { %10662 = vst [vmem:[#allocation55_spill] sm:$0xff] %v7665_v15  ;;  %v2138_v22 = vpop.f32.mrb[0].mxu0  ;;  %10663 = vst [vmem:[#allocation56_spill] sm:$0xff] %v7668_v48 }
 0x102   : > { %1824 = vmatmul.mubr.bf16.gmra.mrb[88].mxu1 %v6496_v39  ;;  %v6047_v28 = vpop.f32.mrb[1].mxu0  ;;  %v6517_v39 = vld [vmem:[%s7219_s13 + $0x290] ss:$12 sps:$4 sm:$0xff]  }
 0x103   : > { %1831 = vmatprep.mubr.bf16.mxu1 %v6498_v42  ;;  %v2141_v42 = vpop.f32.mrb[2].mxu0  ;;  %v6521_v28 = vld [vmem:[%s7219_s13 + $0x2a8] ss:$12 sps:$4 sm:$0xff]  }
 0x104   : > { %v6048_v6 = vpop.f32.mrb[3].mxu0  ;;  %v7673_v10 = vpop.permute.xlu1 %5152 }
 0x105   : > { %10664 = vst [vmem:[#allocation57_spill] sm:$0xff] %v7673_v10  ;;  %v7678_v6 = vpop.permute.xlu0 %5167 }
 0x106   : > { %6154 = vmatmul.mubr.msk.bf16.gmra.mrb[108].mxu0 %vm1443_vm1, %v6517_v39  ;;  %10665 = vst [vmem:[#allocation58_spill] sm:$0xff] %v7678_v6  ;;  %v6508_v39 = vld [vmem:[%s7219_s13 + $0x258] ss:$12 sps:$4 sm:$0xff]   ;;  %v6525_v6 = vld [vmem:[%s7219_s13 + $0x2c0] ss:$12 sps:$4 sm:$0xff]  }
 0x107   : > { %6157 = vmatprep.mubr.msk.bf16.mxu0 %vm6985_vm0, %v10468_v13 }
 0x108   : > { %v7680_v15 = vpop.permute.xlu1 %5162 }
 0x109   : > { %10666 = vst [vmem:[#allocation59_spill] sm:$0xff] %v7680_v15 }
 0x10a   : > { %1832 = vmatmul.mubr.bf16.gmra.mrb[92].mxu1 %v6500_v3  ;;  %v2146_v3 = vpop.f32.mrb[4].mxu0 }
 0x10b   : > { %1839 = vmatprep.mubr.bf16.mxu1 %v6502_v1  ;;  %v6051_v1 = vpop.f32.mrb[5].mxu0 }
 0x10c   : > { %v2149_v11 = vpop.f32.mrb[6].mxu0 }
 0x10d   : > { %v6052_v48 = vpop.f32.mrb[7].mxu0 }
 0x10e   : > { %6158 = vmatmul.mubr.msk.bf16.gmra.mrb[112].mxu0 %vm1443_vm1, %v6521_v28  ;;  %v7692_v48 = vpop.permute.xlu1 %5172 }
 0x10f   : > { %6161 = vmatprep.mubr.msk.bf16.mxu0 %vm6985_vm0, %v10468_v13  ;;  %10668 = vst [vmem:[#allocation61_spill] sm:$0xff] %v7692_v48 }
 0x112   : > { %1840 = vmatmul.mubr.bf16.gmra.mrb[96].mxu1 %v6504_v49  ;;  %v7687_v49 = vpop.permute.xlu0 %5177 }
 0x113   : > { %1847 = vmatprep.mubr.bf16.mxu1 %v6506_v31  ;;  %10667 = vst [vmem:[#allocation60_spill] sm:$0xff] %v7687_v49  ;;  %v7689_v31 = vpop.f32.mrb[8].mxu0  ;;  %v6529_v49 = vld [vmem:[%s7219_s13 + $0x2d8] ss:$12 sps:$4 sm:$0xff]  }
 0x114   : > { %v6055_v1 = vpop.f32.mrb[9].mxu0 }
 0x115   : > { %v7694_v10 = vpop.f32.mrb[10].mxu0 }
 0x116   : > { %v6056_v15 = vpop.f32.mrb[11].mxu0  ;;  %6162 = vmatmul.mubr.msk.bf16.gmra.mrb[116].mxu0 %vm1443_vm1, %v6525_v6  ;;  %v7699_v28 = vpop.permute.xlu0 %5187 }
 0x117   : > { %10669 = vst [vmem:[#allocation62_spill] sm:$0xff] %v7699_v28  ;;  %6165 = vmatprep.mubr.msk.bf16.mxu0 %vm6985_vm0, %v10468_v13 }
 0x11a   : > { %1848 = vmatmul.mubr.bf16.gmra.mrb[100].mxu1 %v6508_v39  ;;  %v7705_v39 = vpop.f32.mrb[12].mxu0  ;;  %v7710_v38 = vpop.permute.xlu0 %5197 }
 0x11b   : > { %1855 = vmatprep.mubr.bf16.mxu1 %v6510_v56  ;;  %v7703_v56 = vpop.permute.xlu1 %5182  ;;  %v6059_v1 = vpop.f32.mrb[13].mxu0  ;;  %10671 = vst [vmem:[#allocation64_spill] sm:$0xff] %v7710_v38 }
 0x11c   : > { %10670 = vst [vmem:[#allocation63_spill] sm:$0xff] %v7703_v56  ;;  %v7708_v15 = vpop.f32.mrb[14].mxu0 }
 0x11d   : > { %v6060_v56 = vpop.f32.mrb[15].mxu0 }
 0x11e   : > { %6166 = vmatmul.mubr.msk.bf16.gmra.mrb[120].mxu0 %vm1443_vm1, %v6529_v49  ;;  %v6533_v49 = vld [vmem:[%s7219_s13 + $0x2f0] ss:$12 sps:$4 sm:$0xff]  }
 0x11f   : > { %6169 = vmatprep.mubr.msk.bf16.mxu0 %vm6985_vm0, %v10673_v62 }
 0x122   : > { %1856 = vmatmul.mubr.bf16.gmra.mrb[104].mxu1 %v6512_v59  ;;  %v7717_v59 = vpop.permute.xlu1 %5192 }
 0x123   : > { %1863 = vmatprep.mubr.bf16.mxu1 %v6514_v32  ;;  %10672 = vst [vmem:[#allocation65_spill] sm:$0xff] %v7717_v59 }
 0x125   : > { %v1649_v48 = vpop.f32.mrb[0].mxu1 }
 0x126   : > { %v7712_v6 = vadd.f32 %v2138_v22, %v1649_v48  ;;  %v1651_v28 = vpop.f32.mrb[1].mxu1  ;;  %v7725_v22 = vpop.f32.mrb[16].mxu0  ;;  %6170 = vmatmul.mubr.msk.bf16.gmra.mrb[124].mxu0 %vm1443_vm1, %v6533_v49  ;;  %v6537_v49 = vld [vmem:[%s7219_s13 + $0x308] ss:$12 sps:$4 sm:$0xff]  }
 0x127   : > { %v1652_v13 = vpop.f32.mrb[2].mxu1  ;;  %v6063_v48 = vpop.f32.mrb[17].mxu0  ;;  %6173 = vmatprep.mubr.msk.bf16.mxu0 %vm6985_vm0, %v10673_v62 }
 0x128   : > { %v7719_v32 = vadd.f32 %v2141_v42, %v1652_v13  ;;  %v1654_v1 = vpop.f32.mrb[3].mxu1  ;;  %v2594_v2 = vsel %vm2593_vm2, %v7712_v6, 0.0  ;;  %v7728_v28 = vpop.permute.xlu0 %5207 }
 0x129   : > { %2595 = vadd.xlane.f32.xlu0 %v2594_v2  ;;  %10674 = vst [vmem:[#allocation66_spill] sm:$0xff] %v7728_v28  ;;  %v7732_v42 = vpop.f32.mrb[18].mxu0  ;;  %v7734_v1 = vpop.permute.xlu1 %5202 }
 0x12a   : > { %1864 = vmatmul.mubr.bf16.gmra.mrb[108].mxu1 %v6516_v20  ;;  %v2597_v13 = vsel %vm2593_vm2, %v7719_v32, 0.0  ;;  %10675 = vst [vmem:[#allocation67_spill] sm:$0xff] %v7734_v1  ;;  %v6520_v20 = vld [vmem:[%s7219_s13 + $0x2a0] ss:$12 sps:$4 sm:$0xff]   ;;  %v6064_v48 = vpop.f32.mrb[19].mxu0 }
 0x12b   : > { %1871 = vmatprep.mubr.bf16.mxu1 %v6518_v23  ;;  %v6522_v23 = vld [vmem:[%s7219_s13 + $0x2bc] ss:$12 sps:$4 sm:$0xff]   ;;  %v6526_v1 = vld [vmem:[%s7219_s13 + $0x2d4] ss:$12 sps:$4 sm:$0xff]  }
 0x12d   : > { %2598 = vadd.xlane.f32.xlu0 %v2597_v13  ;;  %v1657_v56 = vpop.f32.mrb[4].mxu1  ;;  %v7749_v13 = vpop.f32.mrb[20].mxu0 }
 0x12e   : > { %v7736_v38 = vadd.f32 %v2146_v3, %v1657_v56  ;;  %v1659_v2 = vpop.f32.mrb[5].mxu1  ;;  %v7747_v3 = vpop.permute.xlu0 %5217  ;;  %6174 = vmatmul.mubr.msk.bf16.gmra.mrb[128].mxu0 %vm1443_vm1, %v6537_v49 }
 0x12f   : > { %v1660_v59 = vpop.f32.mrb[6].mxu1  ;;  %10676 = vst [vmem:[#allocation68_spill] sm:$0xff] %v7747_v3  ;;  %v6067_v56 = vpop.f32.mrb[21].mxu0  ;;  %v6524_v3 = vld [vmem:[%s7219_s13 + $0x2b8] ss:$12 sps:$4 sm:$0xff]   ;;  %6177 = vmatprep.mubr.msk.bf16.mxu0 %vm6985_vm0, %v10673_v62 }
 0x130   : > { %v7741_v28 = vadd.f32 %v2149_v11, %v1660_v59  ;;  %v1662_v50 = vpop.f32.mrb[7].mxu1  ;;  %v2600_v47 = vsel %vm2593_vm2, %v7736_v38, 0.0  ;;  %v7752_v11 = vpop.permute.xlu1 %5212 }
 0x131   : > { %2601 = vadd.xlane.f32.xlu1 %v2600_v47  ;;  %10677 = vst [vmem:[#allocation69_spill] sm:$0xff] %v7752_v11  ;;  %v7756_v59 = vpop.f32.mrb[22].mxu0 }
 0x132   : > { %1872 = vmatmul.mubr.bf16.gmra.mrb[112].mxu1 %v6520_v20  ;;  %v2603_v50 = vsel %vm2593_vm2, %v7741_v28, 0.0  ;;  %v7764_v56 = vpop.permute.xlu0 %5227 }
 0x133   : > { %1879 = vmatprep.mubr.bf16.mxu1 %v6522_v23  ;;  %v6068_v23 = vpop.f32.mrb[23].mxu0  ;;  %10678 = vst [vmem:[#allocation70_spill] sm:$0xff] %v7764_v56 }
 0x135   : > { %2604 = vadd.xlane.f32.xlu1 %v2603_v50  ;;  %v1665_v2 = vpop.f32.mrb[8].mxu1 }
 0x136   : > { %v7759_v47 = vadd.f32 %v7689_v31, %v1665_v2  ;;  %v1667_v48 = vpop.f32.mrb[9].mxu1  ;;  %v7773_v31 = vpop.permute.xlu1 %5222 }
 0x137   : > { %v1668_v20 = vpop.f32.mrb[10].mxu1  ;;  %10679 = vst [vmem:[#allocation71_spill] sm:$0xff] %v7773_v31  ;;  %v7777_v2 = vpop.f32.mrb[24].mxu0  ;;  %v6528_v31 = vld [vmem:[%s7219_s13 + $0x2d0] ss:$12 sps:$4 sm:$0xff]  }
 0x138   : > { %v7767_v11 = vadd.f32 %v7694_v10, %v1668_v20  ;;  %v1670_v43 = vpop.f32.mrb[11].mxu1  ;;  %v2606_v50 = vsel %vm2593_vm2, %v7759_v47, 0.0  ;;  %v6541_v10 = vld [vmem:[%s7219_s13 + $0x320] ss:$12 sps:$4 sm:$0xff]   ;;  %v7782_v23 = vpop.permute.xlu0 %5237 }
 0x139   : > { %2607 = vadd.xlane.f32.xlu0 %v2606_v50  ;;  %v6071_v43 = vpop.f32.mrb[25].mxu0  ;;  %10680 = vst [vmem:[#allocation72_spill] sm:$0xff] %v7782_v23  ;;  %6178 = vmatmul.mubr.msk.bf16.gmra.mrb[132].mxu0 %vm1443_vm1, %v6541_v10 }
 0x13a   : > { %1880 = vmatmul.mubr.bf16.gmra.mrb[116].mxu1 %v6524_v3  ;;  %v2609_v49 = vsel %vm2593_vm2, %v7767_v11, 0.0  ;;  %v7780_v48 = vpop.f32.mrb[26].mxu0  ;;  %6181 = vmatprep.mubr.msk.bf16.mxu0 %vm6985_vm0, %v10673_v62 }
 0x13b   : > { %2610 = vadd.xlane.f32.xlu1 %v2609_v49  ;;  %1887 = vmatprep.mubr.bf16.mxu1 %v6526_v1  ;;  %v6072_v33 = vpop.f32.mrb[27].mxu0  ;;  %v7790_v49 = vpop.permute.xlu1 %5232 }
 0x13c   : > { %10681 = vst [vmem:[#allocation73_spill] sm:$0xff] %v7790_v49  ;;  %v7804_v10 = vpop.permute.xlu0 %5247  ;;  %v6532_v49 = vld [vmem:[%s7219_s13 + $0x2e8] ss:$12 sps:$4 sm:$0xff]  }
 0x13d   : > { %v1673_v20 = vpop.f32.mrb[12].mxu1  ;;  %10682 = vst [vmem:[#allocation74_spill] sm:$0xff] %v7804_v10 }
 0x13e   : > { %v7785_v50 = vadd.f32 %v7705_v39, %v1673_v20  ;;  %v1675_v56 = vpop.f32.mrb[13].mxu1  ;;  %v7801_v39 = vpop.f32.mrb[28].mxu0 }
 0x13f   : > { %v1676_v3 = vpop.f32.mrb[14].mxu1  ;;  %v6545_v56 = vld [vmem:[%s7219_s13 + $0x338] ss:$12 sps:$4 sm:$0xff]  }
 0x140   : > { %v7793_v1 = vadd.f32 %v7708_v15, %v1676_v3  ;;  %v1678_v43 = vpop.f32.mrb[15].mxu1  ;;  %v2612_v23 = vsel %vm2593_vm2, %v7785_v50, 0.0  ;;  %v6075_v15 = vpop.f32.mrb[29].mxu0 }
 0x141   : > { %2613 = vadd.xlane.f32.xlu0 %v2612_v23  ;;  %v7806_v20 = vpop.f32.mrb[30].mxu0  ;;  %v7808_v43 = vpop.permute.xlu1 %5242  ;;  %6182 = vmatmul.mubr.msk.bf16.gmra.mrb[136].mxu0 %vm1443_vm1, %v6545_v56 }
 0x142   : > { %1888 = vmatmul.mubr.bf16.gmra.mrb[120].mxu1 %v6528_v31  ;;  %v2615_v33 = vsel %vm2593_vm2, %v7793_v1, 0.0  ;;  %10683 = vst [vmem:[#allocation75_spill] sm:$0xff] %v7808_v43  ;;  %v6076_v4 = vpop.f32.mrb[31].mxu0  ;;  %6185 = vmatprep.mubr.msk.bf16.mxu0 %vm6985_vm0, %v10673_v62  ;;  %v6538_v43 = vld [vmem:[%s7219_s13 + $0x31c] ss:$12 sps:$4 sm:$0xff]  }
 0x143   : > { %2616 = vadd.xlane.f32.xlu1 %v2615_v33  ;;  %1895 = vmatprep.mubr.bf16.mxu1 %v6530_v37  ;;  %v7827_v56 = vpop.f32.mrb[32].mxu0 }
 0x145   : > { %v1681_v3 = vpop.f32.mrb[16].mxu1 }
 0x146   : > { %v7811_v23 = vadd.f32 %v7725_v22, %v1681_v3  ;;  %v1683_v31 = vpop.f32.mrb[17].mxu1  ;;  %v7823_v22 = vpop.permute.xlu0 %5257 }
 0x147   : > { %v1684_v21 = vpop.f32.mrb[18].mxu1  ;;  %10684 = vst [vmem:[#allocation76_spill] sm:$0xff] %v7823_v22  ;;  %v7830_v3 = vpop.permute.xlu1 %5252  ;;  %v6536_v22 = vld [vmem:[%s7219_s13 + $0x300] ss:$12 sps:$4 sm:$0xff]  }
 0x148   : > { %v7817_v37 = vadd.f32 %v7732_v42, %v1684_v21  ;;  %v1686_v33 = vpop.f32.mrb[19].mxu1  ;;  %v2618_v15 = vsel %vm2593_vm2, %v7811_v23, 0.0  ;;  %v6079_v21 = vpop.f32.mrb[33].mxu0  ;;  %v6549_v42 = vld [vmem:[%s7219_s13 + $0x350] ss:$12 sps:$4 sm:$0xff]   ;;  %10685 = vst [vmem:[#allocation77_spill] sm:$0xff] %v7830_v3 }
 0x149   : > { %2619 = vadd.xlane.f32.xlu0 %v2618_v15  ;;  %v7832_v31 = vpop.f32.mrb[34].mxu0  ;;  %6186 = vmatmul.mubr.msk.bf16.gmra.mrb[140].mxu0 %vm1443_vm1, %v6549_v42  ;;  %v6553_v42 = vld [vmem:[%s7219_s13 + $0x368] ss:$12 sps:$4 sm:$0xff]  }
 0x14a   : > { %1896 = vmatmul.mubr.bf16.gmra.mrb[124].mxu1 %v6532_v49  ;;  %v2621_v4 = vsel %vm2593_vm2, %v7817_v37, 0.0  ;;  %v6080_v16 = vpop.f32.mrb[35].mxu0  ;;  %6189 = vmatprep.mubr.msk.bf16.mxu0 %vm6985_vm0, %v10673_v62 }
 0x14b   : > { %2622 = vadd.xlane.f32.xlu1 %v2621_v4  ;;  %1903 = vmatprep.mubr.bf16.mxu1 %v6534_v26  ;;  %v7840_v4 = vpop.permute.xlu0 %5267 }
 0x14c   : > { %10686 = vst [vmem:[#allocation78_spill] sm:$0xff] %v7840_v4 }
 0x14d   : > { %v1689_v33 = vpop.f32.mrb[20].mxu1 }
 0x14e   : > { %v7835_v15 = vadd.f32 %v7749_v13, %v1689_v33  ;;  %v1691_v10 = vpop.f32.mrb[21].mxu1  ;;  %v7849_v13 = vpop.permute.xlu1 %5262 }
 0x14f   : > { %v1692_v49 = vpop.f32.mrb[22].mxu1  ;;  %10687 = vst [vmem:[#allocation79_spill] sm:$0xff] %v7849_v13  ;;  %v7853_v10 = vpop.f32.mrb[36].mxu0  ;;  %v6540_v13 = vld [vmem:[%s7219_s13 + $0x318] ss:$12 sps:$4 sm:$0xff]  }
 0x150   : > { %v7843_v26 = vadd.f32 %v7756_v59, %v1692_v49  ;;  %v1694_v21 = vpop.f32.mrb[23].mxu1  ;;  %v2624_v3 = vsel %vm2593_vm2, %v7835_v15, 0.0  ;;  %v6083_v59 = vpop.f32.mrb[37].mxu0 }
 0x151   : > { %2625 = vadd.xlane.f32.xlu0 %v2624_v3  ;;  %v7856_v33 = vpop.f32.mrb[38].mxu0  ;;  %v7858_v21 = vpop.permute.xlu0 %5277  ;;  %6190 = vmatmul.mubr.msk.bf16.gmra.mrb[144].mxu0 %vm1443_vm1, %v6553_v42 }
 0x152   : > { %1904 = vmatmul.mubr.bf16.gmra.mrb[128].mxu1 %v6536_v22  ;;  %v2627_v16 = vsel %vm2593_vm2, %v7843_v26, 0.0  ;;  %10688 = vst [vmem:[#allocation80_spill] sm:$0xff] %v7858_v21  ;;  %v6084_v8 = vpop.f32.mrb[39].mxu0  ;;  %6193 = vmatprep.mubr.msk.bf16.mxu0 %vm6985_vm0, %v10673_v62 }
 0x153   : > { %2628 = vadd.xlane.f32.xlu1 %v2627_v16  ;;  %1911 = vmatprep.mubr.bf16.mxu1 %v6538_v43  ;;  %v7866_v16 = vpop.permute.xlu1 %5272 }
 0x154   : > { %10689 = vst [vmem:[#allocation81_spill] sm:$0xff] %v7866_v16  ;;  %v6544_v16 = vld [vmem:[%s7219_s13 + $0x330] ss:$12 sps:$4 sm:$0xff]  }
 0x155   : > { %v1697_v49 = vpop.f32.mrb[24].mxu1  ;;  %v7880_v42 = vpop.permute.xlu0 %5287 }
 0x156   : > { %v7861_v3 = vadd.f32 %v7777_v2, %v1697_v49  ;;  %v1699_v4 = vpop.f32.mrb[25].mxu1  ;;  %v7877_v2 = vpop.f32.mrb[40].mxu0  ;;  %10690 = vst [vmem:[#allocation82_spill] sm:$0xff] %v7880_v42 }
 0x157   : > { %v1700_v22 = vpop.f32.mrb[26].mxu1  ;;  %v6557_v4 = vld [vmem:[%s7219_s13 + $0x380] ss:$12 sps:$4 sm:$0xff]  }
 0x158   : > { %v7869_v43 = vadd.f32 %v7780_v48, %v1700_v22  ;;  %v1702_v59 = vpop.f32.mrb[27].mxu1  ;;  %v2630_v21 = vsel %vm2593_vm2, %v7861_v3, 0.0  ;;  %v6087_v48 = vpop.f32.mrb[41].mxu0 }
 0x159   : > { %2631 = vadd.xlane.f32.xlu0 %v2630_v21  ;;  %v7882_v49 = vpop.f32.mrb[42].mxu0  ;;  %v7884_v59 = vpop.permute.xlu1 %5282  ;;  %6194 = vmatmul.mubr.msk.bf16.gmra.mrb[148].mxu0 %vm1443_vm1, %v6557_v4 }
 0x15a   : > { %1912 = vmatmul.mubr.bf16.gmra.mrb[132].mxu1 %v6540_v13  ;;  %v2633_v8 = vsel %vm2593_vm2, %v7869_v43, 0.0  ;;  %10691 = vst [vmem:[#allocation83_spill] sm:$0xff] %v7884_v59  ;;  %v6088_v36 = vpop.f32.mrb[43].mxu0  ;;  %6197 = vmatprep.mubr.msk.bf16.mxu0 %vm6985_vm0, %v10673_v62  ;;  %v6550_v59 = vld [vmem:[%s7219_s13 + $0x364] ss:$12 sps:$4 sm:$0xff]  }
 0x15b   : > { %2634 = vadd.xlane.f32.xlu1 %v2633_v8  ;;  %1919 = vmatprep.mubr.bf16.mxu1 %v6542_v55  ;;  %v7903_v4 = vpop.f32.mrb[44].mxu0 }
 0x15d   : > { %v1705_v22 = vpop.f32.mrb[28].mxu1 }
 0x15e   : > { %v7887_v21 = vadd.f32 %v7801_v39, %v1705_v22  ;;  %v1707_v13 = vpop.f32.mrb[29].mxu1  ;;  %v7899_v39 = vpop.permute.xlu0 %5297 }
 0x15f   : > { %v1708_v44 = vpop.f32.mrb[30].mxu1  ;;  %10692 = vst [vmem:[#allocation84_spill] sm:$0xff] %v7899_v39  ;;  %v7906_v22 = vpop.permute.xlu1 %5292  ;;  %v6548_v39 = vld [vmem:[%s7219_s13 + $0x348] ss:$12 sps:$4 sm:$0xff]  }
 0x160   : > { %v7893_v55 = vadd.f32 %v7806_v20, %v1708_v44  ;;  %v1710_v8 = vpop.f32.mrb[31].mxu1  ;;  %v2636_v48 = vsel %vm2593_vm2, %v7887_v21, 0.0  ;;  %v6091_v44 = vpop.f32.mrb[45].mxu0  ;;  %v6561_v20 = vld [vmem:[%s7219_s13 + $0x398] ss:$12 sps:$4 sm:$0xff]   ;;  %10693 = vst [vmem:[#allocation85_spill] sm:$0xff] %v7906_v22 }
 0x161   : > { %2637 = vadd.xlane.f32.xlu0 %v2636_v48  ;;  %v7908_v13 = vpop.f32.mrb[46].mxu0  ;;  %6198 = vmatmul.mubr.msk.bf16.gmra.mrb[152].mxu0 %vm1443_vm1, %v6561_v20  ;;  %v6565_v20 = vld [vmem:[%s7219_s13 + $0x3b0] ss:$12 sps:$4 sm:$0xff]  }
 0x162   : > { %1920 = vmatmul.mubr.bf16.gmra.mrb[136].mxu1 %v6544_v16  ;;  %v2639_v36 = vsel %vm2593_vm2, %v7893_v55, 0.0  ;;  %v6092_v51 = vpop.f32.mrb[47].mxu0  ;;  %6201 = vmatprep.mubr.msk.bf16.mxu0 %vm6985_vm0, %v10673_v62 }
 0x163   : > { %2640 = vadd.xlane.f32.xlu1 %v2639_v36  ;;  %1927 = vmatprep.mubr.bf16.mxu1 %v6546_v60  ;;  %v7916_v36 = vpop.permute.xlu0 %5307 }
 0x164   : > { %10694 = vst [vmem:[#allocation86_spill] sm:$0xff] %v7916_v36 }
 0x165   : > { %v1713_v8 = vpop.f32.mrb[32].mxu1 }
 0x166   : > { %v7911_v48 = vadd.f32 %v7827_v56, %v1713_v8  ;;  %v1715_v42 = vpop.f32.mrb[33].mxu1  ;;  %v7925_v56 = vpop.permute.xlu1 %5302 }
 0x167   : > { %v1716_v16 = vpop.f32.mrb[34].mxu1  ;;  %10695 = vst [vmem:[#allocation87_spill] sm:$0xff] %v7925_v56  ;;  %v7929_v42 = vpop.f32.mrb[48].mxu0  ;;  %v6552_v56 = vld [vmem:[%s7219_s13 + $0x360] ss:$12 sps:$4 sm:$0xff]  }
 0x168   : > { %v7919_v60 = vadd.f32 %v7832_v31, %v1716_v16  ;;  %v1718_v44 = vpop.f32.mrb[35].mxu1  ;;  %v2642_v22 = vsel %vm2593_vm2, %v7911_v48, 0.0  ;;  %v6095_v31 = vpop.f32.mrb[49].mxu0 }
 0x169   : > { %2643 = vadd.xlane.f32.xlu0 %v2642_v22  ;;  %v7932_v8 = vpop.f32.mrb[50].mxu0  ;;  %v7934_v44 = vpop.permute.xlu0 %5317  ;;  %6202 = vmatmul.mubr.msk.bf16.gmra.mrb[156].mxu0 %vm1443_vm1, %v6565_v20 }
 0x16a   : > { %1928 = vmatmul.mubr.bf16.gmra.mrb[140].mxu1 %v6548_v39  ;;  %v2645_v51 = vsel %vm2593_vm2, %v7919_v60, 0.0  ;;  %10696 = vst [vmem:[#allocation88_spill] sm:$0xff] %v7934_v44  ;;  %v6096_v45 = vpop.f32.mrb[51].mxu0  ;;  %6205 = vmatprep.mubr.msk.bf16.mxu0 %vm6985_vm0, %v10673_v62 }
 0x16b   : > { %2646 = vadd.xlane.f32.xlu1 %v2645_v51  ;;  %1935 = vmatprep.mubr.bf16.mxu1 %v6550_v59  ;;  %v7942_v51 = vpop.permute.xlu1 %5312 }
 0x16c   : > { %10697 = vst [vmem:[#allocation89_spill] sm:$0xff] %v7942_v51 }
 0x16d   : > { %v1721_v16 = vpop.f32.mrb[36].mxu1  ;;  %v7956_v20 = vpop.permute.xlu0 %5327 }
 0x16e   : > { %v7937_v22 = vadd.f32 %v7853_v10, %v1721_v16  ;;  %v1723_v36 = vpop.f32.mrb[37].mxu1  ;;  %v7953_v10 = vpop.f32.mrb[52].mxu0  ;;  %10698 = vst [vmem:[#allocation90_spill] sm:$0xff] %v7956_v20 }
 0x16f   : > { %v1724_v39 = vpop.f32.mrb[38].mxu1  ;;  %v6569_v36 = vld [vmem:[%s7219_s13 + $0x3c8] ss:$12 sps:$4 sm:$0xff]   ;;  %v7960_v51 = vpop.permute.xlu1 %5322 }
 0x170   : > { %v7945_v59 = vadd.f32 %v7856_v33, %v1724_v39  ;;  %v1726_v31 = vpop.f32.mrb[39].mxu1  ;;  %v2648_v44 = vsel %vm2593_vm2, %v7937_v22, 0.0  ;;  %v6099_v33 = vpop.f32.mrb[53].mxu0  ;;  %10699 = vst [vmem:[#allocation91_spill] sm:$0xff] %v7960_v51 }
 0x171   : > { %2649 = vadd.xlane.f32.xlu0 %v2648_v44  ;;  %v7958_v16 = vpop.f32.mrb[54].mxu0  ;;  %6206 = vmatmul.mubr.msk.bf16.gmra.mrb[160].mxu0 %vm1443_vm1, %v6569_v36 }
 0x172   : > { %1936 = vmatmul.mubr.bf16.gmra.mrb[144].mxu1 %v6552_v56  ;;  %v2651_v45 = vsel %vm2593_vm2, %v7945_v59, 0.0  ;;  %v6100_v31 = vpop.f32.mrb[55].mxu0  ;;  %6209 = vmatprep.mubr.msk.bf16.mxu0 %vm6985_vm0, %v10673_v62 }
 0x173   : > { %2652 = vadd.xlane.f32.xlu1 %v2651_v45  ;;  %1943 = vmatprep.mubr.bf16.mxu1 %v6554_v27  ;;  %v7979_v36 = vpop.f32.mrb[56].mxu0  ;;  %v7982_v31 = vpop.permute.xlu1 %5332 }
 0x174   : > { %10701 = vst [vmem:[#allocation93_spill] sm:$0xff] %v7982_v31 }
 0x175   : > { %v1729_v39 = vpop.f32.mrb[40].mxu1 }
 0x176   : > { %v7963_v56 = vadd.f32 %v7877_v2, %v1729_v39  ;;  %v1731_v44 = vpop.f32.mrb[41].mxu1  ;;  %v7975_v2 = vpop.permute.xlu0 %5337 }
 0x177   : > { %v1732_v40 = vpop.f32.mrb[42].mxu1  ;;  %10700 = vst [vmem:[#allocation92_spill] sm:$0xff] %v7975_v2 }
 0x178   : > { %v7969_v27 = vadd.f32 %v7882_v49, %v1732_v40  ;;  %v1734_v45 = vpop.f32.mrb[43].mxu1  ;;  %v2654_v33 = vsel %vm2593_vm2, %v7963_v56, 0.0  ;;  %v6103_v40 = vpop.f32.mrb[57].mxu0  ;;  %v6573_v49 = vld [vmem:[%s7219_s13 + $0x3e0] ss:$12 sps:$4 sm:$0xff]  }
 0x179   : > { %2655 = vadd.xlane.f32.xlu0 %v2654_v33  ;;  %v7984_v44 = vpop.f32.mrb[58].mxu0  ;;  %6210 = vmatmul.mubr.msk.bf16.gmra.mrb[164].mxu0 %vm1443_vm1, %v6573_v49 }
 0x17a   : > { %1944 = vmatmul.mubr.bf16.gmra.mrb[148].mxu1 %v6556_v17  ;;  %v2657_v39 = vsel %vm2593_vm2, %v7969_v27, 0.0  ;;  %v6104_v20 = vpop.f32.mrb[59].mxu0  ;;  %v6560_v17 = vld [vmem:[%s7219_s13 + $0x390] ss:$12 sps:$4 sm:$0xff]   ;;  %6213 = vmatprep.mubr.msk.bf16.mxu0 %vm6985_vm0, %v10673_v62 }
 0x17b   : > { %2658 = vadd.xlane.f32.xlu1 %v2657_v39  ;;  %1951 = vmatprep.mubr.bf16.mxu1 %v6558_v9  ;;  %v7992_v39 = vpop.permute.xlu0 %5347 }
 0x17c   : > { %10702 = vst [vmem:[#allocation94_spill] sm:$0xff] %v7992_v39 }
 0x17d   : > { %v1737_v45 = vpop.f32.mrb[44].mxu1 }
 0x17e   : > { %v7987_v33 = vadd.f32 %v7903_v4, %v1737_v45  ;;  %v1739_v2 = vpop.f32.mrb[45].mxu1  ;;  %v8001_v4 = vpop.permute.xlu1 %5342 }
 0x17f   : > { %v1740_v51 = vpop.f32.mrb[46].mxu1  ;;  %10703 = vst [vmem:[#allocation95_spill] sm:$0xff] %v8001_v4  ;;  %v8005_v2 = vpop.f32.mrb[60].mxu0 }
 0x180   : > { %v7995_v9 = vadd.f32 %v7908_v13, %v1740_v51  ;;  %v1742_v40 = vpop.f32.mrb[47].mxu1  ;;  %v2660_v31 = vsel %vm2593_vm2, %v7987_v33, 0.0  ;;  %v6107_v13 = vpop.f32.mrb[61].mxu0  ;;  %v6577_v51 = vld [vmem:[%s7219_s13 + $0x3f8] ss:$12 sps:$4 sm:$0xff]  }
 0x181   : > { %2661 = vadd.xlane.f32.xlu0 %v2660_v31  ;;  %v8008_v49 = vpop.f32.mrb[62].mxu0  ;;  %v8010_v39 = vpop.permute.xlu0 %5357  ;;  %6214 = vmatmul.mubr.msk.bf16.gmra.mrb[168].mxu0 %vm1443_vm1, %v6577_v51 }
 0x182   : > { %1952 = vmatmul.mubr.bf16.gmra.mrb[152].mxu1 %v6560_v17  ;;  %v2663_v20 = vsel %vm2593_vm2, %v7995_v9, 0.0  ;;  %v6108_v40 = vpop.f32.mrb[63].mxu0  ;;  %10704 = vst [vmem:[#allocation96_spill] sm:$0xff] %v8010_v39  ;;  %v6564_v17 = vld [vmem:[%s7219_s13 + $0x3a8] ss:$12 sps:$4 sm:$0xff]   ;;  %6217 = vmatprep.mubr.msk.bf16.mxu0 %vm6985_vm0, %v10673_v62 }
 0x183   : > { %2664 = vadd.xlane.f32.xlu1 %v2663_v20  ;;  %1959 = vmatprep.mubr.bf16.mxu1 %v6562_v34  ;;  %v8018_v20 = vpop.permute.xlu1 %5352 }
 0x184   : > { %10705 = vst [vmem:[#allocation97_spill] sm:$0xff] %v8018_v20 }
 0x185   : > { %v1745_v45 = vpop.f32.mrb[48].mxu1 }
 0x186   : > { %v8013_v31 = vadd.f32 %v7929_v42, %v1745_v45  ;;  %v1747_v4 = vpop.f32.mrb[49].mxu1  ;;  %v6581_v45 = vld [vmem:[%s7219_s13 + $0x410] ss:$12 sps:$4 sm:$0xff]  }
 0x187   : > { %v1748_v61 = vpop.f32.mrb[50].mxu1  ;;  %v8029_v4 = vpop.f32.mrb[64].mxu0 }
 0x188   : > { %v8021_v34 = vadd.f32 %v7932_v8, %v1748_v61  ;;  %v1750_v13 = vpop.f32.mrb[51].mxu1  ;;  %v2666_v40 = vsel %vm2593_vm2, %v8013_v31, 0.0  ;;  %v6111_v51 = vpop.f32.mrb[65].mxu0 }
 0x189   : > { %2667 = vadd.xlane.f32.xlu0 %v2666_v40  ;;  %v8031_v61 = vpop.permute.xlu0 %5367  ;;  %v8033_v8 = vpop.f32.mrb[66].mxu0  ;;  %6218 = vmatmul.mubr.msk.bf16.gmra.mrb[172].mxu0 %vm1443_vm1, %v6581_v45 }
 0x18a   : > { %v2669_v42 = vsel %vm2593_vm2, %v8021_v34, 0.0  ;;  %1960 = vmatmul.mubr.bf16.gmra.mrb[156].mxu1 %v6564_v17  ;;  %10706 = vst [vmem:[#allocation98_spill] sm:$0xff] %v8031_v61  ;;  %v6112_v39 = vpop.f32.mrb[67].mxu0  ;;  %v8036_v20 = vpop.permute.xlu1 %5362  ;;  %6221 = vmatprep.mubr.msk.bf16.mxu0 %vm6985_vm0, %v10673_v62 }
 0x18b   : > { %2670 = vadd.xlane.f32.xlu1 %v2669_v42  ;;  %1967 = vmatprep.mubr.bf16.mxu1 %v6566_v29  ;;  %10707 = vst [vmem:[#allocation99_spill] sm:$0xff] %v8036_v20  ;;  %v8055_v39 = vpop.f32.mrb[68].mxu0  ;;  %v6574_v20 = vld [vmem:[%s7219_s13 + $0x3f4] ss:$12 sps:$4 sm:$0xff]  }
 0x18d   : > { %v1753_v13 = vpop.f32.mrb[52].mxu1 }
 0x18e   : > { %v8039_v40 = vadd.f32 %v7953_v10, %v1753_v13  ;;  %v1755_v54 = vpop.f32.mrb[53].mxu1  ;;  %v8051_v10 = vpop.permute.xlu0 %5377 }
 0x18f   : > { %v1756_v46 = vpop.f32.mrb[54].mxu1  ;;  %10708 = vst [vmem:[#allocation100_spill] sm:$0xff] %v8051_v10  ;;  %v6572_v10 = vld [vmem:[%s7219_s13 + $0x3d8] ss:$12 sps:$4 sm:$0xff]  }
 0x190   : > { %v8045_v29 = vadd.f32 %v7958_v16, %v1756_v46  ;;  %v1758_v17 = vpop.f32.mrb[55].mxu1  ;;  %v2672_v42 = vsel %vm2593_vm2, %v8039_v40, 0.0  ;;  %v6115_v46 = vpop.f32.mrb[69].mxu0 }
 0x191   : > { %2673 = vadd.xlane.f32.xlu0 %v2672_v42  ;;  %v8057_v16 = vpop.permute.xlu1 %5372  ;;  %v8059_v51 = vpop.f32.mrb[70].mxu0  ;;  %6222 = vmatmul.mubr.msk.bf16.gmra.mrb[176].mxu0 %vm1443_vm1, %v6585_v58 }
 0x192   : > { %v2675_v54 = vsel %vm2593_vm2, %v8045_v29, 0.0  ;;  %1968 = vmatmul.mubr.bf16.gmra.mrb[160].mxu1 %v6568_v24  ;;  %10709 = vst [vmem:[#allocation101_spill] sm:$0xff] %v8057_v16  ;;  %v6116_v13 = vpop.f32.mrb[71].mxu0  ;;  %v8066_v41 = vpop.permute.xlu0 %5387  ;;  %6225 = vmatprep.mubr.msk.bf16.mxu0 %vm6985_vm0, %v10673_v62 }
 0x193   : > { %2676 = vadd.xlane.f32.xlu1 %v2675_v54  ;;  %1975 = vmatprep.mubr.bf16.mxu1 %v6570_v18  ;;  %10710 = vst [vmem:[#allocation102_spill] sm:$0xff] %v8066_v41 }
 0x195   : > { %v1761_v45 = vpop.f32.mrb[56].mxu1  ;;  %v8073_v46 = vpop.permute.xlu1 %5382 }
 0x196   : > { %v8062_v17 = vadd.f32 %v7979_v36, %v1761_v45  ;;  %v1763_v42 = vpop.f32.mrb[57].mxu1  ;;  %10711 = vst [vmem:[#allocation103_spill] sm:$0xff] %v8073_v46  ;;  %v8077_v45 = vpop.f32.mrb[72].mxu0  ;;  %v6576_v46 = vld [vmem:[%s7219_s13 + $0x3f0] ss:$12 sps:$4 sm:$0xff]  }
 0x197   : > { %v1764_v61 = vpop.f32.mrb[58].mxu1  ;;  %v6119_v13 = vpop.f32.mrb[73].mxu0 }
 0x198   : > { %v8069_v24 = vadd.f32 %v7984_v44, %v1764_v61  ;;  %v1766_v54 = vpop.f32.mrb[59].mxu1  ;;  %v2678_v18 = vsel %vm2593_vm2, %v8062_v17, 0.0  ;;  %v8079_v44 = vpop.f32.mrb[74].mxu0 }
 0x199   : > { %2679 = vadd.xlane.f32.xlu0 %v2678_v18  ;;  %v6120_v42 = vpop.f32.mrb[75].mxu0  ;;  %v8081_v54 = vpop.permute.xlu0 %5397 }
 0x19a   : > { %v2681_v36 = vsel %vm2593_vm2, %v8069_v24, 0.0  ;;  %1976 = vmatmul.mubr.bf16.gmra.mrb[164].mxu1 %v6572_v10  ;;  %10712 = vst [vmem:[#allocation104_spill] sm:$0xff] %v8081_v54  ;;  %v8088_v35 = vpop.permute.xlu1 %5392 }
 0x19b   : > { %2682 = vadd.xlane.f32.xlu1 %v2681_v36  ;;  %1983 = vmatprep.mubr.bf16.mxu1 %v6574_v20  ;;  %10713 = vst [vmem:[#allocation105_spill] sm:$0xff] %v8088_v35  ;;  %v6580_v35 = vld [vmem:[%s7219_s13 + $0x408] ss:$12 sps:$4 sm:$0xff]  }
 0x19d   : > { %v1769_v61 = vpop.f32.mrb[60].mxu1 }
 0x19e   : > { %v8084_v18 = vadd.f32 %v8005_v2, %v1769_v61  ;;  %v1771_v41 = vpop.f32.mrb[61].mxu1  ;;  %v8097_v2 = vpop.f32.mrb[76].mxu0 }
 0x19f   : > { %v1772_v16 = vpop.f32.mrb[62].mxu1  ;;  %v6123_v41 = vpop.f32.mrb[77].mxu0 }
 0x1a0   : > { %v8091_v10 = vadd.f32 %v8008_v49, %v1772_v16  ;;  %v1774_v36 = vpop.f32.mrb[63].mxu1  ;;  %v2684_v20 = vsel %vm2593_vm2, %v8084_v18, 0.0  ;;  %v8099_v61 = vpop.permute.xlu0 %5407 }
 0x1a1   : > { %2685 = vadd.xlane.f32.xlu0 %v2684_v20  ;;  %10714 = vst [vmem:[#allocation106_spill] sm:$0xff] %v8099_v61  ;;  %v8101_v42 = vpop.f32.mrb[78].mxu0  ;;  %v8103_v36 = vpop.permute.xlu1 %5402 }
 0x1a2   : > { %v2687_v13 = vsel %vm2593_vm2, %v8091_v10, 0.0  ;;  %1984 = vmatmul.mubr.bf16.gmra.mrb[168].mxu1 %v6576_v46  ;;  %v6124_v16 = vpop.f32.mrb[79].mxu0  ;;  %10715 = vst [vmem:[#allocation107_spill] sm:$0xff] %v8103_v36 }
 0x1a3   : > { %2688 = vadd.xlane.f32.xlu1 %v2687_v13  ;;  %1991 = vmatprep.mubr.bf16.mxu1 %v6578_v12  ;;  %v8116_v41 = vpop.f32.mrb[80].mxu0 }
 0x1a4   : > { %v8118_v16 = vpop.permute.xlu0 %5417 }
 0x1a5   : > { %v1777_v49 = vpop.f32.mrb[64].mxu1  ;;  %10716 = vst [vmem:[#allocation108_spill] sm:$0xff] %v8118_v16 }
 0x1a6   : > { %v8106_v54 = vadd.f32 %v8029_v4, %v1777_v49  ;;  %v1779_v20 = vpop.f32.mrb[65].mxu1  ;;  %v6127_v4 = vpop.f32.mrb[81].mxu0 }
 0x1a7   : > { %v1780_v5 = vpop.f32.mrb[66].mxu1  ;;  %v8120_v49 = vpop.permute.xlu1 %5412 }
 0x1a8   : > { %v8110_v30 = vadd.f32 %v8033_v8, %v1780_v5  ;;  %v1782_v46 = vpop.f32.mrb[67].mxu1  ;;  %v2690_v12 = vsel %vm2593_vm2, %v8106_v54, 0.0  ;;  %10717 = vst [vmem:[#allocation109_spill] sm:$0xff] %v8120_v49  ;;  %v8122_v20 = vpop.f32.mrb[82].mxu0 }
 0x1a9   : > { %2691 = vadd.xlane.f32.xlu0 %v2690_v12  ;;  %v6128_v8 = vpop.f32.mrb[83].mxu0 }
 0x1aa   : > { %v2693_v13 = vsel %vm2593_vm2, %v8110_v30, 0.0  ;;  %1992 = vmatmul.mubr.bf16.gmra.mrb[172].mxu1 %v6580_v35  ;;  %v8136_v16 = vpop.f32.mrb[84].mxu0 }
 0x1ab   : > { %2694 = vadd.xlane.f32.xlu1 %v2693_v13  ;;  %v8132_v13 = vpop.permute.xlu0 %5427  ;;  %v8138_v8 = vpop.permute.xlu1 %5422 }
 0x1ac   : > { %10718 = vst [vmem:[#allocation110_spill] sm:$0xff] %v8132_v13  ;;  %10719 = vst [vmem:[#allocation111_spill] sm:$0xff] %v8138_v8 }
 0x1ad   : > { %v1785_v5 = vpop.f32.mrb[68].mxu1 }
 0x1ae   : > { %v8125_v46 = vadd.f32 %v8055_v39, %v1785_v5  ;;  %v1787_v12 = vpop.f32.mrb[69].mxu1  ;;  %v6131_v39 = vpop.f32.mrb[85].mxu0 }
 0x1af   : > { %v1788_v61 = vpop.f32.mrb[70].mxu1  ;;  %v8140_v5 = vpop.f32.mrb[86].mxu0 }
 0x1b0   : > { %v8128_v36 = vadd.f32 %v8059_v51, %v1788_v61  ;;  %v1790_v14 = vpop.f32.mrb[71].mxu1  ;;  %v2696_v35 = vsel %vm2593_vm2, %v8125_v46, 0.0  ;;  %v6132_v61 = vpop.f32.mrb[87].mxu0 }
 0x1b1   : > { %2697 = vadd.xlane.f32.xlu0 %v2696_v35 }
 0x1b2   : > { %v2699_v4 = vsel %vm2593_vm2, %v8128_v36, 0.0 }
 0x1b3   : > { %2700 = vadd.xlane.f32.xlu1 %v2699_v4  ;;  %v8150_v4 = vpop.permute.xlu1 %5432 }
 0x1b4   : > { %10720 = vst [vmem:[#allocation112_spill] sm:$0xff] %v8150_v4 }
 0x1b5   : > { %v1793_v51 = vpop.f32.mrb[72].mxu1 }
 0x1b6   : > { %v8143_v14 = vadd.f32 %v8077_v45, %v1793_v51  ;;  %v2596_v12 = vpop.xlane.xlu0 %2595  ;;  %v1795_v35 = vpop.f32.mrb[73].mxu1 }
 0x1b7   : > { %v2937_v49 = vmul.f32 0.020408163, %v2596_v12  ;;  %v1796_v13 = vpop.f32.mrb[74].mxu1  ;;  %v8157_v51 = vpop.f32.mrb[88].mxu0 }
 0x1b8   : > { %v8146_v63 = vadd.f32 %v8079_v44, %v1796_v13  ;;  %v1798_v25 = vpop.f32.mrb[75].mxu1  ;;  %v2702_v8 = vsel %vm2593_vm2, %v8143_v14, 0.0  ;;  %v6135_v44 = vpop.f32.mrb[89].mxu0 }
 0x1b9   : > { %v8153_v39 = vsub.f32 %v7712_v6, %v2937_v49  ;;  %2703 = vadd.xlane.f32.xlu0 %v2702_v8  ;;  %v8161_v13 = vpop.f32.mrb[90].mxu0 }
 0x1ba   : > { %v2599_v61 = vpop.xlane.xlu0 %2598  ;;  %v2705_v45 = vsel %vm2593_vm2, %v8146_v63, 0.0  ;;  %v6136_v8 = vpop.f32.mrb[91].mxu0 }
 0x1bb   : > { %v2938_v12 = vmul.f32 0.020408163, %v2599_v61  ;;  %2706 = vadd.xlane.f32.xlu1 %v2705_v45  ;;  %v3165_v25 = vmul.f32 %v8153_v39, %v8153_v39  ;;  %v6582_v8 = vld [vmem:[%s7219_s13 + $0x424] ss:$12 sps:$4 sm:$0xff]  }
 0x1bc   : > { %1999 = vmatprep.mubr.bf16.mxu1 %v6582_v8 }
 0x1bd   : > { %v8164_v35 = vsub.f32 %v7719_v32, %v2938_v12  ;;  %v1801_v6 = vpop.f32.mrb[76].mxu1  ;;  %v3279_v49 = vsel %vm2593_vm2, %v3165_v25, 0.0 }
 0x1be   : > { %v8168_v4 = vadd.f32 %v8097_v2, %v1801_v6  ;;  %v2602_v7 = vpop.xlane.xlu1 %2601  ;;  %3280 = vadd.xlane.f32.xlu0 %v3279_v49  ;;  %v1803_v61 = vpop.f32.mrb[77].mxu1 }
 0x1bf   : > { %v2939_v45 = vmul.f32 0.020408163, %v2602_v7  ;;  %v1804_v57 = vpop.f32.mrb[78].mxu1  ;;  %v3166_v44 = vmul.f32 %v8164_v35, %v8164_v35  ;;  %v8181_v7 = vpop.f32.mrb[92].mxu0 }
 0x1c0   : > { %v8173_v19 = vadd.f32 %v8101_v42, %v1804_v57  ;;  %v1806_v32 = vpop.f32.mrb[79].mxu1  ;;  %v2708_v12 = vsel %vm2593_vm2, %v8168_v4, 0.0  ;;  %v6139_v42 = vpop.f32.mrb[93].mxu0 }
 0x1c1   : > { %v8178_v25 = vsub.f32 %v7736_v38, %v2939_v45  ;;  %v3282_v2 = vsel %vm2593_vm2, %v3166_v44, 0.0  ;;  %v8186_v61 = vpop.f32.mrb[94].mxu0 }
 0x1c2   : > { %v2605_v6 = vpop.xlane.xlu1 %2604  ;;  %3283 = vadd.xlane.f32.xlu1 %v3282_v2  ;;  %2709 = vadd.xlane.f32.xlu0 %v2708_v12  ;;  %v2711_v44 = vsel %vm2593_vm2, %v8173_v19, 0.0  ;;  %v6140_v12 = vpop.f32.mrb[95].mxu0  ;;  %v6584_v2 = vld [vmem:[%s7219_s13 + $0x420] ss:$12 sps:$4 sm:$0xff]  }
 0x1c3   : > { %10721 = vst [vmem:[#allocation113_spill] sm:$0xff] %v8178_v25  ;;  %v2940_v49 = vmul.f32 0.020408163, %v2605_v6  ;;  %v3167_v57 = vmul.f32 %v8178_v25, %v8178_v25  ;;  %2000 = vmatmul.mubr.bf16.gmra.mrb[176].mxu1 %v6584_v2 }
 0x1c5   : > { %v8189_v38 = vsub.f32 %v7741_v28, %v2940_v49  ;;  %v3285_v45 = vsel %vm2593_vm2, %v3167_v57, 0.0  ;;  %v1809_v32 = vpop.f32.mrb[80].mxu1 }
 0x1c6   : > { %v2608_v6 = vpop.xlane.xlu0 %2607  ;;  %3286 = vadd.xlane.f32.xlu0 %v3285_v45  ;;  %2712 = vadd.xlane.f32.xlu1 %v2711_v44  ;;  %v8196_v42 = vadd.f32 %v8116_v41, %v1809_v32  ;;  %v1811_v0 = vpop.f32.mrb[81].mxu1 }
 0x1c7   : > { %v2941_v25 = vmul.f32 0.020408163, %v2608_v6  ;;  %v1812_v28 = vpop.f32.mrb[82].mxu1  ;;  %v3168_v49 = vmul.f32 %v8189_v38, %v8189_v38  ;;  %v8213_v32 = vpop.f32.mrb[96].mxu0 }
 0x1c8   : > { %v2611_v57 = vpop.xlane.xlu1 %2610  ;;  %v8202_v52 = vadd.f32 %v8122_v20, %v1812_v28  ;;  %v1814_v8 = vpop.f32.mrb[83].mxu1  ;;  %v2714_v45 = vsel %vm2593_vm2, %v8196_v42, 0.0 }
 0x1c9   : > { %v8208_v41 = vsub.f32 %v7759_v47, %v2941_v25  ;;  %v2942_v0 = vmul.f32 0.020408163, %v2611_v57  ;;  %v3288_v44 = vsel %vm2593_vm2, %v3168_v49, 0.0  ;;  %v6143_v47 = vpop.f32.mrb[97].mxu0 }
 0x1ca   : > { %3289 = vadd.xlane.f32.xlu1 %v3288_v44  ;;  %2715 = vadd.xlane.f32.xlu0 %v2714_v45  ;;  %v2717_v58 = vsel %vm2593_vm2, %v8202_v52, 0.0  ;;  %v8222_v25 = vpop.f32.mrb[98].mxu0 }
 0x1cb   : > { %10722 = vst [vmem:[#allocation114_spill] sm:$0xff] %v8208_v41  ;;  %v8216_v20 = vsub.f32 %v7767_v11, %v2942_v0  ;;  %v3169_v12 = vmul.f32 %v8208_v41, %v8208_v41  ;;  %v6144_v49 = vpop.f32.mrb[99].mxu0 }
 0x1cd   : > { %10723 = vst [vmem:[#allocation115_spill] sm:$0xff] %v8216_v20  ;;  %v3291_v2 = vsel %vm2593_vm2, %v3169_v12, 0.0  ;;  %v1817_v6 = vpop.f32.mrb[84].mxu1  ;;  %v3170_v28 = vmul.f32 %v8216_v20, %v8216_v20 }
 0x1ce   : > { %v2614_v57 = vpop.xlane.xlu0 %2613  ;;  %3292 = vadd.xlane.f32.xlu0 %v3291_v2  ;;  %2718 = vadd.xlane.f32.xlu1 %v2717_v58  ;;  %v8228_v11 = vadd.f32 %v8136_v16, %v1817_v6  ;;  %v1819_v8 = vpop.f32.mrb[85].mxu1 }
 0x1cf   : > { %v2943_v45 = vmul.f32 0.020408163, %v2614_v57  ;;  %v1820_v0 = vpop.f32.mrb[86].mxu1  ;;  %v3294_v58 = vsel %vm2593_vm2, %v3170_v28, 0.0  ;;  %v8239_v16 = vpop.f32.mrb[100].mxu0 }
 0x1d0   : > { %v2617_v44 = vpop.xlane.xlu1 %2616  ;;  %v8231_v47 = vadd.f32 %v8140_v5, %v1820_v0  ;;  %v1822_v41 = vpop.f32.mrb[87].mxu1  ;;  %v2720_v12 = vsel %vm2593_vm2, %v8228_v11, 0.0 }
 0x1d1   : > { %v8236_v20 = vsub.f32 %v7785_v50, %v2943_v45  ;;  %v2944_v49 = vmul.f32 0.020408163, %v2617_v44  ;;  %v6147_v6 = vpop.f32.mrb[101].mxu0 }
 0x1d2   : > { %3295 = vadd.xlane.f32.xlu1 %v3294_v58  ;;  %2721 = vadd.xlane.f32.xlu0 %v2720_v12  ;;  %v2723_v41 = vsel %vm2593_vm2, %v8231_v47, 0.0  ;;  %v8248_v57 = vpop.f32.mrb[102].mxu0 }
 0x1d3   : > { %10724 = vst [vmem:[#allocation116_spill] sm:$0xff] %v8236_v20  ;;  %v8242_v2 = vsub.f32 %v7793_v1, %v2944_v49  ;;  %v3171_v5 = vmul.f32 %v8236_v20, %v8236_v20  ;;  %v6148_v45 = vpop.f32.mrb[103].mxu0 }
 0x1d5   : > { %10725 = vst [vmem:[#allocation117_spill] sm:$0xff] %v8242_v2  ;;  %v3297_v50 = vsel %vm2593_vm2, %v3171_v5, 0.0  ;;  %v1825_v8 = vpop.f32.mrb[88].mxu1  ;;  %v3172_v28 = vmul.f32 %v8242_v2, %v8242_v2 }
 0x1d6   : > { %v2620_v0 = vpop.xlane.xlu0 %2619  ;;  %3298 = vadd.xlane.f32.xlu0 %v3297_v50  ;;  %2724 = vadd.xlane.f32.xlu1 %v2723_v41  ;;  %v8254_v1 = vadd.f32 %v8157_v51, %v1825_v8  ;;  %v1827_v44 = vpop.f32.mrb[89].mxu1 }
 0x1d7   : > { %v2945_v12 = vmul.f32 0.020408163, %v2620_v0  ;;  %v1828_v49 = vpop.f32.mrb[90].mxu1  ;;  %v3300_v41 = vsel %vm2593_vm2, %v3172_v28, 0.0  ;;  %v8265_v51 = vpop.f32.mrb[104].mxu0 }
 0x1d8   : > { %v2623_v58 = vpop.xlane.xlu1 %2622  ;;  %v8257_v6 = vadd.f32 %v8161_v13, %v1828_v49  ;;  %v1830_v20 = vpop.f32.mrb[91].mxu1  ;;  %v2726_v5 = vsel %vm2593_vm2, %v8254_v1, 0.0 }
 0x1d9   : > { %v8262_v2 = vsub.f32 %v7811_v23, %v2945_v12  ;;  %v2946_v45 = vmul.f32 0.020408163, %v2623_v58  ;;  %v6151_v8 = vpop.f32.mrb[105].mxu0 }
 0x1da   : > { %3301 = vadd.xlane.f32.xlu1 %v3300_v41  ;;  %2727 = vadd.xlane.f32.xlu0 %v2726_v5  ;;  %v2729_v20 = vsel %vm2593_vm2, %v8257_v6, 0.0  ;;  %v8274_v0 = vpop.f32.mrb[106].mxu0 }
 0x1db   : > { %10726 = vst [vmem:[#allocation118_spill] sm:$0xff] %v8262_v2  ;;  %v8268_v50 = vsub.f32 %v7817_v37, %v2946_v45  ;;  %v3173_v13 = vmul.f32 %v8262_v2, %v8262_v2  ;;  %v6152_v12 = vpop.f32.mrb[107].mxu0 }
 0x1dd   : > { %10727 = vst [vmem:[#allocation119_spill] sm:$0xff] %v8268_v50  ;;  %v3303_v23 = vsel %vm2593_vm2, %v3173_v13, 0.0  ;;  %v1833_v44 = vpop.f32.mrb[92].mxu1  ;;  %v3174_v28 = vmul.f32 %v8268_v50, %v8268_v50 }
 0x1de   : > { %v2626_v49 = vpop.xlane.xlu0 %2625  ;;  %3304 = vadd.xlane.f32.xlu0 %v3303_v23  ;;  %2730 = vadd.xlane.f32.xlu1 %v2729_v20  ;;  %v8280_v37 = vadd.f32 %v8181_v7, %v1833_v44  ;;  %v1835_v58 = vpop.f32.mrb[93].mxu1 }
 0x1df   : > { %v2947_v5 = vmul.f32 0.020408163, %v2626_v49  ;;  %v1836_v45 = vpop.f32.mrb[94].mxu1  ;;  %v3306_v20 = vsel %vm2593_vm2, %v3174_v28, 0.0  ;;  %v8291_v7 = vpop.f32.mrb[108].mxu0 }
 0x1e0   : > { %v2629_v41 = vpop.xlane.xlu1 %2628  ;;  %v8283_v8 = vadd.f32 %v8186_v61, %v1836_v45  ;;  %v1838_v2 = vpop.f32.mrb[95].mxu1  ;;  %v2732_v13 = vsel %vm2593_vm2, %v8280_v37, 0.0 }
 0x1e1   : > { %v8288_v50 = vsub.f32 %v7835_v15, %v2947_v5  ;;  %v2948_v12 = vmul.f32 0.020408163, %v2629_v41  ;;  %v6155_v44 = vpop.f32.mrb[109].mxu0 }
 0x1e2   : > { %3307 = vadd.xlane.f32.xlu1 %v3306_v20  ;;  %2733 = vadd.xlane.f32.xlu0 %v2732_v13  ;;  %v2735_v2 = vsel %vm2593_vm2, %v8283_v8, 0.0  ;;  %v8300_v49 = vpop.f32.mrb[110].mxu0 }
 0x1e3   : > { %10728 = vst [vmem:[#allocation120_spill] sm:$0xff] %v8288_v50  ;;  %v8294_v23 = vsub.f32 %v7843_v26, %v2948_v12  ;;  %v3175_v61 = vmul.f32 %v8288_v50, %v8288_v50  ;;  %v6156_v5 = vpop.f32.mrb[111].mxu0 }
 0x1e5   : > { %10729 = vst [vmem:[#allocation121_spill] sm:$0xff] %v8294_v23  ;;  %v3309_v15 = vsel %vm2593_vm2, %v3175_v61, 0.0  ;;  %v1841_v58 = vpop.f32.mrb[96].mxu1  ;;  %v3176_v28 = vmul.f32 %v8294_v23, %v8294_v23 }
 0x1e6   : > { %v2632_v45 = vpop.xlane.xlu0 %2631  ;;  %3310 = vadd.xlane.f32.xlu0 %v3309_v15  ;;  %2736 = vadd.xlane.f32.xlu1 %v2735_v2  ;;  %v8306_v26 = vadd.f32 %v8213_v32, %v1841_v58  ;;  %v1843_v41 = vpop.f32.mrb[97].mxu1 }
 0x1e7   : > { %v2949_v13 = vmul.f32 0.020408163, %v2632_v45  ;;  %v1844_v12 = vpop.f32.mrb[98].mxu1  ;;  %v3312_v2 = vsel %vm2593_vm2, %v3176_v28, 0.0  ;;  %v8317_v32 = vpop.f32.mrb[112].mxu0 }
 0x1e8   : > { %v2635_v20 = vpop.xlane.xlu1 %2634  ;;  %v8309_v44 = vadd.f32 %v8222_v25, %v1844_v12  ;;  %v1846_v50 = vpop.f32.mrb[99].mxu1  ;;  %v2738_v61 = vsel %vm2593_vm2, %v8306_v26, 0.0 }
 0x1e9   : > { %v8314_v23 = vsub.f32 %v7861_v3, %v2949_v13  ;;  %v2950_v5 = vmul.f32 0.020408163, %v2635_v20  ;;  %v6159_v58 = vpop.f32.mrb[113].mxu0 }
 0x1ea   : > { %3313 = vadd.xlane.f32.xlu1 %v3312_v2  ;;  %2739 = vadd.xlane.f32.xlu0 %v2738_v61  ;;  %v2741_v50 = vsel %vm2593_vm2, %v8309_v44, 0.0  ;;  %v8326_v45 = vpop.f32.mrb[114].mxu0 }
 0x1eb   : > { %10730 = vst [vmem:[#allocation122_spill] sm:$0xff] %v8314_v23  ;;  %v8320_v15 = vsub.f32 %v7869_v43, %v2950_v5  ;;  %v3177_v25 = vmul.f32 %v8314_v23, %v8314_v23  ;;  %v6160_v13 = vpop.f32.mrb[115].mxu0 }
 0x1ed   : > { %10731 = vst [vmem:[#allocation123_spill] sm:$0xff] %v8320_v15  ;;  %v3315_v3 = vsel %vm2593_vm2, %v3177_v25, 0.0  ;;  %v1849_v41 = vpop.f32.mrb[100].mxu1  ;;  %v3178_v28 = vmul.f32 %v8320_v15, %v8320_v15 }
 0x1ee   : > { %v2638_v12 = vpop.xlane.xlu0 %2637  ;;  %3316 = vadd.xlane.f32.xlu0 %v3315_v3  ;;  %2742 = vadd.xlane.f32.xlu1 %v2741_v50  ;;  %v8332_v43 = vadd.f32 %v8239_v16, %v1849_v41  ;;  %v1851_v20 = vpop.f32.mrb[101].mxu1 }
 0x1ef   : > { %v2951_v61 = vmul.f32 0.020408163, %v2638_v12  ;;  %v1852_v5 = vpop.f32.mrb[102].mxu1  ;;  %v3318_v50 = vsel %vm2593_vm2, %v3178_v28, 0.0  ;;  %v8343_v16 = vpop.f32.mrb[116].mxu0 }
 0x1f0   : > { %v2641_v2 = vpop.xlane.xlu1 %2640  ;;  %v8335_v58 = vadd.f32 %v8248_v57, %v1852_v5  ;;  %v1854_v23 = vpop.f32.mrb[103].mxu1  ;;  %v2744_v25 = vsel %vm2593_vm2, %v8332_v43, 0.0 }
 0x1f1   : > { %v8340_v15 = vsub.f32 %v7887_v21, %v2951_v61  ;;  %v2952_v13 = vmul.f32 0.020408163, %v2641_v2  ;;  %v6163_v41 = vpop.f32.mrb[117].mxu0 }
 0x1f2   : > { %10732 = vst [vmem:[#allocation124_spill] sm:$0xff] %v8335_v58  ;;  %3319 = vadd.xlane.f32.xlu1 %v3318_v50  ;;  %2745 = vadd.xlane.f32.xlu0 %v2744_v25  ;;  %v2747_v23 = vsel %vm2593_vm2, %v8335_v58, 0.0  ;;  %v8352_v12 = vpop.f32.mrb[118].mxu0 }
 0x1f3   : > { %10733 = vst [vmem:[#allocation125_spill] sm:$0xff] %v8340_v15  ;;  %v8346_v3 = vsub.f32 %v7893_v55, %v2952_v13  ;;  %v3179_v57 = vmul.f32 %v8340_v15, %v8340_v15  ;;  %v6164_v61 = vpop.f32.mrb[119].mxu0 }
 0x1f5   : > { %10734 = vst [vmem:[#allocation126_spill] sm:$0xff] %v8346_v3  ;;  %v3321_v21 = vsel %vm2593_vm2, %v3179_v57, 0.0  ;;  %v1857_v20 = vpop.f32.mrb[104].mxu1  ;;  %v3180_v28 = vmul.f32 %v8346_v3, %v8346_v3 }
 0x1f6   : > { %v2644_v5 = vpop.xlane.xlu0 %2643  ;;  %3322 = vadd.xlane.f32.xlu0 %v3321_v21  ;;  %2748 = vadd.xlane.f32.xlu1 %v2747_v23  ;;  %v8358_v55 = vadd.f32 %v8265_v51, %v1857_v20  ;;  %v1859_v2 = vpop.f32.mrb[105].mxu1 }
 0x1f7   : > { %v2953_v25 = vmul.f32 0.020408163, %v2644_v5  ;;  %v1860_v13 = vpop.f32.mrb[106].mxu1  ;;  %v3324_v23 = vsel %vm2593_vm2, %v3180_v28, 0.0  ;;  %v8369_v51 = vpop.f32.mrb[120].mxu0 }
 0x1f8   : > { %v2647_v50 = vpop.xlane.xlu1 %2646  ;;  %v8361_v41 = vadd.f32 %v8274_v0, %v1860_v13  ;;  %v1862_v15 = vpop.f32.mrb[107].mxu1  ;;  %v2750_v57 = vsel %vm2593_vm2, %v8358_v55, 0.0 }
 0x1f9   : > { %v8366_v61 = vsub.f32 %v7911_v48, %v2953_v25  ;;  %v2954_v21 = vmul.f32 0.020408163, %v2647_v50  ;;  %v6167_v48 = vpop.f32.mrb[121].mxu0  ;;  %v6586_v50 = vld [vmem:[%s7219_s13 + $0x43c] ss:$12 sps:$4 sm:$0xff]  }
 0x1fa   : > { %10735 = vst [vmem:[#allocation127_spill] sm:$0xff] %v8361_v41  ;;  %3325 = vadd.xlane.f32.xlu1 %v3324_v23  ;;  %2751 = vadd.xlane.f32.xlu0 %v2750_v57  ;;  %v2753_v15 = vsel %vm2593_vm2, %v8361_v41, 0.0  ;;  %v8378_v5 = vpop.f32.mrb[122].mxu0  ;;  %v6588_v23 = vld [vmem:[%s7219_s13 + $0x438] ss:$12 sps:$4 sm:$0xff]  }
 0x1fb   : > { %10736 = vst [vmem:[#allocation128_spill] sm:$0xff] %v8366_v61  ;;  %v8372_v20 = vsub.f32 %v7919_v60, %v2954_v21  ;;  %v3181_v0 = vmul.f32 %v8366_v61, %v8366_v61  ;;  %v6168_v13 = vpop.f32.mrb[123].mxu0  ;;  %v6589_v61 = vld [vmem:[%s7219_s13 + $0x440] ss:$12 sps:$4 sm:$0xff]   ;;  %2007 = vmatprep.mubr.bf16.mxu1 %v6586_v50 }
 0x1fc   : > { %2008 = vmatmul.mubr.bf16.gmra.mrb[180].mxu1 %v6588_v23  ;;  %6226 = vmatmul.mubr.msk.bf16.gmra.mrb[180].mxu0 %vm1443_vm1, %v6589_v61 }
 0x1fd   : > { %10737 = vst [vmem:[#allocation129_spill] sm:$0xff] %v8372_v20  ;;  %v3327_v28 = vsel %vm2593_vm2, %v3181_v0, 0.0  ;;  %v1865_v2 = vpop.f32.mrb[108].mxu1  ;;  %v3182_v25 = vmul.f32 %v8372_v20, %v8372_v20  ;;  %6229 = vmatprep.mubr.msk.bf16.mxu0 %vm6985_vm0, %v10673_v62 }
 0x1fe   : > { %v2650_v60 = vpop.xlane.xlu0 %2649  ;;  %3328 = vadd.xlane.f32.xlu0 %v3327_v28  ;;  %2754 = vadd.xlane.f32.xlu1 %v2753_v15  ;;  %v8385_v57 = vadd.f32 %v8291_v7, %v1865_v2  ;;  %v1867_v21 = vpop.f32.mrb[109].mxu1 }
 0x1ff   : > { %v2955_v48 = vmul.f32 0.020408163, %v2650_v60  ;;  %v1868_v3 = vpop.f32.mrb[110].mxu1  ;;  %v3330_v28 = vsel %vm2593_vm2, %v3182_v25, 0.0 }
 0x200   : > { %v2653_v41 = vpop.xlane.xlu1 %2652  ;;  %v8390_v0 = vadd.f32 %v8300_v49, %v1868_v3  ;;  %v1870_v58 = vpop.f32.mrb[111].mxu1  ;;  %v2756_v13 = vsel %vm2593_vm2, %v8385_v57, 0.0 }
 0x201   : > { %v8396_v7 = vsub.f32 %v7937_v22, %v2955_v48  ;;  %v2956_v15 = vmul.f32 0.020408163, %v2653_v41  ;;  %v8401_v49 = vpop.f32.mrb[124].mxu0 }
 0x202   : > { %10738 = vst [vmem:[#allocation130_spill] sm:$0xff] %v8390_v0  ;;  %3331 = vadd.xlane.f32.xlu1 %v3330_v28  ;;  %2757 = vadd.xlane.f32.xlu0 %v2756_v13  ;;  %v2759_v22 = vsel %vm2593_vm2, %v8390_v0, 0.0  ;;  %v6171_v61 = vpop.f32.mrb[125].mxu0 }
 0x203   : > { %10739 = vst [vmem:[#allocation131_spill] sm:$0xff] %v8396_v7  ;;  %v8404_v58 = vsub.f32 %v7945_v59, %v2956_v15  ;;  %v3183_v3 = vmul.f32 %v8396_v7, %v8396_v7  ;;  %v8410_v41 = vpop.f32.mrb[126].mxu0 }
 0x204   : > { %v6172_v60 = vpop.f32.mrb[127].mxu0 }
 0x205   : > { %10740 = vst [vmem:[#allocation132_spill] sm:$0xff] %v8404_v58  ;;  %v3333_v2 = vsel %vm2593_vm2, %v3183_v3, 0.0  ;;  %v1873_v25 = vpop.f32.mrb[112].mxu1  ;;  %v3184_v50 = vmul.f32 %v8404_v58, %v8404_v58 }
 0x206   : > { %v2656_v21 = vpop.xlane.xlu0 %2655  ;;  %3334 = vadd.xlane.f32.xlu0 %v3333_v2  ;;  %2760 = vadd.xlane.f32.xlu1 %v2759_v22  ;;  %v8416_v59 = vadd.f32 %v8317_v32, %v1873_v25  ;;  %v1875_v23 = vpop.f32.mrb[113].mxu1 }
 0x207   : > { %v2957_v48 = vmul.f32 0.020408163, %v2656_v21  ;;  %v1876_v13 = vpop.f32.mrb[114].mxu1  ;;  %v3336_v22 = vsel %vm2593_vm2, %v3184_v50, 0.0  ;;  %v8427_v32 = vpop.f32.mrb[128].mxu0 }
 0x208   : > { %v2659_v15 = vpop.xlane.xlu1 %2658  ;;  %v8419_v28 = vadd.f32 %v8326_v45, %v1876_v13  ;;  %v1878_v61 = vpop.f32.mrb[115].mxu1  ;;  %v2762_v3 = vsel %vm2593_vm2, %v8416_v59, 0.0 }
 0x209   : > { %v8424_v7 = vsub.f32 %v7963_v56, %v2957_v48  ;;  %v2958_v60 = vmul.f32 0.020408163, %v2659_v15  ;;  %v6175_v21 = vpop.f32.mrb[129].mxu0 }
 0x20a   : > { %10741 = vst [vmem:[#allocation133_spill] sm:$0xff] %v8419_v28  ;;  %3337 = vadd.xlane.f32.xlu1 %v3336_v22  ;;  %2763 = vadd.xlane.f32.xlu0 %v2762_v3  ;;  %v2765_v25 = vsel %vm2593_vm2, %v8419_v28, 0.0  ;;  %v8436_v23 = vpop.f32.mrb[130].mxu0 }
 0x20b   : > { %10742 = vst [vmem:[#allocation134_spill] sm:$0xff] %v8424_v7  ;;  %v8430_v2 = vsub.f32 %v7969_v27, %v2958_v60  ;;  %v3185_v45 = vmul.f32 %v8424_v7, %v8424_v7  ;;  %v6176_v13 = vpop.f32.mrb[131].mxu0 }
 0x20d   : > { %10743 = vst [vmem:[#allocation135_spill] sm:$0xff] %v8430_v2  ;;  %v3339_v56 = vsel %vm2593_vm2, %v3185_v45, 0.0  ;;  %v1881_v48 = vpop.f32.mrb[116].mxu1  ;;  %v3186_v50 = vmul.f32 %v8430_v2, %v8430_v2 }
 0x20e   : > { %v2662_v15 = vpop.xlane.xlu0 %2661  ;;  %3340 = vadd.xlane.f32.xlu0 %v3339_v56  ;;  %2766 = vadd.xlane.f32.xlu1 %v2765_v25  ;;  %v8442_v27 = vadd.f32 %v8343_v16, %v1881_v48  ;;  %v1883_v61 = vpop.f32.mrb[117].mxu1 }
 0x20f   : > { %v2959_v3 = vmul.f32 0.020408163, %v2662_v15  ;;  %v1884_v60 = vpop.f32.mrb[118].mxu1  ;;  %v3342_v25 = vsel %vm2593_vm2, %v3186_v50, 0.0  ;;  %v8453_v16 = vpop.f32.mrb[132].mxu0 }
 0x210   : > { %10744 = vst [vmem:[#allocation136_spill] sm:$0xff] %v8442_v27  ;;  %v2665_v22 = vpop.xlane.xlu1 %2664  ;;  %v8445_v21 = vadd.f32 %v8352_v12, %v1884_v60  ;;  %v1886_v7 = vpop.f32.mrb[119].mxu1  ;;  %v2768_v45 = vsel %vm2593_vm2, %v8442_v27, 0.0 }
 0x211   : > { %v8450_v2 = vsub.f32 %v7987_v33, %v2959_v3  ;;  %v2960_v13 = vmul.f32 0.020408163, %v2665_v22  ;;  %v6179_v48 = vpop.f32.mrb[133].mxu0 }
 0x212   : > { %10745 = vst [vmem:[#allocation137_spill] sm:$0xff] %v8445_v21  ;;  %3343 = vadd.xlane.f32.xlu1 %v3342_v25  ;;  %2769 = vadd.xlane.f32.xlu0 %v2768_v45  ;;  %v2771_v7 = vsel %vm2593_vm2, %v8445_v21, 0.0  ;;  %v8462_v15 = vpop.f32.mrb[134].mxu0  ;;  %v6594_v21 = vld [vmem:[%s7219_s13 + $0x46c] ss:$12 sps:$4 sm:$0xff]  }
 0x213   : > { %10746 = vst [vmem:[#allocation138_spill] sm:$0xff] %v8450_v2  ;;  %v8456_v56 = vsub.f32 %v7995_v9, %v2960_v13  ;;  %v3187_v12 = vmul.f32 %v8450_v2, %v8450_v2  ;;  %v6180_v3 = vpop.f32.mrb[135].mxu0 }
 0x215   : > { %10747 = vst [vmem:[#allocation139_spill] sm:$0xff] %v8456_v56  ;;  %v3345_v33 = vsel %vm2593_vm2, %v3187_v12, 0.0  ;;  %v1889_v61 = vpop.f32.mrb[120].mxu1  ;;  %v3188_v50 = vmul.f32 %v8456_v56, %v8456_v56 }
 0x216   : > { %v2668_v60 = vpop.xlane.xlu0 %2667  ;;  %3346 = vadd.xlane.f32.xlu0 %v3345_v33  ;;  %2772 = vadd.xlane.f32.xlu1 %v2771_v7  ;;  %v8468_v9 = vadd.f32 %v8369_v51, %v1889_v61  ;;  %v1891_v22 = vpop.f32.mrb[121].mxu1 }
 0x217   : > { %v2961_v45 = vmul.f32 0.020408163, %v2668_v60  ;;  %v1892_v13 = vpop.f32.mrb[122].mxu1  ;;  %v3348_v7 = vsel %vm2593_vm2, %v3188_v50, 0.0  ;;  %v8479_v51 = vpop.f32.mrb[136].mxu0 }
 0x218   : > { %10748 = vst [vmem:[#allocation140_spill] sm:$0xff] %v8468_v9  ;;  %v2671_v25 = vpop.xlane.xlu1 %2670  ;;  %v8471_v48 = vadd.f32 %v8378_v5, %v1892_v13  ;;  %v1894_v2 = vpop.f32.mrb[123].mxu1  ;;  %v2774_v12 = vsel %vm2593_vm2, %v8468_v9, 0.0 }
 0x219   : > { %v8476_v56 = vsub.f32 %v8013_v31, %v2961_v45  ;;  %v2962_v3 = vmul.f32 0.020408163, %v2671_v25  ;;  %v6183_v61 = vpop.f32.mrb[137].mxu0 }
 0x21a   : > { %10749 = vst [vmem:[#allocation141_spill] sm:$0xff] %v8471_v48  ;;  %3349 = vadd.xlane.f32.xlu1 %v3348_v7  ;;  %2775 = vadd.xlane.f32.xlu0 %v2774_v12  ;;  %v2777_v2 = vsel %vm2593_vm2, %v8471_v48, 0.0  ;;  %v8488_v60 = vpop.f32.mrb[138].mxu0 }
 0x21b   : > { %10750 = vst [vmem:[#allocation142_spill] sm:$0xff] %v8476_v56  ;;  %v8482_v33 = vsub.f32 %v8021_v34, %v2962_v3  ;;  %v3189_v5 = vmul.f32 %v8476_v56, %v8476_v56  ;;  %v6184_v45 = vpop.f32.mrb[139].mxu0 }
 0x21d   : > { %10751 = vst [vmem:[#allocation143_spill] sm:$0xff] %v8482_v33  ;;  %v3351_v31 = vsel %vm2593_vm2, %v3189_v5, 0.0  ;;  %v1897_v22 = vpop.f32.mrb[124].mxu1  ;;  %v3190_v50 = vmul.f32 %v8482_v33, %v8482_v33 }
 0x21e   : > { %v2674_v13 = vpop.xlane.xlu0 %2673  ;;  %3352 = vadd.xlane.f32.xlu0 %v3351_v31  ;;  %2778 = vadd.xlane.f32.xlu1 %v2777_v2  ;;  %v8494_v34 = vadd.f32 %v8401_v49, %v1897_v22  ;;  %v1899_v25 = vpop.f32.mrb[125].mxu1 }
 0x21f   : > { %v2963_v12 = vmul.f32 0.020408163, %v2674_v13  ;;  %v1900_v3 = vpop.f32.mrb[126].mxu1  ;;  %v3354_v2 = vsel %vm2593_vm2, %v3190_v50, 0.0  ;;  %v8505_v49 = vpop.f32.mrb[140].mxu0 }
 0x220   : > { %10752 = vst [vmem:[#allocation144_spill] sm:$0xff] %v8494_v34  ;;  %v2677_v7 = vpop.xlane.xlu1 %2676  ;;  %v8497_v61 = vadd.f32 %v8410_v41, %v1900_v3  ;;  %v1902_v56 = vpop.f32.mrb[127].mxu1  ;;  %v2780_v5 = vsel %vm2593_vm2, %v8494_v34, 0.0 }
 0x221   : > { %v8502_v33 = vsub.f32 %v8039_v40, %v2963_v12  ;;  %v2964_v45 = vmul.f32 0.020408163, %v2677_v7  ;;  %v6187_v22 = vpop.f32.mrb[141].mxu0 }
 0x222   : > { %10753 = vst [vmem:[#allocation145_spill] sm:$0xff] %v8497_v61  ;;  %3355 = vadd.xlane.f32.xlu1 %v3354_v2  ;;  %2781 = vadd.xlane.f32.xlu0 %v2780_v5  ;;  %v2783_v56 = vsel %vm2593_vm2, %v8497_v61, 0.0  ;;  %v8514_v13 = vpop.f32.mrb[142].mxu0 }
 0x223   : > { %10754 = vst [vmem:[#allocation146_spill] sm:$0xff] %v8502_v33  ;;  %v8508_v31 = vsub.f32 %v8045_v29, %v2964_v45  ;;  %v3191_v41 = vmul.f32 %v8502_v33, %v8502_v33  ;;  %v6188_v12 = vpop.f32.mrb[143].mxu0 }
 0x225   : > { %10755 = vst [vmem:[#allocation147_spill] sm:$0xff] %v8508_v31  ;;  %v3357_v40 = vsel %vm2593_vm2, %v3191_v41, 0.0  ;;  %v1905_v25 = vpop.f32.mrb[128].mxu1  ;;  %v3192_v50 = vmul.f32 %v8508_v31, %v8508_v31 }
 0x226   : > { %v2680_v3 = vpop.xlane.xlu0 %2679  ;;  %3358 = vadd.xlane.f32.xlu0 %v3357_v40  ;;  %2784 = vadd.xlane.f32.xlu1 %v2783_v56  ;;  %v8520_v29 = vadd.f32 %v8427_v32, %v1905_v25  ;;  %v1907_v7 = vpop.f32.mrb[129].mxu1 }
 0x227   : > { %v2965_v5 = vmul.f32 0.020408163, %v2680_v3  ;;  %v1908_v45 = vpop.f32.mrb[130].mxu1  ;;  %v3360_v56 = vsel %vm2593_vm2, %v3192_v50, 0.0  ;;  %v8531_v32 = vpop.f32.mrb[144].mxu0 }
 0x228   : > { %10756 = vst [vmem:[#allocation148_spill] sm:$0xff] %v8520_v29  ;;  %v2683_v2 = vpop.xlane.xlu1 %2682  ;;  %v8523_v22 = vadd.f32 %v8436_v23, %v1908_v45  ;;  %v1910_v33 = vpop.f32.mrb[131].mxu1  ;;  %v2786_v41 = vsel %vm2593_vm2, %v8520_v29, 0.0  ;;  %v6596_v29 = vld [vmem:[%s7219_s13 + $0x468] ss:$12 sps:$4 sm:$0xff]  }
 0x229   : > { %v8528_v31 = vsub.f32 %v8062_v17, %v2965_v5  ;;  %v2966_v12 = vmul.f32 0.020408163, %v2683_v2  ;;  %v6191_v25 = vpop.f32.mrb[145].mxu0 }
 0x22a   : > { %10757 = vst [vmem:[#allocation149_spill] sm:$0xff] %v8523_v22  ;;  %3361 = vadd.xlane.f32.xlu1 %v3360_v56  ;;  %2787 = vadd.xlane.f32.xlu0 %v2786_v41  ;;  %v2789_v33 = vsel %vm2593_vm2, %v8523_v22, 0.0  ;;  %v8540_v3 = vpop.f32.mrb[146].mxu0 }
 0x22b   : > { %10758 = vst [vmem:[#allocation150_spill] sm:$0xff] %v8528_v31  ;;  %v8534_v40 = vsub.f32 %v8069_v24, %v2966_v12  ;;  %v3193_v23 = vmul.f32 %v8528_v31, %v8528_v31  ;;  %v6192_v5 = vpop.f32.mrb[147].mxu0 }
 0x22d   : > { %10759 = vst [vmem:[#allocation151_spill] sm:$0xff] %v8534_v40  ;;  %v3363_v17 = vsel %vm2593_vm2, %v3193_v23, 0.0  ;;  %v1913_v7 = vpop.f32.mrb[132].mxu1  ;;  %v3194_v50 = vmul.f32 %v8534_v40, %v8534_v40 }
 0x22e   : > { %v2686_v45 = vpop.xlane.xlu0 %2685  ;;  %3364 = vadd.xlane.f32.xlu0 %v3363_v17  ;;  %2790 = vadd.xlane.f32.xlu1 %v2789_v33  ;;  %v8546_v24 = vadd.f32 %v8453_v16, %v1913_v7  ;;  %v1915_v2 = vpop.f32.mrb[133].mxu1 }
 0x22f   : > { %v2967_v41 = vmul.f32 0.020408163, %v2686_v45  ;;  %v1916_v12 = vpop.f32.mrb[134].mxu1  ;;  %v3366_v33 = vsel %vm2593_vm2, %v3194_v50, 0.0  ;;  %v8557_v16 = vpop.f32.mrb[148].mxu0 }
 0x230   : > { %10760 = vst [vmem:[#allocation152_spill] sm:$0xff] %v8546_v24  ;;  %v2689_v56 = vpop.xlane.xlu1 %2688  ;;  %v8549_v25 = vadd.f32 %v8462_v15, %v1916_v12  ;;  %v1918_v31 = vpop.f32.mrb[135].mxu1  ;;  %v2792_v23 = vsel %vm2593_vm2, %v8546_v24, 0.0 }
 0x231   : > { %v8554_v40 = vsub.f32 %v8084_v18, %v2967_v41  ;;  %v2968_v5 = vmul.f32 0.020408163, %v2689_v56  ;;  %v6195_v18 = vpop.f32.mrb[149].mxu0 }
 0x232   : > { %10761 = vst [vmem:[#allocation153_spill] sm:$0xff] %v8549_v25  ;;  %3367 = vadd.xlane.f32.xlu1 %v3366_v33  ;;  %2793 = vadd.xlane.f32.xlu0 %v2792_v23  ;;  %v2795_v31 = vsel %vm2593_vm2, %v8549_v25, 0.0  ;;  %v8566_v7 = vpop.f32.mrb[150].mxu0  ;;  %v6590_v23 = vld [vmem:[%s7219_s13 + $0x454] ss:$12 sps:$4 sm:$0xff]  }
 0x233   : > { %10762 = vst [vmem:[#allocation154_spill] sm:$0xff] %v8554_v40  ;;  %v8560_v17 = vsub.f32 %v8091_v10, %v2968_v5  ;;  %v3195_v15 = vmul.f32 %v8554_v40, %v8554_v40  ;;  %v6196_v41 = vpop.f32.mrb[151].mxu0  ;;  %v6592_v18 = vld [vmem:[%s7219_s13 + $0x450] ss:$12 sps:$4 sm:$0xff]   ;;  %2015 = vmatprep.mubr.bf16.mxu1 %v6590_v23 }
 0x234   : > { %v6593_v41 = vld [vmem:[%s7219_s13 + $0x458] ss:$12 sps:$4 sm:$0xff]   ;;  %2016 = vmatmul.mubr.bf16.gmra.mrb[184].mxu1 %v6592_v18 }
 0x235   : > { %10763 = vst [vmem:[#allocation155_spill] sm:$0xff] %v8560_v17  ;;  %v3369_v50 = vsel %vm2593_vm2, %v3195_v15, 0.0  ;;  %v1921_v45 = vpop.f32.mrb[136].mxu1  ;;  %v3196_v2 = vmul.f32 %v8560_v17, %v8560_v17  ;;  %6230 = vmatmul.mubr.msk.bf16.gmra.mrb[184].mxu0 %vm1443_vm1, %v6593_v41  ;;  %2023 = vmatprep.mubr.bf16.mxu1 %v6594_v21 }
 0x236   : > { %v2692_v10 = vpop.xlane.xlu0 %2691  ;;  %3370 = vadd.xlane.f32.xlu0 %v3369_v50  ;;  %2796 = vadd.xlane.f32.xlu1 %v2795_v31  ;;  %v8572_v12 = vadd.f32 %v8479_v51, %v1921_v45  ;;  %v1923_v56 = vpop.f32.mrb[137].mxu1 }
 0x237   : > { %v2969_v5 = vmul.f32 0.020408163, %v2692_v10  ;;  %v1924_v33 = vpop.f32.mrb[138].mxu1  ;;  %v3372_v50 = vsel %vm2593_vm2, %v3196_v2, 0.0  ;;  %v8586_v45 = vpop.f32.mrb[152].mxu0  ;;  %6233 = vmatprep.mubr.msk.bf16.mxu0 %vm6985_vm0, %v10673_v62 }
 0x238   : > { %10764 = vst [vmem:[#allocation156_spill] sm:$0xff] %v8572_v12  ;;  %v2695_v40 = vpop.xlane.xlu1 %2694  ;;  %v8577_v15 = vadd.f32 %v8488_v60, %v1924_v33  ;;  %v1926_v25 = vpop.f32.mrb[139].mxu1  ;;  %v2798_v17 = vsel %vm2593_vm2, %v8572_v12, 0.0 }
 0x239   : > { %v8583_v31 = vsub.f32 %v8106_v54, %v2969_v5  ;;  %v2970_v51 = vmul.f32 0.020408163, %v2695_v40  ;;  %v6199_v56 = vpop.f32.mrb[153].mxu0 }
 0x23a   : > { %10765 = vst [vmem:[#allocation157_spill] sm:$0xff] %v8577_v15  ;;  %3373 = vadd.xlane.f32.xlu1 %v3372_v50  ;;  %2799 = vadd.xlane.f32.xlu0 %v2798_v17  ;;  %v2801_v10 = vsel %vm2593_vm2, %v8577_v15, 0.0  ;;  %v8596_v54 = vpop.f32.mrb[154].mxu0 }
 0x23b   : > { %10766 = vst [vmem:[#allocation158_spill] sm:$0xff] %v8583_v31  ;;  %v8589_v60 = vsub.f32 %v8110_v30, %v2970_v51  ;;  %v3197_v25 = vmul.f32 %v8583_v31, %v8583_v31  ;;  %v6200_v2 = vpop.f32.mrb[155].mxu0 }
 0x23c   : > { %2024 = vmatmul.mubr.bf16.gmra.mrb[188].mxu1 %v6596_v29 }
 0x23d   : > { %10767 = vst [vmem:[#allocation159_spill] sm:$0xff] %v8589_v60  ;;  %v3375_v40 = vsel %vm2593_vm2, %v3197_v25, 0.0  ;;  %v1929_v17 = vpop.f32.mrb[140].mxu1  ;;  %v3198_v30 = vmul.f32 %v8589_v60, %v8589_v60 }
 0x23e   : > { %v2698_v23 = vpop.xlane.xlu0 %2697  ;;  %3376 = vadd.xlane.f32.xlu0 %v3375_v40  ;;  %2802 = vadd.xlane.f32.xlu1 %v2801_v10  ;;  %v8604_v5 = vadd.f32 %v8505_v49, %v1929_v17  ;;  %v1931_v33 = vpop.f32.mrb[141].mxu1 }
 0x23f   : > { %v2971_v18 = vmul.f32 0.020408163, %v2698_v23  ;;  %v1932_v41 = vpop.f32.mrb[142].mxu1  ;;  %v3378_v10 = vsel %vm2593_vm2, %v3198_v30, 0.0  ;;  %v8615_v49 = vpop.f32.mrb[156].mxu0 }
 0x240   : > { %10768 = vst [vmem:[#allocation160_spill] sm:$0xff] %v8604_v5  ;;  %v2701_v51 = vpop.xlane.xlu1 %2700  ;;  %v8607_v50 = vadd.f32 %v8514_v13, %v1932_v41  ;;  %v1934_v56 = vpop.f32.mrb[143].mxu1  ;;  %v2804_v25 = vsel %vm2593_vm2, %v8604_v5, 0.0 }
 0x241   : > { %v8612_v31 = vsub.f32 %v8125_v46, %v2971_v18  ;;  %v2972_v2 = vmul.f32 0.020408163, %v2701_v51  ;;  %v6203_v23 = vpop.f32.mrb[157].mxu0 }
 0x242   : > { %10769 = vst [vmem:[#allocation161_spill] sm:$0xff] %v8607_v50  ;;  %3379 = vadd.xlane.f32.xlu1 %v3378_v10  ;;  %2805 = vadd.xlane.f32.xlu0 %v2804_v25  ;;  %v2807_v17 = vsel %vm2593_vm2, %v8607_v50, 0.0  ;;  %v8624_v33 = vpop.f32.mrb[158].mxu0 }
 0x243   : > { %10770 = vst [vmem:[#allocation162_spill] sm:$0xff] %v8612_v31  ;;  %v8618_v40 = vsub.f32 %v8128_v36, %v2972_v2  ;;  %v3199_v13 = vmul.f32 %v8612_v31, %v8612_v31  ;;  %v6204_v41 = vpop.f32.mrb[159].mxu0 }
 0x245   : > { %10771 = vst [vmem:[#allocation163_spill] sm:$0xff] %v8618_v40  ;;  %v3381_v46 = vsel %vm2593_vm2, %v3199_v13, 0.0  ;;  %v1937_v18 = vpop.f32.mrb[144].mxu1  ;;  %v3200_v30 = vmul.f32 %v8618_v40, %v8618_v40 }
 0x246   : > { %v2704_v51 = vpop.xlane.xlu0 %2703  ;;  %3382 = vadd.xlane.f32.xlu0 %v3381_v46  ;;  %2808 = vadd.xlane.f32.xlu1 %v2807_v17  ;;  %v8630_v36 = vadd.f32 %v8531_v32, %v1937_v18  ;;  %v1939_v56 = vpop.f32.mrb[145].mxu1 }
 0x247   : > { %v2973_v25 = vmul.f32 0.020408163, %v2704_v51  ;;  %v1940_v2 = vpop.f32.mrb[146].mxu1  ;;  %v3384_v17 = vsel %vm2593_vm2, %v3200_v30, 0.0  ;;  %v8641_v32 = vpop.f32.mrb[160].mxu0 }
 0x248   : > { %10772 = vst [vmem:[#allocation164_spill] sm:$0xff] %v8630_v36  ;;  %v2707_v10 = vpop.xlane.xlu1 %2706  ;;  %v8633_v23 = vadd.f32 %v8540_v3, %v1940_v2  ;;  %v1942_v31 = vpop.f32.mrb[147].mxu1  ;;  %v2810_v13 = vsel %vm2593_vm2, %v8630_v36, 0.0 }
 0x249   : > { %v8638_v40 = vsub.f32 %v8143_v14, %v2973_v25  ;;  %v2974_v41 = vmul.f32 0.020408163, %v2707_v10  ;;  %v6207_v51 = vpop.f32.mrb[161].mxu0 }
 0x24a   : > { %10773 = vst [vmem:[#allocation165_spill] sm:$0xff] %v8633_v23  ;;  %3385 = vadd.xlane.f32.xlu1 %v3384_v17  ;;  %2811 = vadd.xlane.f32.xlu0 %v2810_v13  ;;  %v2813_v31 = vsel %vm2593_vm2, %v8633_v23, 0.0  ;;  %v8650_v14 = vpop.f32.mrb[162].mxu0 }
 0x24b   : > { %10774 = vst [vmem:[#allocation166_spill] sm:$0xff] %v8638_v40  ;;  %v8644_v46 = vsub.f32 %v8146_v63, %v2974_v41  ;;  %v3281_v18 = vpop.xlane.xlu0 %3280  ;;  %v3201_v3 = vmul.f32 %v8638_v40, %v8638_v40  ;;  %v6208_v2 = vpop.f32.mrb[163].mxu0 }
 0x24d   : > { %10775 = vst [vmem:[#allocation167_spill] sm:$0xff] %v8644_v46  ;;  %v3387_v56 = vsel %vm2593_vm2, %v3201_v3, 0.0  ;;  %v1945_v30 = vpop.f32.mrb[148].mxu1  ;;  %v3202_v25 = vmul.f32 %v8644_v46, %v8644_v46 }
 0x24e   : > { %3388 = vadd.xlane.f32.xlu0 %v3387_v56  ;;  %2814 = vadd.xlane.f32.xlu1 %v2813_v31  ;;  %v8656_v63 = vadd.f32 %v8557_v16, %v1945_v30  ;;  %v1947_v10 = vpop.f32.mrb[149].mxu1  ;;  %v8667_v16 = vpop.f32.mrb[164].mxu0 }
 0x24f   : > { %v3284_v13 = vpop.xlane.xlu1 %3283  ;;  %v2710_v41 = vpop.xlane.xlu0 %2709  ;;  %v3390_v46 = vsel %vm2593_vm2, %v3202_v25, 0.0 }
 0x250   : > { %10776 = vst [vmem:[#allocation168_spill] sm:$0xff] %v8656_v63  ;;  %v2975_v17 = vmul.f32 0.020408163, %v2710_v41  ;;  %v1948_v40 = vpop.f32.mrb[150].mxu1  ;;  %v2816_v51 = vsel %vm2593_vm2, %v8656_v63, 0.0 }
 0x251   : > { %v8661_v3 = vadd.f32 %v8566_v7, %v1948_v40  ;;  %v1950_v23 = vpop.f32.mrb[151].mxu1  ;;  %v6211_v40 = vpop.f32.mrb[165].mxu0  ;;  %v3622_v60 = vmul.f32 0.020408163, %v3284_v13 }
 0x252   : > { %v8665_v56 = vsub.f32 %v8168_v4, %v2975_v17  ;;  %3391 = vadd.xlane.f32.xlu1 %v3390_v46  ;;  %2817 = vadd.xlane.f32.xlu0 %v2816_v51  ;;  %v8675_v25 = vpop.f32.mrb[166].mxu0 }
 0x253   : > { %10777 = vst [vmem:[#allocation169_spill] sm:$0xff] %v8661_v3  ;;  %v8669_v31 = vpop.xlane.xlu0 %3286  ;;  %v2713_v30 = vpop.xlane.xlu1 %2712  ;;  %v2819_v2 = vsel %vm2593_vm2, %v8661_v3, 0.0 }
 0x254   : > { %10778 = vst [vmem:[#allocation170_spill] sm:$0xff] %v8665_v56  ;;  %v2976_v10 = vmul.f32 0.020408163, %v2713_v30  ;;  %v3203_v7 = vmul.f32 %v8665_v56, %v8665_v56  ;;  %v6212_v51 = vpop.f32.mrb[167].mxu0 }
 0x255   : > { %v1953_v23 = vpop.f32.mrb[152].mxu1 }
 0x256   : > { %v8678_v4 = vsub.f32 %v8173_v19, %v2976_v10  ;;  %2820 = vadd.xlane.f32.xlu1 %v2819_v2  ;;  %v8681_v46 = vadd.f32 %v8586_v45, %v1953_v23  ;;  %v3393_v41 = vsel %vm2593_vm2, %v3203_v7, 0.0  ;;  %v1955_v17 = vpop.f32.mrb[153].mxu1  ;;  %v3621_v10 = vmul.f32 0.020408163, %v3281_v18  ;;  %v2474_v23 = vpop.f32.mrb[168].mxu0 }
 0x257   : > { %v8684_v3 = vpop.xlane.xlu1 %3289  ;;  %v8686_v30 = vpop.xlane.xlu0 %2715  ;;  %3394 = vadd.xlane.f32.xlu0 %v3393_v41 }
 0x258   : > { %10779 = vst [vmem:[#allocation171_spill] sm:$0xff] %v8678_v4  ;;  %10780 = vst [vmem:[#allocation172_spill] sm:$0xff] %v8681_v46  ;;  %v1956_v40 = vpop.f32.mrb[154].mxu1  ;;  %v3204_v56 = vmul.f32 %v8678_v4, %v8678_v4  ;;  %v2822_v45 = vsel %vm2593_vm2, %v8681_v46, 0.0  ;;  %v6215_v41 = vpop.f32.mrb[169].mxu0 }
 0x259   : > { %v8691_v19 = vadd.f32 %v8596_v54, %v1956_v40  ;;  %v1958_v2 = vpop.f32.mrb[155].mxu1  ;;  %v3850_v4 = vadd.f32 0.001, %v3622_v60  ;;  %v3849_v50 = vadd.f32 0.001, %v3621_v10  ;;  %v2477_v15 = vpop.f32.mrb[170].mxu0 }
 0x25a   : > { %v3396_v7 = vsel %vm2593_vm2, %v3204_v56, 0.0  ;;  %v6216_v10 = vpop.f32.mrb[171].mxu0  ;;  %v3624_v27 = vmul.f32 0.020408163, %v8684_v3 }
 0x25b   : > { %10781 = vst [vmem:[#allocation173_spill] sm:$0xff] %v8691_v19  ;;  %v8696_v17 = vpop.xlane.xlu0 %3292  ;;  %v8698_v51 = vpop.xlane.xlu1 %2718  ;;  %3397 = vadd.xlane.f32.xlu1 %v3396_v7  ;;  %2823 = vadd.xlane.f32.xlu0 %v2822_v45  ;;  %v2825_v54 = vsel %vm2593_vm2, %v8691_v19, 0.0  ;;  %6634 = vrsqrt.f32 %v3850_v4 }
 0x25c   : > { %6636 = vrsqrt.f32 %v3849_v50  ;;  %v2482_v7 = vpop.f32.mrb[172].mxu0 }
 0x25d   : > { %v1961_v13 = vpop.f32.mrb[156].mxu1 }
 0x25e   : > { %v8703_v40 = vadd.f32 %v8615_v49, %v1961_v13  ;;  %v1963_v18 = vpop.f32.mrb[157].mxu1  ;;  %v6219_v13 = vpop.f32.mrb[173].mxu0 }
 0x25f   : > { %v8705_v2 = vpop.xlane.xlu1 %3295  ;;  %v8707_v56 = vpop.xlane.xlu0 %2721  ;;  %2826 = vadd.xlane.f32.xlu1 %v2825_v54 }
 0x260   : > { %10782 = vst [vmem:[#allocation174_spill] sm:$0xff] %v8703_v40  ;;  %v1964_v46 = vpop.f32.mrb[158].mxu1 }
 0x261   : > { %v8710_v45 = vadd.f32 %v8624_v33, %v1964_v46  ;;  %v1966_v60 = vpop.f32.mrb[159].mxu1 }
 0x263   : > { %10783 = vst [vmem:[#allocation175_spill] sm:$0xff] %v8710_v45  ;;  %v8712_v41 = vpop.xlane.xlu0 %3298  ;;  %v8714_v49 = vpop.xlane.xlu1 %2724 }
 0x265   : > { %v1969_v18 = vpop.f32.mrb[160].mxu1  ;;  %v6635_v60 = vpop.eup %6634 }
 0x266   : > { %v8717_v19 = vadd.f32 %v8641_v32, %v1969_v18  ;;  %v1971_v54 = vpop.f32.mrb[161].mxu1  ;;  %v6637_v13 = vpop.eup %6636  ;;  %v6862_v18 = vld [vmem:[%s7073_s22 + $0x8] sm:$0xff] }
 0x267   : > { %v8719_v63 = vpop.xlane.xlu1 %3301  ;;  %v8721_v33 = vpop.xlane.xlu0 %2727  ;;  %v4078_v54 = vmul.f32 %v6862_v18, %v6635_v60  ;;  %v6597_v60 = vld [vmem:[%s7219_s13 + $0x470] ss:$12 sps:$4 sm:$0xff]  }
 0x268   : > { %10784 = vst [vmem:[#allocation176_spill] sm:$0xff] %v8717_v19  ;;  %v1972_v4 = vpop.f32.mrb[162].mxu1  ;;  %6234 = vmatmul.mubr.msk.bf16.gmra.mrb[188].mxu0 %vm1443_vm1, %v6597_v60 }
 0x269   : > { %v8724_v50 = vadd.f32 %v8650_v14, %v1972_v4  ;;  %v1974_v46 = vpop.f32.mrb[163].mxu1  ;;  %v6863_v4 = vld [vmem:[%s7073_s22] sm:$0xff]  ;;  %6237 = vmatprep.mubr.msk.bf16.mxu0 %vm6985_vm0, %v10673_v62 }
 0x26a   : > { %v4077_v46 = vmul.f32 %v6863_v4, %v6637_v13 }
 0x26b   : > { %10785 = vst [vmem:[#allocation177_spill] sm:$0xff] %v8724_v50  ;;  %v8726_v10 = vpop.xlane.xlu0 %3304  ;;  %v8728_v36 = vpop.xlane.xlu1 %2730 }
 0x26d   : > { %v1977_v32 = vpop.f32.mrb[164].mxu1 }
 0x26e   : > { %v8732_v22 = vadd.f32 %v8667_v16, %v1977_v32  ;;  %v1979_v5 = vpop.f32.mrb[165].mxu1 }
 0x26f   : > { %v8734_v61 = vpop.xlane.xlu1 %3307  ;;  %v8736_v14 = vpop.xlane.xlu0 %2733 }
 0x270   : > { %10786 = vst [vmem:[#allocation178_spill] sm:$0xff] %v8732_v22  ;;  %4198 = vperm.xlu1 %6403, %v4078_v54   ;;  %v1980_v12 = vpop.f32.mrb[166].mxu1 }
 0x271   : > { %4193 = vperm.xlu0 %6402, %v4077_v46   ;;  %v8740_v48 = vadd.f32 %v8675_v25, %v1980_v12  ;;  %v1982_v24 = vpop.f32.mrb[167].mxu1 }
 0x273   : > { %10787 = vst [vmem:[#allocation179_spill] sm:$0xff] %v8740_v48  ;;  %v8745_v18 = vpop.xlane.xlu0 %3310  ;;  %v8747_v16 = vpop.xlane.xlu1 %2736 }
 0x275   : > { %v1985_v5 = vpop.f32.mrb[168].mxu1 }
 0x276   : > { %v8752_v13 = vadd.f32 %v2474_v23, %v1985_v5  ;;  %v1987_v12 = vpop.f32.mrb[169].mxu1  ;;  %v2977_v5 = vmul.f32 0.020408163, %v8686_v30 }
 0x277   : > { %v8754_v25 = vpop.xlane.xlu1 %3313  ;;  %v8756_v24 = vpop.xlane.xlu0 %2739 }
 0x278   : > { %10788 = vst [vmem:[#allocation180_spill] sm:$0xff] %v8752_v13  ;;  %v1988_v32 = vpop.f32.mrb[170].mxu1 }
 0x279   : > { %v8758_v54 = vadd.f32 %v2477_v15, %v1988_v32  ;;  %v1990_v4 = vpop.f32.mrb[171].mxu1  ;;  %v8776_v15 = vsub.f32 %v8196_v42, %v2977_v5  ;;  %v2978_v32 = vmul.f32 0.020408163, %v8698_v51 }
 0x27b   : > { %v8760_v46 = vpop.xlane.xlu0 %3316  ;;  %v8762_v21 = vpop.xlane.xlu1 %2742  ;;  %10791 = vst [vmem:[#allocation183_spill] sm:$0xff] %v8776_v15  ;;  %v3205_v0 = vmul.f32 %v8776_v15, %v8776_v15 }
 0x27c   : > { %v2485_v15 = vpop.f32.mrb[174].mxu0 }
 0x27d   : > { %v1993_v29 = vpop.f32.mrb[172].mxu1  ;;  %v3399_v9 = vsel %vm2593_vm2, %v3205_v0, 0.0 }
 0x27e   : > { %v8764_v60 = vadd.f32 %v2482_v7, %v1993_v29  ;;  %v1995_v58 = vpop.f32.mrb[173].mxu1  ;;  %v2979_v29 = vmul.f32 0.020408163, %v8707_v56  ;;  %v2828_v56 = vsel %vm2593_vm2, %v8703_v40, 0.0  ;;  %v6220_v40 = vpop.f32.mrb[175].mxu0 }
 0x27f   : > { %v8766_v28 = vpop.xlane.xlu1 %3319  ;;  %v8768_v23 = vpop.xlane.xlu0 %2745  ;;  %v8784_v58 = vsub.f32 %v8202_v52, %v2978_v32  ;;  %v3623_v32 = vmul.f32 0.020408163, %v8669_v31  ;;  %v2834_v40 = vsel %vm2593_vm2, %v8717_v19, 0.0 }
 0x280   : > { %10789 = vst [vmem:[#allocation181_spill] sm:$0xff] %v8764_v60  ;;  %v8794_v42 = vsub.f32 %v8228_v11, %v2979_v29  ;;  %v2981_v11 = vmul.f32 0.020408163, %v8721_v33 }
 0x281   : > { %10792 = vst [vmem:[#allocation184_spill] sm:$0xff] %v8784_v58  ;;  %v3206_v52 = vmul.f32 %v8784_v58, %v8784_v58  ;;  %v3851_v31 = vadd.f32 0.001, %v3623_v32 }
 0x282   : > { %10795 = vst [vmem:[#allocation187_spill] sm:$0xff] %v8794_v42  ;;  %v3207_v0 = vmul.f32 %v8794_v42, %v8794_v42  ;;  %v8818_v33 = vsub.f32 %v8254_v1, %v2981_v11  ;;  %v2983_v1 = vmul.f32 0.020408163, %v8736_v14  ;;  %v2490_v11 = vpop.f32.mrb[176].mxu0 }
 0x283   : > { %v8771_v12 = vpop.xlane.xlu0 %3322  ;;  %v8773_v34 = vpop.xlane.xlu1 %2748  ;;  %6638 = vrsqrt.f32 %v3851_v31 }
 0x284   : > { %10790 = vst [vmem:[#allocation182_spill] sm:$0xff] %v8771_v12  ;;  %10798 = vst [vmem:[#allocation190_spill] sm:$0xff] %v8818_v33  ;;  %v3209_v32 = vmul.f32 %v8818_v33, %v8818_v33  ;;  %v8839_v31 = vsub.f32 %v8280_v37, %v2983_v1 }
 0x286   : > { %10800 = vst [vmem:[#allocation192_spill] sm:$0xff] %v8839_v31  ;;  %v3211_v37 = vmul.f32 %v8839_v31, %v8839_v31  ;;  %v2846_v31 = vsel %vm2593_vm2, %v8752_v13, 0.0  ;;  %v2980_v13 = vmul.f32 0.020408163, %v8714_v49 }
 0x287   : > { %v8779_v4 = vpop.xlane.xlu1 %3325  ;;  %v8781_v7 = vpop.xlane.xlu0 %2751 }
 0x28b   : > { %v8787_v20 = vpop.xlane.xlu0 %3328  ;;  %v8789_v30 = vpop.xlane.xlu1 %2754 }
 0x28c   : > { %10793 = vst [vmem:[#allocation185_spill] sm:$0xff] %v8787_v20  ;;  %10794 = vst [vmem:[#allocation186_spill] sm:$0xff] %v8789_v30  ;;  %v1996_v20 = vpop.f32.mrb[174].mxu1  ;;  %v3402_v30 = vsel %vm2593_vm2, %v3206_v52, 0.0  ;;  %v3405_v52 = vsel %vm2593_vm2, %v3207_v0, 0.0 }
 0x28d   : > { %v8814_v58 = vadd.f32 %v2485_v15, %v1996_v20  ;;  %v2831_v20 = vsel %vm2593_vm2, %v8710_v45, 0.0  ;;  %v3852_v15 = vadd.f32 0.001, %v3624_v27  ;;  %v6639_v1 = vpop.eup %6638  ;;  %v6598_v45 = vld [vmem:[%s7219_s13 + $0x484] ss:$12 sps:$4 sm:$0xff]  }
 0x28e   : > { %2031 = vmatprep.mubr.bf16.mxu1 %v6598_v45 }
 0x28f   : > { %v8796_v51 = vpop.xlane.xlu1 %3331  ;;  %v8798_v5 = vpop.xlane.xlu0 %2757  ;;  %6640 = vrsqrt.f32 %v3852_v15 }
 0x290   : > { %3400 = vadd.xlane.f32.xlu0 %v3399_v9  ;;  %v1998_v9 = vpop.f32.mrb[175].mxu1 }
 0x293   : > { %v8807_v29 = vpop.xlane.xlu0 %3334  ;;  %v8809_v12 = vpop.xlane.xlu1 %2760 }
 0x294   : > { %10796 = vst [vmem:[#allocation188_spill] sm:$0xff] %v8807_v29  ;;  %10797 = vst [vmem:[#allocation189_spill] sm:$0xff] %v8809_v12  ;;  %3403 = vadd.xlane.f32.xlu1 %v3402_v30  ;;  %2829 = vadd.xlane.f32.xlu0 %v2828_v56 }
 0x296   : > { %v2001_v3 = vpop.f32.mrb[176].mxu1 }
 0x297   : > { %v8820_v29 = vpop.xlane.xlu1 %3337  ;;  %v8822_v12 = vpop.xlane.xlu0 %2763  ;;  %v8836_v9 = vadd.f32 %v2490_v11, %v2001_v3 }
 0x298   : > { %3406 = vadd.xlane.f32.xlu0 %v3405_v52  ;;  %2832 = vadd.xlane.f32.xlu1 %v2831_v20  ;;  %v2003_v0 = vpop.f32.mrb[177].mxu1  ;;  %v6223_v52 = vpop.f32.mrb[177].mxu0  ;;  %v3411_v20 = vsel %vm2593_vm2, %v3209_v32, 0.0 }
 0x299   : > { %10799 = vst [vmem:[#allocation191_spill] sm:$0xff] %v8836_v9  ;;  %v2985_v0 = vmul.f32 0.020408163, %v8756_v24  ;;  %v3417_v24 = vsel %vm2593_vm2, %v3211_v37, 0.0  ;;  %v6641_v42 = vpop.eup %6640 }
 0x29b   : > { %v8830_v30 = vpop.xlane.xlu0 %3340  ;;  %v8832_v56 = vpop.xlane.xlu1 %2766  ;;  %v8856_v32 = vsub.f32 %v8306_v26, %v2985_v0  ;;  %v6865_v0 = vld [vmem:[%s7073_s22 + $0x18] sm:$0xff] }
 0x29c   : > { %2835 = vadd.xlane.f32.xlu0 %v2834_v40  ;;  %v2840_v40 = vsel %vm2593_vm2, %v8732_v22, 0.0  ;;  %v6601_v22 = vld [vmem:[%s7219_s13 + $0x488] ss:$12 sps:$4 sm:$0xff]  }
 0x29d   : > { %10802 = vst [vmem:[#allocation194_spill] sm:$0xff] %v8856_v32  ;;  %v3213_v37 = vmul.f32 %v8856_v32, %v8856_v32  ;;  %6238 = vmatmul.mubr.msk.bf16.gmra.mrb[192].mxu0 %vm1443_vm1, %v6601_v22 }
 0x29e   : > { %6241 = vmatprep.mubr.msk.bf16.mxu0 %vm6985_vm0, %v10673_v62 }
 0x29f   : > { %v8841_v27 = vpop.xlane.xlu1 %3343  ;;  %v8843_v14 = vpop.xlane.xlu0 %2769 }
 0x2a0   : > { %3412 = vadd.xlane.f32.xlu0 %v3411_v20  ;;  %v6864_v20 = vld [vmem:[%s7073_s22 + $0x10] sm:$0xff] }
 0x2a1   : > { %v4079_v33 = vmul.f32 %v6864_v20, %v6639_v1 }
 0x2a3   : > { %v8849_v3 = vpop.xlane.xlu0 %3346  ;;  %v8851_v15 = vpop.xlane.xlu1 %2772 }
 0x2a4   : > { %10801 = vst [vmem:[#allocation193_spill] sm:$0xff] %v8849_v3  ;;  %2841 = vadd.xlane.f32.xlu0 %v2840_v40  ;;  %v6600_v40 = vld [vmem:[%s7219_s13 + $0x480] ss:$12 sps:$4 sm:$0xff]   ;;  %v4080_v3 = vmul.f32 %v6865_v0, %v6641_v42  ;;  %v3423_v42 = vsel %vm2593_vm2, %v3213_v37, 0.0 }
 0x2a5   : > { %2032 = vmatmul.mubr.bf16.gmra.mrb[192].mxu1 %v6600_v40 }
 0x2a7   : > { %v8858_v11 = vpop.xlane.xlu1 %3349  ;;  %v8860_v52 = vpop.xlane.xlu0 %2775 }
 0x2a8   : > { %3418 = vadd.xlane.f32.xlu0 %v3417_v24 }
 0x2a9   : > { %4203 = vperm.xlu1 %6403, %v4079_v33   ;;  %v3630_v33 = vmul.f32 0.020408163, %v8734_v61 }
 0x2ab   : > { %v8869_v19 = vpop.xlane.xlu0 %3352  ;;  %v8871_v26 = vpop.xlane.xlu1 %2778  ;;  %v3858_v20 = vadd.f32 0.001, %v3630_v33 }
 0x2ac   : > { %10803 = vst [vmem:[#allocation195_spill] sm:$0xff] %v8869_v19  ;;  %10804 = vst [vmem:[#allocation196_spill] sm:$0xff] %v8871_v26  ;;  %2847 = vadd.xlane.f32.xlu0 %v2846_v31 }
 0x2ad   : > { %4208 = vperm.xlu1 %6403, %v4080_v3   ;;  %6642 = vrsqrt.f32 %v3858_v20  ;;  %v6866_v20 = vld [vmem:[%s7073_s22 + $0x48] sm:$0xff] }
 0x2af   : > { %v8880_v1 = vpop.xlane.xlu1 %3355  ;;  %v8882_v24 = vpop.xlane.xlu0 %2781 }
 0x2b0   : > { %3424 = vadd.xlane.f32.xlu0 %v3423_v42 }
 0x2b3   : > { %v8885_v45 = vpop.xlane.xlu0 %3358  ;;  %v8887_v31 = vpop.xlane.xlu1 %2784 }
 0x2b4   : > { %10805 = vst [vmem:[#allocation197_spill] sm:$0xff] %v8885_v45  ;;  %10806 = vst [vmem:[#allocation198_spill] sm:$0xff] %v8887_v31 }
 0x2b7   : > { %v8889_v22 = vpop.xlane.xlu1 %3361  ;;  %v8891_v3 = vpop.xlane.xlu0 %2787 }
 0x2b8   : > { %v6643_v37 = vpop.eup %6642 }
 0x2b9   : > { %v4086_v45 = vmul.f32 %v6866_v20, %v6643_v37  ;;  %v2004_v20 = vpop.f32.mrb[178].mxu1 }
 0x2bb   : > { %v8893_v40 = vpop.xlane.xlu0 %3364  ;;  %v8895_v61 = vpop.xlane.xlu1 %2790 }
 0x2bc   : > { %10807 = vst [vmem:[#allocation199_spill] sm:$0xff] %v8893_v40  ;;  %10808 = vst [vmem:[#allocation200_spill] sm:$0xff] %v8895_v61  ;;  %v8912_v40 = vsub.f32 %v8231_v47, %v2980_v13  ;;  %v2006_v13 = vpop.f32.mrb[179].mxu1 }
 0x2be   : > { %10814 = vst [vmem:[#allocation206_spill] sm:$0xff] %v8912_v40 }
 0x2bf   : > { %v8897_v0 = vpop.xlane.xlu1 %3367  ;;  %v8899_v32 = vpop.xlane.xlu0 %2793 }
 0x2c0   : > { %10809 = vst [vmem:[#allocation201_spill] sm:$0xff] %v8897_v0 }
 0x2c3   : > { %v8901_v42 = vpop.xlane.xlu0 %3370  ;;  %v8903_v33 = vpop.xlane.xlu1 %2796 }
 0x2c4   : > { %10810 = vst [vmem:[#allocation202_spill] sm:$0xff] %v8901_v42  ;;  %10811 = vst [vmem:[#allocation203_spill] sm:$0xff] %v8903_v33  ;;  %v3208_v42 = vmul.f32 %v8912_v40, %v8912_v40  ;;  %v3625_v33 = vmul.f32 0.020408163, %v8696_v17  ;;  %v2837_v17 = vsel %vm2593_vm2, %v8724_v50, 0.0 }
 0x2c6   : > { %4238 = vperm.xlu0 %6402, %v4086_v45   ;;  %v3408_v45 = vsel %vm2593_vm2, %v3208_v42, 0.0 }
 0x2c7   : > { %v8907_v19 = vpop.xlane.xlu1 %3373  ;;  %v8909_v31 = vpop.xlane.xlu0 %2799 }
 0x2c8   : > { %10812 = vst [vmem:[#allocation204_spill] sm:$0xff] %v8907_v19  ;;  %10813 = vst [vmem:[#allocation205_spill] sm:$0xff] %v8909_v31  ;;  %v2493_v19 = vpop.f32.mrb[178].mxu0  ;;  %v3853_v31 = vadd.f32 0.001, %v3625_v33 }
 0x2c9   : > { %v8926_v47 = vadd.f32 %v2493_v19, %v2004_v20 }
 0x2ca   : > { %6644 = vrsqrt.f32 %v3853_v31 }
 0x2cb   : > { %v8914_v61 = vpop.xlane.xlu0 %3376  ;;  %v8916_v0 = vpop.xlane.xlu1 %2802  ;;  %10819 = vst [vmem:[#allocation211_spill] sm:$0xff] %v8926_v47 }
 0x2cc   : > { %10815 = vst [vmem:[#allocation207_spill] sm:$0xff] %v8914_v61  ;;  %10816 = vst [vmem:[#allocation208_spill] sm:$0xff] %v8916_v0  ;;  %v6224_v61 = vpop.f32.mrb[179].mxu0  ;;  %v3626_v0 = vmul.f32 0.020408163, %v8705_v2 }
 0x2ce   : > { %v3854_v61 = vadd.f32 0.001, %v3626_v0 }
 0x2cf   : > { %v8921_v49 = vpop.xlane.xlu1 %3379  ;;  %v8923_v37 = vpop.xlane.xlu0 %2805 }
 0x2d0   : > { %10817 = vst [vmem:[#allocation209_spill] sm:$0xff] %v8921_v49  ;;  %10818 = vst [vmem:[#allocation210_spill] sm:$0xff] %v8923_v37  ;;  %v2009_v49 = vpop.f32.mrb[180].mxu1  ;;  %v2498_v37 = vpop.f32.mrb[180].mxu0  ;;  %6646 = vrsqrt.f32 %v3854_v61  ;;  %v6604_v61 = vld [vmem:[%s7219_s13 + $0x498] ss:$12 sps:$4 sm:$0xff]  }
 0x2d1   : > { %3409 = vadd.xlane.f32.xlu1 %v3408_v45  ;;  %v8935_v42 = vadd.f32 %v2498_v37, %v2009_v49  ;;  %v2011_v19 = vpop.f32.mrb[181].mxu1  ;;  %v6227_v45 = vpop.f32.mrb[181].mxu0  ;;  %v2987_v49 = vmul.f32 0.020408163, %v8768_v23 }
 0x2d2   : > { %v2852_v19 = vsel %vm2593_vm2, %v8764_v60, 0.0  ;;  %v6602_v45 = vld [vmem:[%s7219_s13 + $0x49c] ss:$12 sps:$4 sm:$0xff]   ;;  %v3632_v60 = vmul.f32 0.020408163, %v8754_v25 }
 0x2d3   : > { %v8929_v26 = vpop.xlane.xlu0 %3382  ;;  %v8931_v40 = vpop.xlane.xlu1 %2808  ;;  %2039 = vmatprep.mubr.bf16.mxu1 %v6602_v45 }
 0x2d4   : > { %10820 = vst [vmem:[#allocation212_spill] sm:$0xff] %v8929_v26  ;;  %v6645_v0 = vpop.eup %6644  ;;  %v6867_v26 = vld [vmem:[%s7073_s22 + $0x20] sm:$0xff]  ;;  %2040 = vmatmul.mubr.bf16.gmra.mrb[196].mxu1 %v6604_v61 }
 0x2d5   : > { %2838 = vadd.xlane.f32.xlu1 %v2837_v17  ;;  %v8949_v17 = vsub.f32 %v8332_v43, %v2987_v49 }
 0x2d7   : > { %v8937_v2 = vpop.xlane.xlu1 %3385  ;;  %v8939_v33 = vpop.xlane.xlu0 %2811  ;;  %10823 = vst [vmem:[#allocation215_spill] sm:$0xff] %v8949_v17  ;;  %v3215_v23 = vmul.f32 %v8949_v17, %v8949_v17 }
 0x2da   : > { %v6647_v43 = vpop.eup %6646 }
 0x2db   : > { %v8941_v20 = vpop.xlane.xlu0 %3388  ;;  %v8943_v13 = vpop.xlane.xlu1 %2814 }
 0x2dc   : > { %10821 = vst [vmem:[#allocation213_spill] sm:$0xff] %v8941_v20  ;;  %10822 = vst [vmem:[#allocation214_spill] sm:$0xff] %v8943_v13  ;;  %v6605_v20 = vld [vmem:[%s7219_s13 + $0x4a0] ss:$12 sps:$4 sm:$0xff]   ;;  %v4081_v13 = vmul.f32 %v6867_v26, %v6645_v0  ;;  %v3429_v26 = vsel %vm2593_vm2, %v3215_v23, 0.0 }
 0x2dd   : > { %6242 = vmatmul.mubr.msk.bf16.gmra.mrb[196].mxu0 %vm1443_vm1, %v6605_v20  ;;  %v6868_v0 = vld [vmem:[%s7073_s22 + $0x28] sm:$0xff] }
 0x2de   : > { %6245 = vmatprep.mubr.msk.bf16.mxu0 %vm6985_vm0, %v10673_v62  ;;  %v4082_v45 = vmul.f32 %v6868_v0, %v6647_v43  ;;  %v10826_v23 = vld [vmem:[#allocation2_spill] sm:$0xff] }
 0x2df   : > { %v8946_v37 = vpop.xlane.xlu1 %3391  ;;  %v8951_v31 = vpop.xlane.xlu0 %2817 }
 0x2e3   : > { %v8956_v50 = vpop.xlane.xlu1 %2820 }
 0x2e4   : > { %10824 = vst [vmem:[#allocation216_spill] sm:$0xff] %v8956_v50  ;;  %v8963_v49 = vpop.xlane.xlu0 %3394 }
 0x2e5   : > { %2853 = vadd.xlane.f32.xlu0 %v2852_v19  ;;  %10825 = vst [vmem:[#allocation217_spill] sm:$0xff] %v8963_v49  ;;  %v3860_v19 = vadd.f32 0.001, %v3632_v60 }
 0x2e6   : > { %4213 = vperm.xlu1 %6403, %v4081_v13  }
 0x2e7   : > { %6648 = vrsqrt.f32 %v3860_v19  ;;  %v2501_v19 = vpop.f32.mrb[182].mxu0 }
 0x2e8   : > { %v8969_v50 = vpop.xlane.xlu1 %3397  ;;  %v8973_v61 = vpop.xlane.xlu0 %2823 }
 0x2e9   : > { %3430 = vadd.xlane.f32.xlu0 %v3429_v26 }
 0x2ea   : > { %4218 = vperm.xlu1 %6403, %v4082_v45   ;;  %v2012_v45 = vpop.f32.mrb[182].mxu1 }
 0x2ec   : > { %v8975_v13 = vpop.xlane.xlu1 %2826 }
 0x2f0   : > { %v4194_v20 = vpop.permute.xlu0 %4193  ;;  %v4199_v17 = vpop.permute.xlu1 %4198 }
 0x2f1   : > { %v4761_v49 = vmul.f32 %v4194_v20, %v8153_v39  ;;  %v4762_v25 = vmul.f32 %v4199_v17, %v8164_v35  ;;  %v6649_v26 = vpop.eup %6648  ;;  %v6869_v39 = vld [vmem:[%s7073_s22 + $0x58] sm:$0xff]  ;;  %v2982_v35 = vmul.f32 0.020408163, %v8728_v36  ;;  %v2014_v20 = vpop.f32.mrb[183].mxu1 }
 0x2f2   : > { %v4088_v0 = vmul.f32 %v6869_v39, %v6649_v26  ;;  %v2858_v20 = vsel %vm2593_vm2, %v8836_v9, 0.0 }
 0x2f3   : > { %v5445_v60 = vadd.f32 %v7423_v53, %v4761_v49  ;;  %v5446_v43 = vadd.f32 %v10826_v23, %v4762_v25  ;;  %v8995_v17 = vsub.f32 %v8257_v6, %v2982_v35  ;;  %v8999_v49 = vadd.f32 %v2501_v19, %v2012_v45  ;;  %v6228_v25 = vpop.f32.mrb[183].mxu0 }
 0x2f4   : > { %v3628_v35 = vmul.f32 0.020408163, %v8719_v63  ;;  %v2843_v45 = vsel %vm2593_vm2, %v8740_v48, 0.0  ;;  %v2989_v19 = vmul.f32 0.020408163, %v8781_v7 }
 0x2f5   : > { %5559 = vst.msk [vmem:[%s8984_s26] sm:$0xff] %vm2593_vm2, %v5445_v60  ;;  %5560 = vst.msk [vmem:[%s8984_s26 + $0x8] sm:$0xff] %vm2593_vm2, %v5446_v43  ;;  %v3210_v53 = vmul.f32 %v8995_v17, %v8995_v17  ;;  %v3627_v60 = vmul.f32 0.020408163, %v8712_v41  ;;  %v6606_v25 = vld [vmem:[%s7219_s13 + $0x4b4] ss:$12 sps:$4 sm:$0xff]  }
 0x2f6   : > { %10827 = vst [vmem:[#allocation2_spill] sm:$0xff] %v8995_v17  ;;  %10828 = vst [vmem:[#allocation218_spill] sm:$0xff] %v8999_v49  ;;  %v3856_v41 = vadd.f32 0.001, %v3628_v35  ;;  %2047 = vmatprep.mubr.bf16.mxu1 %v6606_v25  ;;  %v6871_v25 = vld [vmem:[%s7073_s22 + $0x38] sm:$0xff]  ;;  %v10834_v17 = vld [vmem:[#allocation6_spill] sm:$0xff] }
 0x2f7   : > { %v3414_v43 = vsel %vm2593_vm2, %v3210_v53, 0.0  ;;  %v9010_v53 = vsub.f32 %v8358_v55, %v2989_v19  ;;  %v3634_v55 = vmul.f32 0.020408163, %v8766_v28 }
 0x2f9   : > { %10829 = vst [vmem:[#allocation219_spill] sm:$0xff] %v9010_v53 }
 0x2ff   : > { %4248 = vperm.xlu0 %6402, %v4088_v0   ;;  %v3855_v0 = vadd.f32 0.001, %v3627_v60  ;;  %v6608_v60 = vld [vmem:[%s7219_s13 + $0x4b0] ss:$12 sps:$4 sm:$0xff]  }
 0x300   : > { %2048 = vmatmul.mubr.bf16.gmra.mrb[200].mxu1 %v6608_v60 }
 0x301   : > { %6650 = vrsqrt.f32 %v3855_v0  ;;  %v6870_v0 = vld [vmem:[%s7073_s22 + $0x30] sm:$0xff] }
 0x302   : > { %6652 = vrsqrt.f32 %v3856_v41  ;;  %v3862_v41 = vadd.f32 0.001, %v3634_v55 }
 0x304   : > { %6654 = vrsqrt.f32 %v3862_v41 }
 0x307   : > { %v2017_v23 = vpop.f32.mrb[184].mxu1 }
 0x308   : > { %v2019_v26 = vpop.f32.mrb[185].mxu1  ;;  %v2506_v6 = vpop.f32.mrb[184].mxu0 }
 0x309   : > { %v9003_v36 = vadd.f32 %v2506_v6, %v2017_v23  ;;  %v6231_v39 = vpop.f32.mrb[185].mxu0  ;;  %v6609_v23 = vld [vmem:[%s7219_s13 + $0x4b8] ss:$12 sps:$4 sm:$0xff]  }
 0x30a   : > { %6246 = vmatmul.mubr.msk.bf16.gmra.mrb[200].mxu0 %vm1443_vm1, %v6609_v23 }
 0x30b   : > { %v6651_v26 = vpop.eup %6650  ;;  %6249 = vmatprep.mubr.msk.bf16.mxu0 %vm6985_vm0, %v10673_v62 }
 0x30c   : > { %v4083_v35 = vmul.f32 %v6870_v0, %v6651_v26  ;;  %v10832_v0 = vld [vmem:[#allocation4_spill] sm:$0xff] }
 0x30e   : > { %3415 = vadd.xlane.f32.xlu1 %v3414_v43  ;;  %v3217_v43 = vmul.f32 %v9010_v53, %v9010_v53 }
 0x310   : > { %v3435_v39 = vsel %vm2593_vm2, %v3217_v43, 0.0  ;;  %v10831_v43 = vld [vmem:[#allocation113_spill] sm:$0xff] }
 0x312   : > { %2844 = vadd.xlane.f32.xlu1 %v2843_v45  ;;  %v6653_v45 = vpop.eup %6652 }
 0x313   : > { %v4084_v28 = vmul.f32 %v6871_v25, %v6653_v45  ;;  %v6655_v41 = vpop.eup %6654 }
 0x31d   : > { %v9017_v63 = vpop.xlane.xlu0 %3400 }
 0x31e   : > { %2859 = vadd.xlane.f32.xlu0 %v2858_v20 }
 0x321   : > { %v9025_v7 = vpop.xlane.xlu1 %3403  ;;  %v9027_v6 = vpop.xlane.xlu0 %2829 }
 0x322   : > { %3436 = vadd.xlane.f32.xlu0 %v3435_v39 }
 0x323   : > { %4223 = vperm.xlu1 %6403, %v4083_v35  }
 0x325   : > { %v9031_v19 = vpop.xlane.xlu0 %3406  ;;  %v9033_v20 = vpop.xlane.xlu1 %2832 }
 0x326   : > { %10830 = vst [vmem:[#allocation220_spill] sm:$0xff] %v9031_v19 }
 0x327   : > { %4228 = vperm.xlu1 %6403, %v4084_v28   ;;  %v6872_v28 = vld [vmem:[%s7073_s22 + $0x68] sm:$0xff] }
 0x329   : > { %v4204_v60 = vpop.permute.xlu1 %4203  ;;  %v9036_v23 = vpop.xlane.xlu0 %2835 }
 0x32a   : > { %v4763_v26 = vmul.f32 %v4204_v60, %v10831_v43  ;;  %v4090_v60 = vmul.f32 %v6872_v28, %v6655_v41 }
 0x32c   : > { %v5447_v53 = vadd.f32 %v10832_v0, %v4763_v26  ;;  %v2984_v26 = vmul.f32 0.020408163, %v8747_v16 }
 0x32d   : > { %v4209_v39 = vpop.permute.xlu1 %4208  ;;  %v9040_v35 = vpop.xlane.xlu0 %3412 }
 0x32e   : > { %10833 = vst [vmem:[#allocation113_spill] sm:$0xff] %v9040_v35  ;;  %5561 = vst.msk [vmem:[%s8984_s26 + $0x10] sm:$0xff] %vm2593_vm2, %v5447_v53  ;;  %v4764_v55 = vmul.f32 %v4209_v39, %v8189_v38  ;;  %v2020_v53 = vpop.f32.mrb[186].mxu1  ;;  %v2509_v38 = vpop.f32.mrb[186].mxu0  ;;  %v10838_v35 = vld [vmem:[#allocation119_spill] sm:$0xff] }
 0x32f   : > { %v9061_v39 = vadd.f32 %v2509_v38, %v2020_v53  ;;  %v3629_v53 = vmul.f32 0.020408163, %v8726_v10  ;;  %v2991_v38 = vmul.f32 0.020408163, %v8798_v5  ;;  %v6613_v10 = vld [vmem:[%s7219_s13 + $0x4d0] ss:$12 sps:$4 sm:$0xff]  }
 0x330   : > { %v5448_v48 = vadd.f32 %v10834_v17, %v4764_v55  ;;  %v9059_v17 = vsub.f32 %v8283_v8, %v2984_v26  ;;  %v6232_v55 = vpop.f32.mrb[187].mxu0  ;;  %6250 = vmatmul.mubr.msk.bf16.gmra.mrb[204].mxu0 %vm1443_vm1, %v6613_v10  ;;  %v10844_v10 = vld [vmem:[#allocation115_spill] sm:$0xff] }
 0x331   : > { %v9046_v45 = vpop.xlane.xlu0 %2841  ;;  %10837 = vst [vmem:[#allocation221_spill] sm:$0xff] %v9061_v39  ;;  %v6610_v55 = vld [vmem:[%s7219_s13 + $0x4cc] ss:$12 sps:$4 sm:$0xff]   ;;  %6253 = vmatprep.mubr.msk.bf16.mxu0 %vm6985_vm0, %v10673_v62 }
 0x332   : > { %5562 = vst.msk [vmem:[%s8984_s26 + $0x18] sm:$0xff] %vm2593_vm2, %v5448_v48  ;;  %v2022_v48 = vpop.f32.mrb[187].mxu1  ;;  %v3212_v28 = vmul.f32 %v9059_v17, %v9059_v17  ;;  %2055 = vmatprep.mubr.bf16.mxu1 %v6610_v55  ;;  %v10843_v55 = vld [vmem:[#allocation3_spill] sm:$0xff] }
 0x333   : > { %v2849_v48 = vsel %vm2593_vm2, %v8758_v54, 0.0 }
 0x335   : > { %v9050_v25 = vpop.xlane.xlu0 %3418 }
 0x336   : > { %10835 = vst [vmem:[#allocation4_spill] sm:$0xff] %v9050_v25 }
 0x338   : > { %4258 = vperm.xlu0 %6402, %v4090_v60   ;;  %v2025_v60 = vpop.f32.mrb[188].mxu1 }
 0x339   : > { %v9053_v43 = vpop.xlane.xlu0 %2847  ;;  %v2027_v8 = vpop.f32.mrb[189].mxu1 }
 0x33b   : > { %v2514_v16 = vpop.f32.mrb[188].mxu0 }
 0x33c   : > { %v9067_v9 = vadd.f32 %v2514_v16, %v2025_v60  ;;  %v6235_v26 = vpop.f32.mrb[189].mxu0 }
 0x33d   : > { %v9056_v0 = vpop.xlane.xlu0 %3424  ;;  %v6873_v26 = vld [vmem:[%s7073_s22 + $0x40] sm:$0xff] }
 0x33e   : > { %10836 = vst [vmem:[#allocation6_spill] sm:$0xff] %v9056_v0  ;;  %v10839_v0 = vld [vmem:[#allocation12_spill] sm:$0xff]  ;;  %10840 = vst [vmem:[#allocation119_spill] sm:$0xff] %v9067_v9 }
 0x345   : > { %v4239_v25 = vpop.permute.xlu0 %4238 }
 0x346   : > { %v4770_v41 = vmul.f32 %v4239_v25, %v10838_v35  ;;  %v3420_v35 = vsel %vm2593_vm2, %v3212_v28, 0.0  ;;  %v3857_v25 = vadd.f32 0.001, %v3629_v53 }
 0x348   : > { %v5454_v19 = vadd.f32 %v10839_v0, %v4770_v41  ;;  %6656 = vrsqrt.f32 %v3857_v25  ;;  %v9077_v0 = vsub.f32 %v8385_v57, %v2991_v38  ;;  %v6612_v41 = vld [vmem:[%s7219_s13 + $0x4c8] ss:$12 sps:$4 sm:$0xff]   ;;  %v3636_v57 = vmul.f32 0.020408163, %v8779_v4 }
 0x349   : > { %2056 = vmatmul.mubr.bf16.gmra.mrb[204].mxu1 %v6612_v41  ;;  %v10842_v38 = vld [vmem:[#allocation114_spill] sm:$0xff] }
 0x34a   : > { %5568 = vst.msk [vmem:[%s8984_s26 + $0x48] sm:$0xff] %vm2593_vm2, %v5454_v19  ;;  %10841 = vst [vmem:[#allocation12_spill] sm:$0xff] %v9077_v0  ;;  %v2864_v19 = vsel %vm2593_vm2, %v8935_v42, 0.0  ;;  %v3219_v5 = vmul.f32 %v9077_v0, %v9077_v0  ;;  %v3864_v16 = vadd.f32 0.001, %v3636_v57  ;;  %v10845_v57 = vld [vmem:[#allocation8_spill] sm:$0xff] }
 0x34b   : > { %3421 = vadd.xlane.f32.xlu1 %v3420_v35  ;;  %v10850_v0 = vld [vmem:[#allocation14_spill] sm:$0xff] }
 0x34c   : > { %v3441_v28 = vsel %vm2593_vm2, %v3219_v5, 0.0  ;;  %6658 = vrsqrt.f32 %v3864_v16 }
 0x34f   : > { %2850 = vadd.xlane.f32.xlu1 %v2849_v48 }
 0x352   : > { %v6657_v60 = vpop.eup %6656 }
 0x353   : > { %v4085_v53 = vmul.f32 %v6873_v26, %v6657_v60  ;;  %v6874_v60 = vld [vmem:[%s7073_s22 + $0x78] sm:$0xff] }
 0x356   : > { %v6659_v5 = vpop.eup %6658 }
 0x357   : > { %2865 = vadd.xlane.f32.xlu0 %v2864_v19  ;;  %v4092_v26 = vmul.f32 %v6874_v60, %v6659_v5 }
 0x35b   : > { %3442 = vadd.xlane.f32.xlu0 %v3441_v28 }
 0x35e   : > { %v9091_v8 = vpop.xlane.xlu1 %3409 }
 0x360   : > { %4233 = vperm.xlu1 %6403, %v4085_v53   ;;  %v2986_v53 = vmul.f32 0.020408163, %v8762_v21 }
 0x362   : > { %v9094_v35 = vpop.xlane.xlu1 %2838 }
 0x366   : > { %v4214_v25 = vpop.permute.xlu1 %4213 }
 0x367   : > { %v4765_v48 = vmul.f32 %v4214_v25, %v10842_v38  ;;  %v2028_v38 = vpop.f32.mrb[190].mxu1 }
 0x369   : > { %v5449_v4 = vadd.f32 %v10843_v55, %v4765_v48  ;;  %v2517_v48 = vpop.f32.mrb[190].mxu0  ;;  %v9111_v55 = vsub.f32 %v8309_v44, %v2986_v53 }
 0x36a   : > { %v4219_v41 = vpop.permute.xlu1 %4218 }
 0x36b   : > { %5563 = vst.msk [vmem:[%s8984_s26 + $0x20] sm:$0xff] %vm2593_vm2, %v5449_v4  ;;  %v4766_v19 = vmul.f32 %v4219_v41, %v10844_v10  ;;  %10847 = vst [vmem:[#allocation3_spill] sm:$0xff] %v9111_v55  ;;  %v9113_v4 = vadd.f32 %v2517_v48, %v2028_v38  ;;  %v2030_v41 = vpop.f32.mrb[191].mxu1  ;;  %v6236_v10 = vpop.f32.mrb[191].mxu0  ;;  %v3631_v38 = vmul.f32 0.020408163, %v8745_v18 }
 0x36c   : > { %v2993_v10 = vmul.f32 0.020408163, %v8822_v12  ;;  %v6617_v18 = vld [vmem:[%s7219_s13 + $0x4e8] ss:$12 sps:$4 sm:$0xff]  }
 0x36d   : > { %v5450_v28 = vadd.f32 %v10845_v57, %v4766_v19  ;;  %10848 = vst [vmem:[#allocation115_spill] sm:$0xff] %v9113_v4  ;;  %v10849_v57 = vld [vmem:[#allocation121_spill] sm:$0xff]  ;;  %v3859_v41 = vadd.f32 0.001, %v3631_v38  ;;  %6254 = vmatmul.mubr.msk.bf16.gmra.mrb[208].mxu0 %vm1443_vm1, %v6617_v18 }
 0x36e   : > { %6257 = vmatprep.mubr.msk.bf16.mxu0 %vm6985_vm0, %v10673_v62 }
 0x36f   : > { %5564 = vst.msk [vmem:[%s8984_s26 + $0x28] sm:$0xff] %vm2593_vm2, %v5450_v28  ;;  %v3214_v28 = vmul.f32 %v9111_v55, %v9111_v55  ;;  %6660 = vrsqrt.f32 %v3859_v41 }
 0x370   : > { %v2522_v21 = vpop.f32.mrb[192].mxu0 }
 0x371   : > { %4268 = vperm.xlu0 %6402, %v4092_v26   ;;  %v6239_v53 = vpop.f32.mrb[193].mxu0  ;;  %v3426_v48 = vsel %vm2593_vm2, %v3214_v28, 0.0 }
 0x372   : > { %v9105_v16 = vpop.xlane.xlu0 %2853 }
 0x376   : > { %v9108_v25 = vpop.xlane.xlu0 %3430 }
 0x377   : > { %10846 = vst [vmem:[#allocation114_spill] sm:$0xff] %v9108_v25 }
 0x378   : > { %v2033_v60 = vpop.f32.mrb[192].mxu1 }
 0x379   : > { %v2035_v26 = vpop.f32.mrb[193].mxu1  ;;  %v9119_v44 = vadd.f32 %v2522_v21, %v2033_v60  ;;  %v6661_v60 = vpop.eup %6660 }
 0x37a   : > { %v6875_v26 = vld [vmem:[%s7073_s22 + $0x50] sm:$0xff] }
 0x37b   : > { %10851 = vst [vmem:[#allocation8_spill] sm:$0xff] %v9119_v44  ;;  %v4087_v53 = vmul.f32 %v6875_v26, %v6661_v60  ;;  %v10856_v60 = vld [vmem:[#allocation10_spill] sm:$0xff] }
 0x37e   : > { %v4249_v19 = vpop.permute.xlu0 %4248 }
 0x37f   : > { %v4772_v5 = vmul.f32 %v4249_v19, %v10849_v57  ;;  %v2855_v19 = vsel %vm2593_vm2, %v8814_v58, 0.0  ;;  %v6614_v57 = vld [vmem:[%s7219_s13 + $0x4e4] ss:$12 sps:$4 sm:$0xff]  }
 0x380   : > { %2063 = vmatprep.mubr.bf16.mxu1 %v6614_v57  ;;  %v10854_v57 = vld [vmem:[#allocation5_spill] sm:$0xff] }
 0x381   : > { %v5456_v25 = vadd.f32 %v10850_v0, %v4772_v5  ;;  %v9129_v0 = vsub.f32 %v8416_v59, %v2993_v10  ;;  %v6616_v5 = vld [vmem:[%s7219_s13 + $0x4e0] ss:$12 sps:$4 sm:$0xff]   ;;  %v3638_v59 = vmul.f32 0.020408163, %v8796_v51  ;;  %v10853_v10 = vld [vmem:[#allocation116_spill] sm:$0xff] }
 0x382   : > { %2064 = vmatmul.mubr.bf16.gmra.mrb[208].mxu1 %v6616_v5 }
 0x383   : > { %5570 = vst.msk [vmem:[%s8984_s26 + $0x58] sm:$0xff] %vm2593_vm2, %v5456_v25  ;;  %10852 = vst [vmem:[#allocation121_spill] sm:$0xff] %v9129_v0  ;;  %v2870_v25 = vsel %vm2593_vm2, %v9003_v36, 0.0  ;;  %v3221_v12 = vmul.f32 %v9129_v0, %v9129_v0  ;;  %v3866_v21 = vadd.f32 0.001, %v3638_v59  ;;  %v6876_v59 = vld [vmem:[%s7073_s22 + $0x88] sm:$0xff] }
 0x384   : > { %3427 = vadd.xlane.f32.xlu1 %v3426_v48 }
 0x385   : > { %v3447_v28 = vsel %vm2593_vm2, %v3221_v12, 0.0  ;;  %6662 = vrsqrt.f32 %v3866_v21 }
 0x388   : > { %2856 = vadd.xlane.f32.xlu1 %v2855_v19 }
 0x38f   : > { %v6663_v51 = vpop.eup %6662 }
 0x390   : > { %2871 = vadd.xlane.f32.xlu0 %v2870_v25  ;;  %v10855_v25 = vld [vmem:[#allocation117_spill] sm:$0xff] }
 0x394   : > { %3448 = vadd.xlane.f32.xlu0 %v3447_v28  ;;  %v4094_v28 = vmul.f32 %v6876_v59, %v6663_v51  ;;  %v10861_v59 = vld [vmem:[#allocation123_spill] sm:$0xff] }
 0x399   : > { %4243 = vperm.xlu1 %6403, %v4087_v53   ;;  %v2988_v53 = vmul.f32 0.020408163, %v8773_v34 }
 0x39b   : > { %v9144_v38 = vpop.xlane.xlu1 %3415 }
 0x39f   : > { %v9146_v48 = vpop.xlane.xlu1 %2844 }
 0x3a3   : > { %v4224_v41 = vpop.permute.xlu1 %4223 }
 0x3a4   : > { %v4767_v19 = vmul.f32 %v4224_v41, %v10853_v10  ;;  %v2036_v10 = vpop.f32.mrb[194].mxu1 }
 0x3a5   : > { %v2038_v51 = vpop.f32.mrb[195].mxu1 }
 0x3a6   : > { %v5451_v5 = vadd.f32 %v10854_v57, %v4767_v19  ;;  %v2525_v19 = vpop.f32.mrb[194].mxu0  ;;  %v10858_v57 = vld [vmem:[#allocation124_spill] sm:$0xff] }
 0x3a7   : > { %v4229_v18 = vpop.permute.xlu1 %4228 }
 0x3a8   : > { %5565 = vst.msk [vmem:[%s8984_s26 + $0x30] sm:$0xff] %vm2593_vm2, %v5451_v5  ;;  %v4768_v12 = vmul.f32 %v4229_v18, %v10855_v25  ;;  %v9163_v5 = vsub.f32 %v10858_v57, %v2988_v53  ;;  %v9165_v18 = vadd.f32 %v2525_v19, %v2036_v10  ;;  %v6240_v25 = vpop.f32.mrb[195].mxu0  ;;  %v3633_v19 = vmul.f32 0.020408163, %v8760_v46  ;;  %v6621_v46 = vld [vmem:[%s7219_s13 + $0x500] ss:$12 sps:$4 sm:$0xff]  }
 0x3a9   : > { %v2995_v25 = vmul.f32 0.020408163, %v8843_v14  ;;  %6258 = vmatmul.mubr.msk.bf16.gmra.mrb[212].mxu0 %vm1443_vm1, %v6621_v46  ;;  %v6878_v46 = vld [vmem:[%s7073_s22 + $0x98] sm:$0xff] }
 0x3aa   : > { %v5452_v26 = vadd.f32 %v10856_v60, %v4768_v12  ;;  %4278 = vperm.xlu0 %6402, %v4094_v28   ;;  %10859 = vst [vmem:[#allocation116_spill] sm:$0xff] %v9163_v5  ;;  %10860 = vst [vmem:[#allocation5_spill] sm:$0xff] %v9165_v18  ;;  %v3216_v60 = vmul.f32 %v9163_v5, %v9163_v5  ;;  %v3861_v51 = vadd.f32 0.001, %v3633_v19  ;;  %6261 = vmatprep.mubr.msk.bf16.mxu0 %vm6985_vm0, %v10673_v62  ;;  %v6877_v19 = vld [vmem:[%s7073_s22 + $0x60] sm:$0xff] }
 0x3ab   : > { %v9157_v21 = vpop.xlane.xlu0 %2859 }
 0x3ac   : > { %5566 = vst.msk [vmem:[%s8984_s26 + $0x38] sm:$0xff] %vm2593_vm2, %v5452_v26  ;;  %v2041_v26 = vpop.f32.mrb[196].mxu1  ;;  %v3432_v57 = vsel %vm2593_vm2, %v3216_v60, 0.0  ;;  %6664 = vrsqrt.f32 %v3861_v51  ;;  %v3640_v60 = vmul.f32 0.020408163, %v8820_v29 }
 0x3ad   : > { %v2043_v0 = vpop.f32.mrb[197].mxu1 }
 0x3ae   : > { %v10864_v0 = vld [vmem:[#allocation136_spill] sm:$0xff] }
 0x3af   : > { %v9160_v41 = vpop.xlane.xlu0 %3436 }
 0x3b0   : > { %10857 = vst [vmem:[#allocation14_spill] sm:$0xff] %v9160_v41  ;;  %v2530_v34 = vpop.f32.mrb[196].mxu0  ;;  %v10862_v41 = vld [vmem:[#allocation16_spill] sm:$0xff] }
 0x3b1   : > { %v9171_v53 = vadd.f32 %v2530_v34, %v2041_v26  ;;  %v6243_v10 = vpop.f32.mrb[197].mxu0 }
 0x3b2   : > { %v3868_v10 = vadd.f32 0.001, %v3640_v60 }
 0x3b3   : > { %10863 = vst [vmem:[#allocation117_spill] sm:$0xff] %v9171_v53 }
 0x3b4   : > { %6666 = vrsqrt.f32 %v3868_v10 }
 0x3b6   : > { %v6665_v34 = vpop.eup %6664 }
 0x3b7   : > { %v4259_v12 = vpop.permute.xlu0 %4258 }
 0x3b8   : > { %v4774_v28 = vmul.f32 %v4259_v12, %v10861_v59  ;;  %v2861_v12 = vsel %vm2593_vm2, %v8926_v47, 0.0  ;;  %v6618_v59 = vld [vmem:[%s7219_s13 + $0x4fc] ss:$12 sps:$4 sm:$0xff]  }
 0x3b9   : > { %2071 = vmatprep.mubr.bf16.mxu1 %v6618_v59  ;;  %v10866_v59 = vld [vmem:[#allocation118_spill] sm:$0xff] }
 0x3ba   : > { %v5458_v55 = vadd.f32 %v10862_v41, %v4774_v28  ;;  %v9181_v41 = vsub.f32 %v10864_v0, %v2995_v25  ;;  %v6620_v28 = vld [vmem:[%s7219_s13 + $0x4f8] ss:$12 sps:$4 sm:$0xff]   ;;  %v10874_v47 = vld [vmem:[#allocation18_spill] sm:$0xff] }
 0x3bb   : > { %2072 = vmatmul.mubr.bf16.gmra.mrb[212].mxu1 %v6620_v28 }
 0x3bc   : > { %5572 = vst.msk [vmem:[%s8984_s26 + $0x68] sm:$0xff] %vm2593_vm2, %v5458_v55  ;;  %10865 = vst [vmem:[#allocation10_spill] sm:$0xff] %v9181_v41  ;;  %v2876_v55 = vsel %vm2593_vm2, %v9067_v9, 0.0  ;;  %v3223_v14 = vmul.f32 %v9181_v41, %v9181_v41  ;;  %v10870_v41 = vld [vmem:[#allocation127_spill] sm:$0xff] }
 0x3bd   : > { %3433 = vadd.xlane.f32.xlu1 %v3432_v57  ;;  %v4089_v57 = vmul.f32 %v6877_v19, %v6665_v34  ;;  %v2044_v19 = vpop.f32.mrb[198].mxu1 }
 0x3be   : > { %v3453_v26 = vsel %vm2593_vm2, %v3223_v14, 0.0 }
 0x3c1   : > { %2862 = vadd.xlane.f32.xlu1 %v2861_v12  ;;  %v6667_v12 = vpop.eup %6666 }
 0x3c2   : > { %v4096_v29 = vmul.f32 %v6878_v46, %v6667_v12  ;;  %v2046_v12 = vpop.f32.mrb[199].mxu1  ;;  %v10873_v46 = vld [vmem:[#allocation126_spill] sm:$0xff] }
 0x3c9   : > { %2877 = vadd.xlane.f32.xlu0 %v2876_v55  ;;  %v10867_v55 = vld [vmem:[#allocation7_spill] sm:$0xff] }
 0x3cd   : > { %3454 = vadd.xlane.f32.xlu0 %v3453_v26  ;;  %v10868_v26 = vld [vmem:[#allocation186_spill] sm:$0xff] }
 0x3ce   : > { %v2990_v34 = vmul.f32 0.020408163, %v10868_v26 }
 0x3d0   : > { %v9211_v5 = vsub.f32 %v10870_v41, %v2990_v34 }
 0x3d2   : > { %4253 = vperm.xlu1 %6403, %v4089_v57   ;;  %v2533_v57 = vpop.f32.mrb[198].mxu0  ;;  %10871 = vst [vmem:[#allocation123_spill] sm:$0xff] %v9211_v5 }
 0x3d8   : > { %v9196_v51 = vpop.xlane.xlu1 %3421 }
 0x3dc   : > { %v9198_v25 = vpop.xlane.xlu1 %2850 }
 0x3e0   : > { %v4234_v0 = vpop.permute.xlu1 %4233 }
 0x3e1   : > { %v4769_v28 = vmul.f32 %v4234_v0, %v10866_v59  ;;  %v9213_v0 = vadd.f32 %v2533_v57, %v2044_v19  ;;  %v6244_v59 = vpop.f32.mrb[199].mxu0  ;;  %v10876_v19 = vld [vmem:[#allocation182_spill] sm:$0xff] }
 0x3e2   : > { %v2538_v26 = vpop.f32.mrb[200].mxu0  ;;  %v3635_v57 = vmul.f32 0.020408163, %v10876_v19 }
 0x3e3   : > { %v5453_v14 = vadd.f32 %v10867_v55, %v4769_v28  ;;  %4288 = vperm.xlu0 %6402, %v4096_v29   ;;  %10872 = vst [vmem:[#allocation16_spill] sm:$0xff] %v9213_v0  ;;  %v3218_v55 = vmul.f32 %v9211_v5, %v9211_v5  ;;  %v6247_v34 = vpop.f32.mrb[201].mxu0  ;;  %v10883_v5 = vld [vmem:[#allocation130_spill] sm:$0xff] }
 0x3e4   : > { %v9205_v60 = vpop.xlane.xlu0 %2865  ;;  %v3863_v59 = vadd.f32 0.001, %v3635_v57 }
 0x3e5   : > { %5567 = vst.msk [vmem:[%s8984_s26 + $0x40] sm:$0xff] %vm2593_vm2, %v5453_v14  ;;  %v2049_v14 = vpop.f32.mrb[200].mxu1  ;;  %v3438_v12 = vsel %vm2593_vm2, %v3218_v55, 0.0  ;;  %v3642_v55 = vmul.f32 0.020408163, %v8841_v27 }
 0x3e6   : > { %v9219_v41 = vadd.f32 %v2538_v26, %v2049_v14  ;;  %6668 = vrsqrt.f32 %v3863_v59  ;;  %v6624_v14 = vld [vmem:[%s7219_s13 + $0x510] ss:$12 sps:$4 sm:$0xff]   ;;  %v6625_v26 = vld [vmem:[%s7219_s13 + $0x518] ss:$12 sps:$4 sm:$0xff]  }
 0x3e7   : > { %6262 = vmatmul.mubr.msk.bf16.gmra.mrb[216].mxu0 %vm1443_vm1, %v6625_v26  ;;  %v3870_v57 = vadd.f32 0.001, %v3642_v55 }
 0x3e8   : > { %v9208_v10 = vpop.xlane.xlu0 %3442  ;;  %10875 = vst [vmem:[#allocation136_spill] sm:$0xff] %v9219_v41  ;;  %6265 = vmatprep.mubr.msk.bf16.mxu0 %vm6985_vm0, %v10673_v62 }
 0x3e9   : > { %10869 = vst [vmem:[#allocation124_spill] sm:$0xff] %v9208_v10  ;;  %v2051_v10 = vpop.f32.mrb[201].mxu1  ;;  %6670 = vrsqrt.f32 %v3870_v57 }
 0x3ea   : > { %v10877_v10 = vld [vmem:[#allocation140_spill] sm:$0xff] }
 0x3f0   : > { %v4269_v28 = vpop.permute.xlu0 %4268  ;;  %v6669_v19 = vpop.eup %6668 }
 0x3f1   : > { %v4776_v29 = vmul.f32 %v4269_v28, %v10873_v46  ;;  %v2997_v28 = vmul.f32 0.020408163, %v8860_v52  ;;  %v2867_v46 = vsel %vm2593_vm2, %v8999_v49, 0.0 }
 0x3f3   : > { %v5460_v9 = vadd.f32 %v10874_v47, %v4776_v29  ;;  %v9229_v47 = vsub.f32 %v10877_v10, %v2997_v28  ;;  %v6622_v29 = vld [vmem:[%s7219_s13 + $0x514] ss:$12 sps:$4 sm:$0xff]   ;;  %v6671_v10 = vpop.eup %6670 }
 0x3f4   : > { %2079 = vmatprep.mubr.bf16.mxu1 %v6622_v29 }
 0x3f5   : > { %5574 = vst.msk [vmem:[%s8984_s26 + $0x78] sm:$0xff] %vm2593_vm2, %v5460_v9  ;;  %10878 = vst [vmem:[#allocation118_spill] sm:$0xff] %v9229_v47  ;;  %v2882_v9 = vsel %vm2593_vm2, %v9119_v44, 0.0  ;;  %2080 = vmatmul.mubr.bf16.gmra.mrb[216].mxu1 %v6624_v14  ;;  %v3225_v52 = vmul.f32 %v9229_v47, %v9229_v47  ;;  %v10879_v14 = vld [vmem:[#allocation120_spill] sm:$0xff]  ;;  %v10880_v47 = vld [vmem:[#allocation9_spill] sm:$0xff] }
 0x3f6   : > { %3439 = vadd.xlane.f32.xlu1 %v3438_v12  ;;  %v6879_v12 = vld [vmem:[%s7073_s22 + $0x70] sm:$0xff] }
 0x3f7   : > { %v3459_v34 = vsel %vm2593_vm2, %v3225_v52, 0.0  ;;  %v4091_v59 = vmul.f32 %v6879_v12, %v6669_v19  ;;  %v2052_v12 = vpop.f32.mrb[202].mxu1 }
 0x3fa   : > { %2868 = vadd.xlane.f32.xlu1 %v2867_v46 }
 0x402   : > { %2883 = vadd.xlane.f32.xlu0 %v2882_v9  ;;  %v6880_v9 = vld [vmem:[%s7073_s22 + $0xa8] sm:$0xff] }
 0x403   : > { %v4098_v27 = vmul.f32 %v6880_v9, %v6671_v10  ;;  %v2054_v10 = vpop.f32.mrb[203].mxu1 }
 0x406   : > { %3460 = vadd.xlane.f32.xlu0 %v3459_v34  ;;  %v10881_v34 = vld [vmem:[#allocation189_spill] sm:$0xff] }
 0x407   : > { %v2992_v19 = vmul.f32 0.020408163, %v10881_v34 }
 0x409   : > { %v9259_v49 = vsub.f32 %v10883_v5, %v2992_v19  ;;  %v10888_v19 = vld [vmem:[#allocation20_spill] sm:$0xff] }
 0x40b   : > { %4263 = vperm.xlu1 %6403, %v4091_v59   ;;  %v2541_v59 = vpop.f32.mrb[202].mxu0  ;;  %10884 = vst [vmem:[#allocation186_spill] sm:$0xff] %v9259_v49  ;;  %v3220_v5 = vmul.f32 %v9259_v49, %v9259_v49 }
 0x411   : > { %v9244_v28 = vpop.xlane.xlu1 %3427 }
 0x415   : > { %v9246_v46 = vpop.xlane.xlu1 %2856 }
 0x419   : > { %v4244_v29 = vpop.permute.xlu1 %4243 }
 0x41a   : > { %v4771_v26 = vmul.f32 %v4244_v29, %v10879_v14  ;;  %v9261_v29 = vadd.f32 %v2541_v59, %v2052_v12  ;;  %v6248_v14 = vpop.f32.mrb[203].mxu0  ;;  %v10889_v59 = vld [vmem:[#allocation185_spill] sm:$0xff] }
 0x41b   : > { %v3637_v10 = vmul.f32 0.020408163, %v10889_v59  ;;  %v3444_v14 = vsel %vm2593_vm2, %v3220_v5, 0.0  ;;  %v3644_v5 = vmul.f32 0.020408163, %v8858_v11 }
 0x41c   : > { %v5455_v52 = vadd.f32 %v10880_v47, %v4771_v26  ;;  %4298 = vperm.xlu0 %6402, %v4098_v27   ;;  %10885 = vst [vmem:[#allocation127_spill] sm:$0xff] %v9261_v29  ;;  %v2546_v47 = vpop.f32.mrb[204].mxu0  ;;  %v2057_v26 = vpop.f32.mrb[204].mxu1 }
 0x41d   : > { %v9253_v55 = vpop.xlane.xlu0 %2871  ;;  %v6251_v9 = vpop.f32.mrb[205].mxu0 }
 0x41e   : > { %5569 = vst.msk [vmem:[%s8984_s26 + $0x50] sm:$0xff] %vm2593_vm2, %v5455_v52  ;;  %v9263_v52 = vadd.f32 %v2546_v47, %v2057_v26  ;;  %v2059_v34 = vpop.f32.mrb[205].mxu1  ;;  %v3865_v9 = vadd.f32 0.001, %v3637_v10  ;;  %v2873_v26 = vsel %vm2593_vm2, %v9061_v39, 0.0 }
 0x41f   : > { %v2999_v47 = vmul.f32 0.020408163, %v8882_v24  ;;  %v6628_v34 = vld [vmem:[%s7219_s13 + $0x528] ss:$12 sps:$4 sm:$0xff]  }
 0x420   : > { %10886 = vst [vmem:[#allocation126_spill] sm:$0xff] %v9263_v52  ;;  %6672 = vrsqrt.f32 %v3865_v9  ;;  %v6881_v9 = vld [vmem:[%s7073_s22 + $0x80] sm:$0xff] }
 0x421   : > { %v9256_v57 = vpop.xlane.xlu0 %3448 }
 0x422   : > { %10882 = vst [vmem:[#allocation7_spill] sm:$0xff] %v9256_v57  ;;  %v10887_v57 = vld [vmem:[#allocation129_spill] sm:$0xff] }
 0x429   : > { %v4279_v27 = vpop.permute.xlu0 %4278 }
 0x42a   : > { %v4778_v44 = vmul.f32 %v4279_v27, %v10887_v57  ;;  %v10890_v57 = vld [vmem:[#allocation144_spill] sm:$0xff]  ;;  %v6673_v10 = vpop.eup %6672 }
 0x42b   : > { %v9277_v27 = vsub.f32 %v10890_v57, %v2999_v47  ;;  %v4093_v47 = vmul.f32 %v6881_v9, %v6673_v10  ;;  %v2549_v9 = vpop.f32.mrb[206].mxu0 }
 0x42c   : > { %v5462_v12 = vadd.f32 %v10888_v19, %v4778_v44  ;;  %v6626_v44 = vld [vmem:[%s7219_s13 + $0x52c] ss:$12 sps:$4 sm:$0xff]   ;;  %v6629_v19 = vld [vmem:[%s7219_s13 + $0x530] ss:$12 sps:$4 sm:$0xff]  }
 0x42d   : > { %10891 = vst [vmem:[#allocation18_spill] sm:$0xff] %v9277_v27  ;;  %2087 = vmatprep.mubr.bf16.mxu1 %v6626_v44  ;;  %6266 = vmatmul.mubr.msk.bf16.gmra.mrb[220].mxu0 %vm1443_vm1, %v6629_v19  ;;  %v3227_v24 = vmul.f32 %v9277_v27, %v9277_v27  ;;  %v10893_v27 = vld [vmem:[#allocation11_spill] sm:$0xff] }
 0x42e   : > { %5576 = vst.msk [vmem:[%s8984_s26 + $0x88] sm:$0xff] %vm2593_vm2, %v5462_v12  ;;  %v2888_v12 = vsel %vm2593_vm2, %v9171_v53, 0.0  ;;  %2088 = vmatmul.mubr.bf16.gmra.mrb[220].mxu1 %v6628_v34  ;;  %6269 = vmatprep.mubr.msk.bf16.mxu0 %vm6985_vm0, %v10673_v62  ;;  %v10892_v34 = vld [vmem:[#allocation122_spill] sm:$0xff] }
 0x42f   : > { %3445 = vadd.xlane.f32.xlu1 %v3444_v14  ;;  %v3465_v59 = vsel %vm2593_vm2, %v3227_v24, 0.0  ;;  %v3872_v14 = vadd.f32 0.001, %v3644_v5 }
 0x431   : > { %6674 = vrsqrt.f32 %v3872_v14  ;;  %v2060_v14 = vpop.f32.mrb[206].mxu1 }
 0x433   : > { %2874 = vadd.xlane.f32.xlu1 %v2873_v26 }
 0x43b   : > { %2889 = vadd.xlane.f32.xlu0 %v2888_v12  ;;  %v6675_v57 = vpop.eup %6674  ;;  %v6882_v12 = vld [vmem:[%s7073_s22 + $0xb8] sm:$0xff] }
 0x43c   : > { %v4100_v11 = vmul.f32 %v6882_v12, %v6675_v57  ;;  %v2062_v57 = vpop.f32.mrb[207].mxu1 }
 0x43f   : > { %3466 = vadd.xlane.f32.xlu0 %v3465_v59  ;;  %v2994_v59 = vmul.f32 0.020408163, %v8832_v56 }
 0x444   : > { %4273 = vperm.xlu1 %6403, %v4093_v47   ;;  %v10895_v47 = vld [vmem:[#allocation133_spill] sm:$0xff] }
 0x445   : > { %v9307_v49 = vsub.f32 %v10895_v47, %v2994_v59  ;;  %v10900_v47 = vld [vmem:[#allocation22_spill] sm:$0xff] }
 0x447   : > { %10896 = vst [vmem:[#allocation140_spill] sm:$0xff] %v9307_v49  ;;  %v3222_v59 = vmul.f32 %v9307_v49, %v9307_v49  ;;  %v10906_v49 = vld [vmem:[#allocation13_spill] sm:$0xff] }
 0x44a   : > { %v9292_v26 = vpop.xlane.xlu1 %3433 }
 0x44e   : > { %v9294_v62 = vpop.xlane.xlu1 %2862 }
 0x452   : > { %v4254_v44 = vpop.permute.xlu1 %4253 }
 0x453   : > { %v4773_v19 = vmul.f32 %v4254_v44, %v10892_v34  ;;  %v9309_v44 = vadd.f32 %v2549_v9, %v2060_v14  ;;  %v6252_v34 = vpop.f32.mrb[207].mxu0  ;;  %v10901_v9 = vld [vmem:[#allocation188_spill] sm:$0xff] }
 0x454   : > { %v3639_v57 = vmul.f32 0.020408163, %v10901_v9  ;;  %v3450_v34 = vsel %vm2593_vm2, %v3222_v59, 0.0  ;;  %v3646_v59 = vmul.f32 0.020408163, %v8880_v1 }
 0x455   : > { %v5457_v24 = vadd.f32 %v10893_v27, %v4773_v19  ;;  %4308 = vperm.xlu0 %6402, %v4100_v11   ;;  %10897 = vst [vmem:[#allocation120_spill] sm:$0xff] %v9309_v44  ;;  %v2554_v27 = vpop.f32.mrb[208].mxu0  ;;  %v2065_v19 = vpop.f32.mrb[208].mxu1 }
 0x456   : > { %v9301_v5 = vpop.xlane.xlu0 %2877  ;;  %v6255_v12 = vpop.f32.mrb[209].mxu0 }
 0x457   : > { %5571 = vst.msk [vmem:[%s8984_s26 + $0x60] sm:$0xff] %vm2593_vm2, %v5457_v24  ;;  %v9311_v24 = vadd.f32 %v2554_v27, %v2065_v19  ;;  %v2067_v56 = vpop.f32.mrb[209].mxu1  ;;  %v3867_v12 = vadd.f32 0.001, %v3639_v57  ;;  %v2879_v19 = vsel %vm2593_vm2, %v9113_v4, 0.0 }
 0x458   : > { %v3001_v27 = vmul.f32 0.020408163, %v8891_v3  ;;  %v6632_v56 = vld [vmem:[%s7219_s13 + $0x540] ss:$12 sps:$4 sm:$0xff]  }
 0x459   : > { %10898 = vst [vmem:[#allocation9_spill] sm:$0xff] %v9311_v24  ;;  %6676 = vrsqrt.f32 %v3867_v12  ;;  %v6883_v12 = vld [vmem:[%s7073_s22 + $0x90] sm:$0xff] }
 0x45a   : > { %v9304_v10 = vpop.xlane.xlu0 %3454 }
 0x45b   : > { %10894 = vst [vmem:[#allocation182_spill] sm:$0xff] %v9304_v10  ;;  %v10899_v10 = vld [vmem:[#allocation132_spill] sm:$0xff] }
 0x462   : > { %v4289_v11 = vpop.permute.xlu0 %4288 }
 0x463   : > { %v4780_v39 = vmul.f32 %v4289_v11, %v10899_v10  ;;  %v10902_v10 = vld [vmem:[#allocation148_spill] sm:$0xff]  ;;  %v6677_v57 = vpop.eup %6676 }
 0x464   : > { %v9325_v11 = vsub.f32 %v10902_v10, %v3001_v27  ;;  %v4095_v27 = vmul.f32 %v6883_v12, %v6677_v57  ;;  %v2557_v12 = vpop.f32.mrb[210].mxu0 }
 0x465   : > { %v5464_v14 = vadd.f32 %v10900_v47, %v4780_v39  ;;  %v6630_v39 = vld [vmem:[%s7219_s13 + $0x544] ss:$12 sps:$4 sm:$0xff]   ;;  %v6633_v47 = vld [vmem:[%s7219_s13 + $0x548] ss:$12 sps:$4 sm:$0xff]  }
 0x466   : > { %10903 = vst [vmem:[#allocation189_spill] sm:$0xff] %v9325_v11  ;;  %2095 = vmatprep.mubr.bf16.mxu1 %v6630_v39  ;;  %6270 = vmatmul.mubr.msk.bf16.gmra.mrb[224].mxu0 %vm1443_vm1, %v6633_v47  ;;  %v3229_v3 = vmul.f32 %v9325_v11, %v9325_v11  ;;  %v10905_v47 = vld [vmem:[#allocation125_spill] sm:$0xff]  ;;  %v6884_v11 = vld [vmem:[%s7073_s22 + $0xc8] sm:$0xff] }
 0x467   : > { %5578 = vst.msk [vmem:[%s8984_s26 + $0x98] sm:$0xff] %vm2593_vm2, %v5464_v14  ;;  %v2894_v14 = vsel %vm2593_vm2, %v9219_v41, 0.0  ;;  %2096 = vmatmul.mubr.bf16.gmra.mrb[224].mxu1 %v6632_v56 }
 0x468   : > { %3451 = vadd.xlane.f32.xlu1 %v3450_v34  ;;  %v3471_v9 = vsel %vm2593_vm2, %v3229_v3, 0.0  ;;  %v3874_v34 = vadd.f32 0.001, %v3646_v59 }
 0x46a   : > { %6678 = vrsqrt.f32 %v3874_v34  ;;  %v2068_v34 = vpop.f32.mrb[210].mxu1 }
 0x46c   : > { %2880 = vadd.xlane.f32.xlu1 %v2879_v19 }
 0x474   : > { %2895 = vadd.xlane.f32.xlu0 %v2894_v14  ;;  %v6679_v39 = vpop.eup %6678 }
 0x475   : > { %v4102_v1 = vmul.f32 %v6884_v11, %v6679_v39  ;;  %v2070_v11 = vpop.f32.mrb[211].mxu1  ;;  %v6256_v39 = vpop.f32.mrb[211].mxu0 }
 0x476   : > { %v10915_v11 = vld [vmem:[#allocation152_spill] sm:$0xff] }
 0x478   : > { %3472 = vadd.xlane.f32.xlu0 %v3471_v9  ;;  %v2996_v9 = vmul.f32 0.020408163, %v8851_v15  ;;  %v10913_v15 = vld [vmem:[#allocation135_spill] sm:$0xff] }
 0x47d   : > { %4283 = vperm.xlu1 %6403, %v4095_v27   ;;  %v10909_v27 = vld [vmem:[#allocation137_spill] sm:$0xff] }
 0x47e   : > { %v9353_v4 = vsub.f32 %v10909_v27, %v2996_v9  ;;  %v3641_v9 = vmul.f32 0.020408163, %v8830_v30  ;;  %v3003_v27 = vmul.f32 0.020408163, %v8899_v32  ;;  %v2900_v30 = vsel %vm2593_vm2, %v9263_v52, 0.0 }
 0x480   : > { %10910 = vst [vmem:[#allocation185_spill] sm:$0xff] %v9353_v4  ;;  %v9371_v39 = vsub.f32 %v10915_v11, %v3003_v27  ;;  %v6886_v27 = vld [vmem:[%s7073_s22 + $0xd8] sm:$0xff] }
 0x482   : > { %10916 = vst [vmem:[#allocation11_spill] sm:$0xff] %v9371_v39 }
 0x483   : > { %v9338_v19 = vpop.xlane.xlu1 %3439 }
 0x487   : > { %v9340_v10 = vpop.xlane.xlu1 %2868 }
 0x488   : > { %10904 = vst [vmem:[#allocation130_spill] sm:$0xff] %v9340_v10  ;;  %v10914_v10 = vld [vmem:[#allocation24_spill] sm:$0xff] }
 0x48b   : > { %v4264_v56 = vpop.permute.xlu1 %4263 }
 0x48c   : > { %v4775_v14 = vmul.f32 %v4264_v56, %v10905_v47  ;;  %v9355_v56 = vadd.f32 %v2557_v12, %v2068_v34  ;;  %v3869_v12 = vadd.f32 0.001, %v3641_v9 }
 0x48e   : > { %v5459_v3 = vadd.f32 %v10906_v49, %v4775_v14  ;;  %4318 = vperm.xlu0 %6402, %v4102_v1   ;;  %10911 = vst [vmem:[#allocation144_spill] sm:$0xff] %v9355_v56  ;;  %v2562_v49 = vpop.f32.mrb[212].mxu0  ;;  %v2073_v47 = vpop.f32.mrb[212].mxu1  ;;  %6680 = vrsqrt.f32 %v3869_v12 }
 0x48f   : > { %v9347_v59 = vpop.xlane.xlu0 %2883  ;;  %v6259_v14 = vpop.f32.mrb[213].mxu0 }
 0x490   : > { %5573 = vst.msk [vmem:[%s8984_s26 + $0x70] sm:$0xff] %vm2593_vm2, %v5459_v3  ;;  %10907 = vst [vmem:[#allocation129_spill] sm:$0xff] %v9347_v59  ;;  %v9357_v3 = vadd.f32 %v2562_v49, %v2073_v47  ;;  %v2075_v41 = vpop.f32.mrb[213].mxu1  ;;  %v6885_v49 = vld [vmem:[%s7073_s22 + $0xa0] sm:$0xff] }
 0x491   : > { %v2885_v41 = vsel %vm2593_vm2, %v9165_v18, 0.0  ;;  %v10926_v18 = vld [vmem:[#allocation26_spill] sm:$0xff] }
 0x492   : > { %10912 = vst [vmem:[#allocation122_spill] sm:$0xff] %v9357_v3 }
 0x493   : > { %v9350_v57 = vpop.xlane.xlu0 %3460 }
 0x494   : > { %10908 = vst [vmem:[#allocation20_spill] sm:$0xff] %v9350_v57  ;;  %v3224_v57 = vmul.f32 %v9353_v4, %v9353_v4 }
 0x496   : > { %v3456_v34 = vsel %vm2593_vm2, %v3224_v57, 0.0 }
 0x49b   : > { %v4299_v1 = vpop.permute.xlu0 %4298 }
 0x49c   : > { %v4782_v53 = vmul.f32 %v4299_v1, %v10913_v15 }
 0x49e   : > { %v5466_v59 = vadd.f32 %v10914_v10, %v4782_v53  ;;  %v3231_v53 = vmul.f32 %v9371_v39, %v9371_v39  ;;  %v3648_v10 = vmul.f32 0.020408163, %v8889_v22 }
 0x4a0   : > { %5580 = vst.msk [vmem:[%s8984_s26 + $0xa8] sm:$0xff] %vm2593_vm2, %v5466_v59  ;;  %v3477_v32 = vsel %vm2593_vm2, %v3231_v53, 0.0  ;;  %v6681_v59 = vpop.eup %6680  ;;  %v3876_v57 = vadd.f32 0.001, %v3648_v10  ;;  %v10920_v53 = vld [vmem:[#allocation196_spill] sm:$0xff] }
 0x4a1   : > { %3457 = vadd.xlane.f32.xlu1 %v3456_v34  ;;  %v4097_v47 = vmul.f32 %v6885_v49, %v6681_v59  ;;  %v10918_v34 = vld [vmem:[#allocation128_spill] sm:$0xff]  ;;  %v2998_v10 = vmul.f32 0.020408163, %v10920_v53  ;;  %v2076_v59 = vpop.f32.mrb[214].mxu1  ;;  %v10922_v49 = vld [vmem:[#allocation141_spill] sm:$0xff]  ;;  %v10925_v53 = vld [vmem:[#allocation139_spill] sm:$0xff] }
 0x4a2   : > { %6682 = vrsqrt.f32 %v3876_v57  ;;  %v2565_v57 = vpop.f32.mrb[214].mxu0 }
 0x4a5   : > { %2886 = vadd.xlane.f32.xlu1 %v2885_v41  ;;  %v10919_v41 = vld [vmem:[#allocation15_spill] sm:$0xff] }
 0x4ac   : > { %v6683_v15 = vpop.eup %6682 }
 0x4ad   : > { %2901 = vadd.xlane.f32.xlu0 %v2900_v30  ;;  %v4104_v22 = vmul.f32 %v6886_v27, %v6683_v15  ;;  %v2078_v15 = vpop.f32.mrb[215].mxu1 }
 0x4ae   : > { %v10928_v15 = vld [vmem:[#allocation205_spill] sm:$0xff] }
 0x4b1   : > { %3478 = vadd.xlane.f32.xlu0 %v3477_v32 }
 0x4b6   : > { %4293 = vperm.xlu1 %6403, %v4097_v47   ;;  %v9395_v47 = vsub.f32 %v10922_v49, %v2998_v10  ;;  %v10927_v10 = vld [vmem:[#allocation193_spill] sm:$0xff] }
 0x4b7   : > { %v3643_v49 = vmul.f32 0.020408163, %v10927_v10  ;;  %v6887_v10 = vld [vmem:[%s7073_s22 + $0xb0] sm:$0xff] }
 0x4b8   : > { %10923 = vst [vmem:[#allocation22_spill] sm:$0xff] %v9395_v47 }
 0x4bc   : > { %v9380_v14 = vpop.xlane.xlu1 %3445 }
 0x4c0   : > { %v9382_v1 = vpop.xlane.xlu1 %2874 }
 0x4c1   : > { %10917 = vst [vmem:[#allocation133_spill] sm:$0xff] %v9382_v1 }
 0x4c4   : > { %v4274_v9 = vpop.permute.xlu1 %4273 }
 0x4c5   : > { %v4777_v12 = vmul.f32 %v4274_v9, %v10918_v34  ;;  %v9397_v9 = vadd.f32 %v2565_v57, %v2076_v59  ;;  %v6260_v34 = vpop.f32.mrb[215].mxu0  ;;  %v3871_v57 = vadd.f32 0.001, %v3643_v49 }
 0x4c6   : > { %v3005_v34 = vmul.f32 0.020408163, %v10928_v15 }
 0x4c7   : > { %v5461_v11 = vadd.f32 %v10919_v41, %v4777_v12  ;;  %4328 = vperm.xlu0 %6402, %v4104_v22   ;;  %10924 = vst [vmem:[#allocation188_spill] sm:$0xff] %v9397_v9  ;;  %v2570_v12 = vpop.f32.mrb[216].mxu0  ;;  %6684 = vrsqrt.f32 %v3871_v57 }
 0x4c8   : > { %v9389_v30 = vpop.xlane.xlu0 %2889  ;;  %v2081_v27 = vpop.f32.mrb[216].mxu1 }
 0x4c9   : > { %5575 = vst.msk [vmem:[%s8984_s26 + $0x80] sm:$0xff] %vm2593_vm2, %v5461_v11  ;;  %v6263_v22 = vpop.f32.mrb[217].mxu0  ;;  %v9399_v11 = vadd.f32 %v2570_v12, %v2081_v27  ;;  %v2083_v39 = vpop.f32.mrb[217].mxu1  ;;  %v10929_v12 = vld [vmem:[#allocation156_spill] sm:$0xff] }
 0x4ca   : > { %v2891_v39 = vsel %vm2593_vm2, %v9213_v0, 0.0  ;;  %v9413_v27 = vsub.f32 %v10929_v12, %v3005_v34 }
 0x4cc   : > { %v9392_v32 = vpop.xlane.xlu0 %3466  ;;  %10930 = vst [vmem:[#allocation148_spill] sm:$0xff] %v9413_v27 }
 0x4cd   : > { %10921 = vst [vmem:[#allocation132_spill] sm:$0xff] %v9392_v32  ;;  %v3226_v32 = vmul.f32 %v9395_v47, %v9395_v47  ;;  %v10938_v47 = vld [vmem:[#allocation145_spill] sm:$0xff] }
 0x4cf   : > { %v3462_v59 = vsel %vm2593_vm2, %v3226_v32, 0.0 }
 0x4d4   : > { %v4309_v41 = vpop.permute.xlu0 %4308 }
 0x4d5   : > { %v4784_v4 = vmul.f32 %v4309_v41, %v10925_v53  ;;  %v6685_v41 = vpop.eup %6684 }
 0x4d6   : > { %v4099_v49 = vmul.f32 %v6887_v10, %v6685_v41  ;;  %v2084_v10 = vpop.f32.mrb[218].mxu1 }
 0x4d7   : > { %v5468_v52 = vadd.f32 %v10926_v18, %v4784_v4  ;;  %v2906_v4 = vsel %vm2593_vm2, %v9311_v24, 0.0  ;;  %v3233_v18 = vmul.f32 %v9413_v27, %v9413_v27  ;;  %v10934_v27 = vld [vmem:[#allocation17_spill] sm:$0xff] }
 0x4d9   : > { %5582 = vst.msk [vmem:[%s8984_s26 + $0xb8] sm:$0xff] %vm2593_vm2, %v5468_v52  ;;  %v10931_v52 = vld [vmem:[#allocation201_spill] sm:$0xff]  ;;  %v3483_v22 = vsel %vm2593_vm2, %v3233_v18, 0.0 }
 0x4da   : > { %3463 = vadd.xlane.f32.xlu1 %v3462_v59  ;;  %v3650_v32 = vmul.f32 0.020408163, %v10931_v52 }
 0x4dc   : > { %v3878_v53 = vadd.f32 0.001, %v3650_v32 }
 0x4de   : > { %2892 = vadd.xlane.f32.xlu1 %v2891_v39  ;;  %6686 = vrsqrt.f32 %v3878_v53  ;;  %v10933_v39 = vld [vmem:[#allocation131_spill] sm:$0xff] }
 0x4e6   : > { %2907 = vadd.xlane.f32.xlu0 %v2906_v4  ;;  %v6888_v4 = vld [vmem:[%s7073_s22 + $0xe8] sm:$0xff] }
 0x4e8   : > { %v6687_v15 = vpop.eup %6686 }
 0x4e9   : > { %v4106_v52 = vmul.f32 %v6888_v4, %v6687_v15  ;;  %v2086_v15 = vpop.f32.mrb[219].mxu1 }
 0x4ea   : > { %3484 = vadd.xlane.f32.xlu0 %v3483_v22  ;;  %v10936_v22 = vld [vmem:[#allocation198_spill] sm:$0xff] }
 0x4eb   : > { %v3000_v41 = vmul.f32 0.020408163, %v10936_v22  ;;  %v10940_v22 = vld [vmem:[#allocation143_spill] sm:$0xff]  ;;  %v10943_v15 = vld [vmem:[#allocation210_spill] sm:$0xff] }
 0x4ed   : > { %v9437_v0 = vsub.f32 %v10938_v47, %v3000_v41  ;;  %v10942_v47 = vld [vmem:[#allocation195_spill] sm:$0xff] }
 0x4ee   : > { %v3645_v41 = vmul.f32 0.020408163, %v10942_v47  ;;  %v6889_v47 = vld [vmem:[%s7073_s22 + $0xc0] sm:$0xff] }
 0x4ef   : > { %4303 = vperm.xlu1 %6403, %v4099_v49   ;;  %v2573_v49 = vpop.f32.mrb[218].mxu0  ;;  %10939 = vst [vmem:[#allocation135_spill] sm:$0xff] %v9437_v0 }
 0x4f5   : > { %v9422_v59 = vpop.xlane.xlu1 %3451 }
 0x4f9   : > { %v9424_v57 = vpop.xlane.xlu1 %2880 }
 0x4fa   : > { %10932 = vst [vmem:[#allocation125_spill] sm:$0xff] %v9424_v57 }
 0x4fd   : > { %v4284_v34 = vpop.permute.xlu1 %4283 }
 0x4fe   : > { %v4779_v12 = vmul.f32 %v4284_v34, %v10933_v39  ;;  %v9439_v34 = vadd.f32 %v2573_v49, %v2084_v10  ;;  %v6264_v39 = vpop.f32.mrb[219].mxu0  ;;  %v3873_v49 = vadd.f32 0.001, %v3645_v41 }
 0x4ff   : > { %v3007_v39 = vmul.f32 0.020408163, %v10943_v15 }
 0x500   : > { %v5463_v18 = vadd.f32 %v10934_v27, %v4779_v12  ;;  %4338 = vperm.xlu0 %6402, %v4106_v52   ;;  %v2578_v27 = vpop.f32.mrb[220].mxu0  ;;  %6688 = vrsqrt.f32 %v3873_v49 }
 0x501   : > { %v9431_v32 = vpop.xlane.xlu0 %2895  ;;  %v2089_v12 = vpop.f32.mrb[220].mxu1 }
 0x502   : > { %5577 = vst.msk [vmem:[%s8984_s26 + $0x90] sm:$0xff] %vm2593_vm2, %v5463_v18  ;;  %10935 = vst [vmem:[#allocation13_spill] sm:$0xff] %v9431_v32  ;;  %v6267_v4 = vpop.f32.mrb[221].mxu0  ;;  %v9441_v18 = vadd.f32 %v2578_v27, %v2089_v12  ;;  %v2091_v24 = vpop.f32.mrb[221].mxu1  ;;  %v10941_v32 = vld [vmem:[#allocation28_spill] sm:$0xff] }
 0x503   : > { %v2897_v24 = vsel %vm2593_vm2, %v9261_v29, 0.0  ;;  %v10944_v27 = vld [vmem:[#allocation160_spill] sm:$0xff] }
 0x504   : > { %v9455_v12 = vsub.f32 %v10944_v27, %v3007_v39 }
 0x505   : > { %v9434_v53 = vpop.xlane.xlu0 %3472 }
 0x506   : > { %10937 = vst [vmem:[#allocation137_spill] sm:$0xff] %v9434_v53  ;;  %v3228_v53 = vmul.f32 %v9437_v0, %v9437_v0  ;;  %10945 = vst [vmem:[#allocation24_spill] sm:$0xff] %v9455_v12  ;;  %v10954_v0 = vld [vmem:[#allocation149_spill] sm:$0xff] }
 0x508   : > { %v3468_v10 = vsel %vm2593_vm2, %v3228_v53, 0.0 }
 0x50d   : > { %v4319_v52 = vpop.permute.xlu0 %4318 }
 0x50e   : > { %v4786_v57 = vmul.f32 %v4319_v52, %v10940_v22  ;;  %v6689_v52 = vpop.eup %6688 }
 0x50f   : > { %v4101_v41 = vmul.f32 %v6889_v47, %v6689_v52  ;;  %v2092_v47 = vpop.f32.mrb[222].mxu1 }
 0x510   : > { %v5470_v1 = vadd.f32 %v10941_v32, %v4786_v57  ;;  %v2912_v57 = vsel %vm2593_vm2, %v9357_v3, 0.0  ;;  %v10946_v32 = vld [vmem:[#allocation204_spill] sm:$0xff] }
 0x511   : > { %v3652_v53 = vmul.f32 0.020408163, %v10946_v32 }
 0x512   : > { %5584 = vst.msk [vmem:[%s8984_s26 + $0xc8] sm:$0xff] %vm2593_vm2, %v5470_v1  ;;  %v3235_v1 = vmul.f32 %v9455_v12, %v9455_v12  ;;  %v10950_v12 = vld [vmem:[#allocation19_spill] sm:$0xff] }
 0x513   : > { %3469 = vadd.xlane.f32.xlu1 %v3468_v10  ;;  %v3880_v22 = vadd.f32 0.001, %v3652_v53 }
 0x514   : > { %v3489_v4 = vsel %vm2593_vm2, %v3235_v1, 0.0 }
 0x515   : > { %6690 = vrsqrt.f32 %v3880_v22 }
 0x517   : > { %2898 = vadd.xlane.f32.xlu1 %v2897_v24  ;;  %v10949_v24 = vld [vmem:[#allocation134_spill] sm:$0xff] }
 0x51f   : > { %2913 = vadd.xlane.f32.xlu0 %v2912_v57  ;;  %v6691_v15 = vpop.eup %6690  ;;  %v6890_v57 = vld [vmem:[%s7073_s22 + $0xf8] sm:$0xff] }
 0x520   : > { %v4108_v32 = vmul.f32 %v6890_v57, %v6691_v15  ;;  %v2094_v15 = vpop.f32.mrb[223].mxu1 }
 0x521   : > { %v3009_v15 = vmul.f32 0.020408163, %v8939_v33 }
 0x523   : > { %3490 = vadd.xlane.f32.xlu0 %v3489_v4  ;;  %v10952_v4 = vld [vmem:[#allocation200_spill] sm:$0xff] }
 0x524   : > { %v3002_v52 = vmul.f32 0.020408163, %v10952_v4  ;;  %v10957_v4 = vld [vmem:[#allocation147_spill] sm:$0xff] }
 0x526   : > { %v9479_v29 = vsub.f32 %v10954_v0, %v3002_v52  ;;  %v10959_v0 = vld [vmem:[#allocation197_spill] sm:$0xff] }
 0x527   : > { %v3647_v52 = vmul.f32 0.020408163, %v10959_v0 }
 0x528   : > { %4313 = vperm.xlu1 %6403, %v4101_v41   ;;  %v2581_v41 = vpop.f32.mrb[222].mxu0  ;;  %10955 = vst [vmem:[#allocation141_spill] sm:$0xff] %v9479_v29 }
 0x52e   : > { %v9464_v10 = vpop.xlane.xlu1 %3457 }
 0x52f   : > { %10947 = vst [vmem:[#allocation152_spill] sm:$0xff] %v9464_v10 }
 0x532   : > { %v9466_v49 = vpop.xlane.xlu1 %2886 }
 0x533   : > { %10948 = vst [vmem:[#allocation128_spill] sm:$0xff] %v9466_v49 }
 0x536   : > { %v4294_v39 = vpop.permute.xlu1 %4293 }
 0x537   : > { %v4781_v27 = vmul.f32 %v4294_v39, %v10949_v24  ;;  %v9481_v39 = vadd.f32 %v2581_v41, %v2092_v47  ;;  %v6268_v24 = vpop.f32.mrb[223].mxu0  ;;  %v3875_v41 = vadd.f32 0.001, %v3647_v52 }
 0x538   : > { %v10960_v24 = vld [vmem:[#allocation164_spill] sm:$0xff] }
 0x539   : > { %v5465_v1 = vadd.f32 %v10950_v12, %v4781_v27  ;;  %4348 = vperm.xlu0 %6402, %v4108_v32   ;;  %10956 = vst [vmem:[#allocation139_spill] sm:$0xff] %v9481_v39  ;;  %v2586_v12 = vpop.f32.mrb[224].mxu0  ;;  %6692 = vrsqrt.f32 %v3875_v41 }
 0x53a   : > { %v9473_v53 = vpop.xlane.xlu0 %2901  ;;  %v2097_v27 = vpop.f32.mrb[224].mxu1 }
 0x53b   : > { %5579 = vst.msk [vmem:[%s8984_s26 + $0xa0] sm:$0xff] %vm2593_vm2, %v5465_v1  ;;  %10951 = vst [vmem:[#allocation15_spill] sm:$0xff] %v9473_v53  ;;  %v6271_v57 = vpop.f32.mrb[225].mxu0  ;;  %v9483_v1 = vadd.f32 %v2586_v12, %v2097_v27  ;;  %v2099_v3 = vpop.f32.mrb[225].mxu1  ;;  %v10958_v53 = vld [vmem:[#allocation30_spill] sm:$0xff]  ;;  %v9497_v12 = vsub.f32 %v10960_v24, %v3009_v15 }
 0x53c   : > { %v2903_v3 = vsel %vm2593_vm2, %v9309_v44, 0.0  ;;  %v10963_v15 = vld [vmem:[#allocation138_spill] sm:$0xff] }
 0x53d   : > { %10961 = vst [vmem:[#allocation26_spill] sm:$0xff] %v9497_v12  ;;  %v6892_v24 = vld [vmem:[%s7073_s22 + $0x108] sm:$0xff] }
 0x53e   : > { %v9476_v22 = vpop.xlane.xlu0 %3478 }
 0x53f   : > { %10953 = vst [vmem:[#allocation196_spill] sm:$0xff] %v9476_v22  ;;  %v3230_v22 = vmul.f32 %v9479_v29, %v9479_v29  ;;  %v10969_v29 = vld [vmem:[#allocation151_spill] sm:$0xff] }
 0x541   : > { %v3474_v47 = vsel %vm2593_vm2, %v3230_v22, 0.0 }
 0x543   : > { %v6693_v27 = vpop.eup %6692 }
 0x546   : > { %v4329_v32 = vpop.permute.xlu0 %4328 }
 0x547   : > { %v4788_v49 = vmul.f32 %v4329_v32, %v10957_v4  ;;  %v6891_v32 = vld [vmem:[%s7073_s22 + $0xd0] sm:$0xff] }
 0x548   : > { %v4103_v4 = vmul.f32 %v6891_v32, %v6693_v27  ;;  %v10967_v32 = vld [vmem:[#allocation153_spill] sm:$0xff] }
 0x549   : > { %v5472_v10 = vadd.f32 %v10958_v53, %v4788_v49  ;;  %v2918_v49 = vsel %vm2593_vm2, %v9399_v11, 0.0  ;;  %v10962_v53 = vld [vmem:[#allocation209_spill] sm:$0xff] }
 0x54a   : > { %v3654_v22 = vmul.f32 0.020408163, %v10962_v53 }
 0x54b   : > { %5586 = vst.msk [vmem:[%s8984_s26 + $0xd8] sm:$0xff] %vm2593_vm2, %v5472_v10  ;;  %v3237_v10 = vmul.f32 %v9497_v12, %v9497_v12 }
 0x54c   : > { %3475 = vadd.xlane.f32.xlu1 %v3474_v47  ;;  %v3882_v57 = vadd.f32 0.001, %v3654_v22 }
 0x54d   : > { %v3495_v33 = vsel %vm2593_vm2, %v3237_v10, 0.0  ;;  %v10964_v10 = vld [vmem:[#allocation21_spill] sm:$0xff] }
 0x54e   : > { %6694 = vrsqrt.f32 %v3882_v57 }
 0x550   : > { %2904 = vadd.xlane.f32.xlu1 %v2903_v3 }
 0x558   : > { %2919 = vadd.xlane.f32.xlu0 %v2918_v49  ;;  %v6695_v47 = vpop.eup %6694 }
 0x559   : > { %v4110_v49 = vmul.f32 %v6892_v24, %v6695_v47 }
 0x55c   : > { %3496 = vadd.xlane.f32.xlu0 %v3495_v33  ;;  %v10965_v33 = vld [vmem:[#allocation203_spill] sm:$0xff] }
 0x55d   : > { %v3004_v27 = vmul.f32 0.020408163, %v10965_v33  ;;  %v2909_v33 = vsel %vm2593_vm2, %v9355_v56, 0.0 }
 0x561   : > { %4323 = vperm.xlu1 %6403, %v4103_v4   ;;  %v9521_v4 = vsub.f32 %v10967_v32, %v3004_v27  ;;  %v3656_v32 = vmul.f32 0.020408163, %v8937_v2  ;;  %v6894_v2 = vld [vmem:[%s7073_s22 + $0x118] sm:$0xff] }
 0x563   : > { %10968 = vst [vmem:[#allocation205_spill] sm:$0xff] %v9521_v4  ;;  %v3232_v47 = vmul.f32 %v9521_v4, %v9521_v4  ;;  %v10980_v4 = vld [vmem:[#allocation155_spill] sm:$0xff] }
 0x567   : > { %v9506_v0 = vpop.xlane.xlu1 %3463 }
 0x56b   : > { %v9508_v52 = vpop.xlane.xlu1 %2892 }
 0x56f   : > { %v4304_v41 = vpop.permute.xlu1 %4303 }
 0x570   : > { %v4783_v3 = vmul.f32 %v4304_v41, %v10963_v15  ;;  %v10970_v41 = vld [vmem:[#allocation32_spill] sm:$0xff] }
 0x572   : > { %v5467_v53 = vadd.f32 %v10964_v10, %v4783_v3  ;;  %4358 = vperm.xlu0 %6402, %v4110_v49   ;;  %v10971_v3 = vld [vmem:[#allocation199_spill] sm:$0xff]  ;;  %v3480_v49 = vsel %vm2593_vm2, %v3232_v47, 0.0 }
 0x573   : > { %v9515_v22 = vpop.xlane.xlu0 %2907  ;;  %v3649_v24 = vmul.f32 0.020408163, %v10971_v3 }
 0x574   : > { %5581 = vst.msk [vmem:[%s8984_s26 + $0xb0] sm:$0xff] %vm2593_vm2, %v5467_v53  ;;  %v3011_v53 = vmul.f32 0.020408163, %v8951_v31 }
 0x575   : > { %v3877_v10 = vadd.f32 0.001, %v3649_v24 }
 0x577   : > { %v9518_v57 = vpop.xlane.xlu0 %3484  ;;  %6696 = vrsqrt.f32 %v3877_v10 }
 0x578   : > { %10966 = vst [vmem:[#allocation193_spill] sm:$0xff] %v9518_v57 }
 0x57f   : > { %v4339_v12 = vpop.permute.xlu0 %4338 }
 0x580   : > { %v4790_v44 = vmul.f32 %v4339_v12, %v10969_v29  ;;  %v10972_v29 = vld [vmem:[#allocation168_spill] sm:$0xff] }
 0x581   : > { %v9535_v12 = vsub.f32 %v10972_v29, %v3011_v53  ;;  %v6697_v47 = vpop.eup %6696 }
 0x582   : > { %v5474_v15 = vadd.f32 %v10970_v41, %v4790_v44  ;;  %v2924_v44 = vsel %vm2593_vm2, %v9441_v18, 0.0  ;;  %v3884_v41 = vadd.f32 0.001, %v3656_v32 }
 0x583   : > { %10973 = vst [vmem:[#allocation156_spill] sm:$0xff] %v9535_v12  ;;  %v3239_v27 = vmul.f32 %v9535_v12, %v9535_v12 }
 0x584   : > { %5588 = vst.msk [vmem:[%s8984_s26 + $0xe8] sm:$0xff] %vm2593_vm2, %v5474_v15  ;;  %v6893_v15 = vld [vmem:[%s7073_s22 + $0xe0] sm:$0xff]  ;;  %6698 = vrsqrt.f32 %v3884_v41 }
 0x585   : > { %3481 = vadd.xlane.f32.xlu1 %v3480_v49  ;;  %v3501_v31 = vsel %vm2593_vm2, %v3239_v27, 0.0  ;;  %v4105_v3 = vmul.f32 %v6893_v15, %v6697_v47  ;;  %v10975_v27 = vld [vmem:[#allocation23_spill] sm:$0xff]  ;;  %v10978_v15 = vld [vmem:[#allocation157_spill] sm:$0xff] }
 0x589   : > { %2910 = vadd.xlane.f32.xlu1 %v2909_v33  ;;  %v10974_v33 = vld [vmem:[#allocation142_spill] sm:$0xff] }
 0x58e   : > { %v6699_v10 = vpop.eup %6698 }
 0x591   : > { %2925 = vadd.xlane.f32.xlu0 %v2924_v44  ;;  %v4112_v44 = vmul.f32 %v6894_v2, %v6699_v10 }
 0x595   : > { %3502 = vadd.xlane.f32.xlu0 %v3501_v31  ;;  %v10976_v31 = vld [vmem:[#allocation208_spill] sm:$0xff] }
 0x596   : > { %v3006_v47 = vmul.f32 0.020408163, %v10976_v31  ;;  %v2915_v31 = vsel %vm2593_vm2, %v9397_v9, 0.0  ;;  %v10993_v9 = vld [vmem:[#allocation207_spill] sm:$0xff] }
 0x59a   : > { %4333 = vperm.xlu1 %6403, %v4105_v3   ;;  %v9559_v3 = vsub.f32 %v10978_v15, %v3006_v47  ;;  %v3658_v15 = vmul.f32 0.020408163, %v8946_v37 }
 0x59c   : > { %10979 = vst [vmem:[#allocation131_spill] sm:$0xff] %v9559_v3  ;;  %v3234_v10 = vmul.f32 %v9559_v3, %v9559_v3 }
 0x5a0   : > { %v9544_v24 = vpop.xlane.xlu1 %3469 }
 0x5a4   : > { %v9546_v49 = vpop.xlane.xlu1 %2898 }
 0x5a8   : > { %v4314_v53 = vpop.permute.xlu1 %4313 }
 0x5a9   : > { %v4785_v29 = vmul.f32 %v4314_v53, %v10974_v33  ;;  %v10981_v53 = vld [vmem:[#allocation34_spill] sm:$0xff] }
 0x5ab   : > { %v5469_v12 = vadd.f32 %v10975_v27, %v4785_v29  ;;  %4368 = vperm.xlu0 %6402, %v4112_v44   ;;  %v10982_v29 = vld [vmem:[#allocation202_spill] sm:$0xff]  ;;  %v3013_v27 = vmul.f32 0.020408163, %v8973_v61 }
 0x5ac   : > { %v9553_v32 = vpop.xlane.xlu0 %2913  ;;  %v3651_v2 = vmul.f32 0.020408163, %v10982_v29 }
 0x5ad   : > { %5583 = vst.msk [vmem:[%s8984_s26 + $0xc0] sm:$0xff] %vm2593_vm2, %v5469_v12  ;;  %v3486_v12 = vsel %vm2593_vm2, %v3234_v10, 0.0 }
 0x5ae   : > { %v3879_v44 = vadd.f32 0.001, %v3651_v2 }
 0x5b0   : > { %v9556_v41 = vpop.xlane.xlu0 %3490  ;;  %6700 = vrsqrt.f32 %v3879_v44 }
 0x5b1   : > { %10977 = vst [vmem:[#allocation201_spill] sm:$0xff] %v9556_v41  ;;  %v3008_v41 = vmul.f32 0.020408163, %v8931_v40 }
 0x5b8   : > { %v4349_v57 = vpop.permute.xlu0 %4348 }
 0x5b9   : > { %v4792_v56 = vmul.f32 %v4349_v57, %v10980_v4  ;;  %v10983_v57 = vld [vmem:[#allocation172_spill] sm:$0xff] }
 0x5ba   : > { %v9573_v4 = vsub.f32 %v10983_v57, %v3013_v27  ;;  %v6701_v10 = vpop.eup %6700 }
 0x5bb   : > { %v5476_v33 = vadd.f32 %v10981_v53, %v4792_v56  ;;  %v2930_v56 = vsel %vm2593_vm2, %v9483_v1, 0.0  ;;  %v3886_v53 = vadd.f32 0.001, %v3658_v15 }
 0x5bc   : > { %10984 = vst [vmem:[#allocation17_spill] sm:$0xff] %v9573_v4  ;;  %v3241_v47 = vmul.f32 %v9573_v4, %v9573_v4  ;;  %v10986_v4 = vld [vmem:[#allocation25_spill] sm:$0xff] }
 0x5bd   : > { %5590 = vst.msk [vmem:[%s8984_s26 + $0xf8] sm:$0xff] %vm2593_vm2, %v5476_v33  ;;  %v6895_v33 = vld [vmem:[%s7073_s22 + $0xf0] sm:$0xff]  ;;  %6702 = vrsqrt.f32 %v3886_v53 }
 0x5be   : > { %3487 = vadd.xlane.f32.xlu1 %v3486_v12  ;;  %v3507_v61 = vsel %vm2593_vm2, %v3241_v47, 0.0  ;;  %v4107_v29 = vmul.f32 %v6895_v33, %v6701_v10  ;;  %v2589_v10 = vpop.f32.mrb[226].mxu0 }
 0x5c2   : > { %2916 = vadd.xlane.f32.xlu1 %v2915_v31  ;;  %v10985_v31 = vld [vmem:[#allocation146_spill] sm:$0xff] }
 0x5c7   : > { %v6703_v44 = vpop.eup %6702 }
 0x5ca   : > { %2931 = vadd.xlane.f32.xlu0 %v2930_v56  ;;  %v6896_v56 = vld [vmem:[%s7073_s22 + $0x128] sm:$0xff] }
 0x5cb   : > { %v4114_v37 = vmul.f32 %v6896_v56, %v6703_v44 }
 0x5ce   : > { %3508 = vadd.xlane.f32.xlu0 %v3507_v61  ;;  %v2100_v61 = vpop.f32.mrb[226].mxu1 }
 0x5cf   : > { %v9593_v53 = vadd.f32 %v2589_v10, %v2100_v61  ;;  %v2102_v33 = vpop.f32.mrb[227].mxu1  ;;  %v3653_v61 = vmul.f32 0.020408163, %v10993_v9  ;;  %v3015_v10 = vmul.f32 0.020408163, %v9027_v6 }
 0x5d0   : > { %v10994_v33 = vld [vmem:[#allocation174_spill] sm:$0xff]  ;;  %v3660_v6 = vmul.f32 0.020408163, %v8969_v50 }
 0x5d1   : > { %10987 = vst [vmem:[#allocation198_spill] sm:$0xff] %v9593_v53 }
 0x5d3   : > { %4343 = vperm.xlu1 %6403, %v4107_v29   ;;  %v6272_v29 = vpop.f32.mrb[227].mxu0 }
 0x5d4   : > { %v9611_v29 = vsub.f32 %v10994_v33, %v3015_v10  ;;  %v10996_v33 = vld [vmem:[#allocation150_spill] sm:$0xff] }
 0x5d6   : > { %10995 = vst [vmem:[#allocation28_spill] sm:$0xff] %v9611_v29  ;;  %v3243_v9 = vmul.f32 %v9611_v29, %v9611_v29 }
 0x5d9   : > { %v9582_v2 = vpop.xlane.xlu1 %3475 }
 0x5dd   : > { %v9584_v12 = vpop.xlane.xlu1 %2904 }
 0x5e1   : > { %v4324_v27 = vpop.permute.xlu1 %4323 }
 0x5e2   : > { %v4787_v57 = vmul.f32 %v4324_v27, %v10985_v31  ;;  %v10989_v27 = vld [vmem:[#allocation161_spill] sm:$0xff]  ;;  %v10991_v31 = vld [vmem:[#allocation159_spill] sm:$0xff] }
 0x5e3   : > { %v9599_v44 = vsub.f32 %v10989_v27, %v3008_v41  ;;  %v3881_v41 = vadd.f32 0.001, %v3653_v61  ;;  %v2921_v27 = vsel %vm2593_vm2, %v9439_v34, 0.0 }
 0x5e4   : > { %v5471_v47 = vadd.f32 %v10986_v4, %v4787_v57  ;;  %4378 = vperm.xlu0 %6402, %v4114_v37   ;;  %v10992_v37 = vld [vmem:[#allocation36_spill] sm:$0xff] }
 0x5e5   : > { %v9591_v15 = vpop.xlane.xlu0 %2919  ;;  %10990 = vst [vmem:[#allocation143_spill] sm:$0xff] %v9599_v44  ;;  %v3236_v56 = vmul.f32 %v9599_v44, %v9599_v44  ;;  %6704 = vrsqrt.f32 %v3881_v41  ;;  %v11005_v44 = vld [vmem:[#allocation176_spill] sm:$0xff] }
 0x5e6   : > { %5585 = vst.msk [vmem:[%s8984_s26 + $0xd0] sm:$0xff] %vm2593_vm2, %v5471_v47 }
 0x5e7   : > { %v3492_v40 = vsel %vm2593_vm2, %v3236_v56, 0.0  ;;  %v6897_v56 = vld [vmem:[%s7073_s22 + $0x100] sm:$0xff] }
 0x5e9   : > { %v9596_v3 = vpop.xlane.xlu0 %3496 }
 0x5ea   : > { %10988 = vst [vmem:[#allocation145_spill] sm:$0xff] %v9596_v3 }
 0x5f1   : > { %v4359_v4 = vpop.permute.xlu0 %4358 }
 0x5f2   : > { %v4794_v57 = vmul.f32 %v4359_v4, %v10991_v31  ;;  %v3513_v4 = vsel %vm2593_vm2, %v3243_v9, 0.0  ;;  %v3888_v31 = vadd.f32 0.001, %v3660_v6  ;;  %v10997_v9 = vld [vmem:[#allocation27_spill] sm:$0xff] }
 0x5f4   : > { %v5478_v47 = vadd.f32 %v10992_v37, %v4794_v57  ;;  %v6705_v57 = vpop.eup %6704  ;;  %6706 = vrsqrt.f32 %v3888_v31  ;;  %v10998_v31 = vld [vmem:[#allocation214_spill] sm:$0xff] }
 0x5f5   : > { %v4109_v37 = vmul.f32 %v6897_v56, %v6705_v57  ;;  %v3010_v57 = vmul.f32 0.020408163, %v10998_v31 }
 0x5f6   : > { %5592 = vst.msk [vmem:[%s8984_s26 + $0x108] sm:$0xff] %vm2593_vm2, %v5478_v47 }
 0x5f7   : > { %3493 = vadd.xlane.f32.xlu1 %v3492_v40  ;;  %v6898_v40 = vld [vmem:[%s7073_s22 + $0x138] sm:$0xff] }
 0x5fb   : > { %2922 = vadd.xlane.f32.xlu1 %v2921_v27 }
 0x5fe   : > { %v6707_v61 = vpop.eup %6706 }
 0x5ff   : > { %v4116_v41 = vmul.f32 %v6898_v40, %v6707_v61  ;;  %v3017_v61 = vmul.f32 0.020408163, %v9036_v23  ;;  %v11002_v40 = vld [vmem:[#allocation163_spill] sm:$0xff]  ;;  %v2927_v23 = vsel %vm2593_vm2, %v9481_v39, 0.0  ;;  %v11016_v39 = vld [vmem:[#allocation213_spill] sm:$0xff] }
 0x601   : > { %v9644_v31 = vsub.f32 %v11005_v44, %v3017_v61 }
 0x603   : > { %3514 = vadd.xlane.f32.xlu0 %v3513_v4  ;;  %11006 = vst [vmem:[#allocation160_spill] sm:$0xff] %v9644_v31 }
 0x60c   : > { %4353 = vperm.xlu1 %6403, %v4109_v37   ;;  %v11000_v37 = vld [vmem:[#allocation165_spill] sm:$0xff] }
 0x60d   : > { %v9635_v29 = vsub.f32 %v11000_v37, %v3010_v57 }
 0x60f   : > { %11001 = vst [vmem:[#allocation210_spill] sm:$0xff] %v9635_v29 }
 0x612   : > { %v9620_v47 = vpop.xlane.xlu1 %3481 }
 0x616   : > { %v9622_v10 = vpop.xlane.xlu1 %2910 }
 0x619   : > { %4388 = vperm.xlu0 %6402, %v4116_v41  }
 0x61a   : > { %v4334_v50 = vpop.permute.xlu1 %4333 }
 0x61b   : > { %v4789_v27 = vmul.f32 %v4334_v50, %v10996_v33  ;;  %v3238_v50 = vmul.f32 %v9635_v29, %v9635_v29  ;;  %v11003_v33 = vld [vmem:[#allocation38_spill] sm:$0xff] }
 0x61d   : > { %v5473_v4 = vadd.f32 %v10997_v9, %v4789_v27  ;;  %v11004_v9 = vld [vmem:[#allocation212_spill] sm:$0xff]  ;;  %v3498_v57 = vsel %vm2593_vm2, %v3238_v50, 0.0  ;;  %v6899_v50 = vld [vmem:[%s7073_s22 + $0x110] sm:$0xff] }
 0x61e   : > { %v9629_v6 = vpop.xlane.xlu0 %2925 }
 0x61f   : > { %5587 = vst.msk [vmem:[%s8984_s26 + $0xe0] sm:$0xff] %vm2593_vm2, %v5473_v4  ;;  %v3655_v4 = vmul.f32 0.020408163, %v11004_v9 }
 0x621   : > { %v3883_v37 = vadd.f32 0.001, %v3655_v4  ;;  %v6900_v4 = vld [vmem:[%s7073_s22 + $0x148] sm:$0xff] }
 0x622   : > { %v9632_v56 = vpop.xlane.xlu0 %3502 }
 0x623   : > { %10999 = vst [vmem:[#allocation195_spill] sm:$0xff] %v9632_v56  ;;  %6708 = vrsqrt.f32 %v3883_v37  ;;  %v11007_v37 = vld [vmem:[#allocation154_spill] sm:$0xff] }
 0x62a   : > { %v4369_v3 = vpop.permute.xlu0 %4368 }
 0x62b   : > { %v4796_v41 = vmul.f32 %v4369_v3, %v11002_v40  ;;  %v3245_v3 = vmul.f32 %v9644_v31, %v9644_v31  ;;  %v3662_v40 = vmul.f32 0.020408163, %v9025_v7 }
 0x62d   : > { %v5480_v27 = vadd.f32 %v11003_v33, %v4796_v41  ;;  %v3519_v44 = vsel %vm2593_vm2, %v3245_v3, 0.0  ;;  %v3890_v61 = vadd.f32 0.001, %v3662_v40  ;;  %v6709_v41 = vpop.eup %6708 }
 0x62e   : > { %v4111_v33 = vmul.f32 %v6899_v50, %v6709_v41 }
 0x62f   : > { %5594 = vst.msk [vmem:[%s8984_s26 + $0x118] sm:$0xff] %vm2593_vm2, %v5480_v27  ;;  %6710 = vrsqrt.f32 %v3890_v61  ;;  %v11009_v61 = vld [vmem:[#allocation216_spill] sm:$0xff] }
 0x630   : > { %3499 = vadd.xlane.f32.xlu1 %v3498_v57  ;;  %v3012_v41 = vmul.f32 0.020408163, %v11009_v61  ;;  %v3657_v61 = vmul.f32 0.020408163, %v11016_v39 }
 0x634   : > { %2928 = vadd.xlane.f32.xlu1 %v2927_v23 }
 0x638   : > { %3520 = vadd.xlane.f32.xlu0 %v3519_v44  ;;  %v11008_v44 = vld [vmem:[#allocation29_spill] sm:$0xff] }
 0x639   : > { %v6711_v27 = vpop.eup %6710 }
 0x63a   : > { %v4118_v57 = vmul.f32 %v6900_v4, %v6711_v27  ;;  %v3019_v27 = vmul.f32 0.020408163, %v9046_v45 }
 0x645   : > { %4363 = vperm.xlu1 %6403, %v4111_v33   ;;  %v11011_v33 = vld [vmem:[#allocation169_spill] sm:$0xff] }
 0x646   : > { %v9671_v56 = vsub.f32 %v11011_v33, %v3012_v41  ;;  %v3885_v33 = vadd.f32 0.001, %v3657_v61 }
 0x648   : > { %6712 = vrsqrt.f32 %v3885_v33  ;;  %v11018_v33 = vld [vmem:[#allocation31_spill] sm:$0xff] }
 0x64b   : > { %v9656_v9 = vpop.xlane.xlu1 %3487 }
 0x64e   : > { %4398 = vperm.xlu0 %6402, %v4118_v57   ;;  %v11012_v57 = vld [vmem:[#allocation178_spill] sm:$0xff] }
 0x64f   : > { %v9659_v23 = vpop.xlane.xlu1 %2916  ;;  %v9675_v29 = vsub.f32 %v11012_v57, %v3019_v27  ;;  %v3664_v27 = vmul.f32 0.020408163, %v9091_v8  ;;  %v2933_v57 = vsel %vm2593_vm2, %v9593_v53, 0.0 }
 0x651   : > { %11013 = vst [vmem:[#allocation134_spill] sm:$0xff] %v9675_v29  ;;  %v3247_v45 = vmul.f32 %v9675_v29, %v9675_v29  ;;  %v3892_v39 = vadd.f32 0.001, %v3664_v27 }
 0x653   : > { %v4344_v7 = vpop.permute.xlu1 %4343  ;;  %6714 = vrsqrt.f32 %v3892_v39  ;;  %v3014_v39 = vmul.f32 0.020408163, %v8975_v13 }
 0x654   : > { %v4791_v3 = vmul.f32 %v4344_v7, %v11007_v37  ;;  %v11014_v7 = vld [vmem:[#allocation167_spill] sm:$0xff] }
 0x656   : > { %v5475_v31 = vadd.f32 %v11008_v44, %v4791_v3  ;;  %v11015_v3 = vld [vmem:[#allocation40_spill] sm:$0xff] }
 0x657   : > { %v9665_v40 = vpop.xlane.xlu0 %2931 }
 0x658   : > { %5589 = vst.msk [vmem:[%s8984_s26 + $0xf0] sm:$0xff] %vm2593_vm2, %v5475_v31  ;;  %v3240_v31 = vmul.f32 %v9671_v56, %v9671_v56 }
 0x65a   : > { %v3504_v41 = vsel %vm2593_vm2, %v3240_v31, 0.0 }
 0x65b   : > { %v9668_v50 = vpop.xlane.xlu0 %3508 }
 0x65c   : > { %11010 = vst [vmem:[#allocation204_spill] sm:$0xff] %v9668_v50  ;;  %v11023_v50 = vld [vmem:[#allocation171_spill] sm:$0xff] }
 0x663   : > { %v4379_v4 = vpop.permute.xlu0 %4378 }
 0x664   : > { %v4798_v37 = vmul.f32 %v4379_v4, %v11014_v7  ;;  %v3525_v4 = vsel %vm2593_vm2, %v3247_v45, 0.0  ;;  %v6713_v7 = vpop.eup %6712 }
 0x666   : > { %v5482_v44 = vadd.f32 %v11015_v3, %v4798_v37  ;;  %v6901_v37 = vld [vmem:[%s7073_s22 + $0x120] sm:$0xff]  ;;  %v6715_v3 = vpop.eup %6714 }
 0x667   : > { %v4113_v31 = vmul.f32 %v6901_v37, %v6713_v7  ;;  %v3021_v7 = vmul.f32 0.020408163, %v9053_v43 }
 0x668   : > { %5596 = vst.msk [vmem:[%s8984_s26 + $0x128] sm:$0xff] %vm2593_vm2, %v5482_v44  ;;  %v6902_v44 = vld [vmem:[%s7073_s22 + $0x158] sm:$0xff] }
 0x669   : > { %3505 = vadd.xlane.f32.xlu1 %v3504_v41  ;;  %v4120_v61 = vmul.f32 %v6902_v44, %v6715_v3  ;;  %v11021_v44 = vld [vmem:[#allocation180_spill] sm:$0xff] }
 0x66d   : > { %3526 = vadd.xlane.f32.xlu0 %v3525_v4  ;;  %2934 = vadd.xlane.f32.xlu1 %v2933_v57  ;;  %v11017_v4 = vld [vmem:[#allocation158_spill] sm:$0xff] }
 0x67e   : > { %4373 = vperm.xlu1 %6403, %v4113_v31   ;;  %v11020_v31 = vld [vmem:[#allocation173_spill] sm:$0xff] }
 0x67f   : > { %v9706_v3 = vsub.f32 %v11020_v31, %v3014_v39  ;;  %v3666_v39 = vmul.f32 0.020408163, %v9144_v38  ;;  %v6903_v31 = vld [vmem:[%s7073_s22 + $0x130] sm:$0xff] }
 0x681   : > { %v3242_v43 = vmul.f32 %v9706_v3, %v9706_v3 }
 0x683   : > { %4408 = vperm.xlu0 %6402, %v4120_v61   ;;  %v9709_v61 = vsub.f32 %v11021_v44, %v3021_v7 }
 0x684   : > { %v9693_v8 = vpop.xlane.xlu1 %3493 }
 0x685   : > { %11022 = vst [vmem:[#allocation200_spill] sm:$0xff] %v9709_v61  ;;  %v3249_v13 = vmul.f32 %v9709_v61, %v9709_v61  ;;  %v11032_v61 = vld [vmem:[#allocation184_spill] sm:$0xff] }
 0x687   : > { %v3531_v7 = vsel %vm2593_vm2, %v3249_v13, 0.0 }
 0x688   : > { %v9695_v41 = vpop.xlane.xlu1 %2922 }
 0x68c   : > { %v4354_v45 = vpop.permute.xlu1 %4353 }
 0x68d   : > { %v4793_v57 = vmul.f32 %v4354_v45, %v11017_v4  ;;  %v11024_v45 = vld [vmem:[#allocation42_spill] sm:$0xff] }
 0x68f   : > { %v5477_v29 = vadd.f32 %v11018_v33, %v4793_v57  ;;  %v11025_v57 = vld [vmem:[#allocation217_spill] sm:$0xff] }
 0x690   : > { %v9701_v27 = vpop.xlane.xlu0 %3514 }
 0x691   : > { %5591 = vst.msk [vmem:[%s8984_s26 + $0x100] sm:$0xff] %vm2593_vm2, %v5477_v29  ;;  %11019 = vst [vmem:[#allocation19_spill] sm:$0xff] %v9701_v27  ;;  %v3659_v29 = vmul.f32 0.020408163, %v11025_v57 }
 0x693   : > { %v3887_v33 = vadd.f32 0.001, %v3659_v29 }
 0x695   : > { %6716 = vrsqrt.f32 %v3887_v33  ;;  %v11027_v33 = vld [vmem:[#allocation33_spill] sm:$0xff] }
 0x698   : > { %v4389_v37 = vpop.permute.xlu0 %4388 }
 0x699   : > { %v4800_v53 = vmul.f32 %v4389_v37, %v11023_v50  ;;  %v3510_v50 = vsel %vm2593_vm2, %v3242_v43, 0.0  ;;  %v11026_v43 = vld [vmem:[#allocation162_spill] sm:$0xff] }
 0x69b   : > { %v5484_v4 = vadd.f32 %v11024_v45, %v4800_v53  ;;  %v3894_v53 = vadd.f32 0.001, %v3666_v39 }
 0x69d   : > { %5598 = vst.msk [vmem:[%s8984_s26 + $0x138] sm:$0xff] %vm2593_vm2, %v5484_v4  ;;  %6718 = vrsqrt.f32 %v3894_v53  ;;  %v6904_v4 = vld [vmem:[%s7073_s22 + $0x168] sm:$0xff]  ;;  %v3016_v53 = vmul.f32 0.020408163, %v9033_v20 }
 0x69f   : > { %v6717_v37 = vpop.eup %6716 }
 0x6a0   : > { %v4115_v44 = vmul.f32 %v6903_v31, %v6717_v37  ;;  %v3023_v37 = vmul.f32 0.020408163, %v9105_v16 }
 0x6a2   : > { %3532 = vadd.xlane.f32.xlu0 %v3531_v7  ;;  %3511 = vadd.xlane.f32.xlu1 %v3510_v50 }
 0x6a7   : > { %v6719_v45 = vpop.eup %6718 }
 0x6a8   : > { %v4122_v57 = vmul.f32 %v6904_v4, %v6719_v45  ;;  %v11030_v4 = vld [vmem:[#allocation181_spill] sm:$0xff] }
 0x6b3   : > { %4383 = vperm.xlu1 %6403, %v4115_v44   ;;  %v11029_v44 = vld [vmem:[#allocation175_spill] sm:$0xff] }
 0x6b4   : > { %v9738_v45 = vsub.f32 %v11029_v44, %v3016_v53 }
 0x6b6   : > { %v3244_v16 = vmul.f32 %v9738_v45, %v9738_v45 }
 0x6b8   : > { %4418 = vperm.xlu0 %6402, %v4122_v57   ;;  %v9741_v57 = vsub.f32 %v11030_v4, %v3023_v37  ;;  %v6905_v37 = vld [vmem:[%s7073_s22 + $0x140] sm:$0xff]  ;;  %v6906_v4 = vld [vmem:[%s7073_s22 + $0x178] sm:$0xff] }
 0x6ba   : > { %11031 = vst [vmem:[#allocation147_spill] sm:$0xff] %v9741_v57  ;;  %v3251_v20 = vmul.f32 %v9741_v57, %v9741_v57 }
 0x6bc   : > { %v3537_v53 = vsel %vm2593_vm2, %v3251_v20, 0.0 }
 0x6bd   : > { %v9725_v38 = vpop.xlane.xlu1 %3499 }
 0x6c1   : > { %v9727_v29 = vpop.xlane.xlu1 %2928 }
 0x6c5   : > { %v4364_v13 = vpop.permute.xlu1 %4363  ;;  %v9731_v50 = vpop.xlane.xlu0 %3520 }
 0x6c6   : > { %v4795_v7 = vmul.f32 %v4364_v13, %v11026_v43  ;;  %11028 = vst [vmem:[#allocation149_spill] sm:$0xff] %v9731_v50  ;;  %v11033_v13 = vld [vmem:[#allocation44_spill] sm:$0xff] }
 0x6c7   : > { %v11042_v50 = vld [vmem:[#allocation220_spill] sm:$0xff] }
 0x6c8   : > { %v5479_v39 = vadd.f32 %v11027_v33, %v4795_v7  ;;  %v3661_v7 = vmul.f32 0.020408163, %v9017_v63 }
 0x6ca   : > { %5593 = vst.msk [vmem:[%s8984_s26 + $0x110] sm:$0xff] %vm2593_vm2, %v5479_v39  ;;  %v3889_v33 = vadd.f32 0.001, %v3661_v7  ;;  %v3668_v39 = vmul.f32 0.020408163, %v9196_v51 }
 0x6cc   : > { %6720 = vrsqrt.f32 %v3889_v33  ;;  %v3896_v63 = vadd.f32 0.001, %v3668_v39  ;;  %v3025_v33 = vmul.f32 0.020408163, %v9157_v21  ;;  %v11035_v39 = vld [vmem:[#allocation166_spill] sm:$0xff] }
 0x6cd   : > { %v4399_v31 = vpop.permute.xlu0 %4398  ;;  %v3663_v21 = vmul.f32 0.020408163, %v11042_v50 }
 0x6ce   : > { %v4802_v27 = vmul.f32 %v4399_v31, %v11032_v61  ;;  %v3516_v61 = vsel %vm2593_vm2, %v3244_v16, 0.0  ;;  %6722 = vrsqrt.f32 %v3896_v63  ;;  %v3018_v16 = vmul.f32 0.020408163, %v9094_v35 }
 0x6d0   : > { %v5486_v43 = vadd.f32 %v11033_v13, %v4802_v27 }
 0x6d2   : > { %5600 = vst.msk [vmem:[%s8984_s26 + $0x148] sm:$0xff] %vm2593_vm2, %v5486_v43 }
 0x6d6   : > { %v6721_v27 = vpop.eup %6720 }
 0x6d7   : > { %3538 = vadd.xlane.f32.xlu0 %v3537_v53  ;;  %3517 = vadd.xlane.f32.xlu1 %v3516_v61  ;;  %v4117_v31 = vmul.f32 %v6905_v37, %v6721_v27  ;;  %v11036_v61 = vld [vmem:[#allocation35_spill] sm:$0xff]  ;;  %v11037_v37 = vld [vmem:[#allocation177_spill] sm:$0xff] }
 0x6d8   : > { %v6723_v44 = vpop.eup %6722 }
 0x6d9   : > { %v4124_v13 = vmul.f32 %v6906_v4, %v6723_v44  ;;  %v11038_v44 = vld [vmem:[#allocation191_spill] sm:$0xff] }
 0x6da   : > { %v9771_v4 = vsub.f32 %v11038_v44, %v3025_v33  ;;  %v3891_v33 = vadd.f32 0.001, %v3663_v21  ;;  %v3020_v21 = vmul.f32 0.020408163, %v9146_v48 }
 0x6dc   : > { %11039 = vst [vmem:[#allocation197_spill] sm:$0xff] %v9771_v4  ;;  %6724 = vrsqrt.f32 %v3891_v33 }
 0x6e8   : > { %4393 = vperm.xlu1 %6403, %v4117_v31   ;;  %v9768_v31 = vsub.f32 %v11037_v37, %v3018_v16  ;;  %v6908_v37 = vld [vmem:[%s7073_s22 + $0x188] sm:$0xff] }
 0x6ea   : > { %v3246_v16 = vmul.f32 %v9768_v31, %v9768_v31 }
 0x6ed   : > { %4428 = vperm.xlu0 %6402, %v4124_v13   ;;  %v11040_v13 = vld [vmem:[#allocation206_spill] sm:$0xff] }
 0x6f6   : > { %v9757_v51 = vpop.xlane.xlu1 %3505 }
 0x6fa   : > { %v9759_v43 = vpop.xlane.xlu1 %2934  ;;  %v9761_v7 = vpop.xlane.xlu0 %3526 }
 0x6fb   : > { %11034 = vst [vmem:[#allocation30_spill] sm:$0xff] %v9761_v7  ;;  %v11041_v7 = vld [vmem:[#allocation45_spill] sm:$0xff] }
 0x6fe   : > { %v4374_v20 = vpop.permute.xlu1 %4373 }
 0x6ff   : > { %v4797_v53 = vmul.f32 %v4374_v20, %v11035_v39  ;;  %v3253_v20 = vmul.f32 %v9771_v4, %v9771_v4  ;;  %v3670_v39 = vmul.f32 0.020408163, %v9244_v28  ;;  %v11091_v4 = vld [vmem:[#allocation124_spill] sm:$0xff] }
 0x701   : > { %v5481_v63 = vadd.f32 %v11036_v61, %v4797_v53  ;;  %v3543_v53 = vsel %vm2593_vm2, %v3253_v20, 0.0  ;;  %v3522_v61 = vsel %vm2593_vm2, %v3246_v16, 0.0  ;;  %v3898_v50 = vadd.f32 0.001, %v3670_v39  ;;  %v11043_v16 = vld [vmem:[#allocation170_spill] sm:$0xff]  ;;  %v11044_v39 = vld [vmem:[#allocation37_spill] sm:$0xff] }
 0x702   : > { %v4409_v27 = vpop.permute.xlu0 %4408  ;;  %v3027_v20 = vmul.f32 0.020408163, %v9205_v60 }
 0x703   : > { %5595 = vst.msk [vmem:[%s8984_s26 + $0x120] sm:$0xff] %vm2593_vm2, %v5481_v63  ;;  %v4804_v57 = vmul.f32 %v4409_v27, %v11040_v13  ;;  %6726 = vrsqrt.f32 %v3898_v50  ;;  %v11045_v50 = vld [vmem:[#allocation179_spill] sm:$0xff] }
 0x705   : > { %v5488_v35 = vadd.f32 %v11041_v7, %v4804_v57  ;;  %v6725_v57 = vpop.eup %6724  ;;  %v6907_v7 = vld [vmem:[%s7073_s22 + $0x150] sm:$0xff] }
 0x706   : > { %v4119_v63 = vmul.f32 %v6907_v7, %v6725_v57  ;;  %v9798_v57 = vsub.f32 %v11045_v50, %v3020_v21  ;;  %v9801_v7 = vsub.f32 %v8935_v42, %v3027_v20  ;;  %v3672_v20 = vmul.f32 0.020408163, %v9292_v26 }
 0x707   : > { %5602 = vst.msk [vmem:[%s8984_s26 + $0x158] sm:$0xff] %vm2593_vm2, %v5488_v35 }
 0x708   : > { %11046 = vst [vmem:[#allocation164_spill] sm:$0xff] %v9801_v7  ;;  %v3248_v21 = vmul.f32 %v9798_v57, %v9798_v57 }
 0x70c   : > { %3544 = vadd.xlane.f32.xlu0 %v3543_v53  ;;  %3523 = vadd.xlane.f32.xlu1 %v3522_v61 }
 0x70d   : > { %v6727_v27 = vpop.eup %6726 }
 0x70e   : > { %v4126_v44 = vmul.f32 %v6908_v37, %v6727_v27  ;;  %v11048_v37 = vld [vmem:[#allocation47_spill] sm:$0xff] }
 0x71d   : > { %4403 = vperm.xlu1 %6403, %v4119_v63   ;;  %v11047_v63 = vld [vmem:[#allocation2_spill] sm:$0xff] }
 0x722   : > { %4438 = vperm.xlu0 %6402, %v4126_v44   ;;  %v11049_v44 = vld [vmem:[#allocation113_spill] sm:$0xff] }
 0x723   : > { %v3665_v60 = vmul.f32 0.020408163, %v11049_v44 }
 0x725   : > { %v3893_v42 = vadd.f32 0.001, %v3665_v60  ;;  %v3022_v60 = vmul.f32 0.020408163, %v9198_v25 }
 0x727   : > { %6728 = vrsqrt.f32 %v3893_v42 }
 0x72f   : > { %v9789_v28 = vpop.xlane.xlu1 %3511  ;;  %v9791_v13 = vpop.xlane.xlu0 %3532 }
 0x733   : > { %v4384_v35 = vpop.permute.xlu1 %4383 }
 0x734   : > { %v4799_v33 = vmul.f32 %v4384_v35, %v11043_v16  ;;  %v3255_v35 = vmul.f32 %v9801_v7, %v9801_v7  ;;  %v11090_v7 = vld [vmem:[#allocation57_spill] sm:$0xff] }
 0x736   : > { %v5483_v53 = vadd.f32 %v11044_v39, %v4799_v33  ;;  %v3549_v16 = vsel %vm2593_vm2, %v3255_v35, 0.0  ;;  %v3528_v33 = vsel %vm2593_vm2, %v3248_v21, 0.0  ;;  %v3900_v39 = vadd.f32 0.001, %v3672_v20  ;;  %v11050_v21 = vld [vmem:[#allocation183_spill] sm:$0xff] }
 0x737   : > { %v4419_v61 = vpop.permute.xlu0 %4418  ;;  %v3029_v35 = vmul.f32 0.020408163, %v9253_v55  ;;  %v11051_v20 = vld [vmem:[#allocation39_spill] sm:$0xff] }
 0x738   : > { %5597 = vst.msk [vmem:[%s8984_s26 + $0x130] sm:$0xff] %vm2593_vm2, %v5483_v53  ;;  %v4806_v27 = vmul.f32 %v4419_v61, %v11047_v63  ;;  %6730 = vrsqrt.f32 %v3900_v39  ;;  %v6729_v53 = vpop.eup %6728  ;;  %v6909_v61 = vld [vmem:[%s7073_s22 + $0x160] sm:$0xff]  ;;  %v9828_v39 = vsub.f32 %v8758_v54, %v3022_v60 }
 0x739   : > { %v4121_v50 = vmul.f32 %v6909_v61, %v6729_v53  ;;  %v9831_v53 = vsub.f32 %v9003_v36, %v3029_v35 }
 0x73a   : > { %v5490_v48 = vadd.f32 %v11048_v37, %v4806_v27  ;;  %v6910_v27 = vld [vmem:[%s7073_s22 + $0x198] sm:$0xff]  ;;  %v3250_v54 = vmul.f32 %v9828_v39, %v9828_v39 }
 0x73b   : > { %11052 = vst [vmem:[#allocation209_spill] sm:$0xff] %v9831_v53 }
 0x73c   : > { %5604 = vst.msk [vmem:[%s8984_s26 + $0x168] sm:$0xff] %vm2593_vm2, %v5490_v48 }
 0x741   : > { %3550 = vadd.xlane.f32.xlu0 %v3549_v16  ;;  %3529 = vadd.xlane.f32.xlu1 %v3528_v33 }
 0x742   : > { %v6731_v63 = vpop.eup %6730 }
 0x743   : > { %v4128_v37 = vmul.f32 %v6910_v27, %v6731_v63  ;;  %v11054_v63 = vld [vmem:[#allocation4_spill] sm:$0xff]  ;;  %v3257_v27 = vmul.f32 %v9831_v53, %v9831_v53 }
 0x744   : > { %v3667_v55 = vmul.f32 0.020408163, %v11054_v63  ;;  %v3031_v63 = vmul.f32 0.020408163, %v9301_v5 }
 0x746   : > { %v3895_v36 = vadd.f32 0.001, %v3667_v55  ;;  %v11055_v55 = vld [vmem:[#allocation187_spill] sm:$0xff] }
 0x748   : > { %6732 = vrsqrt.f32 %v3895_v36 }
 0x752   : > { %4413 = vperm.xlu1 %6403, %v4121_v50   ;;  %v11053_v50 = vld [vmem:[#allocation49_spill] sm:$0xff]  ;;  %v6733_v35 = vpop.eup %6732 }
 0x757   : > { %4448 = vperm.xlu0 %6402, %v4128_v37   ;;  %v3674_v37 = vmul.f32 0.020408163, %v9338_v19 }
 0x759   : > { %v3902_v60 = vadd.f32 0.001, %v3674_v37 }
 0x75b   : > { %6734 = vrsqrt.f32 %v3902_v60 }
 0x764   : > { %v9819_v26 = vpop.xlane.xlu1 %3517  ;;  %v9821_v48 = vpop.xlane.xlu0 %3538 }
 0x768   : > { %v4394_v44 = vpop.permute.xlu1 %4393 }
 0x769   : > { %v4801_v42 = vmul.f32 %v4394_v44, %v11050_v21  ;;  %v3555_v44 = vsel %vm2593_vm2, %v3257_v27, 0.0  ;;  %v6911_v21 = vld [vmem:[%s7073_s22 + $0x170] sm:$0xff] }
 0x76b   : > { %v5485_v16 = vadd.f32 %v11051_v20, %v4801_v42  ;;  %v4123_v42 = vmul.f32 %v6911_v21, %v6733_v35  ;;  %v6735_v20 = vpop.eup %6734  ;;  %v11059_v35 = vld [vmem:[#allocation3_spill] sm:$0xff] }
 0x76c   : > { %v4429_v33 = vpop.permute.xlu0 %4428 }
 0x76d   : > { %5599 = vst.msk [vmem:[%s8984_s26 + $0x140] sm:$0xff] %vm2593_vm2, %v5485_v16  ;;  %v4808_v61 = vmul.f32 %v4429_v33, %v9059_v17  ;;  %v3534_v17 = vsel %vm2593_vm2, %v3250_v54, 0.0  ;;  %v6912_v16 = vld [vmem:[%s7073_s22 + $0x1a8] sm:$0xff]  ;;  %v11056_v54 = vld [vmem:[#allocation41_spill] sm:$0xff] }
 0x76e   : > { %v4130_v33 = vmul.f32 %v6912_v16, %v6735_v20  ;;  %v11061_v20 = vld [vmem:[#allocation6_spill] sm:$0xff] }
 0x76f   : > { %v5492_v25 = vadd.f32 %v11053_v50, %v4808_v61  ;;  %v3669_v5 = vmul.f32 0.020408163, %v11061_v20  ;;  %v11062_v20 = vld [vmem:[#allocation129_spill] sm:$0xff] }
 0x771   : > { %5606 = vst.msk [vmem:[%s8984_s26 + $0x178] sm:$0xff] %vm2593_vm2, %v5492_v25  ;;  %v3024_v25 = vmul.f32 0.020408163, %v9246_v46 }
 0x776   : > { %3556 = vadd.xlane.f32.xlu0 %v3555_v44  ;;  %3535 = vadd.xlane.f32.xlu1 %v3534_v17  ;;  %v9858_v44 = vsub.f32 %v8814_v58, %v3024_v25  ;;  %v11057_v17 = vld [vmem:[#allocation119_spill] sm:$0xff] }
 0x777   : > { %v9861_v60 = vsub.f32 %v11057_v17, %v3031_v63  ;;  %v6914_v17 = vld [vmem:[%s7073_s22 + $0x1b8] sm:$0xff] }
 0x778   : > { %v3252_v58 = vmul.f32 %v9858_v44, %v9858_v44 }
 0x779   : > { %11058 = vst [vmem:[#allocation138_spill] sm:$0xff] %v9861_v60  ;;  %v3259_v16 = vmul.f32 %v9861_v60, %v9861_v60  ;;  %v11079_v60 = vld [vmem:[#allocation14_spill] sm:$0xff] }
 0x77a   : > { %v3540_v63 = vsel %vm2593_vm2, %v3252_v58, 0.0 }
 0x77b   : > { %v3561_v25 = vsel %vm2593_vm2, %v3259_v16, 0.0  ;;  %v11063_v16 = vld [vmem:[#allocation190_spill] sm:$0xff] }
 0x787   : > { %4423 = vperm.xlu1 %6403, %v4123_v42   ;;  %v11060_v42 = vld [vmem:[#allocation51_spill] sm:$0xff] }
 0x78c   : > { %4458 = vperm.xlu0 %6402, %v4130_v33   ;;  %v3897_v33 = vadd.f32 0.001, %v3669_v5  ;;  %v3033_v5 = vmul.f32 0.020408163, %v11062_v20 }
 0x78e   : > { %6736 = vrsqrt.f32 %v3897_v33  ;;  %v11064_v33 = vld [vmem:[#allocation43_spill] sm:$0xff] }
 0x799   : > { %v9849_v19 = vpop.xlane.xlu1 %3523  ;;  %v9851_v61 = vpop.xlane.xlu0 %3544 }
 0x79d   : > { %v4404_v50 = vpop.permute.xlu1 %4403 }
 0x79e   : > { %v4803_v27 = vmul.f32 %v4404_v50, %v11055_v55  ;;  %v3676_v50 = vmul.f32 0.020408163, %v9380_v14 }
 0x7a0   : > { %v5487_v36 = vadd.f32 %v11056_v54, %v4803_v27  ;;  %v3904_v55 = vadd.f32 0.001, %v3676_v50  ;;  %v6737_v27 = vpop.eup %6736  ;;  %v6913_v54 = vld [vmem:[%s7073_s22 + $0x180] sm:$0xff] }
 0x7a1   : > { %v4439_v37 = vpop.permute.xlu0 %4438 }
 0x7a2   : > { %5601 = vst.msk [vmem:[%s8984_s26 + $0x150] sm:$0xff] %vm2593_vm2, %v5487_v36  ;;  %v4810_v21 = vmul.f32 %v4439_v37, %v11059_v35  ;;  %6738 = vrsqrt.f32 %v3904_v55  ;;  %v4125_v36 = vmul.f32 %v6913_v54, %v6737_v27  ;;  %v11066_v27 = vld [vmem:[#allocation8_spill] sm:$0xff] }
 0x7a3   : > { %v9891_v54 = vsub.f32 %v11066_v27, %v3033_v5 }
 0x7a4   : > { %v5494_v46 = vadd.f32 %v11060_v42, %v4810_v21 }
 0x7a5   : > { %11067 = vst [vmem:[#allocation21_spill] sm:$0xff] %v9891_v54 }
 0x7a6   : > { %5608 = vst.msk [vmem:[%s8984_s26 + $0x188] sm:$0xff] %vm2593_vm2, %v5494_v46  ;;  %v3026_v46 = vmul.f32 0.020408163, %v9294_v62 }
 0x7ab   : > { %3562 = vadd.xlane.f32.xlu0 %v3561_v25  ;;  %3541 = vadd.xlane.f32.xlu1 %v3540_v63  ;;  %v11065_v63 = vld [vmem:[#allocation211_spill] sm:$0xff] }
 0x7ac   : > { %v6739_v37 = vpop.eup %6738  ;;  %v9888_v55 = vsub.f32 %v11065_v63, %v3026_v46  ;;  %v6915_v63 = vld [vmem:[%s7073_s22 + $0x190] sm:$0xff] }
 0x7ad   : > { %v4132_v35 = vmul.f32 %v6914_v17, %v6739_v37  ;;  %v11069_v17 = vld [vmem:[#allocation53_spill] sm:$0xff] }
 0x7ae   : > { %v3254_v46 = vmul.f32 %v9888_v55, %v9888_v55 }
 0x7bc   : > { %4433 = vperm.xlu1 %6403, %v4125_v36   ;;  %v11068_v36 = vld [vmem:[#allocation116_spill] sm:$0xff] }
 0x7c1   : > { %4468 = vperm.xlu0 %6402, %v4132_v35   ;;  %v11070_v35 = vld [vmem:[#allocation114_spill] sm:$0xff] }
 0x7c2   : > { %v3671_v20 = vmul.f32 0.020408163, %v11070_v35 }
 0x7c4   : > { %v3899_v5 = vadd.f32 0.001, %v3671_v20  ;;  %v11071_v20 = vld [vmem:[#allocation130_spill] sm:$0xff] }
 0x7c6   : > { %6740 = vrsqrt.f32 %v3899_v5  ;;  %v11072_v5 = vld [vmem:[#allocation192_spill] sm:$0xff] }
 0x7ce   : > { %v9879_v14 = vpop.xlane.xlu1 %3529  ;;  %v9881_v21 = vpop.xlane.xlu0 %3550 }
 0x7d2   : > { %v4414_v42 = vpop.permute.xlu1 %4413 }
 0x7d3   : > { %v4805_v58 = vmul.f32 %v4414_v42, %v11063_v16  ;;  %v3261_v42 = vmul.f32 %v9891_v54, %v9891_v54  ;;  %v3678_v16 = vmul.f32 0.020408163, %v9422_v59  ;;  %v11078_v54 = vld [vmem:[#allocation55_spill] sm:$0xff] }
 0x7d5   : > { %v5489_v50 = vadd.f32 %v11064_v33, %v4805_v58  ;;  %v3567_v58 = vsel %vm2593_vm2, %v3261_v42, 0.0  ;;  %v3546_v33 = vsel %vm2593_vm2, %v3254_v46, 0.0  ;;  %v3028_v42 = vmul.f32 0.020408163, %v11071_v20 }
 0x7d6   : > { %v4449_v25 = vpop.permute.xlu0 %4448  ;;  %v3035_v46 = vmul.f32 0.020408163, %v9389_v30  ;;  %v3673_v30 = vmul.f32 0.020408163, %v11079_v60 }
 0x7d7   : > { %5603 = vst.msk [vmem:[%s8984_s26 + $0x160] sm:$0xff] %vm2593_vm2, %v5489_v50  ;;  %v4812_v37 = vmul.f32 %v4449_v25, %v11068_v36  ;;  %v3906_v50 = vadd.f32 0.001, %v3678_v16  ;;  %v6741_v25 = vpop.eup %6740 }
 0x7d8   : > { %v4127_v27 = vmul.f32 %v6915_v63, %v6741_v25  ;;  %v11074_v25 = vld [vmem:[#allocation218_spill] sm:$0xff] }
 0x7d9   : > { %v5496_v62 = vadd.f32 %v11069_v17, %v4812_v37  ;;  %6742 = vrsqrt.f32 %v3906_v50  ;;  %v6916_v37 = vld [vmem:[%s7073_s22 + $0x1c8] sm:$0xff]  ;;  %v9918_v63 = vsub.f32 %v11074_v25, %v3028_v42 }
 0x7db   : > { %5610 = vst.msk [vmem:[%s8984_s26 + $0x198] sm:$0xff] %vm2593_vm2, %v5496_v62  ;;  %v3256_v42 = vmul.f32 %v9918_v63, %v9918_v63 }
 0x7e0   : > { %3568 = vadd.xlane.f32.xlu0 %v3567_v58  ;;  %3547 = vadd.xlane.f32.xlu1 %v3546_v33  ;;  %v11073_v58 = vld [vmem:[#allocation46_spill] sm:$0xff] }
 0x7e3   : > { %v6743_v36 = vpop.eup %6742 }
 0x7e4   : > { %v4134_v17 = vmul.f32 %v6916_v37, %v6743_v36  ;;  %v11077_v37 = vld [vmem:[#allocation123_spill] sm:$0xff] }
 0x7f1   : > { %4443 = vperm.xlu1 %6403, %v4127_v27   ;;  %v11075_v27 = vld [vmem:[#allocation117_spill] sm:$0xff] }
 0x7f2   : > { %v9921_v36 = vsub.f32 %v11075_v27, %v3035_v46  ;;  %v3901_v46 = vadd.f32 0.001, %v3673_v30 }
 0x7f4   : > { %11076 = vst [vmem:[#allocation203_spill] sm:$0xff] %v9921_v36  ;;  %6744 = vrsqrt.f32 %v3901_v46  ;;  %v11083_v46 = vld [vmem:[#allocation13_spill] sm:$0xff] }
 0x7f6   : > { %4478 = vperm.xlu0 %6402, %v4134_v17  }
 0x803   : > { %v9909_v59 = vpop.xlane.xlu1 %3535  ;;  %v9911_v62 = vpop.xlane.xlu0 %3556 }
 0x807   : > { %v4424_v35 = vpop.permute.xlu1 %4423 }
 0x808   : > { %v4807_v16 = vmul.f32 %v4424_v35, %v11072_v5  ;;  %v3263_v35 = vmul.f32 %v9921_v36, %v9921_v36  ;;  %v11080_v5 = vld [vmem:[#allocation152_spill] sm:$0xff]  ;;  %v11086_v36 = vld [vmem:[#allocation221_spill] sm:$0xff] }
 0x80a   : > { %v5491_v33 = vadd.f32 %v11073_v58, %v4807_v16  ;;  %v3680_v16 = vmul.f32 0.020408163, %v11080_v5  ;;  %v3573_v58 = vsel %vm2593_vm2, %v3263_v35, 0.0 }
 0x80b   : > { %v4459_v50 = vpop.permute.xlu0 %4458 }
 0x80c   : > { %5605 = vst.msk [vmem:[%s8984_s26 + $0x170] sm:$0xff] %vm2593_vm2, %v5491_v33  ;;  %v4814_v17 = vmul.f32 %v4459_v50, %v11077_v37  ;;  %v3552_v33 = vsel %vm2593_vm2, %v3256_v42, 0.0  ;;  %v3908_v60 = vadd.f32 0.001, %v3680_v16  ;;  %v6917_v50 = vld [vmem:[%s7073_s22 + $0x1a0] sm:$0xff]  ;;  %v6918_v37 = vld [vmem:[%s7073_s22 + $0x1d8] sm:$0xff] }
 0x80d   : > { %v11082_v42 = vld [vmem:[#allocation133_spill] sm:$0xff]  ;;  %v3037_v16 = vmul.f32 0.020408163, %v11083_v46  ;;  %v3675_v46 = vmul.f32 0.020408163, %v11091_v4 }
 0x80e   : > { %v5498_v20 = vadd.f32 %v11078_v54, %v4814_v17  ;;  %6746 = vrsqrt.f32 %v3908_v60  ;;  %v6745_v54 = vpop.eup %6744  ;;  %v3030_v5 = vmul.f32 0.020408163, %v11082_v42  ;;  %v11085_v60 = vld [vmem:[#allocation48_spill] sm:$0xff] }
 0x80f   : > { %v4129_v25 = vmul.f32 %v6917_v50, %v6745_v54 }
 0x810   : > { %5612 = vst.msk [vmem:[%s8984_s26 + $0x1a8] sm:$0xff] %vm2593_vm2, %v5498_v20 }
 0x815   : > { %3574 = vadd.xlane.f32.xlu0 %v3573_v58  ;;  %3553 = vadd.xlane.f32.xlu1 %v3552_v33  ;;  %v11084_v58 = vld [vmem:[#allocation194_spill] sm:$0xff] }
 0x818   : > { %v6747_v27 = vpop.eup %6746 }
 0x819   : > { %v4136_v17 = vmul.f32 %v6918_v37, %v6747_v27  ;;  %v11087_v27 = vld [vmem:[#allocation136_spill] sm:$0xff] }
 0x81a   : > { %v9951_v37 = vsub.f32 %v11087_v27, %v3037_v16  ;;  %v3682_v16 = vmul.f32 0.020408163, %v9506_v0 }
 0x81c   : > { %11088 = vst [vmem:[#allocation151_spill] sm:$0xff] %v9951_v37  ;;  %v3910_v4 = vadd.f32 0.001, %v3682_v16  ;;  %v11095_v16 = vld [vmem:[#allocation215_spill] sm:$0xff] }
 0x826   : > { %4453 = vperm.xlu1 %6403, %v4129_v25   ;;  %v9948_v25 = vsub.f32 %v11086_v36, %v3030_v5  ;;  %v3903_v5 = vadd.f32 0.001, %v3675_v46  ;;  %v11093_v46 = vld [vmem:[#allocation125_spill] sm:$0xff] }
 0x828   : > { %v3258_v36 = vmul.f32 %v9948_v25, %v9948_v25  ;;  %6748 = vrsqrt.f32 %v3903_v5 }
 0x829   : > { %6750 = vrsqrt.f32 %v3910_v4 }
 0x82b   : > { %4488 = vperm.xlu0 %6402, %v4136_v17   ;;  %v11089_v17 = vld [vmem:[#allocation186_spill] sm:$0xff] }
 0x838   : > { %v9939_v20 = vpop.xlane.xlu1 %3541  ;;  %v9941_v30 = vpop.xlane.xlu0 %3562 }
 0x839   : > { %11081 = vst [vmem:[#allocation153_spill] sm:$0xff] %v9941_v30  ;;  %v11102_v30 = vld [vmem:[#allocation7_spill] sm:$0xff] }
 0x83c   : > { %v4434_v35 = vpop.permute.xlu1 %4433 }
 0x83d   : > { %v4809_v33 = vmul.f32 %v4434_v35, %v11084_v58  ;;  %v3265_v35 = vmul.f32 %v9951_v37, %v9951_v37 }
 0x83f   : > { %v5493_v54 = vadd.f32 %v11085_v60, %v4809_v33  ;;  %v3579_v58 = vsel %vm2593_vm2, %v3265_v35, 0.0  ;;  %v3558_v33 = vsel %vm2593_vm2, %v3258_v36, 0.0  ;;  %v3032_v35 = vmul.f32 0.020408163, %v11093_v46  ;;  %v11094_v36 = vld [vmem:[#allocation15_spill] sm:$0xff] }
 0x840   : > { %v4469_v50 = vpop.permute.xlu0 %4468  ;;  %v3039_v5 = vmul.f32 0.020408163, %v11094_v36  ;;  %v3677_v36 = vmul.f32 0.020408163, %v11102_v30 }
 0x841   : > { %5607 = vst.msk [vmem:[%s8984_s26 + $0x180] sm:$0xff] %vm2593_vm2, %v5493_v54  ;;  %v4816_v53 = vmul.f32 %v4469_v50, %v11089_v17  ;;  %v6920_v50 = vld [vmem:[%s7073_s22 + $0x1e8] sm:$0xff] }
 0x843   : > { %v5500_v42 = vadd.f32 %v11090_v7, %v4816_v53  ;;  %v6749_v7 = vpop.eup %6748  ;;  %v6919_v53 = vld [vmem:[%s7073_s22 + $0x1b0] sm:$0xff] }
 0x844   : > { %v4131_v60 = vmul.f32 %v6919_v53, %v6749_v7  ;;  %v6751_v54 = vpop.eup %6750  ;;  %v11097_v53 = vld [vmem:[#allocation115_spill] sm:$0xff] }
 0x845   : > { %5614 = vst.msk [vmem:[%s8984_s26 + $0x1b8] sm:$0xff] %vm2593_vm2, %v5500_v42  ;;  %v4138_v27 = vmul.f32 %v6920_v50, %v6751_v54  ;;  %v11098_v54 = vld [vmem:[#allocation126_spill] sm:$0xff] }
 0x846   : > { %v9981_v50 = vsub.f32 %v11098_v54, %v3039_v5  ;;  %v3905_v5 = vadd.f32 0.001, %v3677_v36  ;;  %v11104_v36 = vld [vmem:[#allocation128_spill] sm:$0xff] }
 0x848   : > { %11099 = vst [vmem:[#allocation199_spill] sm:$0xff] %v9981_v50  ;;  %6752 = vrsqrt.f32 %v3905_v5  ;;  %v11105_v5 = vld [vmem:[#allocation219_spill] sm:$0xff] }
 0x84a   : > { %3580 = vadd.xlane.f32.xlu0 %v3579_v58  ;;  %3559 = vadd.xlane.f32.xlu1 %v3558_v33  ;;  %v11096_v33 = vld [vmem:[#allocation50_spill] sm:$0xff] }
 0x85b   : > { %4463 = vperm.xlu1 %6403, %v4131_v60   ;;  %v9978_v60 = vsub.f32 %v11097_v53, %v3032_v35  ;;  %v6922_v53 = vld [vmem:[%s7073_s22 + $0x1f8] sm:$0xff] }
 0x85d   : > { %v3260_v35 = vmul.f32 %v9978_v60, %v9978_v60 }
 0x860   : > { %4498 = vperm.xlu0 %6402, %v4138_v27   ;;  %v11100_v27 = vld [vmem:[#allocation140_spill] sm:$0xff] }
 0x86d   : > { %v9969_v0 = vpop.xlane.xlu1 %3547  ;;  %v9971_v17 = vpop.xlane.xlu0 %3568 }
 0x86e   : > { %11092 = vst [vmem:[#allocation32_spill] sm:$0xff] %v9971_v17  ;;  %v11101_v17 = vld [vmem:[#allocation59_spill] sm:$0xff] }
 0x871   : > { %v4444_v42 = vpop.permute.xlu1 %4443 }
 0x872   : > { %v4811_v58 = vmul.f32 %v4444_v42, %v11095_v16  ;;  %v3267_v42 = vmul.f32 %v9981_v50, %v9981_v50  ;;  %v3684_v16 = vmul.f32 0.020408163, %v9544_v24  ;;  %v11111_v50 = vld [vmem:[#allocation61_spill] sm:$0xff] }
 0x874   : > { %v5495_v4 = vadd.f32 %v11096_v33, %v4811_v58  ;;  %v3585_v58 = vsel %vm2593_vm2, %v3267_v42, 0.0  ;;  %v3564_v33 = vsel %vm2593_vm2, %v3260_v35, 0.0  ;;  %v3912_v30 = vadd.f32 0.001, %v3684_v16 }
 0x875   : > { %v4479_v7 = vpop.permute.xlu0 %4478  ;;  %v3034_v42 = vmul.f32 0.020408163, %v11104_v36  ;;  %v3041_v35 = vmul.f32 0.020408163, %v9515_v22 }
 0x876   : > { %5609 = vst.msk [vmem:[%s8984_s26 + $0x190] sm:$0xff] %vm2593_vm2, %v5495_v4  ;;  %v4818_v37 = vmul.f32 %v4479_v7, %v11100_v27  ;;  %6754 = vrsqrt.f32 %v3912_v30 }
 0x878   : > { %v5502_v46 = vadd.f32 %v11101_v17, %v4818_v37  ;;  %v6753_v37 = vpop.eup %6752  ;;  %v6921_v17 = vld [vmem:[%s7073_s22 + $0x1c0] sm:$0xff] }
 0x879   : > { %v4133_v4 = vmul.f32 %v6921_v17, %v6753_v37  ;;  %v11107_v37 = vld [vmem:[#allocation5_spill] sm:$0xff] }
 0x87a   : > { %5616 = vst.msk [vmem:[%s8984_s26 + $0x1c8] sm:$0xff] %vm2593_vm2, %v5502_v46  ;;  %v10008_v17 = vsub.f32 %v11107_v37, %v3034_v42 }
 0x87c   : > { %v3262_v42 = vmul.f32 %v10008_v17, %v10008_v17 }
 0x87f   : > { %3586 = vadd.xlane.f32.xlu0 %v3585_v58  ;;  %3565 = vadd.xlane.f32.xlu1 %v3564_v33  ;;  %v11106_v58 = vld [vmem:[#allocation52_spill] sm:$0xff] }
 0x880   : > { %v6755_v7 = vpop.eup %6754 }
 0x881   : > { %v4140_v54 = vmul.f32 %v6922_v53, %v6755_v7  ;;  %v11110_v53 = vld [vmem:[#allocation185_spill] sm:$0xff] }
 0x890   : > { %4473 = vperm.xlu1 %6403, %v4133_v4   ;;  %v11108_v4 = vld [vmem:[#allocation9_spill] sm:$0xff] }
 0x891   : > { %v10011_v7 = vsub.f32 %v11108_v4, %v3041_v35  ;;  %v6924_v4 = vld [vmem:[%s7073_s22 + $0x208] sm:$0xff] }
 0x893   : > { %11109 = vst [vmem:[#allocation142_spill] sm:$0xff] %v10011_v7 }
 0x895   : > { %4508 = vperm.xlu0 %6402, %v4140_v54  }
 0x8a2   : > { %v9999_v24 = vpop.xlane.xlu1 %3553  ;;  %v10001_v27 = vpop.xlane.xlu0 %3574 }
 0x8a3   : > { %11103 = vst [vmem:[#allocation168_spill] sm:$0xff] %v10001_v27  ;;  %v11112_v27 = vld [vmem:[#allocation182_spill] sm:$0xff] }
 0x8a4   : > { %v3679_v22 = vmul.f32 0.020408163, %v11112_v27 }
 0x8a6   : > { %v4454_v46 = vpop.permute.xlu1 %4453  ;;  %v3907_v35 = vadd.f32 0.001, %v3679_v22  ;;  %v3036_v22 = vmul.f32 0.020408163, %v9508_v52 }
 0x8a7   : > { %v4813_v16 = vmul.f32 %v4454_v46, %v11105_v5  ;;  %v3269_v46 = vmul.f32 %v10011_v7, %v10011_v7  ;;  %v3686_v5 = vmul.f32 0.020408163, %v9582_v2  ;;  %v11119_v7 = vld [vmem:[#allocation20_spill] sm:$0xff] }
 0x8a8   : > { %6756 = vrsqrt.f32 %v3907_v35 }
 0x8a9   : > { %v5497_v33 = vadd.f32 %v11106_v58, %v4813_v16  ;;  %v3591_v16 = vsel %vm2593_vm2, %v3269_v46, 0.0  ;;  %v3570_v58 = vsel %vm2593_vm2, %v3262_v42, 0.0  ;;  %v3043_v46 = vmul.f32 0.020408163, %v9553_v32  ;;  %v11113_v42 = vld [vmem:[#allocation12_spill] sm:$0xff] }
 0x8aa   : > { %v4489_v30 = vpop.permute.xlu0 %4488  ;;  %v3681_v32 = vmul.f32 0.020408163, %v11119_v7 }
 0x8ab   : > { %5611 = vst.msk [vmem:[%s8984_s26 + $0x1a0] sm:$0xff] %vm2593_vm2, %v5497_v33  ;;  %v4820_v54 = vmul.f32 %v4489_v30, %v11110_v53  ;;  %v6923_v33 = vld [vmem:[%s7073_s22 + $0x1d0] sm:$0xff] }
 0x8ad   : > { %v5504_v36 = vadd.f32 %v11111_v50, %v4820_v54  ;;  %v3914_v50 = vadd.f32 0.001, %v3686_v5  ;;  %v11114_v5 = vld [vmem:[#allocation54_spill] sm:$0xff] }
 0x8af   : > { %5618 = vst.msk [vmem:[%s8984_s26 + $0x1d8] sm:$0xff] %vm2593_vm2, %v5504_v36  ;;  %6758 = vrsqrt.f32 %v3914_v50  ;;  %v11115_v50 = vld [vmem:[#allocation16_spill] sm:$0xff] }
 0x8b2   : > { %v6757_v27 = vpop.eup %6756 }
 0x8b3   : > { %v4135_v30 = vmul.f32 %v6923_v33, %v6757_v27  ;;  %v10038_v27 = vsub.f32 %v11115_v50, %v3036_v22  ;;  %v11116_v33 = vld [vmem:[#allocation122_spill] sm:$0xff] }
 0x8b4   : > { %3592 = vadd.xlane.f32.xlu0 %v3591_v16  ;;  %3571 = vadd.xlane.f32.xlu1 %v3570_v58 }
 0x8b5   : > { %v3264_v22 = vmul.f32 %v10038_v27, %v10038_v27 }
 0x8b9   : > { %v6759_v37 = vpop.eup %6758 }
 0x8ba   : > { %v4142_v53 = vmul.f32 %v6924_v4, %v6759_v37  ;;  %v11117_v37 = vld [vmem:[#allocation22_spill] sm:$0xff] }
 0x8c5   : > { %4483 = vperm.xlu1 %6403, %v4135_v30   ;;  %v10041_v30 = vsub.f32 %v11116_v33, %v3043_v46  ;;  %v3909_v46 = vadd.f32 0.001, %v3681_v32  ;;  %v3038_v32 = vmul.f32 0.020408163, %v9546_v49 }
 0x8c7   : > { %6760 = vrsqrt.f32 %v3909_v46 }
 0x8ca   : > { %4518 = vperm.xlu0 %6402, %v4142_v53   ;;  %v11118_v53 = vld [vmem:[#allocation63_spill] sm:$0xff] }
 0x8d7   : > { %v10029_v2 = vpop.xlane.xlu1 %3559  ;;  %v10031_v54 = vpop.xlane.xlu0 %3580 }
 0x8db   : > { %v4464_v36 = vpop.permute.xlu1 %4463 }
 0x8dc   : > { %v4815_v35 = vmul.f32 %v4464_v36, %v11113_v42  ;;  %v3271_v36 = vmul.f32 %v10041_v30, %v10041_v30  ;;  %v3688_v42 = vmul.f32 0.020408163, %v9620_v47 }
 0x8de   : > { %v5499_v16 = vadd.f32 %v11114_v5, %v4815_v35  ;;  %v3597_v35 = vsel %vm2593_vm2, %v3271_v36, 0.0  ;;  %v3576_v5 = vsel %vm2593_vm2, %v3264_v22, 0.0  ;;  %v3916_v7 = vadd.f32 0.001, %v3688_v42  ;;  %v11120_v22 = vld [vmem:[#allocation121_spill] sm:$0xff]  ;;  %v11121_v42 = vld [vmem:[#allocation56_spill] sm:$0xff] }
 0x8df   : > { %v4499_v58 = vpop.permute.xlu0 %4498  ;;  %v3045_v36 = vmul.f32 0.020408163, %v9591_v15 }
 0x8e0   : > { %5613 = vst.msk [vmem:[%s8984_s26 + $0x1b0] sm:$0xff] %vm2593_vm2, %v5499_v16  ;;  %v4822_v4 = vmul.f32 %v4499_v58, %v11117_v37  ;;  %6762 = vrsqrt.f32 %v3916_v7  ;;  %v6761_v16 = vpop.eup %6760  ;;  %v6925_v58 = vld [vmem:[%s7073_s22 + $0x1e0] sm:$0xff]  ;;  %v6926_v37 = vld [vmem:[%s7073_s22 + $0x218] sm:$0xff]  ;;  %v11122_v7 = vld [vmem:[#allocation127_spill] sm:$0xff] }
 0x8e1   : > { %v4137_v50 = vmul.f32 %v6925_v58, %v6761_v16  ;;  %v10068_v16 = vsub.f32 %v11122_v7, %v3038_v32  ;;  %v10071_v58 = vsub.f32 %v9399_v11, %v3045_v36  ;;  %v3690_v36 = vmul.f32 0.020408163, %v9656_v9 }
 0x8e2   : > { %v5506_v52 = vadd.f32 %v11118_v53, %v4822_v4 }
 0x8e3   : > { %v3266_v32 = vmul.f32 %v10068_v16, %v10068_v16 }
 0x8e4   : > { %5620 = vst.msk [vmem:[%s8984_s26 + $0x1e8] sm:$0xff] %vm2593_vm2, %v5506_v52 }
 0x8e9   : > { %3598 = vadd.xlane.f32.xlu0 %v3597_v35  ;;  %3577 = vadd.xlane.f32.xlu1 %v3576_v5 }
 0x8ea   : > { %v6763_v33 = vpop.eup %6762 }
 0x8eb   : > { %v4144_v4 = vmul.f32 %v6926_v37, %v6763_v33  ;;  %v11124_v37 = vld [vmem:[#allocation65_spill] sm:$0xff] }
 0x8fa   : > { %4493 = vperm.xlu1 %6403, %v4137_v50   ;;  %v11123_v50 = vld [vmem:[#allocation135_spill] sm:$0xff] }
 0x8ff   : > { %4528 = vperm.xlu0 %6402, %v4144_v4   ;;  %v11125_v4 = vld [vmem:[#allocation132_spill] sm:$0xff] }
 0x900   : > { %v3683_v15 = vmul.f32 0.020408163, %v11125_v4 }
 0x902   : > { %v3911_v11 = vadd.f32 0.001, %v3683_v15  ;;  %v3040_v15 = vmul.f32 0.020408163, %v9584_v12 }
 0x904   : > { %6764 = vrsqrt.f32 %v3911_v11 }
 0x90c   : > { %v10059_v47 = vpop.xlane.xlu1 %3565  ;;  %v10061_v53 = vpop.xlane.xlu0 %3586 }
 0x910   : > { %v4474_v52 = vpop.permute.xlu1 %4473 }
 0x911   : > { %v4817_v46 = vmul.f32 %v4474_v52, %v11120_v22  ;;  %v3273_v52 = vmul.f32 %v10071_v58, %v10071_v58 }
 0x913   : > { %v5501_v35 = vadd.f32 %v11121_v42, %v4817_v46  ;;  %v3603_v22 = vsel %vm2593_vm2, %v3273_v52, 0.0  ;;  %v3582_v46 = vsel %vm2593_vm2, %v3266_v32, 0.0  ;;  %v3918_v42 = vadd.f32 0.001, %v3690_v36  ;;  %v11126_v32 = vld [vmem:[#allocation10_spill] sm:$0xff] }
 0x914   : > { %v4509_v5 = vpop.permute.xlu0 %4508  ;;  %v3047_v52 = vmul.f32 0.020408163, %v9629_v6  ;;  %v11127_v36 = vld [vmem:[#allocation58_spill] sm:$0xff] }
 0x915   : > { %5615 = vst.msk [vmem:[%s8984_s26 + $0x1c0] sm:$0xff] %vm2593_vm2, %v5501_v35  ;;  %v4824_v33 = vmul.f32 %v4509_v5, %v11123_v50  ;;  %6766 = vrsqrt.f32 %v3918_v42  ;;  %v6765_v35 = vpop.eup %6764  ;;  %v6927_v5 = vld [vmem:[%s7073_s22 + $0x1f0] sm:$0xff]  ;;  %v11128_v42 = vld [vmem:[#allocation120_spill] sm:$0xff] }
 0x916   : > { %v4139_v7 = vmul.f32 %v6927_v5, %v6765_v35  ;;  %v10098_v35 = vsub.f32 %v11128_v42, %v3040_v15  ;;  %v10101_v5 = vsub.f32 %v9441_v18, %v3047_v52  ;;  %v3692_v52 = vmul.f32 0.020408163, %v9693_v8 }
 0x917   : > { %v5508_v49 = vadd.f32 %v11124_v37, %v4824_v33  ;;  %v6928_v33 = vld [vmem:[%s7073_s22 + $0x228] sm:$0xff] }
 0x918   : > { %11129 = vst [vmem:[#allocation23_spill] sm:$0xff] %v10101_v5  ;;  %v3268_v15 = vmul.f32 %v10098_v35, %v10098_v35 }
 0x919   : > { %5622 = vst.msk [vmem:[%s8984_s26 + $0x1f8] sm:$0xff] %vm2593_vm2, %v5508_v49 }
 0x91e   : > { %3604 = vadd.xlane.f32.xlu0 %v3603_v22  ;;  %3583 = vadd.xlane.f32.xlu1 %v3582_v46 }
 0x91f   : > { %v6767_v50 = vpop.eup %6766 }
 0x920   : > { %v4146_v37 = vmul.f32 %v6928_v33, %v6767_v50  ;;  %v11131_v33 = vld [vmem:[#allocation67_spill] sm:$0xff] }
 0x92f   : > { %4503 = vperm.xlu1 %6403, %v4139_v7   ;;  %v11130_v7 = vld [vmem:[#allocation141_spill] sm:$0xff] }
 0x934   : > { %4538 = vperm.xlu0 %6402, %v4146_v37   ;;  %v11132_v37 = vld [vmem:[#allocation137_spill] sm:$0xff] }
 0x935   : > { %v3685_v6 = vmul.f32 0.020408163, %v11132_v37 }
 0x937   : > { %v3913_v18 = vadd.f32 0.001, %v3685_v6  ;;  %v3042_v6 = vmul.f32 0.020408163, %v9622_v10  ;;  %v11138_v10 = vld [vmem:[#allocation196_spill] sm:$0xff] }
 0x939   : > { %6768 = vrsqrt.f32 %v3913_v18 }
 0x941   : > { %v10089_v9 = vpop.xlane.xlu1 %3571  ;;  %v10091_v49 = vpop.xlane.xlu0 %3592 }
 0x945   : > { %v4484_v4 = vpop.permute.xlu1 %4483 }
 0x946   : > { %v4819_v11 = vmul.f32 %v4484_v4, %v11126_v32  ;;  %v3275_v4 = vmul.f32 %v10101_v5, %v10101_v5  ;;  %v3687_v5 = vmul.f32 0.020408163, %v11138_v10 }
 0x948   : > { %v5503_v22 = vadd.f32 %v11127_v36, %v4819_v11  ;;  %v3609_v32 = vsel %vm2593_vm2, %v3275_v4, 0.0  ;;  %v3588_v11 = vsel %vm2593_vm2, %v3268_v15, 0.0  ;;  %v3920_v36 = vadd.f32 0.001, %v3692_v52  ;;  %v11133_v15 = vld [vmem:[#allocation118_spill] sm:$0xff]  ;;  %v11134_v52 = vld [vmem:[#allocation60_spill] sm:$0xff] }
 0x949   : > { %v4519_v46 = vpop.permute.xlu0 %4518  ;;  %v3049_v4 = vmul.f32 0.020408163, %v9665_v40 }
 0x94a   : > { %5617 = vst.msk [vmem:[%s8984_s26 + $0x1d0] sm:$0xff] %vm2593_vm2, %v5503_v22  ;;  %v4826_v50 = vmul.f32 %v4519_v46, %v11130_v7  ;;  %6770 = vrsqrt.f32 %v3920_v36  ;;  %v6769_v22 = vpop.eup %6768  ;;  %v6929_v46 = vld [vmem:[%s7073_s22 + $0x200] sm:$0xff]  ;;  %v11135_v36 = vld [vmem:[#allocation144_spill] sm:$0xff] }
 0x94b   : > { %v4141_v42 = vmul.f32 %v6929_v46, %v6769_v22  ;;  %v10128_v22 = vsub.f32 %v11135_v36, %v3042_v6  ;;  %v10131_v46 = vsub.f32 %v9483_v1, %v3049_v4  ;;  %v3915_v6 = vadd.f32 0.001, %v3687_v5 }
 0x94c   : > { %v5510_v12 = vadd.f32 %v11131_v33, %v4826_v50  ;;  %v6930_v50 = vld [vmem:[%s7073_s22 + $0x238] sm:$0xff]  ;;  %v3694_v1 = vmul.f32 0.020408163, %v9725_v38  ;;  %v3700_v38 = vmul.f32 0.020408163, %v9819_v26 }
 0x94d   : > { %v3277_v40 = vmul.f32 %v10131_v46, %v10131_v46  ;;  %6772 = vrsqrt.f32 %v3915_v6 }
 0x94e   : > { %5624 = vst.msk [vmem:[%s8984_s26 + $0x208] sm:$0xff] %vm2593_vm2, %v5510_v12 }
 0x94f   : > { %v3615_v4 = vsel %vm2593_vm2, %v3277_v40, 0.0  ;;  %v3704_v40 = vmul.f32 0.020408163, %v9879_v14 }
 0x951   : > { %v3932_v26 = vadd.f32 0.001, %v3704_v40 }
 0x953   : > { %3610 = vadd.xlane.f32.xlu0 %v3609_v32  ;;  %3589 = vadd.xlane.f32.xlu1 %v3588_v11 }
 0x954   : > { %v6771_v7 = vpop.eup %6770 }
 0x955   : > { %v4148_v33 = vmul.f32 %v6930_v50, %v6771_v7  ;;  %v11137_v50 = vld [vmem:[#allocation69_spill] sm:$0xff] }
 0x957   : > { %v6773_v36 = vpop.eup %6772 }
 0x964   : > { %4513 = vperm.xlu1 %6403, %v4141_v42   ;;  %v11136_v42 = vld [vmem:[#allocation205_spill] sm:$0xff] }
 0x969   : > { %4548 = vperm.xlu0 %6402, %v4148_v33  }
 0x976   : > { %v10119_v8 = vpop.xlane.xlu1 %3577  ;;  %v10121_v12 = vpop.xlane.xlu0 %3598 }
 0x97a   : > { %v4494_v37 = vpop.permute.xlu1 %4493 }
 0x97b   : > { %v4821_v18 = vmul.f32 %v4494_v37, %v11133_v15  ;;  %v3270_v37 = vmul.f32 %v10128_v22, %v10128_v22 }
 0x97d   : > { %v5505_v32 = vadd.f32 %v11134_v52, %v4821_v18  ;;  %v3594_v15 = vsel %vm2593_vm2, %v3270_v37, 0.0  ;;  %v3922_v18 = vadd.f32 0.001, %v3694_v1  ;;  %v3696_v52 = vmul.f32 0.020408163, %v9757_v51 }
 0x97e   : > { %v4529_v11 = vpop.permute.xlu0 %4528  ;;  %v3706_v1 = vmul.f32 0.020408163, %v9909_v59 }
 0x97f   : > { %5619 = vst.msk [vmem:[%s8984_s26 + $0x1e0] sm:$0xff] %vm2593_vm2, %v5505_v32  ;;  %v4828_v7 = vmul.f32 %v4529_v11, %v11136_v42  ;;  %6774 = vrsqrt.f32 %v3922_v18  ;;  %v3924_v32 = vadd.f32 0.001, %v3696_v52  ;;  %v3698_v11 = vmul.f32 0.020408163, %v9789_v28  ;;  %v6932_v28 = vld [vmem:[%s7073_s22 + $0x248] sm:$0xff] }
 0x980   : > { %v3928_v42 = vadd.f32 0.001, %v3700_v38  ;;  %v3934_v18 = vadd.f32 0.001, %v3706_v1  ;;  %v3708_v52 = vmul.f32 0.020408163, %v9939_v20 }
 0x981   : > { %v5512_v33 = vadd.f32 %v11137_v50, %v4828_v7  ;;  %6776 = vrsqrt.f32 %v3924_v32  ;;  %v3926_v5 = vadd.f32 0.001, %v3698_v11  ;;  %v3702_v7 = vmul.f32 0.020408163, %v9849_v19  ;;  %v6931_v50 = vld [vmem:[%s7073_s22 + $0x210] sm:$0xff]  ;;  %v6934_v32 = vld [vmem:[%s7073_s22 + $0x268] sm:$0xff] }
 0x982   : > { %v3710_v38 = vmul.f32 0.020408163, %v9969_v0  ;;  %v6936_v20 = vld [vmem:[%s7073_s22 + $0x288] sm:$0xff] }
 0x983   : > { %5626 = vst.msk [vmem:[%s8984_s26 + $0x218] sm:$0xff] %vm2593_vm2, %v5512_v33  ;;  %6778 = vrsqrt.f32 %v3926_v5  ;;  %v4143_v33 = vmul.f32 %v6931_v50, %v6773_v36  ;;  %v3930_v51 = vadd.f32 0.001, %v3702_v7  ;;  %v3936_v5 = vadd.f32 0.001, %v3708_v52  ;;  %v6935_v36 = vld [vmem:[%s7073_s22 + $0x278] sm:$0xff] }
 0x984   : > { %6780 = vrsqrt.f32 %v3928_v42  ;;  %v3938_v7 = vadd.f32 0.001, %v3710_v38  ;;  %v3712_v50 = vmul.f32 0.020408163, %v9999_v24  ;;  %v6938_v38 = vld [vmem:[%s7073_s22 + $0x2a8] sm:$0xff] }
 0x985   : > { %6782 = vrsqrt.f32 %v3930_v51 }
 0x986   : > { %6784 = vrsqrt.f32 %v3932_v26  ;;  %v3940_v40 = vadd.f32 0.001, %v3712_v50  ;;  %v11139_v26 = vld [vmem:[#allocation18_spill] sm:$0xff]  ;;  %v11144_v50 = vld [vmem:[#allocation71_spill] sm:$0xff] }
 0x987   : > { %6786 = vrsqrt.f32 %v3934_v18 }
 0x988   : > { %3616 = vadd.xlane.f32.xlu0 %v3615_v4  ;;  %3595 = vadd.xlane.f32.xlu1 %v3594_v15  ;;  %v6933_v4 = vld [vmem:[%s7073_s22 + $0x258] sm:$0xff]  ;;  %6788 = vrsqrt.f32 %v3936_v5 }
 0x989   : > { %v6775_v10 = vpop.eup %6774  ;;  %6790 = vrsqrt.f32 %v3938_v7 }
 0x98a   : > { %v4150_v37 = vmul.f32 %v6932_v28, %v6775_v10  ;;  %v3714_v28 = vmul.f32 0.020408163, %v10029_v2  ;;  %6792 = vrsqrt.f32 %v3940_v40  ;;  %v3716_v2 = vmul.f32 0.020408163, %v10059_v47 }
 0x98b   : > { %v6777_v6 = vpop.eup %6776  ;;  %v3718_v47 = vmul.f32 0.020408163, %v10089_v9 }
 0x98c   : > { %v4152_v19 = vmul.f32 %v6933_v4, %v6777_v6  ;;  %v3044_v6 = vmul.f32 0.020408163, %v9659_v23  ;;  %v6937_v4 = vld [vmem:[%s7073_s22 + $0x298] sm:$0xff]  ;;  %v3942_v52 = vadd.f32 0.001, %v3714_v28  ;;  %v11142_v23 = vld [vmem:[#allocation131_spill] sm:$0xff] }
 0x98d   : > { %v6779_v15 = vpop.eup %6778 }
 0x98e   : > { %v4154_v14 = vmul.f32 %v6934_v32, %v6779_v15  ;;  %v6781_v11 = vpop.eup %6780  ;;  %v11140_v15 = vld [vmem:[#allocation62_spill] sm:$0xff]  ;;  %6794 = vrsqrt.f32 %v3942_v52  ;;  %v6941_v52 = vld [vmem:[%s7073_s22 + $0x2d8] sm:$0xff] }
 0x98f   : > { %v4156_v42 = vmul.f32 %v6935_v36, %v6781_v11  ;;  %v6783_v59 = vpop.eup %6782 }
 0x990   : > { %v4158_v10 = vmul.f32 %v6936_v20, %v6783_v59  ;;  %v6785_v51 = vpop.eup %6784  ;;  %v11143_v59 = vld [vmem:[#allocation193_spill] sm:$0xff] }
 0x991   : > { %v4160_v24 = vmul.f32 %v6937_v4, %v6785_v51  ;;  %v3689_v7 = vmul.f32 0.020408163, %v11143_v59  ;;  %v6939_v51 = vld [vmem:[%s7073_s22 + $0x2b8] sm:$0xff] }
 0x999   : > { %4523 = vperm.xlu1 %6403, %v4143_v33  }
 0x99e   : > { %4558 = vperm.xlu0 %6402, %v4150_v37  }
 0x9a2   : > { %4568 = vperm.xlu0 %6402, %v4152_v19   ;;  %v6787_v19 = vpop.eup %6786 }
 0x9a3   : > { %v4162_v36 = vmul.f32 %v6938_v38, %v6787_v19 }
 0x9a6   : > { %4578 = vperm.xlu0 %6402, %v4154_v14   ;;  %v11141_v14 = vld [vmem:[#allocation188_spill] sm:$0xff] }
 0x9a7   : > { %v10171_v11 = vsub.f32 %v11141_v14, %v3044_v6  ;;  %v3917_v6 = vadd.f32 0.001, %v3689_v7  ;;  %v6942_v14 = vld [vmem:[%s7073_s22 + $0x2e8] sm:$0xff] }
 0x9a9   : > { %v3272_v28 = vmul.f32 %v10171_v11, %v10171_v11 }
 0x9aa   : > { %4588 = vperm.xlu0 %6402, %v4156_v42   ;;  %v6789_v42 = vpop.eup %6788 }
 0x9ab   : > { %v3584_v33 = vpop.xlane.xlu1 %3583  ;;  %v10163_v0 = vpop.xlane.xlu0 %3604  ;;  %v4164_v40 = vmul.f32 %v6939_v51, %v6789_v42  ;;  %v3600_v4 = vsel %vm2593_vm2, %v3272_v28, 0.0  ;;  %v6947_v28 = vld [vmem:[%s7073_s22 + $0x328] sm:$0xff] }
 0x9ae   : > { %4598 = vperm.xlu0 %6402, %v4158_v10   ;;  %v3944_v10 = vadd.f32 0.001, %v3716_v2 }
 0x9af   : > { %v4504_v37 = vpop.permute.xlu1 %4503 }
 0x9b0   : > { %v4823_v1 = vmul.f32 %v4504_v37, %v11139_v26  ;;  %v6791_v37 = vpop.eup %6790  ;;  %6796 = vrsqrt.f32 %v3944_v10  ;;  %v3946_v26 = vadd.f32 0.001, %v3718_v47  ;;  %v6946_v47 = vld [vmem:[%s7073_s22 + $0x318] sm:$0xff] }
 0x9b1   : > { %v6793_v19 = vpop.eup %6792  ;;  %6798 = vrsqrt.f32 %v3917_v6 }
 0x9b2   : > { %v5507_v18 = vadd.f32 %v11140_v15, %v4823_v1  ;;  %4608 = vperm.xlu0 %6402, %v4160_v24   ;;  %v3720_v1 = vmul.f32 0.020408163, %v10119_v8  ;;  %v6940_v24 = vld [vmem:[%s7073_s22 + $0x2c8] sm:$0xff]  ;;  %6800 = vrsqrt.f32 %v3946_v26  ;;  %v4168_v2 = vmul.f32 %v6941_v52, %v6793_v19  ;;  %v11145_v19 = vld [vmem:[#allocation189_spill] sm:$0xff] }
 0x9b3   : > { %v4539_v32 = vpop.permute.xlu0 %4538  ;;  %v4166_v9 = vmul.f32 %v6940_v24, %v6791_v37 }
 0x9b4   : > { %5621 = vst.msk [vmem:[%s8984_s26 + $0x1f0] sm:$0xff] %vm2593_vm2, %v5507_v18  ;;  %v4830_v5 = vmul.f32 %v4539_v32, %v11142_v23  ;;  %v3948_v15 = vadd.f32 0.001, %v3720_v1  ;;  %v3722_v18 = vmul.f32 0.020408163, %v3584_v33  ;;  %v6795_v32 = vpop.eup %6794  ;;  %v6944_v33 = vld [vmem:[%s7073_s22 + $0x220] sm:$0xff] }
 0x9b5   : > { %v4170_v23 = vmul.f32 %v6942_v14, %v6795_v32 }
 0x9b6   : > { %v5514_v20 = vadd.f32 %v11144_v50, %v4830_v5  ;;  %4618 = vperm.xlu0 %6402, %v4162_v36   ;;  %6802 = vrsqrt.f32 %v3948_v15  ;;  %v3950_v8 = vadd.f32 0.001, %v3722_v18  ;;  %v6943_v36 = vld [vmem:[%s7073_s22 + $0x2f8] sm:$0xff]  ;;  %v6945_v50 = vld [vmem:[%s7073_s22 + $0x308] sm:$0xff] }
 0x9b7   : > { %v11146_v18 = vld [vmem:[#allocation64_spill] sm:$0xff] }
 0x9b8   : > { %5628 = vst.msk [vmem:[%s8984_s26 + $0x228] sm:$0xff] %vm2593_vm2, %v5514_v20  ;;  %6804 = vrsqrt.f32 %v3950_v8  ;;  %v11147_v8 = vld [vmem:[#allocation143_spill] sm:$0xff] }
 0x9ba   : > { %4628 = vperm.xlu0 %6402, %v4164_v40   ;;  %v6797_v5 = vpop.eup %6796 }
 0x9bb   : > { %v6799_v38 = vpop.eup %6798  ;;  %v4172_v42 = vmul.f32 %v6943_v36, %v6797_v5 }
 0x9bc   : > { %v6801_v59 = vpop.eup %6800  ;;  %v4145_v7 = vmul.f32 %v6944_v33, %v6799_v38  ;;  %v11149_v38 = vld [vmem:[#allocation201_spill] sm:$0xff] }
 0x9bd   : > { %3601 = vadd.xlane.f32.xlu1 %v3600_v4  ;;  %v4174_v20 = vmul.f32 %v6945_v50, %v6801_v59  ;;  %v3691_v36 = vmul.f32 0.020408163, %v11149_v38 }
 0x9be   : > { %4638 = vperm.xlu0 %6402, %v4166_v9   ;;  %v3046_v9 = vmul.f32 0.020408163, %v9695_v41 }
 0x9bf   : > { %v3919_v59 = vadd.f32 0.001, %v3691_v36 }
 0x9c0   : > { %v6803_v10 = vpop.eup %6802  ;;  %v10201_v32 = vsub.f32 %v9439_v34, %v3046_v9  ;;  %v6948_v34 = vld [vmem:[%s7073_s22 + $0x338] sm:$0xff] }
 0x9c1   : > { %v4176_v51 = vmul.f32 %v6946_v47, %v6803_v10 }
 0x9c2   : > { %4648 = vperm.xlu0 %6402, %v4168_v2   ;;  %v6805_v40 = vpop.eup %6804  ;;  %v3274_v41 = vmul.f32 %v10201_v32, %v10201_v32 }
 0x9c3   : > { %v4178_v37 = vmul.f32 %v6947_v28, %v6805_v40 }
 0x9c4   : > { %v3606_v33 = vsel %vm2593_vm2, %v3274_v41, 0.0  ;;  %v11156_v41 = vld [vmem:[#allocation77_spill] sm:$0xff] }
 0x9c6   : > { %4658 = vperm.xlu0 %6402, %v4170_v23   ;;  %v11148_v23 = vld [vmem:[#allocation73_spill] sm:$0xff] }
 0x9ca   : > { %4668 = vperm.xlu0 %6402, %v4172_v42  }
 0x9ce   : > { %4533 = vperm.xlu1 %6403, %v4145_v7   ;;  %4678 = vperm.xlu0 %6402, %v4174_v20   ;;  %v6949_v20 = vld [vmem:[%s7073_s22 + $0x230] sm:$0xff] }
 0x9d2   : > { %4688 = vperm.xlu0 %6402, %v4176_v51  }
 0x9d6   : > { %4698 = vperm.xlu0 %6402, %v4178_v37  }
 0x9e0   : > { %v3590_v6 = vpop.xlane.xlu1 %3589  ;;  %v10195_v4 = vpop.xlane.xlu0 %3610 }
 0x9e1   : > { %v3724_v26 = vmul.f32 0.020408163, %v3590_v6  ;;  %v3048_v6 = vmul.f32 0.020408163, %v9727_v29 }
 0x9e3   : > { %v3952_v1 = vadd.f32 0.001, %v3724_v26  ;;  %v11150_v26 = vld [vmem:[#allocation11_spill] sm:$0xff] }
 0x9e4   : > { %v4514_v24 = vpop.permute.xlu1 %4513 }
 0x9e5   : > { %v4825_v15 = vmul.f32 %v4514_v24, %v11145_v19  ;;  %6806 = vrsqrt.f32 %v3952_v1  ;;  %v11151_v24 = vld [vmem:[#allocation66_spill] sm:$0xff] }
 0x9e6   : > { %6808 = vrsqrt.f32 %v3919_v59 }
 0x9e7   : > { %v5509_v52 = vadd.f32 %v11146_v18, %v4825_v15  ;;  %v11152_v15 = vld [vmem:[#allocation139_spill] sm:$0xff] }
 0x9e8   : > { %v4549_v2 = vpop.permute.xlu0 %4548  ;;  %v10221_v18 = vsub.f32 %v11152_v15, %v3048_v6 }
 0x9e9   : > { %5623 = vst.msk [vmem:[%s8984_s26 + $0x200] sm:$0xff] %vm2593_vm2, %v5509_v52  ;;  %v4832_v14 = vmul.f32 %v4549_v2, %v11147_v8  ;;  %v11153_v52 = vld [vmem:[#allocation210_spill] sm:$0xff]  ;;  %v11154_v8 = vld [vmem:[#allocation75_spill] sm:$0xff] }
 0x9ea   : > { %v3276_v36 = vmul.f32 %v10221_v18, %v10221_v18 }
 0x9eb   : > { %v5516_v5 = vadd.f32 %v11148_v23, %v4832_v14  ;;  %v11155_v23 = vld [vmem:[#allocation145_spill] sm:$0xff] }
 0x9ed   : > { %5630 = vst.msk [vmem:[%s8984_s26 + $0x238] sm:$0xff] %vm2593_vm2, %v5516_v5  ;;  %v3693_v5 = vmul.f32 0.020408163, %v11155_v23 }
 0x9ef   : > { %v6807_v42 = vpop.eup %6806 }
 0x9f0   : > { %v4180_v7 = vmul.f32 %v6948_v34, %v6807_v42  ;;  %v6809_v50 = vpop.eup %6808 }
 0x9f1   : > { %v4147_v10 = vmul.f32 %v6949_v20, %v6809_v50  ;;  %v3612_v50 = vsel %vm2593_vm2, %v3276_v36, 0.0  ;;  %v6950_v20 = vld [vmem:[%s7073_s22 + $0x348] sm:$0xff] }
 0x9f2   : > { %3607 = vadd.xlane.f32.xlu1 %v3606_v33  ;;  %4708 = vperm.xlu0 %6402, %v4180_v7   ;;  %v3921_v33 = vadd.f32 0.001, %v3693_v5 }
 0xa03   : > { %4543 = vperm.xlu1 %6403, %v4147_v10  }
 0xa15   : > { %v3596_v47 = vpop.xlane.xlu1 %3595  ;;  %v10215_v28 = vpop.xlane.xlu0 %3616 }
 0xa16   : > { %v3726_v51 = vmul.f32 0.020408163, %v3596_v47 }
 0xa18   : > { %v3954_v40 = vadd.f32 0.001, %v3726_v51 }
 0xa19   : > { %v4524_v37 = vpop.permute.xlu1 %4523 }
 0xa1a   : > { %v4827_v1 = vmul.f32 %v4524_v37, %v11150_v26  ;;  %6810 = vrsqrt.f32 %v3954_v40  ;;  %v11158_v37 = vld [vmem:[#allocation81_spill] sm:$0xff] }
 0xa1b   : > { %6812 = vrsqrt.f32 %v3921_v33 }
 0xa1c   : > { %v5511_v9 = vadd.f32 %v11151_v24, %v4827_v1  ;;  %v11159_v1 = vld [vmem:[#allocation83_spill] sm:$0xff] }
 0xa1d   : > { %v4559_v19 = vpop.permute.xlu0 %4558 }
 0xa1e   : > { %5625 = vst.msk [vmem:[%s8984_s26 + $0x210] sm:$0xff] %vm2593_vm2, %v5511_v9  ;;  %v4834_v2 = vmul.f32 %v4559_v19, %v11153_v52  ;;  %v11160_v52 = vld [vmem:[#allocation85_spill] sm:$0xff] }
 0xa20   : > { %v5518_v14 = vadd.f32 %v11154_v8, %v4834_v2 }
 0xa21   : > { %v4569_v29 = vpop.permute.xlu0 %4568 }
 0xa22   : > { %5632 = vst.msk [vmem:[%s8984_s26 + $0x248] sm:$0xff] %vm2593_vm2, %v5518_v14  ;;  %v4836_v38 = vmul.f32 %v4569_v29, %v9671_v56  ;;  %v11157_v56 = vld [vmem:[#allocation79_spill] sm:$0xff]  ;;  %v6951_v14 = vld [vmem:[%s7073_s22 + $0x240] sm:$0xff] }
 0xa24   : > { %v5520_v42 = vadd.f32 %v11156_v41, %v4836_v38  ;;  %v6811_v59 = vpop.eup %6810  ;;  %v11162_v38 = vld [vmem:[#allocation89_spill] sm:$0xff] }
 0xa25   : > { %v4579_v34 = vpop.permute.xlu0 %4578  ;;  %v4182_v10 = vmul.f32 %v6950_v20, %v6811_v59  ;;  %v6813_v15 = vpop.eup %6812 }
 0xa26   : > { %5634 = vst.msk [vmem:[%s8984_s26 + $0x258] sm:$0xff] %vm2593_vm2, %v5520_v42  ;;  %v4838_v7 = vmul.f32 %v4579_v34, %v9706_v3  ;;  %v4149_v23 = vmul.f32 %v6951_v14, %v6813_v15  ;;  %v11169_v15 = vld [vmem:[#allocation68_spill] sm:$0xff] }
 0xa27   : > { %3613 = vadd.xlane.f32.xlu1 %v3612_v50  ;;  %4718 = vperm.xlu0 %6402, %v4182_v10   ;;  %v11165_v10 = vld [vmem:[#allocation95_spill] sm:$0xff] }
 0xa28   : > { %v5522_v47 = vadd.f32 %v11157_v56, %v4838_v7  ;;  %v11164_v7 = vld [vmem:[#allocation93_spill] sm:$0xff] }
 0xa29   : > { %v4589_v51 = vpop.permute.xlu0 %4588 }
 0xa2a   : > { %5636 = vst.msk [vmem:[%s8984_s26 + $0x268] sm:$0xff] %vm2593_vm2, %v5522_v47  ;;  %v4840_v40 = vmul.f32 %v4589_v51, %v9738_v45 }
 0xa2c   : > { %v5524_v6 = vadd.f32 %v11158_v37, %v4840_v40  ;;  %v11166_v37 = vld [vmem:[#allocation97_spill] sm:$0xff] }
 0xa2d   : > { %v4599_v3 = vpop.permute.xlu0 %4598 }
 0xa2e   : > { %5638 = vst.msk [vmem:[%s8984_s26 + $0x278] sm:$0xff] %vm2593_vm2, %v5524_v6  ;;  %v4842_v26 = vmul.f32 %v4599_v3, %v9768_v31  ;;  %v11161_v31 = vld [vmem:[#allocation87_spill] sm:$0xff] }
 0xa30   : > { %v5526_v24 = vadd.f32 %v11159_v1, %v4842_v26  ;;  %v3050_v1 = vmul.f32 0.020408163, %v9759_v43  ;;  %v11171_v43 = vld [vmem:[#allocation101_spill] sm:$0xff] }
 0xa31   : > { %v4609_v9 = vpop.permute.xlu0 %4608 }
 0xa32   : > { %5640 = vst.msk [vmem:[%s8984_s26 + $0x288] sm:$0xff] %vm2593_vm2, %v5526_v24  ;;  %v4844_v19 = vmul.f32 %v4609_v9, %v9798_v57  ;;  %v11167_v24 = vld [vmem:[#allocation148_spill] sm:$0xff] }
 0xa34   : > { %v5528_v2 = vadd.f32 %v11160_v52, %v4844_v19  ;;  %v11168_v19 = vld [vmem:[#allocation99_spill] sm:$0xff] }
 0xa35   : > { %v4619_v45 = vpop.permute.xlu0 %4618 }
 0xa36   : > { %5642 = vst.msk [vmem:[%s8984_s26 + $0x298] sm:$0xff] %vm2593_vm2, %v5528_v2  ;;  %v4846_v8 = vmul.f32 %v4619_v45, %v9828_v39  ;;  %v11163_v39 = vld [vmem:[#allocation91_spill] sm:$0xff] }
 0xa38   : > { %v5530_v5 = vadd.f32 %v11161_v31, %v4846_v8  ;;  %4553 = vperm.xlu1 %6403, %v4149_v23   ;;  %v11170_v8 = vld [vmem:[#allocation198_spill] sm:$0xff]  ;;  %v11172_v31 = vld [vmem:[#allocation195_spill] sm:$0xff] }
 0xa39   : > { %v4629_v29 = vpop.permute.xlu0 %4628  ;;  %v10288_v14 = vsub.f32 %v11170_v8, %v3050_v1  ;;  %v6954_v1 = vld [vmem:[%s7073_s22 + $0x260] sm:$0xff] }
 0xa3a   : > { %5644 = vst.msk [vmem:[%s8984_s26 + $0x2a8] sm:$0xff] %vm2593_vm2, %v5530_v5  ;;  %v4848_v57 = vmul.f32 %v4629_v29, %v9858_v44  ;;  %v3695_v5 = vmul.f32 0.020408163, %v11172_v31  ;;  %v11178_v8 = vld [vmem:[#allocation105_spill] sm:$0xff] }
 0xa3c   : > { %v5532_v36 = vadd.f32 %v11162_v38, %v4848_v57  ;;  %v3278_v57 = vmul.f32 %v10288_v14, %v10288_v14  ;;  %v11173_v38 = vld [vmem:[#allocation103_spill] sm:$0xff] }
 0xa3d   : > { %v4639_v41 = vpop.permute.xlu0 %4638 }
 0xa3e   : > { %5646 = vst.msk [vmem:[%s8984_s26 + $0x2b8] sm:$0xff] %vm2593_vm2, %v5532_v36  ;;  %v4850_v42 = vmul.f32 %v4639_v41, %v9888_v55  ;;  %v3923_v41 = vadd.f32 0.001, %v3695_v5  ;;  %v3713_v5 = vmul.f32 0.020408163, %v9911_v62 }
 0xa40   : > { %v5534_v59 = vadd.f32 %v11163_v39, %v4850_v42  ;;  %v11174_v42 = vld [vmem:[#allocation204_spill] sm:$0xff] }
 0xa41   : > { %v4649_v33 = vpop.permute.xlu0 %4648  ;;  %v3697_v39 = vmul.f32 0.020408163, %v11174_v42  ;;  %v6958_v42 = vld [vmem:[%s7073_s22 + $0x2a0] sm:$0xff] }
 0xa42   : > { %5648 = vst.msk [vmem:[%s8984_s26 + $0x2c8] sm:$0xff] %vm2593_vm2, %v5534_v59  ;;  %v4852_v34 = vmul.f32 %v4649_v33, %v9918_v63  ;;  %v6952_v59 = vld [vmem:[%s7073_s22 + $0x358] sm:$0xff] }
 0xa44   : > { %v5536_v50 = vadd.f32 %v11164_v7, %v4852_v34  ;;  %v3618_v34 = vsel %vm2593_vm2, %v3278_v57, 0.0  ;;  %v11175_v7 = vld [vmem:[#allocation19_spill] sm:$0xff] }
 0xa45   : > { %v4659_v20 = vpop.permute.xlu0 %4658 }
 0xa46   : > { %5650 = vst.msk [vmem:[%s8984_s26 + $0x2d8] sm:$0xff] %vm2593_vm2, %v5536_v50  ;;  %v4854_v44 = vmul.f32 %v4659_v20, %v9948_v25  ;;  %v3699_v50 = vmul.f32 0.020408163, %v11175_v7 }
 0xa48   : > { %v5538_v56 = vadd.f32 %v11165_v10, %v4854_v44  ;;  %v3927_v20 = vadd.f32 0.001, %v3699_v50  ;;  %v11176_v44 = vld [vmem:[#allocation149_spill] sm:$0xff] }
 0xa49   : > { %v4669_v47 = vpop.permute.xlu0 %4668  ;;  %v3701_v10 = vmul.f32 0.020408163, %v11176_v44 }
 0xa4a   : > { %5652 = vst.msk [vmem:[%s8984_s26 + $0x2e8] sm:$0xff] %vm2593_vm2, %v5538_v56  ;;  %v4856_v55 = vmul.f32 %v4669_v47, %v9978_v60  ;;  %v3602_v51 = vpop.xlane.xlu1 %3601  ;;  %v11177_v47 = vld [vmem:[#allocation30_spill] sm:$0xff] }
 0xa4b   : > { %v3728_v40 = vmul.f32 0.020408163, %v3602_v51  ;;  %v3929_v56 = vadd.f32 0.001, %v3701_v10 }
 0xa4c   : > { %v5540_v63 = vadd.f32 %v11166_v37, %v4856_v55  ;;  %v3703_v55 = vmul.f32 0.020408163, %v11177_v47  ;;  %v3705_v37 = vmul.f32 0.020408163, %v9791_v13 }
 0xa4d   : > { %v3956_v6 = vadd.f32 0.001, %v3728_v40  ;;  %v4679_v3 = vpop.permute.xlu0 %4678 }
 0xa4e   : > { %5654 = vst.msk [vmem:[%s8984_s26 + $0x2f8] sm:$0xff] %vm2593_vm2, %v5540_v63  ;;  %v4858_v25 = vmul.f32 %v4679_v3, %v10008_v17  ;;  %v4534_v26 = vpop.permute.xlu1 %4533  ;;  %v3931_v40 = vadd.f32 0.001, %v3703_v55  ;;  %v6953_v63 = vld [vmem:[%s7073_s22 + $0x250] sm:$0xff] }
 0xa4f   : > { %6814 = vrsqrt.f32 %v3956_v6  ;;  %v4829_v9 = vmul.f32 %v4534_v26, %v11167_v24  ;;  %v3707_v26 = vmul.f32 0.020408163, %v9821_v48 }
 0xa50   : > { %v5542_v60 = vadd.f32 %v11168_v19, %v4858_v25  ;;  %6816 = vrsqrt.f32 %v3923_v41  ;;  %v3933_v25 = vadd.f32 0.001, %v3705_v37  ;;  %v11183_v37 = vld [vmem:[#allocation70_spill] sm:$0xff] }
 0xa51   : > { %v5513_v52 = vadd.f32 %v11169_v15, %v4829_v9  ;;  %v4689_v2 = vpop.permute.xlu0 %4688  ;;  %v3935_v19 = vadd.f32 0.001, %v3707_v26 }
 0xa52   : > { %5656 = vst.msk [vmem:[%s8984_s26 + $0x308] sm:$0xff] %vm2593_vm2, %v5542_v60  ;;  %v4860_v45 = vmul.f32 %v4689_v2, %v10038_v27  ;;  %v3709_v60 = vmul.f32 0.020408163, %v9851_v61 }
 0xa53   : > { %5627 = vst.msk [vmem:[%s8984_s26 + $0x220] sm:$0xff] %vm2593_vm2, %v5513_v52  ;;  %v6955_v52 = vld [vmem:[%s7073_s22 + $0x270] sm:$0xff] }
 0xa54   : > { %v5544_v17 = vadd.f32 %v11171_v43, %v4860_v45  ;;  %v3937_v48 = vadd.f32 0.001, %v3709_v60 }
 0xa55   : > { %v4699_v23 = vpop.permute.xlu0 %4698 }
 0xa56   : > { %5658 = vst.msk [vmem:[%s8984_s26 + $0x318] sm:$0xff] %vm2593_vm2, %v5544_v17  ;;  %v4862_v29 = vmul.f32 %v4699_v23, %v10068_v16  ;;  %v3925_v16 = vadd.f32 0.001, %v3697_v39  ;;  %v3711_v17 = vmul.f32 0.020408163, %v9881_v21  ;;  %v6956_v23 = vld [vmem:[%s7073_s22 + $0x280] sm:$0xff] }
 0xa58   : > { %v5546_v36 = vadd.f32 %v11173_v38, %v4862_v29  ;;  %6818 = vrsqrt.f32 %v3925_v16  ;;  %v6957_v29 = vld [vmem:[%s7073_s22 + $0x290] sm:$0xff]  ;;  %v11180_v16 = vld [vmem:[#allocation32_spill] sm:$0xff] }
 0xa59   : > { %v6815_v27 = vpop.eup %6814  ;;  %6820 = vrsqrt.f32 %v3927_v20  ;;  %v3717_v62 = vmul.f32 0.020408163, %v11180_v16  ;;  %v6959_v20 = vld [vmem:[%s7073_s22 + $0x2b0] sm:$0xff] }
 0xa5a   : > { %5660 = vst.msk [vmem:[%s8984_s26 + $0x328] sm:$0xff] %vm2593_vm2, %v5546_v36  ;;  %v4184_v33 = vmul.f32 %v6952_v59, %v6815_v27  ;;  %v6817_v51 = vpop.eup %6816  ;;  %6822 = vrsqrt.f32 %v3929_v56  ;;  %v3941_v36 = vadd.f32 0.001, %v3713_v5  ;;  %v11179_v27 = vld [vmem:[#allocation153_spill] sm:$0xff]  ;;  %v11181_v56 = vld [vmem:[#allocation24_spill] sm:$0xff] }
 0xa5b   : > { %v4151_v6 = vmul.f32 %v6953_v63, %v6817_v51  ;;  %6824 = vrsqrt.f32 %v3931_v40  ;;  %v3715_v21 = vmul.f32 0.020408163, %v11179_v27  ;;  %v3945_v55 = vadd.f32 0.001, %v3717_v62  ;;  %v11182_v51 = vld [vmem:[#allocation168_spill] sm:$0xff] }
 0xa5c   : > { %3619 = vadd.xlane.f32.xlu1 %v3618_v34  ;;  %4728 = vperm.xlu0 %6402, %v4184_v33   ;;  %6826 = vrsqrt.f32 %v3933_v25  ;;  %v3719_v40 = vmul.f32 0.020408163, %v11182_v51  ;;  %v6971_v51 = vld [vmem:[%s7073_s22 + $0x360] sm:$0xff] }
 0xa5d   : > { %6828 = vrsqrt.f32 %v3935_v19  ;;  %v3943_v34 = vadd.f32 0.001, %v3715_v21 }
 0xa5e   : > { %6830 = vrsqrt.f32 %v3937_v48  ;;  %v3947_v26 = vadd.f32 0.001, %v3719_v40  ;;  %v3725_v48 = vmul.f32 0.020408163, %v10091_v49 }
 0xa62   : > { %v6819_v3 = vpop.eup %6818 }
 0xa63   : > { %v4153_v24 = vmul.f32 %v6954_v1, %v6819_v3  ;;  %v6821_v9 = vpop.eup %6820  ;;  %v3721_v1 = vmul.f32 0.020408163, %v10031_v54 }
 0xa64   : > { %v4155_v2 = vmul.f32 %v6955_v52, %v6821_v9  ;;  %v6823_v45 = vpop.eup %6822  ;;  %v6962_v52 = vld [vmem:[%s7073_s22 + $0x2e0] sm:$0xff] }
 0xa65   : > { %v4157_v31 = vmul.f32 %v6956_v23, %v6823_v45  ;;  %v6825_v61 = vpop.eup %6824  ;;  %v6963_v45 = vld [vmem:[%s7073_s22 + $0x368] sm:$0xff] }
 0xa66   : > { %v4159_v57 = vmul.f32 %v6957_v29, %v6825_v61  ;;  %v6827_v38 = vpop.eup %6826  ;;  %v3953_v61 = vadd.f32 0.001, %v3725_v48 }
 0xa67   : > { %v4161_v39 = vmul.f32 %v6958_v42, %v6827_v38  ;;  %v6829_v59 = vpop.eup %6828  ;;  %v3729_v38 = vmul.f32 0.020408163, %v10163_v0  ;;  %v6967_v42 = vld [vmem:[%s7073_s22 + $0x320] sm:$0xff] }
 0xa68   : > { %v4163_v44 = vmul.f32 %v6959_v20, %v6829_v59  ;;  %v6831_v10 = vpop.eup %6830 }
 0xa69   : > { %v3957_v21 = vadd.f32 0.001, %v3729_v38 }
 0xa6d   : > { %4563 = vperm.xlu1 %6403, %v4151_v6   ;;  %v6960_v6 = vld [vmem:[%s7073_s22 + $0x2c0] sm:$0xff] }
 0xa6e   : > { %v4165_v3 = vmul.f32 %v6960_v6, %v6831_v10  ;;  %v11184_v10 = vld [vmem:[#allocation107_spill] sm:$0xff] }
 0xa71   : > { %4573 = vperm.xlu1 %6403, %v4153_v24   ;;  %v4709_v13 = vpop.permute.xlu0 %4708  ;;  %v6961_v24 = vld [vmem:[%s7073_s22 + $0x2d0] sm:$0xff] }
 0xa72   : > { %v4864_v15 = vmul.f32 %v4709_v13, %v10098_v35  ;;  %v3939_v35 = vadd.f32 0.001, %v3711_v17  ;;  %v3949_v13 = vadd.f32 0.001, %v3721_v1  ;;  %v6964_v17 = vld [vmem:[%s7073_s22 + $0x2f0] sm:$0xff] }
 0xa74   : > { %v5548_v43 = vadd.f32 %v11178_v8, %v4864_v15  ;;  %6832 = vrsqrt.f32 %v3939_v35  ;;  %v3723_v15 = vmul.f32 0.020408163, %v10061_v53  ;;  %v3727_v53 = vmul.f32 0.020408163, %v10121_v12  ;;  %v6965_v35 = vld [vmem:[%s7073_s22 + $0x300] sm:$0xff] }
 0xa75   : > { %4583 = vperm.xlu1 %6403, %v4155_v2   ;;  %6834 = vrsqrt.f32 %v3941_v36  ;;  %v6966_v36 = vld [vmem:[%s7073_s22 + $0x310] sm:$0xff] }
 0xa76   : > { %5662 = vst.msk [vmem:[%s8984_s26 + $0x338] sm:$0xff] %vm2593_vm2, %v5548_v43  ;;  %v3951_v54 = vadd.f32 0.001, %v3723_v15 }
 0xa79   : > { %4593 = vperm.xlu1 %6403, %v4157_v31  }
 0xa7d   : > { %4603 = vperm.xlu1 %6403, %v4159_v57   ;;  %v3955_v57 = vadd.f32 0.001, %v3727_v53 }
 0xa7e   : > { %v6833_v25 = vpop.eup %6832 }
 0xa7f   : > { %v3608_v41 = vpop.xlane.xlu1 %3607  ;;  %v4167_v9 = vmul.f32 %v6961_v24, %v6833_v25  ;;  %v6835_v19 = vpop.eup %6834  ;;  %v3847_v25 = vld [vmem:[%s7073_s22 + $0x380] sm:$0xff] }
 0xa80   : > { %v3730_v33 = vmul.f32 0.020408163, %v3608_v41  ;;  %v4169_v2 = vmul.f32 %v6962_v52, %v6835_v19  ;;  %v3731_v41 = vmul.f32 0.020408163, %v10195_v4  ;;  %v11185_v19 = vld [vmem:[#allocation26_spill] sm:$0xff] }
 0xa81   : > { %4613 = vperm.xlu1 %6403, %v4161_v39   ;;  %v3848_v52 = vld [vmem:[%s7073_s22 + $0x388] sm:$0xff] }
 0xa82   : > { %v3958_v7 = vadd.f32 0.001, %v3730_v33  ;;  %v3959_v59 = vadd.f32 0.001, %v3731_v41  ;;  %v3733_v33 = vmul.f32 0.020408163, %v10215_v28 }
 0xa83   : > { %v4544_v50 = vpop.permute.xlu1 %4543 }
 0xa84   : > { %6836 = vrsqrt.f32 %v3958_v7  ;;  %v4831_v47 = vmul.f32 %v4544_v50, %v11181_v56  ;;  %v3961_v62 = vadd.f32 0.001, %v3733_v33  ;;  %v6969_v50 = vld [vmem:[%s7073_s22 + $0x340] sm:$0xff]  ;;  %v6970_v56 = vld [vmem:[%s7073_s22 + $0x350] sm:$0xff] }
 0xa85   : > { %4623 = vperm.xlu1 %6403, %v4163_v44   ;;  %6838 = vrsqrt.f32 %v3943_v34  ;;  %v6968_v34 = vld [vmem:[%s7073_s22 + $0x330] sm:$0xff] }
 0xa86   : > { %v5515_v63 = vadd.f32 %v11183_v37, %v4831_v47  ;;  %6840 = vrsqrt.f32 %v3945_v55 }
 0xa87   : > { %6842 = vrsqrt.f32 %v3947_v26 }
 0xa88   : > { %5629 = vst.msk [vmem:[%s8984_s26 + $0x230] sm:$0xff] %vm2593_vm2, %v5515_v63  ;;  %6844 = vrsqrt.f32 %v3949_v13  ;;  %v6972_v63 = vld [vmem:[%s7073_s22 + $0x370] sm:$0xff]  ;;  %v11186_v13 = vld [vmem:[#allocation72_spill] sm:$0xff] }
 0xa89   : > { %4633 = vperm.xlu1 %6403, %v4165_v3   ;;  %6846 = vrsqrt.f32 %v3951_v54 }
 0xa8a   : > { %6848 = vrsqrt.f32 %v3953_v61 }
 0xa8b   : > { %6850 = vrsqrt.f32 %v3955_v57  ;;  %v11190_v57 = vld [vmem:[#allocation74_spill] sm:$0xff] }
 0xa8c   : > { %6852 = vrsqrt.f32 %v3957_v21 }
 0xa8d   : > { %4643 = vperm.xlu1 %6403, %v4167_v9   ;;  %6854 = vrsqrt.f32 %v3959_v59  ;;  %v11194_v59 = vld [vmem:[#allocation78_spill] sm:$0xff] }
 0xa8e   : > { %v6837_v60 = vpop.eup %6836  ;;  %6856 = vrsqrt.f32 %v3961_v62 }
 0xa8f   : > { %v4186_v8 = vmul.f32 %v6963_v45, %v6837_v60  ;;  %v6839_v43 = vpop.eup %6838 }
 0xa90   : > { %v4171_v23 = vmul.f32 %v6964_v17, %v6839_v43  ;;  %v6841_v31 = vpop.eup %6840  ;;  %v11188_v17 = vld [vmem:[#allocation109_spill] sm:$0xff] }
 0xa91   : > { %4653 = vperm.xlu1 %6403, %v4169_v2   ;;  %4738 = vperm.xlu0 %6402, %v4186_v8   ;;  %v4173_v5 = vmul.f32 %v6965_v35, %v6841_v31  ;;  %v6843_v29 = vpop.eup %6842  ;;  %v11187_v2 = vmov 1   ;;  %v6973_v8 = vld [vmem:[%s7073_s22 + $0x378] sm:$0xff] }
 0xa92   : > { %v4175_v49 = vmul.f32 %v6966_v36, %v6843_v29  ;;  %v6845_v27 = vpop.eup %6844 }
 0xa93   : > { %v4177_v12 = vmul.f32 %v6967_v42, %v6845_v27  ;;  %v6847_v39 = vpop.eup %6846  ;;  %v11192_v27 = vld [vmem:[#allocation76_spill] sm:$0xff] }
 0xa94   : > { %v4179_v0 = vmul.f32 %v6968_v34, %v6847_v39  ;;  %v6849_v16 = vpop.eup %6848  ;;  %v11193_v42 = vld [vmem:[#allocation28_spill] sm:$0xff] }
 0xa95   : > { %4663 = vperm.xlu1 %6403, %v4171_v23   ;;  %v4181_v4 = vmul.f32 %v6969_v50, %v6849_v16  ;;  %v6851_v20 = vpop.eup %6850  ;;  %v11195_v16 = vld [vmem:[#allocation160_spill] sm:$0xff] }
 0xa96   : > { %v4183_v47 = vmul.f32 %v6970_v56, %v6851_v20  ;;  %v6853_v55 = vpop.eup %6852  ;;  %v11197_v20 = vld [vmem:[#allocation134_spill] sm:$0xff] }
 0xa97   : > { %v4185_v40 = vmul.f32 %v6971_v51, %v6853_v55  ;;  %v6855_v37 = vpop.eup %6854  ;;  %v11200_v51 = vld [vmem:[#allocation84_spill] sm:$0xff] }
 0xa98   : > { %v4187_v6 = vmul.f32 %v6972_v63, %v6855_v37  ;;  %v11201_v63 = vld [vmem:[#allocation147_spill] sm:$0xff] }
 0xa99   : > { %4673 = vperm.xlu1 %6403, %v4173_v5   ;;  %v11189_v5 = vld [vmem:[#allocation156_spill] sm:$0xff] }
 0xa9d   : > { %4683 = vperm.xlu1 %6403, %v4175_v49   ;;  %v11191_v49 = vld [vmem:[#allocation17_spill] sm:$0xff] }
 0xaa1   : > { %4693 = vperm.xlu1 %6403, %v4177_v12  }
 0xaa5   : > { %4703 = vperm.xlu1 %6403, %v4179_v0  }
 0xaa6   : > { %v4719_v7 = vpop.permute.xlu0 %4718 }
 0xaa7   : > { %v4866_v44 = vmul.f32 %v4719_v7, %v10128_v22  ;;  %v6857_v22 = vpop.eup %6856  ;;  %v11196_v7 = vld [vmem:[#allocation80_spill] sm:$0xff] }
 0xaa8   : > { %v4189_v24 = vmul.f32 %v6857_v22, %v3847_v25  ;;  %v11202_v22 = vld [vmem:[#allocation86_spill] sm:$0xff] }
 0xaa9   : > { %4713 = vperm.xlu1 %6403, %v4181_v4   ;;  %v5550_v28 = vadd.f32 %v11184_v10, %v4866_v44  ;;  %v11198_v10 = vld [vmem:[#allocation82_spill] sm:$0xff] }
 0xaab   : > { %5664 = vst.msk [vmem:[%s8984_s26 + $0x348] sm:$0xff] %vm2593_vm2, %v5550_v28 }
 0xaad   : > { %4723 = vperm.xlu1 %6403, %v4183_v47   ;;  %v11199_v47 = vld [vmem:[#allocation200_spill] sm:$0xff] }
 0xab1   : > { %4733 = vperm.xlu1 %6403, %v4185_v40  }
 0xab4   : > { %v3614_v3 = vpop.xlane.xlu1 %3613 }
 0xab5   : > { %v3732_v26 = vmul.f32 0.020408163, %v3614_v3  ;;  %4743 = vperm.xlu1 %6403, %v4187_v6  }
 0xab7   : > { %v3960_v1 = vadd.f32 0.001, %v3732_v26 }
 0xab8   : > { %v4554_v9 = vpop.permute.xlu1 %4553 }
 0xab9   : > { %6858 = vrsqrt.f32 %v3960_v1  ;;  %v4833_v60 = vmul.f32 %v4554_v9, %v11185_v19  ;;  %4753 = vperm.xlu1 %6403, %v4189_v24   ;;  %v11204_v24 = vld [vmem:[#allocation88_spill] sm:$0xff] }
 0xabb   : > { %v5517_v15 = vadd.f32 %v11186_v13, %v4833_v60  ;;  %v11205_v60 = vld [vmem:[#allocation164_spill] sm:$0xff] }
 0xabd   : > { %5631 = vst.msk [vmem:[%s8984_s26 + $0x240] sm:$0xff] %vm2593_vm2, %v5517_v15  ;;  %6405 = vset.pattern.permute.xlu1 %v11187_v2  ;;  %v11206_v15 = vld [vmem:[#allocation90_spill] sm:$0xff] }
 0xabe   : > { %5442 = vperm.xlu1 %6405, %v3848_v52  }
 0xac3   : > { %v6859_v45 = vpop.eup %6858 }
 0xac4   : > { %v4188_v43 = vmul.f32 %v6973_v8, %v6859_v45 }
 0xac6   : > { %4748 = vperm.xlu0 %6402, %v4188_v43   ;;  %v11207_v43 = vld [vmem:[#allocation209_spill] sm:$0xff] }
 0xadb   : > { %v4729_v54 = vpop.permute.xlu0 %4728 }
 0xadc   : > { %v4868_v48 = vmul.f32 %v4729_v54, %v10171_v11 }
 0xade   : > { %v5552_v23 = vadd.f32 %v11188_v17, %v4868_v48  ;;  %v11208_v48 = vld [vmem:[#allocation111_spill] sm:$0xff] }
 0xae0   : > { %5666 = vst.msk [vmem:[%s8984_s26 + $0x358] sm:$0xff] %vm2593_vm2, %v5552_v23  ;;  %v11209_v23 = vld [vmem:[#allocation92_spill] sm:$0xff] }
 0xae9   : > { %v3620_v31 = vpop.xlane.xlu1 %3619 }
 0xaea   : > { %v3734_v61 = vmul.f32 0.020408163, %v3620_v31 }
 0xaec   : > { %v3962_v53 = vadd.f32 0.001, %v3734_v61 }
 0xaed   : > { %v4564_v35 = vpop.permute.xlu1 %4563 }
 0xaee   : > { %6860 = vrsqrt.f32 %v3962_v53  ;;  %v4835_v29 = vmul.f32 %v4564_v35, %v11189_v5  ;;  %v11210_v53 = vld [vmem:[#allocation138_spill] sm:$0xff] }
 0xaf0   : > { %v5519_v38 = vadd.f32 %v11190_v57, %v4835_v29  ;;  %v11212_v57 = vld [vmem:[#allocation21_spill] sm:$0xff] }
 0xaf1   : > { %v4574_v36 = vpop.permute.xlu1 %4573 }
 0xaf2   : > { %5633 = vst.msk [vmem:[%s8984_s26 + $0x250] sm:$0xff] %vm2593_vm2, %v5519_v38  ;;  %v4837_v11 = vmul.f32 %v4574_v36, %v11191_v49  ;;  %v11213_v36 = vld [vmem:[#allocation96_spill] sm:$0xff] }
 0xaf4   : > { %v5521_v21 = vadd.f32 %v11192_v27, %v4837_v11  ;;  %v11214_v27 = vld [vmem:[#allocation203_spill] sm:$0xff] }
 0xaf5   : > { %v4584_v41 = vpop.permute.xlu1 %4583 }
 0xaf6   : > { %5635 = vst.msk [vmem:[%s8984_s26 + $0x260] sm:$0xff] %vm2593_vm2, %v5521_v21  ;;  %v4839_v12 = vmul.f32 %v4584_v41, %v11193_v42  ;;  %v11215_v41 = vld [vmem:[#allocation98_spill] sm:$0xff] }
 0xaf8   : > { %v6861_v39 = vpop.eup %6860  ;;  %v5523_v33 = vadd.f32 %v11194_v59, %v4839_v12 }
 0xaf9   : > { %v4594_v34 = vpop.permute.xlu1 %4593  ;;  %v4190_v0 = vmul.f32 %v6861_v39, %v3848_v52  ;;  %v11216_v39 = vld [vmem:[#allocation151_spill] sm:$0xff] }
 0xafa   : > { %5637 = vst.msk [vmem:[%s8984_s26 + $0x270] sm:$0xff] %vm2593_vm2, %v5523_v33  ;;  %v4841_v62 = vmul.f32 %v4594_v34, %v11195_v16  ;;  %v11217_v33 = vld [vmem:[#allocation100_spill] sm:$0xff]  ;;  %v11218_v16 = vld [vmem:[#allocation199_spill] sm:$0xff] }
 0xafb   : > { %4758 = vperm.xlu0 %6402, %v4190_v0  }
 0xafc   : > { %v5525_v50 = vadd.f32 %v11196_v7, %v4841_v62  ;;  %v11219_v7 = vld [vmem:[#allocation102_spill] sm:$0xff] }
 0xafd   : > { %v4604_v4 = vpop.permute.xlu1 %4603 }
 0xafe   : > { %5639 = vst.msk [vmem:[%s8984_s26 + $0x280] sm:$0xff] %vm2593_vm2, %v5525_v50  ;;  %v4843_v44 = vmul.f32 %v4604_v4, %v11197_v20  ;;  %v11220_v20 = vld [vmem:[#allocation142_spill] sm:$0xff] }
 0xaff   : > { %6404 = vset.pattern.permute.xlu0 %v11187_v2 }
 0xb00   : > { %v5527_v28 = vadd.f32 %v11198_v10, %v4843_v44  ;;  %5437 = vperm.xlu0 %6404, %v3847_v25   ;;  %v11203_v25 = vld [vmem:[#allocation197_spill] sm:$0xff]  ;;  %v11221_v10 = vld [vmem:[#allocation104_spill] sm:$0xff] }
 0xb01   : > { %v4614_v56 = vpop.permute.xlu1 %4613 }
 0xb02   : > { %5641 = vst.msk [vmem:[%s8984_s26 + $0x290] sm:$0xff] %vm2593_vm2, %v5527_v28  ;;  %v4845_v55 = vmul.f32 %v4614_v56, %v11199_v47 }
 0xb04   : > { %v5529_v40 = vadd.f32 %v11200_v51, %v4845_v55  ;;  %v11222_v55 = vld [vmem:[#allocation106_spill] sm:$0xff] }
 0xb05   : > { %v4624_v37 = vpop.permute.xlu1 %4623 }
 0xb06   : > { %5643 = vst.msk [vmem:[%s8984_s26 + $0x2a0] sm:$0xff] %vm2593_vm2, %v5529_v40  ;;  %v4847_v6 = vmul.f32 %v4624_v37, %v11201_v63  ;;  %v11223_v63 = vld [vmem:[#allocation108_spill] sm:$0xff] }
 0xb08   : > { %v5531_v3 = vadd.f32 %v11202_v22, %v4847_v6 }
 0xb09   : > { %v4634_v26 = vpop.permute.xlu1 %4633 }
 0xb0a   : > { %5645 = vst.msk [vmem:[%s8984_s26 + $0x2b0] sm:$0xff] %vm2593_vm2, %v5531_v3  ;;  %v4849_v1 = vmul.f32 %v4634_v26, %v11203_v25  ;;  %v11224_v3 = vld [vmem:[#allocation23_spill] sm:$0xff]  ;;  %v11225_v25 = vld [vmem:[#allocation110_spill] sm:$0xff] }
 0xb0c   : > { %v5533_v9 = vadd.f32 %v11204_v24, %v4849_v1 }
 0xb0d   : > { %v4644_v19 = vpop.permute.xlu1 %4643 }
 0xb0e   : > { %5647 = vst.msk [vmem:[%s8984_s26 + $0x2c0] sm:$0xff] %vm2593_vm2, %v5533_v9  ;;  %v4851_v13 = vmul.f32 %v4644_v19, %v11205_v60  ;;  %v11226_v9 = vld [vmem:[#allocation112_spill] sm:$0xff] }
 0xb10   : > { %v5535_v52 = vadd.f32 %v11206_v15, %v4851_v13  ;;  %v4739_v2 = vpop.permute.xlu0 %4738 }
 0xb11   : > { %v4870_v45 = vmul.f32 %v4739_v2, %v10201_v32  ;;  %v4654_v8 = vpop.permute.xlu1 %4653  ;;  %v11211_v32 = vld [vmem:[#allocation94_spill] sm:$0xff] }
 0xb12   : > { %5649 = vst.msk [vmem:[%s8984_s26 + $0x2d0] sm:$0xff] %vm2593_vm2, %v5535_v52  ;;  %v4853_v54 = vmul.f32 %v4654_v8, %v11207_v43 }
 0xb13   : > { %v5554_v17 = vadd.f32 %v11208_v48, %v4870_v45 }
 0xb14   : > { %v5537_v31 = vadd.f32 %v11209_v23, %v4853_v54 }
 0xb15   : > { %5668 = vst.msk [vmem:[%s8984_s26 + $0x368] sm:$0xff] %vm2593_vm2, %v5554_v17  ;;  %v4664_v61 = vpop.permute.xlu1 %4663 }
 0xb16   : > { %5651 = vst.msk [vmem:[%s8984_s26 + $0x2e0] sm:$0xff] %vm2593_vm2, %v5537_v31  ;;  %v4855_v35 = vmul.f32 %v4664_v61, %v11210_v53 }
 0xb18   : > { %v5539_v5 = vadd.f32 %v11211_v32, %v4855_v35 }
 0xb19   : > { %v4674_v29 = vpop.permute.xlu1 %4673 }
 0xb1a   : > { %5653 = vst.msk [vmem:[%s8984_s26 + $0x2f0] sm:$0xff] %vm2593_vm2, %v5539_v5  ;;  %v4857_v38 = vmul.f32 %v4674_v29, %v11212_v57 }
 0xb1c   : > { %v5541_v49 = vadd.f32 %v11213_v36, %v4857_v38 }
 0xb1d   : > { %v4684_v11 = vpop.permute.xlu1 %4683 }
 0xb1e   : > { %5655 = vst.msk [vmem:[%s8984_s26 + $0x300] sm:$0xff] %vm2593_vm2, %v5541_v49  ;;  %v4859_v21 = vmul.f32 %v4684_v11, %v11214_v27 }
 0xb20   : > { %v5543_v42 = vadd.f32 %v11215_v41, %v4859_v21 }
 0xb21   : > { %v4694_v12 = vpop.permute.xlu1 %4693 }
 0xb22   : > { %5657 = vst.msk [vmem:[%s8984_s26 + $0x310] sm:$0xff] %vm2593_vm2, %v5543_v42  ;;  %v4861_v59 = vmul.f32 %v4694_v12, %v11216_v39 }
 0xb24   : > { %v5545_v34 = vadd.f32 %v11217_v33, %v4861_v59 }
 0xb25   : > { %v4704_v0 = vpop.permute.xlu1 %4703 }
 0xb26   : > { %5659 = vst.msk [vmem:[%s8984_s26 + $0x320] sm:$0xff] %vm2593_vm2, %v5545_v34  ;;  %v4863_v62 = vmul.f32 %v4704_v0, %v11218_v16 }
 0xb28   : > { %v5547_v50 = vadd.f32 %v11219_v7, %v4863_v62 }
 0xb29   : > { %v4714_v4 = vpop.permute.xlu1 %4713 }
 0xb2a   : > { %5661 = vst.msk [vmem:[%s8984_s26 + $0x330] sm:$0xff] %vm2593_vm2, %v5547_v50  ;;  %v4865_v44 = vmul.f32 %v4714_v4, %v11220_v20 }
 0xb2c   : > { %v5549_v28 = vadd.f32 %v11221_v10, %v4865_v44 }
 0xb2d   : > { %v4724_v56 = vpop.permute.xlu1 %4723 }
 0xb2e   : > { %5663 = vst.msk [vmem:[%s8984_s26 + $0x340] sm:$0xff] %vm2593_vm2, %v5549_v28  ;;  %v4867_v47 = vmul.f32 %v4724_v56, %v10041_v30 }
 0xb30   : > { %v5551_v51 = vadd.f32 %v11222_v55, %v4867_v47 }
 0xb31   : > { %v4734_v40 = vpop.permute.xlu1 %4733 }
 0xb32   : > { %5665 = vst.msk [vmem:[%s8984_s26 + $0x350] sm:$0xff] %vm2593_vm2, %v5551_v51  ;;  %v4869_v37 = vmul.f32 %v4734_v40, %v10071_v58 }
 0xb34   : > { %v5553_v6 = vadd.f32 %v11223_v63, %v4869_v37 }
 0xb35   : > { %v4744_v22 = vpop.permute.xlu1 %4743 }
 0xb36   : > { %5667 = vst.msk [vmem:[%s8984_s26 + $0x360] sm:$0xff] %vm2593_vm2, %v5553_v6  ;;  %v4871_v26 = vmul.f32 %v4744_v22, %v11224_v3 }
 0xb38   : > { %v5555_v1 = vadd.f32 %v11225_v25, %v4871_v26 }
 0xb39   : > { %v4754_v58 = vpop.permute.xlu1 %4753 }
 0xb3a   : > { %5669 = vst.msk [vmem:[%s8984_s26 + $0x370] sm:$0xff] %vm2593_vm2, %v5555_v1  ;;  %v4873_v2 = vmul.f32 %v4754_v58, %v10131_v46 }
 0xb3d   : > { %v5443_v13 = vpop.permute.xlu1 %5442 }
 0xb45   : > { %v4749_v30 = vpop.permute.xlu0 %4748 }
 0xb46   : > { %v4872_v24 = vmul.f32 %v4749_v30, %v10221_v18 }
 0xb48   : > { %v5556_v19 = vadd.f32 %v11226_v9, %v4872_v24 }
 0xb4a   : > { %5670 = vst.msk [vmem:[%s8984_s26 + $0x378] sm:$0xff] %vm2593_vm2, %v5556_v19 }
 0xb7a   : > { %v4759_v60 = vpop.permute.xlu0 %4758 }
 0xb7b   : > { %v4874_v15 = vmul.f32 %v4759_v60, %v10288_v14 }
 0xb7d   : > { %v5558_v52 = vadd.f32 %v5443_v13, %v4874_v15 }
 0xb7f   : > { %5672 = vst.msk [vmem:[%s8984_s26 + $0x388] sm:$0xff] %vm2593_vm2, %v5558_v52  ;;  %v5438_v45 = vpop.permute.xlu0 %5437 }
 0xb80   : > { %v5557_v8 = vadd.f32 %v5438_v45, %v4873_v2 }
 0xb82   : > { %5671 = vst.msk [vmem:[%s8984_s26 + $0x380] sm:$0xff] %vm2593_vm2, %v5557_v8 }
 0xb83 PF: > { %s14_s15 = sadd.s32 1, %s6980_s15  }
 0xb84   : > { %p11_p4 = scmp.ge.s32.totalorder %s14_s15, 4  }
 0xb86   :  { %13 = sbr.rel (!%p11_p4) target bundleno = 1 (0x1), region = 69 }

</bundles_post_ra>
